<compile_context>
chip_gen: v7x
topology: tpu7x:2x2x1
jax: 0.10.0
libtpu: 0.0.40
codegen_flags: <defaults>
</compile_context>

<pallas_src>
import functools
import math

import jax
import jax.numpy as jnp
from jax.experimental import pallas as pl
from jax.experimental.pallas import tpu as pltpu


def sa_kernel(xq_ref, xkv_ref, wq_ref, wk_ref, wv_ref, wout_ref, bias_ref,
              o_ref, k_cache, v_cache, *, n_heads, scale):
    # xq_ref:   (1, TQ, C)  input dtype   query-token tile
    # xkv_ref:  (1, HW, C)  input dtype   all tokens of this batch element
    # wq/wk/wv: (H, C, D)   bf16          per-head projection weights
    # wout_ref: (H, D, C)   bf16          per-head (spectrally normalized) out weights
    # bias_ref: (1, C)      f32           output bias
    # o_ref:    (1, TQ, C)
    # k_cache/v_cache: (H, HW, D) bf16 scratch, persists across grid steps
    H = n_heads

    # K/V projection once per batch element. The q-tile grid axis is the inner,
    # sequentially executed ("arbitrary") axis, so qi == 0 runs first per b.
    @pl.when(pl.program_id(1) == 0)
    def _():
        xkv = xkv_ref[0].astype(jnp.bfloat16)                     # (HW, C)
        xkv_b = jnp.broadcast_to(xkv, (H,) + xkv.shape)           # (H, HW, C)
        k = jnp.einsum('htc,hcd->htd', xkv_b, wk_ref[...],
                       preferred_element_type=jnp.float32)
        v = jnp.einsum('htc,hcd->htd', xkv_b, wv_ref[...],
                       preferred_element_type=jnp.float32)
        k_cache[...] = k.astype(jnp.bfloat16)
        v_cache[...] = v.astype(jnp.bfloat16)

    # Q projection for this query tile; fold the 1/sqrt(D) scale into q.
    xq = xq_ref[0].astype(jnp.bfloat16)                           # (TQ, C)
    xq_b = jnp.broadcast_to(xq, (H,) + xq.shape)                  # (H, TQ, C)
    q = jnp.einsum('htc,hcd->htd', xq_b, wq_ref[...],
                   preferred_element_type=jnp.float32)            # (H, TQ, D) f32
    q = (q * scale).astype(jnp.bfloat16)

    k = k_cache[...]
    v = v_cache[...]

    # Attention, batched over heads. Softmax in f32 (v5e has no bf16 VPU/EUP).
    s = jnp.einsum('hqd,hkd->hqk', q, k,
                   preferred_element_type=jnp.float32)            # (H, TQ, HW)
    m = jnp.max(s, axis=-1, keepdims=True)
    p = jnp.exp(s - m)
    l = jnp.sum(p, axis=-1, keepdims=True)
    p = (p * pl.reciprocal(l, approx=True)).astype(jnp.bfloat16)
    attn = jnp.einsum('hqk,hkd->hqd', p, v,
                      preferred_element_type=jnp.float32).astype(jnp.bfloat16)

    # Output projection folds the head-concat: sum_h attn_h @ Wout_h + bias.
    out = jnp.einsum('hqd,hdc->hqc', attn, wout_ref[...],
                     preferred_element_type=jnp.float32)          # (H, TQ, C)
    out = jnp.sum(out, axis=0) + bias_ref[...]                    # (TQ, C)
    o_ref[0] = out.astype(o_ref.dtype)


def sa_forward(x, wqkv, wout_sn, bias, n_heads):
    """x: (B, C, H, W) NCHW (like PyTorch). Returns same shape/dtype."""
    B, C, H, W = x.shape
    assert C % n_heads == 0
    HW = H * W
    D = C // n_heads
    scale = 1.0 / math.sqrt(D)

    # Query tile: 128 tokens keeps per-step scores at (H, 128, HW) f32.
    # TODO(synk): stream K/V tiles (online softmax) for very large H*W.
    TQ = 128 if HW % 128 == 0 else HW
    n_q = HW // TQ

    # NCHW -> tokens-major (B, HW, C).
    x_tok = jnp.transpose(x.reshape(B, C, HW), (0, 2, 1))

    # Per-head weight layouts (conv channel order is [qkv, head, d]); bf16 for MXU.
    wqkv_r = wqkv.reshape(3, n_heads, D, C)                                   # [qkv,h,d,c]
    wq = jnp.transpose(wqkv_r[0], (0, 2, 1)).astype(jnp.bfloat16)             # (H, C, D)
    wk = jnp.transpose(wqkv_r[1], (0, 2, 1)).astype(jnp.bfloat16)
    wv = jnp.transpose(wqkv_r[2], (0, 2, 1)).astype(jnp.bfloat16)
    wout = jnp.transpose(wout_sn.reshape(C, n_heads, D), (1, 2, 0)).astype(jnp.bfloat16)  # (H, D, C)
    bias2d = bias.reshape(1, C).astype(jnp.float32)

    out_tok = pl.pallas_call(
        functools.partial(sa_kernel, n_heads=n_heads, scale=scale),
        out_shape=jax.ShapeDtypeStruct((B, HW, C), x.dtype),
        grid_spec=pltpu.PrefetchScalarGridSpec(
            num_scalar_prefetch=0,
            grid=(B, n_q),
            in_specs=[
                pl.BlockSpec((1, TQ, C), lambda b, qi: (b, qi, 0)),   # x (query tile)
                pl.BlockSpec((1, HW, C), lambda b, qi: (b, 0, 0)),    # x (full, for K/V)
                pl.BlockSpec((n_heads, C, D), lambda b, qi: (0, 0, 0)),
                pl.BlockSpec((n_heads, C, D), lambda b, qi: (0, 0, 0)),
                pl.BlockSpec((n_heads, C, D), lambda b, qi: (0, 0, 0)),
                pl.BlockSpec((n_heads, D, C), lambda b, qi: (0, 0, 0)),
                pl.BlockSpec((1, C), lambda b, qi: (0, 0)),
            ],
            out_specs=pl.BlockSpec((1, TQ, C), lambda b, qi: (b, qi, 0)),
            scratch_shapes=[
                pltpu.VMEM((n_heads, HW, D), jnp.bfloat16),   # K cache
                pltpu.VMEM((n_heads, HW, D), jnp.bfloat16),   # V cache
            ],
        ),
        compiler_params=pltpu.CompilerParams(
            dimension_semantics=("parallel", "arbitrary"),
            vmem_limit_bytes=32 * 1024 * 1024,
        ),
    )(x_tok, x_tok, wq, wk, wv, wout, bias2d)

    # (B, HW, C) -> NCHW.
    return jnp.transpose(out_tok, (0, 2, 1)).reshape(B, C, H, W)


def sa_reference(x, wqkv, wout_sn, bias, n_heads):
    """Pure-JAX reference mirroring the PyTorch module (f32 convs, bf16 attention)."""
    B, C, H, W = x.shape
    HW = H * W
    D = C // n_heads
    x_tok = jnp.transpose(x.reshape(B, C, HW), (0, 2, 1))                     # (B,HW,C)
    qkv = jnp.einsum('btc,oc->bto', x_tok, wqkv.reshape(3 * C, C))            # f32
    qkv = qkv.reshape(B, HW, 3, n_heads, D).transpose(2, 0, 3, 1, 4)          # (3,B,H,HW,D)
    q, k, v = (t.astype(jnp.bfloat16) for t in (qkv[0], qkv[1], qkv[2]))
    s = jnp.einsum('bhqd,bhkd->bhqk', q, k,
                   preferred_element_type=jnp.float32) / math.sqrt(D)
    p = jax.nn.softmax(s, axis=-1)
    o = jnp.einsum('bhqk,bhkd->bhqd', p.astype(jnp.bfloat16), v,
                   preferred_element_type=jnp.float32)
    attn = o.astype(jnp.bfloat16).astype(x.dtype)                             # flash out -> x.dtype
    attn2d = attn.transpose(0, 2, 1, 3).reshape(B, HW, C)                     # channels (head, d)
    out = jnp.einsum('btc,oc->bto', attn2d, wout_sn.reshape(C, C)) + bias
    return jnp.transpose(out, (0, 2, 1)).reshape(B, C, H, W)


def spectral_normalize(w2d, n_iter=50):
    # Power iteration from a deterministic start (emulates torch spectral_norm's
    # weight / sigma, iterated to convergence).
    u = jnp.ones((w2d.shape[0],), jnp.float32) / jnp.sqrt(w2d.shape[0])
    v = None
    for _ in range(n_iter):
        v = w2d.T @ u
        v = v / (jnp.linalg.norm(v) + 1e-12)
        u = w2d @ v
        u = u / (jnp.linalg.norm(u) + 1e-12)
    sigma = u @ (w2d @ v)
    return w2d / sigma


if __name__ == "__main__":
    B, dim, H, W = 2, 64, 16, 16
    n_heads = 8

    key = jax.random.PRNGKey(0)
    kx, kq, kw, kb = jax.random.split(key, 4)

    x = jax.random.normal(kx, (B, dim, H, W), dtype=jnp.float32)

    # to_qkv: Conv2d(dim, 3*dim, 1, bias=False) -> weight (3*dim, dim, 1, 1)
    wqkv = jax.random.normal(kq, (3 * dim, dim, 1, 1), jnp.float32) * (1.0 / math.sqrt(dim))
    # to_out: spectral_norm(Conv2d(dim, dim, 1)) -> weight (dim, dim, 1, 1), bias (dim,)
    wout_raw = jax.random.normal(kw, (dim, dim, 1, 1), jnp.float32) * (1.0 / math.sqrt(dim))
    bias = jax.random.normal(kb, (dim,), jnp.float32) * 0.01
    wout_sn = spectral_normalize(wout_raw.reshape(dim, dim)).reshape(dim, dim, 1, 1)

    out = sa_forward(x, wqkv, wout_sn, bias, n_heads)
    jax.block_until_ready(out)
    assert out.shape == (B, dim, H, W) and out.dtype == x.dtype

    ref = sa_reference(x, wqkv, wout_sn, bias, n_heads)
    jax.block_until_ready(ref)
    max_err = float(jnp.max(jnp.abs(out - ref)))
    # bf16 projections + approx reciprocal vs. f32-conv reference: small tolerance.
    assert max_err < 5e-2, f"max abs error {max_err}"
    print("KERNEL_OK")
</pallas_src>

<mosaic_0001>
module attributes {stable_mosaic.version = 11 : i64} {
  func.func @sa_kernel(%arg0: i32, %arg1: i32, %arg2: memref<1x128x64xf32, #tpu.memory_space<vmem>>, %arg3: memref<1x256x64xf32, #tpu.memory_space<vmem>>, %arg4: memref<8x64x8xbf16, #tpu.memory_space<vmem>>, %arg5: memref<8x64x8xbf16, #tpu.memory_space<vmem>>, %arg6: memref<8x64x8xbf16, #tpu.memory_space<vmem>>, %arg7: memref<8x8x64xbf16, #tpu.memory_space<vmem>>, %arg8: memref<1x64xf32, #tpu.memory_space<vmem>>, %arg9: memref<1x128x64xf32, #tpu.memory_space<vmem>>, %arg10: memref<8x256x8xbf16, #tpu.memory_space<vmem>>, %arg11: memref<8x256x8xbf16, #tpu.memory_space<vmem>>) attributes {dimension_semantics = [#tpu.dimension_semantics<parallel>, #tpu.dimension_semantics<arbitrary>], iteration_bounds = array<i64: 2, 2>, scalar_prefetch = 0 : i64, scratch_operands = 2 : i64, tpu.core_type = #tpu.core_type<tc>, window_params = [{transform_indices = @transform_0, window_bounds = array<i64: 1, 128, 64>}, {transform_indices = @transform_1, window_bounds = array<i64: 1, 256, 64>}, {pipeline_mode = #tpu.pipeline_mode<synchronous>, transform_indices = @transform_2, window_bounds = array<i64: 8, 64, 8>}, {pipeline_mode = #tpu.pipeline_mode<synchronous>, transform_indices = @transform_3, window_bounds = array<i64: 8, 64, 8>}, {pipeline_mode = #tpu.pipeline_mode<synchronous>, transform_indices = @transform_4, window_bounds = array<i64: 8, 64, 8>}, {pipeline_mode = #tpu.pipeline_mode<synchronous>, transform_indices = @transform_5, window_bounds = array<i64: 8, 8, 64>}, {pipeline_mode = #tpu.pipeline_mode<synchronous>, transform_indices = @transform_6, window_bounds = array<i64: 1, 64>}, {transform_indices = @transform_7, window_bounds = array<i64: 1, 128, 64>}]} {
    %c0_i32 = arith.constant 0 : i32
    %0 = arith.cmpi eq, %arg1, %c0_i32 : i32
    %1 = arith.extui %0 : i1 to i32
    %c0_i32_0 = arith.constant 0 : i32
    %2 = arith.cmpi ne, %1, %c0_i32_0 : i32
    scf.if %2 {
      %c0_27 = arith.constant 0 : index
      %c0_28 = arith.constant 0 : index
      %c0_29 = arith.constant 0 : index
      %38 = vector.load %arg3[%c0_27, %c0_28, %c0_29] : memref<1x256x64xf32, #tpu.memory_space<vmem>>, vector<1x256x64xf32>
      %39 = vector.shape_cast %38 : vector<1x256x64xf32> to vector<256x64xf32>
      %40 = arith.truncf %39 : vector<256x64xf32> to vector<256x64xbf16>
      %41 = vector.shape_cast %40 : vector<256x64xbf16> to vector<1x256x64xbf16>
      %42 = vector.broadcast %41 : vector<1x256x64xbf16> to vector<8x256x64xbf16>
      %c0_30 = arith.constant 0 : index
      %c0_31 = arith.constant 0 : index
      %c0_32 = arith.constant 0 : index
      %43 = vector.load %arg5[%c0_30, %c0_31, %c0_32] : memref<8x64x8xbf16, #tpu.memory_space<vmem>>, vector<8x64x8xbf16>
      "tpu.trace_start"() <{level = 10 : i32, message = "htc,hcd->htd"}> : () -> ()
      %cst_33 = arith.constant dense<0.000000e+00> : vector<8x256x8xf32>
      %44 = tpu.matmul %42, %43, %cst_33 {dimension_numbers = #tpu.dot_dimension_numbers<[2], [1], [1], [2], [0, 0, 0, 1, 1, 2], [0], [0]>} : vector<8x256x64xbf16>, vector<8x64x8xbf16>, vector<8x256x8xf32> -> vector<8x256x8xf32>
      "tpu.trace_stop"() : () -> ()
      %c0_34 = arith.constant 0 : index
      %c0_35 = arith.constant 0 : index
      %c0_36 = arith.constant 0 : index
      %45 = vector.load %arg6[%c0_34, %c0_35, %c0_36] : memref<8x64x8xbf16, #tpu.memory_space<vmem>>, vector<8x64x8xbf16>
      "tpu.trace_start"() <{level = 10 : i32, message = "htc,hcd->htd"}> : () -> ()
      %cst_37 = arith.constant dense<0.000000e+00> : vector<8x256x8xf32>
      %46 = tpu.matmul %42, %45, %cst_37 {dimension_numbers = #tpu.dot_dimension_numbers<[2], [1], [1], [2], [0, 0, 0, 1, 1, 2], [0], [0]>} : vector<8x256x64xbf16>, vector<8x64x8xbf16>, vector<8x256x8xf32> -> vector<8x256x8xf32>
      "tpu.trace_stop"() : () -> ()
      %47 = arith.truncf %44 : vector<8x256x8xf32> to vector<8x256x8xbf16>
      %c0_38 = arith.constant 0 : index
      %c0_39 = arith.constant 0 : index
      %c0_40 = arith.constant 0 : index
      %48 = vector.load %arg10[%c0_38, %c0_39, %c0_40] : memref<8x256x8xbf16, #tpu.memory_space<vmem>>, vector<8x256x8xbf16>
      tpu.vector_store %arg10[%c0_38, %c0_39, %c0_40], %47 {strides = array<i32>} : memref<8x256x8xbf16, #tpu.memory_space<vmem>>, vector<8x256x8xbf16>,
      %49 = arith.truncf %46 : vector<8x256x8xf32> to vector<8x256x8xbf16>
      %c0_41 = arith.constant 0 : index
      %c0_42 = arith.constant 0 : index
      %c0_43 = arith.constant 0 : index
      %50 = vector.load %arg11[%c0_41, %c0_42, %c0_43] : memref<8x256x8xbf16, #tpu.memory_space<vmem>>, vector<8x256x8xbf16>
      tpu.vector_store %arg11[%c0_41, %c0_42, %c0_43], %49 {strides = array<i32>} : memref<8x256x8xbf16, #tpu.memory_space<vmem>>, vector<8x256x8xbf16>,
    } else {
    }
    %c0 = arith.constant 0 : index
    %c0_1 = arith.constant 0 : index
    %c0_2 = arith.constant 0 : index
    %3 = vector.load %arg2[%c0, %c0_1, %c0_2] : memref<1x128x64xf32, #tpu.memory_space<vmem>>, vector<1x128x64xf32>
    %4 = vector.shape_cast %3 : vector<1x128x64xf32> to vector<128x64xf32>
    %5 = arith.truncf %4 : vector<128x64xf32> to vector<128x64xbf16>
    %6 = vector.shape_cast %5 : vector<128x64xbf16> to vector<1x128x64xbf16>
    %7 = vector.broadcast %6 : vector<1x128x64xbf16> to vector<8x128x64xbf16>
    %c0_3 = arith.constant 0 : index
    %c0_4 = arith.constant 0 : index
    %c0_5 = arith.constant 0 : index
    %8 = vector.load %arg4[%c0_3, %c0_4, %c0_5] : memref<8x64x8xbf16, #tpu.memory_space<vmem>>, vector<8x64x8xbf16>
    "tpu.trace_start"() <{level = 10 : i32, message = "htc,hcd->htd"}> : () -> ()
    %cst = arith.constant dense<0.000000e+00> : vector<8x128x8xf32>
    %9 = tpu.matmul %7, %8, %cst {dimension_numbers = #tpu.dot_dimension_numbers<[2], [1], [1], [2], [0, 0, 0, 1, 1, 2], [0], [0]>} : vector<8x128x64xbf16>, vector<8x64x8xbf16>, vector<8x128x8xf32> -> vector<8x128x8xf32>
    "tpu.trace_stop"() : () -> ()
    %cst_6 = arith.constant 0.353553385 : f32
    %10 = vector.broadcast %cst_6 : f32 to vector<8x128x8xf32>
    %11 = arith.mulf %9, %10 : vector<8x128x8xf32>
    %12 = arith.truncf %11 : vector<8x128x8xf32> to vector<8x128x8xbf16>
    %c0_7 = arith.constant 0 : index
    %c0_8 = arith.constant 0 : index
    %c0_9 = arith.constant 0 : index
    %13 = vector.load %arg10[%c0_7, %c0_8, %c0_9] : memref<8x256x8xbf16, #tpu.memory_space<vmem>>, vector<8x256x8xbf16>
    %c0_10 = arith.constant 0 : index
    %c0_11 = arith.constant 0 : index
    %c0_12 = arith.constant 0 : index
    %14 = vector.load %arg11[%c0_10, %c0_11, %c0_12] : memref<8x256x8xbf16, #tpu.memory_space<vmem>>, vector<8x256x8xbf16>
    "tpu.trace_start"() <{level = 10 : i32, message = "hqd,hkd->hqk"}> : () -> ()
    %cst_13 = arith.constant dense<0.000000e+00> : vector<8x128x256xf32>
    %15 = tpu.matmul %12, %13, %cst_13 {dimension_numbers = #tpu.dot_dimension_numbers<[2], [2], [1], [1], [0, 0, 0, 1, 1, 1], [0], [0]>} : vector<8x128x8xbf16>, vector<8x256x8xbf16>, vector<8x128x256xf32> -> vector<8x128x256xf32>
    "tpu.trace_stop"() : () -> ()
    %cst_14 = arith.constant dense<0xFF800000> : vector<8x128xf32>
    %16 = vector.multi_reduction <maximumf>, %15, %cst_14 [2] : vector<8x128x256xf32> to vector<8x128xf32>
    %17 = vector.shape_cast %16 : vector<8x128xf32> to vector<8x128x1xf32>
    %18 = vector.broadcast %17 : vector<8x128x1xf32> to vector<8x128x256xf32>
    %19 = arith.subf %15, %18 : vector<8x128x256xf32>
    %20 = math.exp %19 : vector<8x128x256xf32>
    %cst_15 = arith.constant dense<0.000000e+00> : vector<8x128xf32>
    %21 = vector.multi_reduction <add>, %20, %cst_15 [2] : vector<8x128x256xf32> to vector<8x128xf32>
    %22 = vector.shape_cast %21 : vector<8x128xf32> to vector<8x128x1xf32>
    %23 = tpu.reciprocal %22 {approx = true} : vector<8x128x1xf32> -> vector<8x128x1xf32>
    %24 = vector.broadcast %23 : vector<8x128x1xf32> to vector<8x128x256xf32>
    %25 = arith.mulf %20, %24 : vector<8x128x256xf32>
    %26 = arith.truncf %25 : vector<8x128x256xf32> to vector<8x128x256xbf16>
    "tpu.trace_start"() <{level = 10 : i32, message = "hqk,hkd->hqd"}> : () -> ()
    %cst_16 = arith.constant dense<0.000000e+00> : vector<8x128x8xf32>
    %27 = tpu.matmul %26, %14, %cst_16 {dimension_numbers = #tpu.dot_dimension_numbers<[2], [1], [1], [2], [0, 0, 0, 1, 1, 2], [0], [0]>} : vector<8x128x256xbf16>, vector<8x256x8xbf16>, vector<8x128x8xf32> -> vector<8x128x8xf32>
    "tpu.trace_stop"() : () -> ()
    %28 = arith.truncf %27 : vector<8x128x8xf32> to vector<8x128x8xbf16>
    %c0_17 = arith.constant 0 : index
    %c0_18 = arith.constant 0 : index
    %c0_19 = arith.constant 0 : index
    %29 = vector.load %arg7[%c0_17, %c0_18, %c0_19] : memref<8x8x64xbf16, #tpu.memory_space<vmem>>, vector<8x8x64xbf16>
    "tpu.trace_start"() <{level = 10 : i32, message = "hqd,hdc->hqc"}> : () -> ()
    %cst_20 = arith.constant dense<0.000000e+00> : vector<8x128x64xf32>
    %30 = tpu.matmul %28, %29, %cst_20 {dimension_numbers = #tpu.dot_dimension_numbers<[2], [1], [1], [2], [0, 0, 0, 1, 1, 2], [0], [0]>} : vector<8x128x8xbf16>, vector<8x8x64xbf16>, vector<8x128x64xf32> -> vector<8x128x64xf32>
    "tpu.trace_stop"() : () -> ()
    %cst_21 = arith.constant dense<0.000000e+00> : vector<128x64xf32>
    %31 = vector.multi_reduction <add>, %30, %cst_21 [0] : vector<8x128x64xf32> to vector<128x64xf32>
    %c0_22 = arith.constant 0 : index
    %c0_23 = arith.constant 0 : index
    %32 = vector.load %arg8[%c0_22, %c0_23] : memref<1x64xf32, #tpu.memory_space<vmem>>, vector<1x64xf32>
    %33 = vector.broadcast %32 : vector<1x64xf32> to vector<128x64xf32>
    %34 = arith.addf %31, %33 : vector<128x64xf32>
    %c0_24 = arith.constant 0 : index
    %c0_25 = arith.constant 0 : index
    %c0_26 = arith.constant 0 : index
    %35 = vector.load %arg9[%c0_24, %c0_25, %c0_26] : memref<1x128x64xf32, #tpu.memory_space<vmem>>, vector<1x128x64xf32>
    %36 = vector.shape_cast %35 : vector<1x128x64xf32> to vector<128x64xf32>
    %37 = vector.shape_cast %34 : vector<128x64xf32> to vector<1x128x64xf32>
    tpu.vector_store %arg9[%c0_24, %c0_25, %c0_26], %37 {strides = array<i32>} : memref<1x128x64xf32, #tpu.memory_space<vmem>>, vector<1x128x64xf32>,
    return
  }
  func.func @transform_0(%arg0: i32, %arg1: i32) -> (i32, i32, i32) {
    %c0_i32 = arith.constant 0 : i32
    %c0_i32_0 = arith.constant 0 : i32
    return %arg0, %arg1, %c0_i32 : i32, i32, i32
  }
  func.func @transform_1(%arg0: i32, %arg1: i32) -> (i32, i32, i32) {
    %c0_i32 = arith.constant 0 : i32
    %c0_i32_0 = arith.constant 0 : i32
    %c0_i32_1 = arith.constant 0 : i32
    return %arg0, %c0_i32, %c0_i32_0 : i32, i32, i32
  }
  func.func @transform_2(%arg0: i32, %arg1: i32) -> (i32, i32, i32) {
    %c0_i32 = arith.constant 0 : i32
    %c0_i32_0 = arith.constant 0 : i32
    %c0_i32_1 = arith.constant 0 : i32
    %c0_i32_2 = arith.constant 0 : i32
    return %c0_i32, %c0_i32_0, %c0_i32_1 : i32, i32, i32
  }
  func.func @transform_3(%arg0: i32, %arg1: i32) -> (i32, i32, i32) {
    %c0_i32 = arith.constant 0 : i32
    %c0_i32_0 = arith.constant 0 : i32
    %c0_i32_1 = arith.constant 0 : i32
    %c0_i32_2 = arith.constant 0 : i32
    return %c0_i32, %c0_i32_0, %c0_i32_1 : i32, i32, i32
  }
  func.func @transform_4(%arg0: i32, %arg1: i32) -> (i32, i32, i32) {
    %c0_i32 = arith.constant 0 : i32
    %c0_i32_0 = arith.constant 0 : i32
    %c0_i32_1 = arith.constant 0 : i32
    %c0_i32_2 = arith.constant 0 : i32
    return %c0_i32, %c0_i32_0, %c0_i32_1 : i32, i32, i32
  }
  func.func @transform_5(%arg0: i32, %arg1: i32) -> (i32, i32, i32) {
    %c0_i32 = arith.constant 0 : i32
    %c0_i32_0 = arith.constant 0 : i32
    %c0_i32_1 = arith.constant 0 : i32
    %c0_i32_2 = arith.constant 0 : i32
    return %c0_i32, %c0_i32_0, %c0_i32_1 : i32, i32, i32
  }
  func.func @transform_6(%arg0: i32, %arg1: i32) -> (i32, i32) {
    %c0_i32 = arith.constant 0 : i32
    %c0_i32_0 = arith.constant 0 : i32
    %c0_i32_1 = arith.constant 0 : i32
    return %c0_i32, %c0_i32_0 : i32, i32
  }
  func.func @transform_7(%arg0: i32, %arg1: i32) -> (i32, i32, i32) {
    %c0_i32 = arith.constant 0 : i32
    %c0_i32_0 = arith.constant 0 : i32
    return %arg0, %arg1, %c0_i32 : i32, i32, i32
  }
}

</mosaic_0001>

<bundles_post_ra>
// kernel: tpu_custom_call.1
= control target key start
LH: loop header
LB: loop body
LE: loop exit
PB: predicated region body
PF: predicated region fallthrough
CT: control target
= control target key end

     0   :  { %s15171_s24 = smov 0   ;;  %s15173_s25 = smov 0   ;;  %s20635_s0 = inlined_call_operand.vmem [shape: f32[2,256,64], index: 0, kind: input, shape index: {}]   ;;  %s20636_s1 = inlined_call_operand.vmem [shape: f32[2,256,64], index: 1, kind: input, shape index: {}]   ;;  %s20637_s2 = inlined_call_operand.vmem [shape: bf16[8,64,8], index: 2, kind: input, shape index: {}]   ;;  %s20638_s3 = inlined_call_operand.vmem [shape: bf16[8,64,8], index: 3, kind: input, shape index: {}]   ;;  %s20639_s4 = inlined_call_operand.vmem [shape: bf16[8,64,8], index: 4, kind: input, shape index: {}]   ;;  %s20640_s5 = inlined_call_operand.vmem [shape: bf16[8,8,64], index: 5, kind: input, shape index: {}]   ;;  %s20641_s6 = inlined_call_operand.vmem [shape: f32[1,64], index: 6, kind: input, shape index: {}]   ;;  %s20642_s7 = inlined_call_operand.vmem [shape: f32[2,256,64], index: 7, kind: output, shape index: {}]  }
   0x1   :  { %s15175_s26 = smov 0   ;;  %s15177_s27 = smov 0  }
   0x2   :  { %s15179_s28 = smov 0  }
   0x3 LB: > { %s26_s29 = sadd.s32 1, %s15121_s26  ;;  %s29_s30 = sadd.s32 1, %s15125_s27  ;;  %s15129_s28 = sphi %s15179_s28, %s17_s28   ;;  %s15125_s27 = sphi %s15177_s27, %s22502_s27   ;;  %s15121_s26 = sphi %s15175_s26, %s22501_s26   ;;  %s15117_s25 = sphi %s15173_s25, %s22500_s25   ;;  %s15113_s24 = sphi %s15171_s24, %s22499_s24  }
   0x4   : > { %p27_p0 = scmp.ge.s32.totalorder %s26_s29, 2  ;;  %p11325_p1 = scmp.ge.s32.totalorder %s15129_s28, 1 }
   0x5   : > { %p268_p2 = scmp.lt.s32.totalorder %s15129_s28, 5 }
   0x6   : > { %s22504_s29 = smov (%p27_p0, %s26_s29), 0  ;;  %s22506_s30 = smov (!%p27_p0, %s29_s30), %s15125_s27 }
   0x7   : > { %p269_p3 = pnand %p11325_p1, %p268_p2  ;;  %p31_p4 = scmp.ge.s32.totalorder %s22506_s30, 2 }
   0x9   : > { %s22508_s30 = smov (%p31_p4, %s22506_s30), 0  ;;  %272 = sbr.rel (%p269_p3) target bundleno = 2342 (0x926), region = 48 }
  0x10   : > { %s11326_s8 = sshll.u32 %s15113_s24, 4  ;;  %p314_p5 = scmp.lt.s32.totalorder %s15117_s25, 1 }
  0x11   : > { %p316_p6 = scmp.lt.s32.totalorder %s11326_s8, 31  ;;  %p11334_p7 = scmp.ne.s32.totalorder %s15113_s24, 0 }
  0x12   : > { %s22510_s25 = smov (!%p314_p5, %s15117_s25), 1  ;;  %v14227_v0 = vld [vmem:[%s20638_s3] sm:$0xff] (!%p11334_p7)   ;;  %v14229_v2 = vld [vmem:[%s20638_s3 + $0x8] sm:$0xff] (!%p11334_p7)   ;;  %v14231_v4 = vld [vmem:[%s20638_s3 + $0x10] sm:$0xff] (!%p11334_p7)   ;;  %vm479_vm0 = vcmask (!%p11334_p7), 523264   ;;  %vm3656_vm1 = vcmask (!%p11334_p7), 64512  }
  0x13   : > { %s22512_s8 = smov (!%p316_p6, %s11326_s8), 31  ;;  %s11327_s9 = sshll.u32 %s22510_s25, 5  ;;  %v14228_v1 = vld [vmem:[%s20638_s3 + $0x20] sm:$0xff] (!%p11334_p7)   ;;  %13139 = vmatprep.subr.bf16.mxu0 (!%p11334_p7), %v14227_v0  ;;  %v14230_v3 = vld [vmem:[%s20638_s3 + $0x28] sm:$0xff] (!%p11334_p7)   ;;  %v14232_v5 = vld [vmem:[%s20638_s3 + $0x30] sm:$0xff] (!%p11334_p7)  }
  0x14   : > { %s11882_s10 = sshll.u32 %s22510_s25, 8  ;;  %s319_s11 = sadd.s32 %s11327_s9, %s22512_s8  ;;  %13179 = vmatprep.subr.bf16.mxu1 (!%p11334_p7), %v14228_v1  ;;  %13140 = vmatpush3.bf16.msra.mxu0 (!%p11334_p7), %v14227_v0  ;;  %v14233_v6 = vld [vmem:[%s20638_s3 + $0x18] sm:$0xff] (!%p11334_p7)   ;;  %v14235_v13 = vld [vmem:[%s20638_s3 + $0x40] sm:$0xff] (!%p11334_p7)   ;;  %v14237_v20 = vld [vmem:[%s20638_s3 + $0x48] sm:$0xff] (!%p11334_p7)  }
  0x15   : > { %s15204_s14 = scalar_lea.vmem %s20636_s1, %s11882_s10  ;;  %s11328_s15 = sshll.u32 %s319_s11, 3  ;;  %13180 = vmatpush3.bf16.msra.mxu1 (!%p11334_p7), %v14228_v1  ;;  %13141 = vmatprep.subr.bf16.mxu0 (!%p11334_p7), %v14229_v2  ;;  %v14234_v9 = vld [vmem:[%s20638_s3 + $0x38] sm:$0xff] (!%p11334_p7)   ;;  %v14236_v14 = vld [vmem:[%s20638_s3 + $0x60] sm:$0xff] (!%p11334_p7)   ;;  %v14238_v22 = vld [vmem:[%s20638_s3 + $0x68] sm:$0xff] (!%p11334_p7)  }
  0x16   : > { %s15209_s18 = scalar_lea.vmem %s20635_s0, %s11328_s15  ;;  %s15214_s21 = scalar_lea.vmem %s20642_s7, %s11328_s15  ;;  %13181 = vmatprep.subr.bf16.mxu1 (!%p11334_p7), %v14230_v3  ;;  %v343_v7 = vld [vmem:[%s15204_s14] sm:$0xff] (!%p11334_p7)  ;;  %v344_v8 = vld [vmem:[%s15204_s14 + $0x8] sm:$0xff] (!%p11334_p7)  ;;  %v345_v11 = vld [vmem:[%s15204_s14 + $0x10] sm:$0xff] (!%p11334_p7) }
  0x17   : > { %342 = sbr.rel (%p11334_p7) target bundleno = 758 (0x2f6), region = 52  ;;  %v15242_v10 = vpack.c.bf16 (!%p11334_p7), %v344_v8, %v343_v7  ;;  %v346_v12 = vld [vmem:[%s15204_s14 + $0x18] sm:$0xff] (!%p11334_p7)  ;;  %v347_v15 = vld [vmem:[%s15204_s14 + $0x20] sm:$0xff] (!%p11334_p7)  ;;  %v348_v16 = vld [vmem:[%s15204_s14 + $0x28] sm:$0xff] (!%p11334_p7) }
  0x18   : > { %13142 = vmatpush3.bf16.msra.mxu0 (!%p11334_p7), %v14229_v2  ;;  %v15258_v17 = vpack.c.bf16 (!%p11334_p7), %v346_v12, %v345_v11  ;;  %v15260_v18 = vpack.c.bf16 (!%p11334_p7), %v348_v16, %v347_v15  ;;  %v349_v19 = vld [vmem:[%s15204_s14 + $0x30] sm:$0xff] (!%p11334_p7)  ;;  %v350_v21 = vld [vmem:[%s15204_s14 + $0x38] sm:$0xff] (!%p11334_p7)  ;;  %v351_v23 = vld [vmem:[%s15204_s14 + $0x40] sm:$0xff] (!%p11334_p7) }
  0x19   : > { %13182 = vmatpush3.bf16.msra.mxu1 (!%p11334_p7), %v14230_v3  ;;  %13143 = vmatprep.subr.bf16.mxu0 (!%p11334_p7), %v14231_v4  ;;  %v352_v24 = vld [vmem:[%s15204_s14 + $0x48] sm:$0xff] (!%p11334_p7)  ;;  %v14239_v25 = vld [vmem:[%s20638_s3 + $0x50] sm:$0xff] (!%p11334_p7)   ;;  %v15286_v27 = vpack.c.bf16 (!%p11334_p7), %v350_v21, %v349_v19  ;;  %v14241_v30 = vld [vmem:[%s20638_s3 + $0x58] sm:$0xff] (!%p11334_p7)  }
  0x1a   : > { %13183 = vmatprep.subr.bf16.mxu1 (!%p11334_p7), %v14232_v5  ;;  %13147 = vmatprep.mubr.msk.bf16.mxu0 (!%p11334_p7), %vm479_vm0, %v15242_v10  ;;  %v14240_v26 = vld [vmem:[%s20638_s3 + $0x70] sm:$0xff] (!%p11334_p7)   ;;  %v15288_v28 = vpack.c.bf16 (!%p11334_p7), %v352_v24, %v351_v23  ;;  %v354_v31 = vld [vmem:[%s15204_s14 + $0x58] sm:$0xff] (!%p11334_p7)  ;;  %v355_v33 = vld [vmem:[%s15204_s14 + $0x60] sm:$0xff] (!%p11334_p7) }
  0x1b   : > { %13187 = vmatprep.mubr.msk.bf16.mxu1 (!%p11334_p7), %vm479_vm0, %v15242_v10  ;;  %v353_v29 = vld [vmem:[%s15204_s14 + $0x50] sm:$0xff] (!%p11334_p7)  ;;  %v14242_v32 = vld [vmem:[%s20638_s3 + $0x78] sm:$0xff] (!%p11334_p7)   ;;  %v356_v34 = vld [vmem:[%s15204_s14 + $0x68] sm:$0xff] (!%p11334_p7) }
  0x1c   : > { %13144 = vmatpush3.bf16.msra.mxu0 (!%p11334_p7), %v14231_v4  ;;  %v15311_v35 = vld [vmem:[%s20638_s3 + $0x80] sm:$0xff] (!%p11334_p7)   ;;  %v15313_v36 = vpack.c.bf16 (!%p11334_p7), %v354_v31, %v353_v29  ;;  %v15318_v38 = vpack.c.bf16 (!%p11334_p7), %v356_v34, %v355_v33  ;;  %v357_v39 = vld [vmem:[%s15204_s14 + $0x70] sm:$0xff] (!%p11334_p7)  ;;  %v358_v40 = vld [vmem:[%s15204_s14 + $0x78] sm:$0xff] (!%p11334_p7) }
  0x1d   : > { %13184 = vmatpush3.bf16.msra.mxu1 (!%p11334_p7), %v14232_v5  ;;  %13145 = vmatprep.subr.bf16.mxu0 (!%p11334_p7), %v14233_v6  ;;  %v14244_v37 = vld [vmem:[%s20638_s3 + $0xa0] sm:$0xff] (!%p11334_p7)   ;;  %v360_v42 = vld [vmem:[%s15204_s14 + $0x88] sm:$0xff] (!%p11334_p7)  ;;  %v15333_v43 = vpack.c.bf16 (!%p11334_p7), %v358_v40, %v357_v39  ;;  %v361_v45 = vld [vmem:[%s15204_s14 + $0x90] sm:$0xff] (!%p11334_p7) }
  0x1e   : > { %13185 = vmatprep.subr.bf16.mxu1 %v14234_v9  ;;  %v359_v41 = vld [vmem:[%s15204_s14 + $0x80] sm:$0xff]  ;;  %v362_v46 = vld [vmem:[%s15204_s14 + $0x98] sm:$0xff]  ;;  %v364_v48 = vld [vmem:[%s15204_s14 + $0xa8] sm:$0xff] }
  0x1f   : > { %v15335_v44 = vpack.c.bf16 %v360_v42, %v359_v41  ;;  %v363_v47 = vld [vmem:[%s15204_s14 + $0xa0] sm:$0xff]  ;;  %v15349_v49 = vpack.c.bf16 %v362_v46, %v361_v45  ;;  %v365_v51 = vld [vmem:[%s15204_s14 + $0xb0] sm:$0xff]  ;;  %v366_v52 = vld [vmem:[%s15204_s14 + $0xb8] sm:$0xff] }
  0x20   : > { %13146 = vmatpush3.bf16.msra.mxu0 %v14233_v6  ;;  %v15351_v50 = vpack.c.bf16 %v364_v48, %v363_v47  ;;  %v367_v53 = vld [vmem:[%s15204_s14 + $0xc0] sm:$0xff]  ;;  %v368_v54 = vld [vmem:[%s15204_s14 + $0xc8] sm:$0xff]  ;;  %v15365_v55 = vpack.c.bf16 %v366_v52, %v365_v51  ;;  %v369_v57 = vld [vmem:[%s15204_s14 + $0xd0] sm:$0xff] }
  0x21   : > { %13186 = vmatpush3.bf16.msra.mxu1 %v14234_v9  ;;  %13219 = vmatprep.subr.bf16.mxu0 %v14235_v13  ;;  %v15367_v56 = vpack.c.bf16 %v368_v54, %v367_v53  ;;  %v370_v58 = vld [vmem:[%s15204_s14 + $0xd8] sm:$0xff]  ;;  %v371_v59 = vld [vmem:[%s15204_s14 + $0xe0] sm:$0xff]  ;;  %v372_v60 = vld [vmem:[%s15204_s14 + $0xe8] sm:$0xff] }
  0x22   : > { %13259 = vmatprep.subr.bf16.mxu1 %v14236_v14  ;;  %v15381_v61 = vpack.c.bf16 %v370_v58, %v369_v57  ;;  %v15383_v62 = vpack.c.bf16 %v372_v60, %v371_v59  ;;  %v373_v63 = vld [vmem:[%s15204_s14 + $0xf0] sm:$0xff]  ;;  %v374_v0 = vld [vmem:[%s15204_s14 + $0xf8] sm:$0xff]  ;;  %v14245_v2 = vld [vmem:[%s20638_s3 + $0x88] sm:$0xff]  }
  0x23   : > { %13148 = vmatmul.mubr.msk.bf16.vlgmr.msra.gmra.mrb[0].mxu0 %vm479_vm0, %v15258_v17  ;;  %v15395_v1 = vpack.c.bf16 %v374_v0, %v373_v63  ;;  %v14246_v3 = vld [vmem:[%s20638_s3 + $0xa8] sm:$0xff]   ;;  %v14247_v4 = vld [vmem:[%s20638_s3 + $0x90] sm:$0xff]   ;;  %v14249_v6 = vld [vmem:[%s20638_s3 + $0x98] sm:$0xff]  }
  0x24   : > { %13188 = vmatmul.mubr.msk.bf16.vlgmr.msra.gmra.mrb[0].mxu1 %vm479_vm0, %v15258_v17  ;;  %13220 = vmatpush3.bf16.msra.mxu0 %v14235_v13  ;;  %v14248_v5 = vld [vmem:[%s20638_s3 + $0xb0] sm:$0xff]   ;;  %v14250_v7 = vld [vmem:[%s20638_s3 + $0xb8] sm:$0xff]   ;;  %v14251_v8 = vld [vmem:[%s20638_s3 + $0xc0] sm:$0xff]  }
  0x25   : > { %13260 = vmatpush3.bf16.msra.mxu1 %v14236_v14  ;;  %13151 = vmatprep.mubr.msk.bf16.mxu0 %vm479_vm0, %v15260_v18  ;;  %v14252_v9 = vld [vmem:[%s20638_s3 + $0xe0] sm:$0xff]   ;;  %v14253_v11 = vld [vmem:[%s20638_s3 + $0xc8] sm:$0xff]   ;;  %v14255_v13 = vld [vmem:[%s20638_s3 + $0xd0] sm:$0xff]  }
  0x26   : > { %13191 = vmatprep.mubr.msk.bf16.mxu1 %vm479_vm0, %v15260_v18  ;;  %13221 = vmatprep.subr.bf16.mxu0 %v14237_v20  ;;  %v14254_v12 = vld [vmem:[%s20638_s3 + $0xe8] sm:$0xff]   ;;  %v14256_v14 = vld [vmem:[%s20638_s3 + $0xf0] sm:$0xff]   ;;  %v14257_v15 = vld [vmem:[%s20638_s3 + $0xd8] sm:$0xff]  }
  0x27   : > { %13261 = vmatprep.subr.bf16.mxu1 %v14238_v22  ;;  %v14258_v16 = vld [vmem:[%s20638_s3 + $0xf8] sm:$0xff]   ;;  %v14259_v19 = vld [vmem:[%s20639_s4] sm:$0xff]   ;;  %v14261_v21 = vld [vmem:[%s20639_s4 + $0x8] sm:$0xff]  }
  0x28   : > { %13222 = vmatpush3.bf16.msra.mxu0 %v14237_v20  ;;  %v14260_v20 = vld [vmem:[%s20639_s4 + $0x20] sm:$0xff]   ;;  %v14263_v23 = vld [vmem:[%s20639_s4 + $0x10] sm:$0xff]  }
  0x29   : > { %13262 = vmatpush3.bf16.msra.mxu1 %v14238_v22  ;;  %13223 = vmatprep.subr.bf16.mxu0 %v14239_v25  ;;  %v14262_v22 = vld [vmem:[%s20639_s4 + $0x28] sm:$0xff]   ;;  %v14264_v24 = vld [vmem:[%s20639_s4 + $0x30] sm:$0xff]   ;;  %v15619_v29 = vld [vmem:[%s20639_s4 + $0x40] sm:$0xff]  }
  0x2a   : > { %13263 = vmatprep.subr.bf16.mxu1 %v14240_v26 }
  0x2b   : > { %13152 = vmatmul.mubr.msk.bf16.gmra.mrb[4].mxu0 %vm479_vm0, %v15286_v27 }
  0x2c   : > { %13192 = vmatmul.mubr.msk.bf16.gmra.mrb[4].mxu1 %vm479_vm0, %v15286_v27  ;;  %13155 = vmatprep.mubr.msk.bf16.mxu0 %vm479_vm0, %v15288_v28 }
  0x2d   : > { %13195 = vmatprep.mubr.msk.bf16.mxu1 %vm479_vm0, %v15288_v28  ;;  %13224 = vmatpush3.bf16.msra.mxu0 %v14239_v25  ;;  %v14265_v25 = vld [vmem:[%s20639_s4 + $0x18] sm:$0xff]  }
  0x2e   : > { %13264 = vmatpush3.bf16.msra.mxu1 %v14240_v26  ;;  %13225 = vmatprep.subr.bf16.mxu0 %v14241_v30  ;;  %v14266_v26 = vld [vmem:[%s20639_s4 + $0x38] sm:$0xff]  }
  0x2f   : > { %13265 = vmatprep.subr.bf16.mxu1 %v14242_v32 }
  0x31   : > { %13226 = vmatpush3.bf16.msra.mxu0 %v14241_v30  ;;  %v15624_v30 = vld [vmem:[%s20639_s4 + $0x60] sm:$0xff]  }
  0x32   : > { %13266 = vmatpush3.bf16.msra.mxu1 %v14242_v32  ;;  %13299 = vmatprep.subr.bf16.mxu0 %v15311_v35 }
  0x33   : > { %13156 = vmatmul.mubr.msk.bf16.gmra.mrb[8].mxu0 %vm479_vm0, %v15313_v36  ;;  %13339 = vmatprep.subr.bf16.mxu1 %v14244_v37 }
  0x34   : > { %13196 = vmatmul.mubr.msk.bf16.gmra.mrb[8].mxu1 %vm479_vm0, %v15313_v36  ;;  %13159 = vmatprep.mubr.msk.bf16.mxu0 %vm479_vm0, %v15318_v38 }
  0x35   : > { %13199 = vmatprep.mubr.msk.bf16.mxu1 %vm479_vm0, %v15318_v38 }
  0x3b   : > { %13160 = vmatmul.mubr.msk.bf16.gmra.mrb[12].mxu0 %vm479_vm0, %v15333_v43 }
  0x3c   : > { %13200 = vmatmul.mubr.msk.bf16.gmra.mrb[12].mxu1 %vm479_vm0, %v15333_v43  ;;  %13163 = vmatprep.mubr.msk.bf16.mxu0 %vm479_vm0, %v15335_v44 }
  0x3d   : > { %13203 = vmatprep.mubr.msk.bf16.mxu1 %vm479_vm0, %v15335_v44 }
  0x43   : > { %13164 = vmatmul.mubr.msk.bf16.gmra.mrb[16].mxu0 %vm479_vm0, %v15349_v49 }
  0x44   : > { %13204 = vmatmul.mubr.msk.bf16.gmra.mrb[16].mxu1 %vm479_vm0, %v15349_v49  ;;  %13167 = vmatprep.mubr.msk.bf16.mxu0 %vm479_vm0, %v15351_v50 }
  0x45   : > { %13207 = vmatprep.mubr.msk.bf16.mxu1 %vm479_vm0, %v15351_v50 }
  0x4b   : > { %13168 = vmatmul.mubr.msk.bf16.gmra.mrb[20].mxu0 %vm479_vm0, %v15365_v55 }
  0x4c   : > { %13208 = vmatmul.mubr.msk.bf16.gmra.mrb[20].mxu1 %vm479_vm0, %v15365_v55  ;;  %13171 = vmatprep.mubr.msk.bf16.mxu0 %vm479_vm0, %v15367_v56 }
  0x4d   : > { %13211 = vmatprep.mubr.msk.bf16.mxu1 %vm479_vm0, %v15367_v56 }
  0x53   : > { %13172 = vmatmul.mubr.msk.bf16.gmra.mrb[24].mxu0 %vm479_vm0, %v15381_v61 }
  0x54   : > { %13212 = vmatmul.mubr.msk.bf16.gmra.mrb[24].mxu1 %vm479_vm0, %v15381_v61  ;;  %13175 = vmatprep.mubr.msk.bf16.mxu0 %vm479_vm0, %v15383_v62 }
  0x55   : > { %13215 = vmatprep.mubr.msk.bf16.mxu1 %vm479_vm0, %v15383_v62 }
  0x5b   : > { %13176 = vmatmul.mubr.msk.bf16.gmra.mrb[28].mxu0 %vm479_vm0, %v15395_v1 }
  0x5c   : > { %13216 = vmatmul.mubr.msk.bf16.gmra.mrb[28].mxu1 %vm479_vm0, %v15395_v1  ;;  %13227 = vmatprep.mubr.msk.bf16.mxu0 %vm479_vm0, %v15242_v10 }
  0x5d   : > { %13267 = vmatprep.mubr.msk.bf16.mxu1 %vm479_vm0, %v15242_v10 }
  0x63   : > { %13228 = vmatmul.mubr.msk.bf16.vlgmr.msra.gmra.mrb[32].mxu0 %vm479_vm0, %v15258_v17 }
  0x64   : > { %13268 = vmatmul.mubr.msk.bf16.vlgmr.msra.gmra.mrb[32].mxu1 %vm479_vm0, %v15258_v17  ;;  %13300 = vmatpush3.bf16.msra.mxu0 %v15311_v35 }
  0x65   : > { %13340 = vmatpush3.bf16.msra.mxu1 %v14244_v37  ;;  %13231 = vmatprep.mubr.msk.bf16.mxu0 %vm479_vm0, %v15260_v18 }
  0x66   : > { %13271 = vmatprep.mubr.msk.bf16.mxu1 %vm479_vm0, %v15260_v18  ;;  %13301 = vmatprep.subr.bf16.mxu0 %v14245_v2 }
  0x67   : > { %13341 = vmatprep.subr.bf16.mxu1 %v14246_v3 }
  0x68   : > { %13302 = vmatpush3.bf16.msra.mxu0 %v14245_v2 }
  0x69   : > { %13342 = vmatpush3.bf16.msra.mxu1 %v14246_v3  ;;  %13303 = vmatprep.subr.bf16.mxu0 %v14247_v4 }
  0x6a   : > { %13343 = vmatprep.subr.bf16.mxu1 %v14248_v5 }
  0x6b   : > { %13232 = vmatmul.mubr.msk.bf16.gmra.mrb[36].mxu0 %vm479_vm0, %v15286_v27 }
  0x6c   : > { %13272 = vmatmul.mubr.msk.bf16.gmra.mrb[36].mxu1 %vm479_vm0, %v15286_v27  ;;  %13235 = vmatprep.mubr.msk.bf16.mxu0 %vm479_vm0, %v15288_v28 }
  0x6d   : > { %13275 = vmatprep.mubr.msk.bf16.mxu1 %vm479_vm0, %v15288_v28  ;;  %13304 = vmatpush3.bf16.msra.mxu0 %v14247_v4 }
  0x6e   : > { %13344 = vmatpush3.bf16.msra.mxu1 %v14248_v5  ;;  %13305 = vmatprep.subr.bf16.mxu0 %v14249_v6 }
  0x6f   : > { %13345 = vmatprep.subr.bf16.mxu1 %v14250_v7 }
  0x71   : > { %13306 = vmatpush3.bf16.msra.mxu0 %v14249_v6 }
  0x72   : > { %13346 = vmatpush3.bf16.msra.mxu1 %v14250_v7  ;;  %13379 = vmatprep.subr.bf16.mxu0 %v14251_v8 }
  0x73   : > { %13236 = vmatmul.mubr.msk.bf16.gmra.mrb[40].mxu0 %vm479_vm0, %v15313_v36  ;;  %13419 = vmatprep.subr.bf16.mxu1 %v14252_v9 }
  0x74   : > { %13276 = vmatmul.mubr.msk.bf16.gmra.mrb[40].mxu1 %vm479_vm0, %v15313_v36  ;;  %13239 = vmatprep.mubr.msk.bf16.mxu0 %vm479_vm0, %v15318_v38 }
  0x75   : > { %13279 = vmatprep.mubr.msk.bf16.mxu1 %vm479_vm0, %v15318_v38 }
  0x7b   : > { %13240 = vmatmul.mubr.msk.bf16.gmra.mrb[44].mxu0 %vm479_vm0, %v15333_v43 }
  0x7c   : > { %13280 = vmatmul.mubr.msk.bf16.gmra.mrb[44].mxu1 %vm479_vm0, %v15333_v43  ;;  %13243 = vmatprep.mubr.msk.bf16.mxu0 %vm479_vm0, %v15335_v44 }
  0x7d   : > { %13283 = vmatprep.mubr.msk.bf16.mxu1 %vm479_vm0, %v15335_v44 }
  0x83   : > { %13244 = vmatmul.mubr.msk.bf16.gmra.mrb[48].mxu0 %vm479_vm0, %v15349_v49 }
  0x84   : > { %13284 = vmatmul.mubr.msk.bf16.gmra.mrb[48].mxu1 %vm479_vm0, %v15349_v49  ;;  %13247 = vmatprep.mubr.msk.bf16.mxu0 %vm479_vm0, %v15351_v50 }
  0x85   : > { %13287 = vmatprep.mubr.msk.bf16.mxu1 %vm479_vm0, %v15351_v50 }
  0x8b   : > { %13248 = vmatmul.mubr.msk.bf16.gmra.mrb[52].mxu0 %vm479_vm0, %v15365_v55 }
  0x8c   : > { %13288 = vmatmul.mubr.msk.bf16.gmra.mrb[52].mxu1 %vm479_vm0, %v15365_v55  ;;  %13251 = vmatprep.mubr.msk.bf16.mxu0 %vm479_vm0, %v15367_v56 }
  0x8d   : > { %13291 = vmatprep.mubr.msk.bf16.mxu1 %vm479_vm0, %v15367_v56 }
  0x93   : > { %13252 = vmatmul.mubr.msk.bf16.gmra.mrb[56].mxu0 %vm479_vm0, %v15381_v61 }
  0x94   : > { %13292 = vmatmul.mubr.msk.bf16.gmra.mrb[56].mxu1 %vm479_vm0, %v15381_v61  ;;  %13255 = vmatprep.mubr.msk.bf16.mxu0 %vm479_vm0, %v15383_v62 }
  0x95   : > { %13295 = vmatprep.mubr.msk.bf16.mxu1 %vm479_vm0, %v15383_v62 }
  0x9b   : > { %13256 = vmatmul.mubr.msk.bf16.gmra.mrb[60].mxu0 %vm479_vm0, %v15395_v1 }
  0x9c   : > { %13296 = vmatmul.mubr.msk.bf16.gmra.mrb[60].mxu1 %vm479_vm0, %v15395_v1  ;;  %13307 = vmatprep.mubr.msk.bf16.mxu0 %vm479_vm0, %v15242_v10 }
  0x9d   : > { %13347 = vmatprep.mubr.msk.bf16.mxu1 %vm479_vm0, %v15242_v10 }
  0xa3   : > { %13308 = vmatmul.mubr.msk.bf16.vlgmr.msra.gmra.mrb[64].mxu0 %vm479_vm0, %v15258_v17 }
  0xa4   : > { %13348 = vmatmul.mubr.msk.bf16.vlgmr.msra.gmra.mrb[64].mxu1 %vm479_vm0, %v15258_v17  ;;  %13380 = vmatpush3.bf16.msra.mxu0 %v14251_v8 }
  0xa5   : > { %13420 = vmatpush3.bf16.msra.mxu1 %v14252_v9  ;;  %13311 = vmatprep.mubr.msk.bf16.mxu0 %vm479_vm0, %v15260_v18 }
  0xa6   : > { %13351 = vmatprep.mubr.msk.bf16.mxu1 %vm479_vm0, %v15260_v18  ;;  %13381 = vmatprep.subr.bf16.mxu0 %v14253_v11 }
  0xa7   : > { %13421 = vmatprep.subr.bf16.mxu1 %v14254_v12 }
  0xa8   : > { %13382 = vmatpush3.bf16.msra.mxu0 %v14253_v11 }
  0xa9   : > { %13422 = vmatpush3.bf16.msra.mxu1 %v14254_v12  ;;  %13383 = vmatprep.subr.bf16.mxu0 %v14255_v13 }
  0xaa   : > { %13423 = vmatprep.subr.bf16.mxu1 %v14256_v14 }
  0xab   : > { %13312 = vmatmul.mubr.msk.bf16.gmra.mrb[68].mxu0 %vm479_vm0, %v15286_v27 }
  0xac   : > { %13352 = vmatmul.mubr.msk.bf16.gmra.mrb[68].mxu1 %vm479_vm0, %v15286_v27  ;;  %13315 = vmatprep.mubr.msk.bf16.mxu0 %vm479_vm0, %v15288_v28 }
  0xad   : > { %13355 = vmatprep.mubr.msk.bf16.mxu1 %vm479_vm0, %v15288_v28  ;;  %13384 = vmatpush3.bf16.msra.mxu0 %v14255_v13 }
  0xae   : > { %13424 = vmatpush3.bf16.msra.mxu1 %v14256_v14  ;;  %13385 = vmatprep.subr.bf16.mxu0 %v14257_v15 }
  0xaf   : > { %13425 = vmatprep.subr.bf16.mxu1 %v14258_v16 }
  0xb1   : > { %13386 = vmatpush3.bf16.msra.mxu0 %v14257_v15 }
  0xb2   : > { %13426 = vmatpush3.bf16.msra.mxu1 %v14258_v16  ;;  %13459 = vmatprep.subr.bf16.mxu0 %v14259_v19 }
  0xb3   : > { %13316 = vmatmul.mubr.msk.bf16.gmra.mrb[72].mxu0 %vm479_vm0, %v15313_v36  ;;  %13499 = vmatprep.subr.bf16.mxu1 %v14260_v20 }
  0xb4   : > { %13356 = vmatmul.mubr.msk.bf16.gmra.mrb[72].mxu1 %vm479_vm0, %v15313_v36  ;;  %13319 = vmatprep.mubr.msk.bf16.mxu0 %vm479_vm0, %v15318_v38 }
  0xb5   : > { %13359 = vmatprep.mubr.msk.bf16.mxu1 %vm479_vm0, %v15318_v38 }
  0xbb   : > { %13320 = vmatmul.mubr.msk.bf16.gmra.mrb[76].mxu0 %vm479_vm0, %v15333_v43 }
  0xbc   : > { %13360 = vmatmul.mubr.msk.bf16.gmra.mrb[76].mxu1 %vm479_vm0, %v15333_v43  ;;  %13323 = vmatprep.mubr.msk.bf16.mxu0 %vm479_vm0, %v15335_v44 }
  0xbd   : > { %13363 = vmatprep.mubr.msk.bf16.mxu1 %vm479_vm0, %v15335_v44 }
  0xc3   : > { %13324 = vmatmul.mubr.msk.bf16.gmra.mrb[80].mxu0 %vm479_vm0, %v15349_v49 }
  0xc4   : > { %13364 = vmatmul.mubr.msk.bf16.gmra.mrb[80].mxu1 %vm479_vm0, %v15349_v49  ;;  %13327 = vmatprep.mubr.msk.bf16.mxu0 %vm479_vm0, %v15351_v50 }
  0xc5   : > { %13367 = vmatprep.mubr.msk.bf16.mxu1 %vm479_vm0, %v15351_v50 }
  0xcb   : > { %13328 = vmatmul.mubr.msk.bf16.gmra.mrb[84].mxu0 %vm479_vm0, %v15365_v55 }
  0xcc   : > { %13368 = vmatmul.mubr.msk.bf16.gmra.mrb[84].mxu1 %vm479_vm0, %v15365_v55  ;;  %13331 = vmatprep.mubr.msk.bf16.mxu0 %vm479_vm0, %v15367_v56 }
  0xcd   : > { %13371 = vmatprep.mubr.msk.bf16.mxu1 %vm479_vm0, %v15367_v56 }
  0xd3   : > { %13332 = vmatmul.mubr.msk.bf16.gmra.mrb[88].mxu0 %vm479_vm0, %v15381_v61 }
  0xd4   : > { %13372 = vmatmul.mubr.msk.bf16.gmra.mrb[88].mxu1 %vm479_vm0, %v15381_v61  ;;  %13335 = vmatprep.mubr.msk.bf16.mxu0 %vm479_vm0, %v15383_v62 }
  0xd5   : > { %13375 = vmatprep.mubr.msk.bf16.mxu1 %vm479_vm0, %v15383_v62 }
  0xdb   : > { %13336 = vmatmul.mubr.msk.bf16.gmra.mrb[92].mxu0 %vm479_vm0, %v15395_v1 }
  0xdc   : > { %13376 = vmatmul.mubr.msk.bf16.gmra.mrb[92].mxu1 %vm479_vm0, %v15395_v1  ;;  %13387 = vmatprep.mubr.msk.bf16.mxu0 %vm479_vm0, %v15242_v10 }
  0xdd   : > { %13427 = vmatprep.mubr.msk.bf16.mxu1 %vm479_vm0, %v15242_v10 }
  0xe3   : > { %13388 = vmatmul.mubr.msk.bf16.vlgmr.msra.gmra.mrb[96].mxu0 %vm479_vm0, %v15258_v17 }
  0xe4   : > { %13428 = vmatmul.mubr.msk.bf16.vlgmr.msra.gmra.mrb[96].mxu1 %vm479_vm0, %v15258_v17  ;;  %13460 = vmatpush3.bf16.msra.mxu0 %v14259_v19 }
  0xe5   : > { %13500 = vmatpush3.bf16.msra.mxu1 %v14260_v20  ;;  %13391 = vmatprep.mubr.msk.bf16.mxu0 %vm479_vm0, %v15260_v18 }
  0xe6   : > { %13431 = vmatprep.mubr.msk.bf16.mxu1 %vm479_vm0, %v15260_v18  ;;  %13461 = vmatprep.subr.bf16.mxu0 %v14261_v21 }
  0xe7   : > { %13501 = vmatprep.subr.bf16.mxu1 %v14262_v22 }
  0xe8   : > { %13462 = vmatpush3.bf16.msra.mxu0 %v14261_v21 }
  0xe9   : > { %13502 = vmatpush3.bf16.msra.mxu1 %v14262_v22  ;;  %13463 = vmatprep.subr.bf16.mxu0 %v14263_v23 }
  0xea   : > { %13503 = vmatprep.subr.bf16.mxu1 %v14264_v24 }
  0xeb   : > { %13392 = vmatmul.mubr.msk.bf16.gmra.mrb[100].mxu0 %vm479_vm0, %v15286_v27 }
  0xec   : > { %13432 = vmatmul.mubr.msk.bf16.gmra.mrb[100].mxu1 %vm479_vm0, %v15286_v27  ;;  %13395 = vmatprep.mubr.msk.bf16.mxu0 %vm479_vm0, %v15288_v28 }
  0xed   : > { %13435 = vmatprep.mubr.msk.bf16.mxu1 %vm479_vm0, %v15288_v28  ;;  %13464 = vmatpush3.bf16.msra.mxu0 %v14263_v23 }
  0xee   : > { %13504 = vmatpush3.bf16.msra.mxu1 %v14264_v24  ;;  %13465 = vmatprep.subr.bf16.mxu0 %v14265_v25 }
  0xef   : > { %13505 = vmatprep.subr.bf16.mxu1 %v14266_v26 }
  0xf1   : > { %13466 = vmatpush3.bf16.msra.mxu0 %v14265_v25 }
  0xf2   : > { %13506 = vmatpush3.bf16.msra.mxu1 %v14266_v26  ;;  %13539 = vmatprep.subr.bf16.mxu0 %v15619_v29 }
  0xf3   : > { %13396 = vmatmul.mubr.msk.bf16.gmra.mrb[104].mxu0 %vm479_vm0, %v15313_v36  ;;  %13579 = vmatprep.subr.bf16.mxu1 %v15624_v30 }
  0xf4   : > { %13436 = vmatmul.mubr.msk.bf16.gmra.mrb[104].mxu1 %vm479_vm0, %v15313_v36  ;;  %13399 = vmatprep.mubr.msk.bf16.mxu0 %vm479_vm0, %v15318_v38 }
  0xf5   : > { %13439 = vmatprep.mubr.msk.bf16.mxu1 %vm479_vm0, %v15318_v38 }
  0xf6   : > { %v13149_v31 = vpop.f32.mrb[0].mxu0 }
  0xf7   : > { %v13189_v32 = vpop.f32.mrb[0].mxu1  ;;  %v562_v33 = vpop.f32.mrb[1].mxu0 }
  0xf8   : > { %v747_v34 = vpop.f32.mrb[1].mxu1  ;;  %v13150_v35 = vpop.f32.mrb[2].mxu0 }
  0xf9   : > { %v3529_v37 = vpack.c.bf16 %v13150_v35, %v13149_v31  ;;  %v13190_v39 = vpop.f32.mrb[2].mxu1  ;;  %v565_v40 = vpop.f32.mrb[3].mxu0 }
  0xfa   : > { %v3545_v41 = vpack.c.bf16 %v13190_v39, %v13189_v32  ;;  %v3528_v42 = vpack.c.bf16 %v565_v40, %v562_v33  ;;  %v750_v45 = vpop.f32.mrb[3].mxu1 }
  0xfb   : > { %3658 = vst.msk [vmem:[#allocation2 + $0x8] sm:$0xff] %vm3656_vm1, %v3529_v37  ;;  %v3544_v46 = vpack.c.bf16 %v750_v45, %v747_v34  ;;  %13400 = vmatmul.mubr.msk.bf16.gmra.mrb[108].mxu0 %vm479_vm0, %v15333_v43 }
  0xfc   : > { %3674 = vst.msk [vmem:[#allocation2 + $0x88] sm:$0xff] %vm3656_vm1, %v3545_v41  ;;  %3657 = vst.msk [vmem:[#allocation2] sm:$0xff] %vm3656_vm1, %v3528_v42  ;;  %13440 = vmatmul.mubr.msk.bf16.gmra.mrb[108].mxu1 %vm479_vm0, %v15333_v43  ;;  %13403 = vmatprep.mubr.msk.bf16.mxu0 %vm479_vm0, %v15335_v44 }
  0xfd   : > { %3673 = vst.msk [vmem:[#allocation2 + $0x80] sm:$0xff] %vm3656_vm1, %v3544_v46  ;;  %13443 = vmatprep.mubr.msk.bf16.mxu1 %vm479_vm0, %v15335_v44 }
  0xfe   : > { %v13153_v47 = vpop.f32.mrb[4].mxu0 }
  0xff   : > { %v13193_v48 = vpop.f32.mrb[4].mxu1  ;;  %v578_v51 = vpop.f32.mrb[5].mxu0 }
 0x100   : > { %v763_v52 = vpop.f32.mrb[5].mxu1  ;;  %v13154_v53 = vpop.f32.mrb[6].mxu0 }
 0x101   : > { %v3531_v54 = vpack.c.bf16 %v13154_v53, %v13153_v47  ;;  %v13194_v57 = vpop.f32.mrb[6].mxu1  ;;  %v581_v58 = vpop.f32.mrb[7].mxu0 }
 0x102   : > { %v3547_v59 = vpack.c.bf16 %v13194_v57, %v13193_v48  ;;  %v3530_v60 = vpack.c.bf16 %v581_v58, %v578_v51  ;;  %v766_v63 = vpop.f32.mrb[7].mxu1 }
 0x103   : > { %3660 = vst.msk [vmem:[#allocation2 + $0x18] sm:$0xff] %vm3656_vm1, %v3531_v54  ;;  %v3546_v0 = vpack.c.bf16 %v766_v63, %v763_v52  ;;  %13404 = vmatmul.mubr.msk.bf16.gmra.mrb[112].mxu0 %vm479_vm0, %v15349_v49 }
 0x104   : > { %3676 = vst.msk [vmem:[#allocation2 + $0x98] sm:$0xff] %vm3656_vm1, %v3547_v59  ;;  %3659 = vst.msk [vmem:[#allocation2 + $0x10] sm:$0xff] %vm3656_vm1, %v3530_v60  ;;  %13444 = vmatmul.mubr.msk.bf16.gmra.mrb[112].mxu1 %vm479_vm0, %v15349_v49  ;;  %13407 = vmatprep.mubr.msk.bf16.mxu0 %vm479_vm0, %v15351_v50 }
 0x105   : > { %3675 = vst.msk [vmem:[#allocation2 + $0x90] sm:$0xff] %vm3656_vm1, %v3546_v0  ;;  %13447 = vmatprep.mubr.msk.bf16.mxu1 %vm479_vm0, %v15351_v50 }
 0x106   : > { %v13157_v2 = vpop.f32.mrb[8].mxu0 }
 0x107   : > { %v13197_v3 = vpop.f32.mrb[8].mxu1  ;;  %v594_v4 = vpop.f32.mrb[9].mxu0 }
 0x108   : > { %v779_v5 = vpop.f32.mrb[9].mxu1  ;;  %v13158_v6 = vpop.f32.mrb[10].mxu0 }
 0x109   : > { %v3533_v7 = vpack.c.bf16 %v13158_v6, %v13157_v2  ;;  %v13198_v8 = vpop.f32.mrb[10].mxu1  ;;  %v597_v9 = vpop.f32.mrb[11].mxu0  ;;  %v14271_v6 = vld [vmem:[%s20639_s4 + $0x50] sm:$0xff]  }
 0x10a   : > { %v3549_v11 = vpack.c.bf16 %v13198_v8, %v13197_v3  ;;  %v3532_v12 = vpack.c.bf16 %v597_v9, %v594_v4  ;;  %v782_v13 = vpop.f32.mrb[11].mxu1  ;;  %v14269_v3 = vld [vmem:[%s20639_s4 + $0x48] sm:$0xff]  }
 0x10b   : > { %3662 = vst.msk [vmem:[#allocation2 + $0x28] sm:$0xff] %vm3656_vm1, %v3533_v7  ;;  %v3548_v14 = vpack.c.bf16 %v782_v13, %v779_v5  ;;  %13408 = vmatmul.mubr.msk.bf16.gmra.mrb[116].mxu0 %vm479_vm0, %v15365_v55  ;;  %v14270_v5 = vld [vmem:[%s20639_s4 + $0x68] sm:$0xff]  }
 0x10c   : > { %3678 = vst.msk [vmem:[#allocation2 + $0xa8] sm:$0xff] %vm3656_vm1, %v3549_v11  ;;  %3661 = vst.msk [vmem:[#allocation2 + $0x20] sm:$0xff] %vm3656_vm1, %v3532_v12  ;;  %13448 = vmatmul.mubr.msk.bf16.gmra.mrb[116].mxu1 %vm479_vm0, %v15365_v55  ;;  %13411 = vmatprep.mubr.msk.bf16.mxu0 %vm479_vm0, %v15367_v56 }
 0x10d   : > { %3677 = vst.msk [vmem:[#allocation2 + $0xa0] sm:$0xff] %vm3656_vm1, %v3548_v14  ;;  %13451 = vmatprep.mubr.msk.bf16.mxu1 %vm479_vm0, %v15367_v56 }
 0x10e   : > { %v13161_v15 = vpop.f32.mrb[12].mxu0 }
 0x10f   : > { %v13201_v16 = vpop.f32.mrb[12].mxu1  ;;  %v610_v19 = vpop.f32.mrb[13].mxu0 }
 0x110   : > { %v795_v20 = vpop.f32.mrb[13].mxu1  ;;  %v13162_v21 = vpop.f32.mrb[14].mxu0 }
 0x111   : > { %v3535_v22 = vpack.c.bf16 %v13162_v21, %v13161_v15  ;;  %v13202_v23 = vpop.f32.mrb[14].mxu1  ;;  %v613_v24 = vpop.f32.mrb[15].mxu0 }
 0x112   : > { %v3551_v25 = vpack.c.bf16 %v13202_v23, %v13201_v16  ;;  %v3534_v26 = vpack.c.bf16 %v613_v24, %v610_v19  ;;  %v798_v31 = vpop.f32.mrb[15].mxu1  ;;  %v15743_v24 = vld [vmem:[%s20639_s4 + $0x80] sm:$0xff]  }
 0x113   : > { %3664 = vst.msk [vmem:[#allocation2 + $0x38] sm:$0xff] %vm3656_vm1, %v3535_v22  ;;  %v3550_v32 = vpack.c.bf16 %v798_v31, %v795_v20  ;;  %13412 = vmatmul.mubr.msk.bf16.gmra.mrb[120].mxu0 %vm479_vm0, %v15381_v61  ;;  %v14273_v20 = vld [vmem:[%s20639_s4 + $0x58] sm:$0xff]   ;;  %v15748_v31 = vld [vmem:[%s20639_s4 + $0xa0] sm:$0xff]  }
 0x114   : > { %3680 = vst.msk [vmem:[#allocation2 + $0xb8] sm:$0xff] %vm3656_vm1, %v3551_v25  ;;  %3663 = vst.msk [vmem:[#allocation2 + $0x30] sm:$0xff] %vm3656_vm1, %v3534_v26  ;;  %13452 = vmatmul.mubr.msk.bf16.gmra.mrb[120].mxu1 %vm479_vm0, %v15381_v61  ;;  %13415 = vmatprep.mubr.msk.bf16.mxu0 %vm479_vm0, %v15383_v62  ;;  %v14274_v22 = vld [vmem:[%s20639_s4 + $0x78] sm:$0xff]  }
 0x115   : > { %3679 = vst.msk [vmem:[#allocation2 + $0xb0] sm:$0xff] %vm3656_vm1, %v3550_v32  ;;  %13455 = vmatprep.mubr.msk.bf16.mxu1 %vm479_vm0, %v15383_v62 }
 0x116   : > { %v13165_v33 = vpop.f32.mrb[16].mxu0 }
 0x117   : > { %v13205_v34 = vpop.f32.mrb[16].mxu1  ;;  %v626_v35 = vpop.f32.mrb[17].mxu0 }
 0x118   : > { %v811_v37 = vpop.f32.mrb[17].mxu1  ;;  %v13166_v39 = vpop.f32.mrb[18].mxu0 }
 0x119   : > { %v3537_v40 = vpack.c.bf16 %v13166_v39, %v13165_v33  ;;  %v13206_v41 = vpop.f32.mrb[18].mxu1  ;;  %v629_v42 = vpop.f32.mrb[19].mxu0 }
 0x11a   : > { %v3553_v45 = vpack.c.bf16 %v13206_v41, %v13205_v34  ;;  %v3536_v46 = vpack.c.bf16 %v629_v42, %v626_v35  ;;  %v814_v47 = vpop.f32.mrb[19].mxu1 }
 0x11b   : > { %3666 = vst.msk [vmem:[#allocation2 + $0x48] sm:$0xff] %vm3656_vm1, %v3537_v40  ;;  %v3552_v48 = vpack.c.bf16 %v814_v47, %v811_v37  ;;  %13416 = vmatmul.mubr.msk.bf16.gmra.mrb[124].mxu0 %vm479_vm0, %v15395_v1 }
 0x11c   : > { %3682 = vst.msk [vmem:[#allocation2 + $0xc8] sm:$0xff] %vm3656_vm1, %v3553_v45  ;;  %3665 = vst.msk [vmem:[#allocation2 + $0x40] sm:$0xff] %vm3656_vm1, %v3536_v46  ;;  %13456 = vmatmul.mubr.msk.bf16.gmra.mrb[124].mxu1 %vm479_vm0, %v15395_v1  ;;  %13467 = vmatprep.mubr.msk.bf16.mxu0 %vm479_vm0, %v15242_v10 }
 0x11d   : > { %3681 = vst.msk [vmem:[#allocation2 + $0xc0] sm:$0xff] %vm3656_vm1, %v3552_v48  ;;  %13507 = vmatprep.mubr.msk.bf16.mxu1 %vm479_vm0, %v15242_v10 }
 0x11e   : > { %v13169_v51 = vpop.f32.mrb[20].mxu0 }
 0x11f   : > { %v13209_v52 = vpop.f32.mrb[20].mxu1  ;;  %v642_v53 = vpop.f32.mrb[21].mxu0 }
 0x120   : > { %v827_v54 = vpop.f32.mrb[21].mxu1  ;;  %v13170_v57 = vpop.f32.mrb[22].mxu0 }
 0x121   : > { %v3539_v58 = vpack.c.bf16 %v13170_v57, %v13169_v51  ;;  %v13210_v59 = vpop.f32.mrb[22].mxu1  ;;  %v645_v60 = vpop.f32.mrb[23].mxu0 }
 0x122   : > { %v3555_v63 = vpack.c.bf16 %v13210_v59, %v13209_v52  ;;  %v3538_v0 = vpack.c.bf16 %v645_v60, %v642_v53  ;;  %v830_v2 = vpop.f32.mrb[23].mxu1 }
 0x123   : > { %3668 = vst.msk [vmem:[#allocation2 + $0x58] sm:$0xff] %vm3656_vm1, %v3539_v58  ;;  %v3554_v4 = vpack.c.bf16 %v830_v2, %v827_v54  ;;  %13468 = vmatmul.mubr.msk.bf16.vlgmr.msra.gmra.mrb[128].mxu0 %vm479_vm0, %v15258_v17 }
 0x124   : > { %3684 = vst.msk [vmem:[#allocation2 + $0xd8] sm:$0xff] %vm3656_vm1, %v3555_v63  ;;  %3667 = vst.msk [vmem:[#allocation2 + $0x50] sm:$0xff] %vm3656_vm1, %v3538_v0  ;;  %13508 = vmatmul.mubr.msk.bf16.vlgmr.msra.gmra.mrb[128].mxu1 %vm479_vm0, %v15258_v17  ;;  %13540 = vmatpush3.bf16.msra.mxu0 %v15619_v29  ;;  %v14272_v29 = vld [vmem:[%s20639_s4 + $0x70] sm:$0xff]  }
 0x125   : > { %3683 = vst.msk [vmem:[#allocation2 + $0xd0] sm:$0xff] %vm3656_vm1, %v3554_v4  ;;  %13580 = vmatpush3.bf16.msra.mxu1 %v15624_v30  ;;  %13471 = vmatprep.mubr.msk.bf16.mxu0 %vm479_vm0, %v15260_v18 }
 0x126   : > { %v13173_v7 = vpop.f32.mrb[24].mxu0  ;;  %13511 = vmatprep.mubr.msk.bf16.mxu1 %vm479_vm0, %v15260_v18  ;;  %13541 = vmatprep.subr.bf16.mxu0 %v14269_v3 }
 0x127   : > { %v13213_v8 = vpop.f32.mrb[24].mxu1  ;;  %v658_v9 = vpop.f32.mrb[25].mxu0  ;;  %13581 = vmatprep.subr.bf16.mxu1 %v14270_v5 }
 0x128   : > { %v843_v30 = vpop.f32.mrb[25].mxu1  ;;  %v13174_v11 = vpop.f32.mrb[26].mxu0  ;;  %13542 = vmatpush3.bf16.msra.mxu0 %v14269_v3 }
 0x129   : > { %v3541_v12 = vpack.c.bf16 %v13174_v11, %v13173_v7  ;;  %v13214_v13 = vpop.f32.mrb[26].mxu1  ;;  %v661_v14 = vpop.f32.mrb[27].mxu0  ;;  %13582 = vmatpush3.bf16.msra.mxu1 %v14270_v5  ;;  %13543 = vmatprep.subr.bf16.mxu0 %v14271_v6 }
 0x12a   : > { %v3557_v15 = vpack.c.bf16 %v13214_v13, %v13213_v8  ;;  %v3540_v16 = vpack.c.bf16 %v661_v14, %v658_v9  ;;  %v846_v19 = vpop.f32.mrb[27].mxu1  ;;  %13583 = vmatprep.subr.bf16.mxu1 %v14272_v29 }
 0x12b   : > { %3670 = vst.msk [vmem:[#allocation2 + $0x68] sm:$0xff] %vm3656_vm1, %v3541_v12  ;;  %v3556_v21 = vpack.c.bf16 %v846_v19, %v843_v30  ;;  %13472 = vmatmul.mubr.msk.bf16.gmra.mrb[132].mxu0 %vm479_vm0, %v15286_v27 }
 0x12c   : > { %3686 = vst.msk [vmem:[#allocation2 + $0xe8] sm:$0xff] %vm3656_vm1, %v3557_v15  ;;  %3669 = vst.msk [vmem:[#allocation2 + $0x60] sm:$0xff] %vm3656_vm1, %v3540_v16  ;;  %13512 = vmatmul.mubr.msk.bf16.gmra.mrb[132].mxu1 %vm479_vm0, %v15286_v27  ;;  %13475 = vmatprep.mubr.msk.bf16.mxu0 %vm479_vm0, %v15288_v28 }
 0x12d   : > { %3685 = vst.msk [vmem:[#allocation2 + $0xe0] sm:$0xff] %vm3656_vm1, %v3556_v21  ;;  %13515 = vmatprep.mubr.msk.bf16.mxu1 %vm479_vm0, %v15288_v28  ;;  %13544 = vmatpush3.bf16.msra.mxu0 %v14271_v6 }
 0x12e   : > { %v13177_v23 = vpop.f32.mrb[28].mxu0  ;;  %13584 = vmatpush3.bf16.msra.mxu1 %v14272_v29  ;;  %13545 = vmatprep.subr.bf16.mxu0 %v14273_v20 }
 0x12f   : > { %v13217_v25 = vpop.f32.mrb[28].mxu1  ;;  %v674_v26 = vpop.f32.mrb[29].mxu0  ;;  %13585 = vmatprep.subr.bf16.mxu1 %v14274_v22 }
 0x130   : > { %v859_v32 = vpop.f32.mrb[29].mxu1  ;;  %v13178_v33 = vpop.f32.mrb[30].mxu0 }
 0x131   : > { %v3543_v34 = vpack.c.bf16 %v13178_v33, %v13177_v23  ;;  %v13218_v35 = vpop.f32.mrb[30].mxu1  ;;  %v677_v37 = vpop.f32.mrb[31].mxu0  ;;  %13546 = vmatpush3.bf16.msra.mxu0 %v14273_v20 }
 0x132   : > { %v3559_v39 = vpack.c.bf16 %v13218_v35, %v13217_v25  ;;  %v3542_v40 = vpack.c.bf16 %v677_v37, %v674_v26  ;;  %v862_v41 = vpop.f32.mrb[31].mxu1  ;;  %13586 = vmatpush3.bf16.msra.mxu1 %v14274_v22  ;;  %13619 = vmatprep.subr.bf16.mxu0 %v15743_v24 }
 0x133   : > { %3672 = vst.msk [vmem:[#allocation2 + $0x78] sm:$0xff] %vm3656_vm1, %v3543_v34  ;;  %v3558_v42 = vpack.c.bf16 %v862_v41, %v859_v32  ;;  %13476 = vmatmul.mubr.msk.bf16.gmra.mrb[136].mxu0 %vm479_vm0, %v15313_v36  ;;  %13659 = vmatprep.subr.bf16.mxu1 %v15748_v31 }
 0x134   : > { %3688 = vst.msk [vmem:[#allocation2 + $0xf8] sm:$0xff] %vm3656_vm1, %v3559_v39  ;;  %3671 = vst.msk [vmem:[#allocation2 + $0x70] sm:$0xff] %vm3656_vm1, %v3542_v40  ;;  %13516 = vmatmul.mubr.msk.bf16.gmra.mrb[136].mxu1 %vm479_vm0, %v15313_v36  ;;  %13479 = vmatprep.mubr.msk.bf16.mxu0 %vm479_vm0, %v15318_v38 }
 0x135   : > { %3687 = vst.msk [vmem:[#allocation2 + $0xf0] sm:$0xff] %vm3656_vm1, %v3558_v42  ;;  %13519 = vmatprep.mubr.msk.bf16.mxu1 %vm479_vm0, %v15318_v38 }
 0x136   : > { %v13229_v45 = vpop.f32.mrb[32].mxu0 }
 0x137   : > { %v13269_v46 = vpop.f32.mrb[32].mxu1  ;;  %v932_v47 = vpop.f32.mrb[33].mxu0 }
 0x138   : > { %v1117_v48 = vpop.f32.mrb[33].mxu1  ;;  %v13230_v51 = vpop.f32.mrb[34].mxu0 }
 0x139   : > { %v3561_v52 = vpack.c.bf16 %v13230_v51, %v13229_v45  ;;  %v13270_v53 = vpop.f32.mrb[34].mxu1  ;;  %v935_v54 = vpop.f32.mrb[35].mxu0 }
 0x13a   : > { %v3577_v57 = vpack.c.bf16 %v13270_v53, %v13269_v46  ;;  %v3560_v58 = vpack.c.bf16 %v935_v54, %v932_v47  ;;  %v1120_v59 = vpop.f32.mrb[35].mxu1 }
 0x13b   : > { %3690 = vst.msk [vmem:[#allocation2 + $0x108] sm:$0xff] %vm3656_vm1, %v3561_v52  ;;  %v3576_v60 = vpack.c.bf16 %v1120_v59, %v1117_v48  ;;  %13480 = vmatmul.mubr.msk.bf16.gmra.mrb[140].mxu0 %vm479_vm0, %v15333_v43 }
 0x13c   : > { %3706 = vst.msk [vmem:[#allocation2 + $0x188] sm:$0xff] %vm3656_vm1, %v3577_v57  ;;  %3689 = vst.msk [vmem:[#allocation2 + $0x100] sm:$0xff] %vm3656_vm1, %v3560_v58  ;;  %13520 = vmatmul.mubr.msk.bf16.gmra.mrb[140].mxu1 %vm479_vm0, %v15333_v43  ;;  %13483 = vmatprep.mubr.msk.bf16.mxu0 %vm479_vm0, %v15335_v44 }
 0x13d   : > { %3705 = vst.msk [vmem:[#allocation2 + $0x180] sm:$0xff] %vm3656_vm1, %v3576_v60  ;;  %13523 = vmatprep.mubr.msk.bf16.mxu1 %vm479_vm0, %v15335_v44 }
 0x13e   : > { %v13233_v63 = vpop.f32.mrb[36].mxu0 }
 0x13f   : > { %v13273_v0 = vpop.f32.mrb[36].mxu1  ;;  %v948_v2 = vpop.f32.mrb[37].mxu0 }
 0x140   : > { %v1133_v3 = vpop.f32.mrb[37].mxu1  ;;  %v13234_v4 = vpop.f32.mrb[38].mxu0 }
 0x141   : > { %v3563_v5 = vpack.c.bf16 %v13234_v4, %v13233_v63  ;;  %v13274_v6 = vpop.f32.mrb[38].mxu1  ;;  %v951_v7 = vpop.f32.mrb[39].mxu0 }
 0x142   : > { %v3579_v29 = vpack.c.bf16 %v13274_v6, %v13273_v0  ;;  %v3562_v8 = vpack.c.bf16 %v951_v7, %v948_v2  ;;  %v1136_v9 = vpop.f32.mrb[39].mxu1 }
 0x143   : > { %3692 = vst.msk [vmem:[#allocation2 + $0x118] sm:$0xff] %vm3656_vm1, %v3563_v5  ;;  %v3578_v30 = vpack.c.bf16 %v1136_v9, %v1133_v3  ;;  %13484 = vmatmul.mubr.msk.bf16.gmra.mrb[144].mxu0 %vm479_vm0, %v15349_v49 }
 0x144   : > { %3708 = vst.msk [vmem:[#allocation2 + $0x198] sm:$0xff] %vm3656_vm1, %v3579_v29  ;;  %3691 = vst.msk [vmem:[#allocation2 + $0x110] sm:$0xff] %vm3656_vm1, %v3562_v8  ;;  %13524 = vmatmul.mubr.msk.bf16.gmra.mrb[144].mxu1 %vm479_vm0, %v15349_v49  ;;  %13487 = vmatprep.mubr.msk.bf16.mxu0 %vm479_vm0, %v15351_v50 }
 0x145   : > { %3707 = vst.msk [vmem:[#allocation2 + $0x190] sm:$0xff] %vm3656_vm1, %v3578_v30  ;;  %13527 = vmatprep.mubr.msk.bf16.mxu1 %vm479_vm0, %v15351_v50 }
 0x146   : > { %v13237_v11 = vpop.f32.mrb[40].mxu0 }
 0x147   : > { %v13277_v12 = vpop.f32.mrb[40].mxu1  ;;  %v964_v13 = vpop.f32.mrb[41].mxu0 }
 0x148   : > { %v1149_v14 = vpop.f32.mrb[41].mxu1  ;;  %v13238_v15 = vpop.f32.mrb[42].mxu0 }
 0x149   : > { %v3565_v16 = vpack.c.bf16 %v13238_v15, %v13237_v11  ;;  %v13278_v19 = vpop.f32.mrb[42].mxu1  ;;  %v967_v20 = vpop.f32.mrb[43].mxu0  ;;  %v14279_v15 = vld [vmem:[%s20639_s4 + $0x90] sm:$0xff]  }
 0x14a   : > { %v3581_v21 = vpack.c.bf16 %v13278_v19, %v13277_v12  ;;  %v3564_v22 = vpack.c.bf16 %v967_v20, %v964_v13  ;;  %v1152_v23 = vpop.f32.mrb[43].mxu1  ;;  %v14277_v12 = vld [vmem:[%s20639_s4 + $0x88] sm:$0xff]  }
 0x14b   : > { %3694 = vst.msk [vmem:[#allocation2 + $0x128] sm:$0xff] %vm3656_vm1, %v3565_v16  ;;  %v3580_v25 = vpack.c.bf16 %v1152_v23, %v1149_v14  ;;  %13488 = vmatmul.mubr.msk.bf16.gmra.mrb[148].mxu0 %vm479_vm0, %v15365_v55  ;;  %v14278_v14 = vld [vmem:[%s20639_s4 + $0xa8] sm:$0xff]  }
 0x14c   : > { %3710 = vst.msk [vmem:[#allocation2 + $0x1a8] sm:$0xff] %vm3656_vm1, %v3581_v21  ;;  %3693 = vst.msk [vmem:[#allocation2 + $0x120] sm:$0xff] %vm3656_vm1, %v3564_v22  ;;  %13528 = vmatmul.mubr.msk.bf16.gmra.mrb[148].mxu1 %vm479_vm0, %v15365_v55  ;;  %13491 = vmatprep.mubr.msk.bf16.mxu0 %vm479_vm0, %v15367_v56 }
 0x14d   : > { %3709 = vst.msk [vmem:[#allocation2 + $0x1a0] sm:$0xff] %vm3656_vm1, %v3580_v25  ;;  %13531 = vmatprep.mubr.msk.bf16.mxu1 %vm479_vm0, %v15367_v56 }
 0x14e   : > { %v13241_v26 = vpop.f32.mrb[44].mxu0 }
 0x14f   : > { %v13281_v32 = vpop.f32.mrb[44].mxu1  ;;  %v980_v33 = vpop.f32.mrb[45].mxu0 }
 0x150   : > { %v1165_v34 = vpop.f32.mrb[45].mxu1  ;;  %v13242_v35 = vpop.f32.mrb[46].mxu0 }
 0x151   : > { %v3567_v37 = vpack.c.bf16 %v13242_v35, %v13241_v26  ;;  %v13282_v39 = vpop.f32.mrb[46].mxu1  ;;  %v983_v40 = vpop.f32.mrb[47].mxu0 }
 0x152   : > { %v3583_v41 = vpack.c.bf16 %v13282_v39, %v13281_v32  ;;  %v3566_v42 = vpack.c.bf16 %v983_v40, %v980_v33  ;;  %v1168_v45 = vpop.f32.mrb[47].mxu1  ;;  %v15871_v40 = vld [vmem:[%s20639_s4 + $0xc0] sm:$0xff]  }
 0x153   : > { %3696 = vst.msk [vmem:[#allocation2 + $0x138] sm:$0xff] %vm3656_vm1, %v3567_v37  ;;  %v3582_v46 = vpack.c.bf16 %v1168_v45, %v1165_v34  ;;  %13492 = vmatmul.mubr.msk.bf16.gmra.mrb[152].mxu0 %vm479_vm0, %v15381_v61  ;;  %v14281_v34 = vld [vmem:[%s20639_s4 + $0x98] sm:$0xff]   ;;  %v15876_v45 = vld [vmem:[%s20639_s4 + $0xe0] sm:$0xff]  }
 0x154   : > { %3712 = vst.msk [vmem:[#allocation2 + $0x1b8] sm:$0xff] %vm3656_vm1, %v3583_v41  ;;  %3695 = vst.msk [vmem:[#allocation2 + $0x130] sm:$0xff] %vm3656_vm1, %v3566_v42  ;;  %13532 = vmatmul.mubr.msk.bf16.gmra.mrb[152].mxu1 %vm479_vm0, %v15381_v61  ;;  %13495 = vmatprep.mubr.msk.bf16.mxu0 %vm479_vm0, %v15383_v62  ;;  %v14282_v37 = vld [vmem:[%s20639_s4 + $0xb8] sm:$0xff]  }
 0x155   : > { %3711 = vst.msk [vmem:[#allocation2 + $0x1b0] sm:$0xff] %vm3656_vm1, %v3582_v46  ;;  %13535 = vmatprep.mubr.msk.bf16.mxu1 %vm479_vm0, %v15383_v62 }
 0x156   : > { %v13245_v47 = vpop.f32.mrb[48].mxu0 }
 0x157   : > { %v13285_v48 = vpop.f32.mrb[48].mxu1  ;;  %v996_v51 = vpop.f32.mrb[49].mxu0 }
 0x158   : > { %v1181_v52 = vpop.f32.mrb[49].mxu1  ;;  %v13246_v53 = vpop.f32.mrb[50].mxu0 }
 0x159   : > { %v3569_v54 = vpack.c.bf16 %v13246_v53, %v13245_v47  ;;  %v13286_v57 = vpop.f32.mrb[50].mxu1  ;;  %v999_v58 = vpop.f32.mrb[51].mxu0 }
 0x15a   : > { %v3585_v59 = vpack.c.bf16 %v13286_v57, %v13285_v48  ;;  %v3568_v60 = vpack.c.bf16 %v999_v58, %v996_v51  ;;  %v1184_v63 = vpop.f32.mrb[51].mxu1 }
 0x15b   : > { %3698 = vst.msk [vmem:[#allocation2 + $0x148] sm:$0xff] %vm3656_vm1, %v3569_v54  ;;  %v3584_v0 = vpack.c.bf16 %v1184_v63, %v1181_v52  ;;  %13496 = vmatmul.mubr.msk.bf16.gmra.mrb[156].mxu0 %vm479_vm0, %v15395_v1 }
 0x15c   : > { %3714 = vst.msk [vmem:[#allocation2 + $0x1c8] sm:$0xff] %vm3656_vm1, %v3585_v59  ;;  %3697 = vst.msk [vmem:[#allocation2 + $0x140] sm:$0xff] %vm3656_vm1, %v3568_v60  ;;  %13536 = vmatmul.mubr.msk.bf16.gmra.mrb[156].mxu1 %vm479_vm0, %v15395_v1  ;;  %13547 = vmatprep.mubr.msk.bf16.mxu0 %vm479_vm0, %v15242_v10 }
 0x15d   : > { %3713 = vst.msk [vmem:[#allocation2 + $0x1c0] sm:$0xff] %vm3656_vm1, %v3584_v0  ;;  %13587 = vmatprep.mubr.msk.bf16.mxu1 %vm479_vm0, %v15242_v10 }
 0x15e   : > { %v13249_v2 = vpop.f32.mrb[52].mxu0 }
 0x15f   : > { %v13289_v3 = vpop.f32.mrb[52].mxu1  ;;  %v1012_v4 = vpop.f32.mrb[53].mxu0 }
 0x160   : > { %v1197_v5 = vpop.f32.mrb[53].mxu1  ;;  %v13250_v6 = vpop.f32.mrb[54].mxu0 }
 0x161   : > { %v3571_v7 = vpack.c.bf16 %v13250_v6, %v13249_v2  ;;  %v13290_v29 = vpop.f32.mrb[54].mxu1  ;;  %v1015_v8 = vpop.f32.mrb[55].mxu0 }
 0x162   : > { %v3587_v9 = vpack.c.bf16 %v13290_v29, %v13289_v3  ;;  %v3570_v30 = vpack.c.bf16 %v1015_v8, %v1012_v4  ;;  %v1200_v11 = vpop.f32.mrb[55].mxu1 }
 0x163   : > { %3700 = vst.msk [vmem:[#allocation2 + $0x158] sm:$0xff] %vm3656_vm1, %v3571_v7  ;;  %v3586_v13 = vpack.c.bf16 %v1200_v11, %v1197_v5  ;;  %13548 = vmatmul.mubr.msk.bf16.vlgmr.msra.gmra.mrb[160].mxu0 %vm479_vm0, %v15258_v17 }
 0x164   : > { %3716 = vst.msk [vmem:[#allocation2 + $0x1d8] sm:$0xff] %vm3656_vm1, %v3587_v9  ;;  %3699 = vst.msk [vmem:[#allocation2 + $0x150] sm:$0xff] %vm3656_vm1, %v3570_v30  ;;  %13588 = vmatmul.mubr.msk.bf16.vlgmr.msra.gmra.mrb[160].mxu1 %vm479_vm0, %v15258_v17  ;;  %13620 = vmatpush3.bf16.msra.mxu0 %v15743_v24  ;;  %v14280_v24 = vld [vmem:[%s20639_s4 + $0xb0] sm:$0xff]  }
 0x165   : > { %3715 = vst.msk [vmem:[#allocation2 + $0x1d0] sm:$0xff] %vm3656_vm1, %v3586_v13  ;;  %13660 = vmatpush3.bf16.msra.mxu1 %v15748_v31  ;;  %13551 = vmatprep.mubr.msk.bf16.mxu0 %vm479_vm0, %v15260_v18 }
 0x166   : > { %v13253_v16 = vpop.f32.mrb[56].mxu0  ;;  %13591 = vmatprep.mubr.msk.bf16.mxu1 %vm479_vm0, %v15260_v18  ;;  %13621 = vmatprep.subr.bf16.mxu0 %v14277_v12 }
 0x167   : > { %v13293_v19 = vpop.f32.mrb[56].mxu1  ;;  %v1028_v20 = vpop.f32.mrb[57].mxu0  ;;  %13661 = vmatprep.subr.bf16.mxu1 %v14278_v14 }
 0x168   : > { %v1213_v31 = vpop.f32.mrb[57].mxu1  ;;  %v13254_v21 = vpop.f32.mrb[58].mxu0  ;;  %13622 = vmatpush3.bf16.msra.mxu0 %v14277_v12 }
 0x169   : > { %v3573_v22 = vpack.c.bf16 %v13254_v21, %v13253_v16  ;;  %v13294_v23 = vpop.f32.mrb[58].mxu1  ;;  %v1031_v25 = vpop.f32.mrb[59].mxu0  ;;  %13662 = vmatpush3.bf16.msra.mxu1 %v14278_v14  ;;  %13623 = vmatprep.subr.bf16.mxu0 %v14279_v15 }
 0x16a   : > { %v3589_v26 = vpack.c.bf16 %v13294_v23, %v13293_v19  ;;  %v3572_v32 = vpack.c.bf16 %v1031_v25, %v1028_v20  ;;  %v1216_v33 = vpop.f32.mrb[59].mxu1  ;;  %13663 = vmatprep.subr.bf16.mxu1 %v14280_v24 }
 0x16b   : > { %3702 = vst.msk [vmem:[#allocation2 + $0x168] sm:$0xff] %vm3656_vm1, %v3573_v22  ;;  %v3588_v35 = vpack.c.bf16 %v1216_v33, %v1213_v31  ;;  %13552 = vmatmul.mubr.msk.bf16.gmra.mrb[164].mxu0 %vm479_vm0, %v15286_v27 }
 0x16c   : > { %3718 = vst.msk [vmem:[#allocation2 + $0x1e8] sm:$0xff] %vm3656_vm1, %v3589_v26  ;;  %3701 = vst.msk [vmem:[#allocation2 + $0x160] sm:$0xff] %vm3656_vm1, %v3572_v32  ;;  %13592 = vmatmul.mubr.msk.bf16.gmra.mrb[164].mxu1 %vm479_vm0, %v15286_v27  ;;  %13555 = vmatprep.mubr.msk.bf16.mxu0 %vm479_vm0, %v15288_v28 }
 0x16d   : > { %3717 = vst.msk [vmem:[#allocation2 + $0x1e0] sm:$0xff] %vm3656_vm1, %v3588_v35  ;;  %13595 = vmatprep.mubr.msk.bf16.mxu1 %vm479_vm0, %v15288_v28  ;;  %13624 = vmatpush3.bf16.msra.mxu0 %v14279_v15 }
 0x16e   : > { %v13257_v39 = vpop.f32.mrb[60].mxu0  ;;  %13664 = vmatpush3.bf16.msra.mxu1 %v14280_v24  ;;  %13625 = vmatprep.subr.bf16.mxu0 %v14281_v34 }
 0x16f   : > { %v13297_v41 = vpop.f32.mrb[60].mxu1  ;;  %v1044_v42 = vpop.f32.mrb[61].mxu0  ;;  %13665 = vmatprep.subr.bf16.mxu1 %v14282_v37 }
 0x170   : > { %v1229_v46 = vpop.f32.mrb[61].mxu1  ;;  %v13258_v47 = vpop.f32.mrb[62].mxu0 }
 0x171   : > { %v3575_v48 = vpack.c.bf16 %v13258_v47, %v13257_v39  ;;  %v13298_v51 = vpop.f32.mrb[62].mxu1  ;;  %v1047_v52 = vpop.f32.mrb[63].mxu0  ;;  %13626 = vmatpush3.bf16.msra.mxu0 %v14281_v34 }
 0x172   : > { %v3591_v53 = vpack.c.bf16 %v13298_v51, %v13297_v41  ;;  %v3574_v54 = vpack.c.bf16 %v1047_v52, %v1044_v42  ;;  %v1232_v57 = vpop.f32.mrb[63].mxu1  ;;  %13666 = vmatpush3.bf16.msra.mxu1 %v14282_v37  ;;  %13699 = vmatprep.subr.bf16.mxu0 %v15871_v40 }
 0x173   : > { %3704 = vst.msk [vmem:[#allocation2 + $0x178] sm:$0xff] %vm3656_vm1, %v3575_v48  ;;  %v3590_v58 = vpack.c.bf16 %v1232_v57, %v1229_v46  ;;  %13556 = vmatmul.mubr.msk.bf16.gmra.mrb[168].mxu0 %vm479_vm0, %v15313_v36  ;;  %13739 = vmatprep.subr.bf16.mxu1 %v15876_v45 }
 0x174   : > { %3720 = vst.msk [vmem:[#allocation2 + $0x1f8] sm:$0xff] %vm3656_vm1, %v3591_v53  ;;  %3703 = vst.msk [vmem:[#allocation2 + $0x170] sm:$0xff] %vm3656_vm1, %v3574_v54  ;;  %13596 = vmatmul.mubr.msk.bf16.gmra.mrb[168].mxu1 %vm479_vm0, %v15313_v36  ;;  %13559 = vmatprep.mubr.msk.bf16.mxu0 %vm479_vm0, %v15318_v38 }
 0x175   : > { %3719 = vst.msk [vmem:[#allocation2 + $0x1f0] sm:$0xff] %vm3656_vm1, %v3590_v58  ;;  %13599 = vmatprep.mubr.msk.bf16.mxu1 %vm479_vm0, %v15318_v38 }
 0x176   : > { %v13309_v59 = vpop.f32.mrb[64].mxu0 }
 0x177   : > { %v13349_v60 = vpop.f32.mrb[64].mxu1  ;;  %v1302_v63 = vpop.f32.mrb[65].mxu0 }
 0x178   : > { %v1487_v0 = vpop.f32.mrb[65].mxu1  ;;  %v13310_v2 = vpop.f32.mrb[66].mxu0 }
 0x179   : > { %v3593_v3 = vpack.c.bf16 %v13310_v2, %v13309_v59  ;;  %v13350_v4 = vpop.f32.mrb[66].mxu1  ;;  %v1305_v5 = vpop.f32.mrb[67].mxu0 }
 0x17a   : > { %v3609_v6 = vpack.c.bf16 %v13350_v4, %v13349_v60  ;;  %v3592_v7 = vpack.c.bf16 %v1305_v5, %v1302_v63  ;;  %v1490_v29 = vpop.f32.mrb[67].mxu1 }
 0x17b   : > { %3722 = vst.msk [vmem:[#allocation2 + $0x208] sm:$0xff] %vm3656_vm1, %v3593_v3  ;;  %v3608_v8 = vpack.c.bf16 %v1490_v29, %v1487_v0  ;;  %13560 = vmatmul.mubr.msk.bf16.gmra.mrb[172].mxu0 %vm479_vm0, %v15333_v43 }
 0x17c   : > { %3738 = vst.msk [vmem:[#allocation2 + $0x288] sm:$0xff] %vm3656_vm1, %v3609_v6  ;;  %3721 = vst.msk [vmem:[#allocation2 + $0x200] sm:$0xff] %vm3656_vm1, %v3592_v7  ;;  %13600 = vmatmul.mubr.msk.bf16.gmra.mrb[172].mxu1 %vm479_vm0, %v15333_v43  ;;  %13563 = vmatprep.mubr.msk.bf16.mxu0 %vm479_vm0, %v15335_v44 }
 0x17d   : > { %3737 = vst.msk [vmem:[#allocation2 + $0x280] sm:$0xff] %vm3656_vm1, %v3608_v8  ;;  %13603 = vmatprep.mubr.msk.bf16.mxu1 %vm479_vm0, %v15335_v44 }
 0x17e   : > { %v13313_v9 = vpop.f32.mrb[68].mxu0 }
 0x17f   : > { %v13353_v30 = vpop.f32.mrb[68].mxu1  ;;  %v1318_v11 = vpop.f32.mrb[69].mxu0 }
 0x180   : > { %v1503_v12 = vpop.f32.mrb[69].mxu1  ;;  %v13314_v13 = vpop.f32.mrb[70].mxu0 }
 0x181   : > { %v3595_v14 = vpack.c.bf16 %v13314_v13, %v13313_v9  ;;  %v13354_v15 = vpop.f32.mrb[70].mxu1  ;;  %v1321_v16 = vpop.f32.mrb[71].mxu0 }
 0x182   : > { %v3611_v24 = vpack.c.bf16 %v13354_v15, %v13353_v30  ;;  %v3594_v19 = vpack.c.bf16 %v1321_v16, %v1318_v11  ;;  %v1506_v20 = vpop.f32.mrb[71].mxu1 }
 0x183   : > { %3724 = vst.msk [vmem:[#allocation2 + $0x218] sm:$0xff] %vm3656_vm1, %v3595_v14  ;;  %v3610_v31 = vpack.c.bf16 %v1506_v20, %v1503_v12  ;;  %13564 = vmatmul.mubr.msk.bf16.gmra.mrb[176].mxu0 %vm479_vm0, %v15349_v49 }
 0x184   : > { %3740 = vst.msk [vmem:[#allocation2 + $0x298] sm:$0xff] %vm3656_vm1, %v3611_v24  ;;  %3723 = vst.msk [vmem:[#allocation2 + $0x210] sm:$0xff] %vm3656_vm1, %v3594_v19  ;;  %13604 = vmatmul.mubr.msk.bf16.gmra.mrb[176].mxu1 %vm479_vm0, %v15349_v49  ;;  %13567 = vmatprep.mubr.msk.bf16.mxu0 %vm479_vm0, %v15351_v50 }
 0x185   : > { %3739 = vst.msk [vmem:[#allocation2 + $0x290] sm:$0xff] %vm3656_vm1, %v3610_v31  ;;  %13607 = vmatprep.mubr.msk.bf16.mxu1 %vm479_vm0, %v15351_v50 }
 0x186   : > { %v13317_v21 = vpop.f32.mrb[72].mxu0 }
 0x187   : > { %v13357_v22 = vpop.f32.mrb[72].mxu1  ;;  %v1334_v23 = vpop.f32.mrb[73].mxu0 }
 0x188   : > { %v1519_v25 = vpop.f32.mrb[73].mxu1  ;;  %v13318_v26 = vpop.f32.mrb[74].mxu0 }
 0x189   : > { %v3597_v32 = vpack.c.bf16 %v13318_v26, %v13317_v21  ;;  %v13358_v33 = vpop.f32.mrb[74].mxu1  ;;  %v1337_v34 = vpop.f32.mrb[75].mxu0  ;;  %v14287_v26 = vld [vmem:[%s20639_s4 + $0xd0] sm:$0xff]  }
 0x18a   : > { %v3613_v35 = vpack.c.bf16 %v13358_v33, %v13357_v22  ;;  %v3596_v37 = vpack.c.bf16 %v1337_v34, %v1334_v23  ;;  %v1522_v39 = vpop.f32.mrb[75].mxu1  ;;  %v14285_v22 = vld [vmem:[%s20639_s4 + $0xc8] sm:$0xff]  }
 0x18b   : > { %3726 = vst.msk [vmem:[#allocation2 + $0x228] sm:$0xff] %vm3656_vm1, %v3597_v32  ;;  %v3612_v41 = vpack.c.bf16 %v1522_v39, %v1519_v25  ;;  %13568 = vmatmul.mubr.msk.bf16.gmra.mrb[180].mxu0 %vm479_vm0, %v15365_v55  ;;  %v14286_v25 = vld [vmem:[%s20639_s4 + $0xe8] sm:$0xff]  }
 0x18c   : > { %3742 = vst.msk [vmem:[#allocation2 + $0x2a8] sm:$0xff] %vm3656_vm1, %v3613_v35  ;;  %3725 = vst.msk [vmem:[#allocation2 + $0x220] sm:$0xff] %vm3656_vm1, %v3596_v37  ;;  %13608 = vmatmul.mubr.msk.bf16.gmra.mrb[180].mxu1 %vm479_vm0, %v15365_v55  ;;  %13571 = vmatprep.mubr.msk.bf16.mxu0 %vm479_vm0, %v15367_v56 }
 0x18d   : > { %3741 = vst.msk [vmem:[#allocation2 + $0x2a0] sm:$0xff] %vm3656_vm1, %v3612_v41  ;;  %13611 = vmatprep.mubr.msk.bf16.mxu1 %vm479_vm0, %v15367_v56 }
 0x18e   : > { %v13321_v42 = vpop.f32.mrb[76].mxu0 }
 0x18f   : > { %v13361_v46 = vpop.f32.mrb[76].mxu1  ;;  %v1350_v47 = vpop.f32.mrb[77].mxu0 }
 0x190   : > { %v1535_v48 = vpop.f32.mrb[77].mxu1  ;;  %v13322_v51 = vpop.f32.mrb[78].mxu0 }
 0x191   : > { %v3599_v52 = vpack.c.bf16 %v13322_v51, %v13321_v42  ;;  %v13362_v53 = vpop.f32.mrb[78].mxu1  ;;  %v1353_v54 = vpop.f32.mrb[79].mxu0 }
 0x192   : > { %v3615_v57 = vpack.c.bf16 %v13362_v53, %v13361_v46  ;;  %v3598_v58 = vpack.c.bf16 %v1353_v54, %v1350_v47  ;;  %v1538_v59 = vpop.f32.mrb[79].mxu1 }
 0x193   : > { %3728 = vst.msk [vmem:[#allocation2 + $0x238] sm:$0xff] %vm3656_vm1, %v3599_v52  ;;  %v3614_v60 = vpack.c.bf16 %v1538_v59, %v1535_v48  ;;  %13572 = vmatmul.mubr.msk.bf16.gmra.mrb[184].mxu0 %vm479_vm0, %v15381_v61  ;;  %v14289_v48 = vld [vmem:[%s20639_s4 + $0xd8] sm:$0xff]  }
 0x194   : > { %3744 = vst.msk [vmem:[#allocation2 + $0x2b8] sm:$0xff] %vm3656_vm1, %v3615_v57  ;;  %3727 = vst.msk [vmem:[#allocation2 + $0x230] sm:$0xff] %vm3656_vm1, %v3598_v58  ;;  %13612 = vmatmul.mubr.msk.bf16.gmra.mrb[184].mxu1 %vm479_vm0, %v15381_v61  ;;  %13575 = vmatprep.mubr.msk.bf16.mxu0 %vm479_vm0, %v15383_v62  ;;  %v14290_v52 = vld [vmem:[%s20639_s4 + $0xf8] sm:$0xff]  }
 0x195   : > { %3743 = vst.msk [vmem:[#allocation2 + $0x2b0] sm:$0xff] %vm3656_vm1, %v3614_v60  ;;  %13615 = vmatprep.mubr.msk.bf16.mxu1 %vm479_vm0, %v15383_v62 }
 0x196   : > { %v13325_v63 = vpop.f32.mrb[80].mxu0 }
 0x197   : > { %v13365_v0 = vpop.f32.mrb[80].mxu1  ;;  %v1366_v2 = vpop.f32.mrb[81].mxu0 }
 0x198   : > { %v1551_v3 = vpop.f32.mrb[81].mxu1  ;;  %v13326_v4 = vpop.f32.mrb[82].mxu0 }
 0x199   : > { %v3601_v5 = vpack.c.bf16 %v13326_v4, %v13325_v63  ;;  %v13366_v6 = vpop.f32.mrb[82].mxu1  ;;  %v1369_v7 = vpop.f32.mrb[83].mxu0 }
 0x19a   : > { %v3617_v29 = vpack.c.bf16 %v13366_v6, %v13365_v0  ;;  %v3600_v8 = vpack.c.bf16 %v1369_v7, %v1366_v2  ;;  %v1554_v9 = vpop.f32.mrb[83].mxu1 }
 0x19b   : > { %3730 = vst.msk [vmem:[#allocation2 + $0x248] sm:$0xff] %vm3656_vm1, %v3601_v5  ;;  %v3616_v30 = vpack.c.bf16 %v1554_v9, %v1551_v3  ;;  %13576 = vmatmul.mubr.msk.bf16.gmra.mrb[188].mxu0 %vm479_vm0, %v15395_v1 }
 0x19c   : > { %3746 = vst.msk [vmem:[#allocation2 + $0x2c8] sm:$0xff] %vm3656_vm1, %v3617_v29  ;;  %3729 = vst.msk [vmem:[#allocation2 + $0x240] sm:$0xff] %vm3656_vm1, %v3600_v8  ;;  %13616 = vmatmul.mubr.msk.bf16.gmra.mrb[188].mxu1 %vm479_vm0, %v15395_v1  ;;  %13627 = vmatprep.mubr.msk.bf16.mxu0 %vm479_vm0, %v15242_v10 }
 0x19d   : > { %3745 = vst.msk [vmem:[#allocation2 + $0x2c0] sm:$0xff] %vm3656_vm1, %v3616_v30  ;;  %13667 = vmatprep.mubr.msk.bf16.mxu1 %vm479_vm0, %v15242_v10 }
 0x19e   : > { %v13329_v11 = vpop.f32.mrb[84].mxu0 }
 0x19f   : > { %v13369_v12 = vpop.f32.mrb[84].mxu1  ;;  %v1382_v13 = vpop.f32.mrb[85].mxu0 }
 0x1a0   : > { %v1567_v14 = vpop.f32.mrb[85].mxu1  ;;  %v13330_v15 = vpop.f32.mrb[86].mxu0 }
 0x1a1   : > { %v3603_v16 = vpack.c.bf16 %v13330_v15, %v13329_v11  ;;  %v13370_v24 = vpop.f32.mrb[86].mxu1  ;;  %v1385_v19 = vpop.f32.mrb[87].mxu0 }
 0x1a2   : > { %v3619_v20 = vpack.c.bf16 %v13370_v24, %v13369_v12  ;;  %v3602_v31 = vpack.c.bf16 %v1385_v19, %v1382_v13  ;;  %v1570_v21 = vpop.f32.mrb[87].mxu1 }
 0x1a3   : > { %3732 = vst.msk [vmem:[#allocation2 + $0x258] sm:$0xff] %vm3656_vm1, %v3603_v16  ;;  %v3618_v23 = vpack.c.bf16 %v1570_v21, %v1567_v14  ;;  %13628 = vmatmul.mubr.msk.bf16.vlgmr.msra.gmra.mrb[192].mxu0 %vm479_vm0, %v15258_v17 }
 0x1a4   : > { %3748 = vst.msk [vmem:[#allocation2 + $0x2d8] sm:$0xff] %vm3656_vm1, %v3619_v20  ;;  %3731 = vst.msk [vmem:[#allocation2 + $0x250] sm:$0xff] %vm3656_vm1, %v3602_v31  ;;  %13668 = vmatmul.mubr.msk.bf16.vlgmr.msra.gmra.mrb[192].mxu1 %vm479_vm0, %v15258_v17  ;;  %13700 = vmatpush3.bf16.msra.mxu0 %v15871_v40  ;;  %v14288_v40 = vld [vmem:[%s20639_s4 + $0xf0] sm:$0xff]  }
 0x1a5   : > { %3747 = vst.msk [vmem:[#allocation2 + $0x2d0] sm:$0xff] %vm3656_vm1, %v3618_v23  ;;  %13740 = vmatpush3.bf16.msra.mxu1 %v15876_v45  ;;  %13631 = vmatprep.mubr.msk.bf16.mxu0 %vm479_vm0, %v15260_v18 }
 0x1a6   : > { %v13333_v32 = vpop.f32.mrb[88].mxu0  ;;  %13671 = vmatprep.mubr.msk.bf16.mxu1 %vm479_vm0, %v15260_v18  ;;  %13701 = vmatprep.subr.bf16.mxu0 %v14285_v22 }
 0x1a7   : > { %v13373_v33 = vpop.f32.mrb[88].mxu1  ;;  %v1398_v34 = vpop.f32.mrb[89].mxu0  ;;  %13741 = vmatprep.subr.bf16.mxu1 %v14286_v25 }
 0x1a8   : > { %v1583_v45 = vpop.f32.mrb[89].mxu1  ;;  %v13334_v35 = vpop.f32.mrb[90].mxu0  ;;  %13702 = vmatpush3.bf16.msra.mxu0 %v14285_v22 }
 0x1a9   : > { %v3605_v37 = vpack.c.bf16 %v13334_v35, %v13333_v32  ;;  %v13374_v39 = vpop.f32.mrb[90].mxu1  ;;  %v1401_v41 = vpop.f32.mrb[91].mxu0  ;;  %13742 = vmatpush3.bf16.msra.mxu1 %v14286_v25  ;;  %13703 = vmatprep.subr.bf16.mxu0 %v14287_v26 }
 0x1aa   : > { %v3621_v42 = vpack.c.bf16 %v13374_v39, %v13373_v33  ;;  %v3604_v46 = vpack.c.bf16 %v1401_v41, %v1398_v34  ;;  %v1586_v47 = vpop.f32.mrb[91].mxu1  ;;  %13743 = vmatprep.subr.bf16.mxu1 %v14288_v40 }
 0x1ab   : > { %3734 = vst.msk [vmem:[#allocation2 + $0x268] sm:$0xff] %vm3656_vm1, %v3605_v37  ;;  %v3620_v51 = vpack.c.bf16 %v1586_v47, %v1583_v45  ;;  %13632 = vmatmul.mubr.msk.bf16.gmra.mrb[196].mxu0 %vm479_vm0, %v15286_v27 }
 0x1ac   : > { %3750 = vst.msk [vmem:[#allocation2 + $0x2e8] sm:$0xff] %vm3656_vm1, %v3621_v42  ;;  %3733 = vst.msk [vmem:[#allocation2 + $0x260] sm:$0xff] %vm3656_vm1, %v3604_v46  ;;  %13672 = vmatmul.mubr.msk.bf16.gmra.mrb[196].mxu1 %vm479_vm0, %v15286_v27  ;;  %13635 = vmatprep.mubr.msk.bf16.mxu0 %vm479_vm0, %v15288_v28 }
 0x1ad   : > { %3749 = vst.msk [vmem:[#allocation2 + $0x2e0] sm:$0xff] %vm3656_vm1, %v3620_v51  ;;  %13675 = vmatprep.mubr.msk.bf16.mxu1 %vm479_vm0, %v15288_v28  ;;  %13704 = vmatpush3.bf16.msra.mxu0 %v14287_v26 }
 0x1ae   : > { %v13337_v53 = vpop.f32.mrb[92].mxu0  ;;  %13744 = vmatpush3.bf16.msra.mxu1 %v14288_v40  ;;  %13705 = vmatprep.subr.bf16.mxu0 %v14289_v48 }
 0x1af   : > { %v13377_v54 = vpop.f32.mrb[92].mxu1  ;;  %v1414_v57 = vpop.f32.mrb[93].mxu0  ;;  %13745 = vmatprep.subr.bf16.mxu1 %v14290_v52 }
 0x1b0   : > { %v1599_v58 = vpop.f32.mrb[93].mxu1  ;;  %v13338_v59 = vpop.f32.mrb[94].mxu0 }
 0x1b1   : > { %v3607_v60 = vpack.c.bf16 %v13338_v59, %v13337_v53  ;;  %v13378_v63 = vpop.f32.mrb[94].mxu1  ;;  %v1417_v0 = vpop.f32.mrb[95].mxu0  ;;  %13706 = vmatpush3.bf16.msra.mxu0 %v14289_v48 }
 0x1b2   : > { %v3623_v2 = vpack.c.bf16 %v13378_v63, %v13377_v54  ;;  %v3606_v3 = vpack.c.bf16 %v1417_v0, %v1414_v57  ;;  %v1602_v4 = vpop.f32.mrb[95].mxu1  ;;  %13746 = vmatpush3.bf16.msra.mxu1 %v14290_v52 }
 0x1b3   : > { %3736 = vst.msk [vmem:[#allocation2 + $0x278] sm:$0xff] %vm3656_vm1, %v3607_v60  ;;  %v3622_v5 = vpack.c.bf16 %v1602_v4, %v1599_v58  ;;  %13636 = vmatmul.mubr.msk.bf16.gmra.mrb[200].mxu0 %vm479_vm0, %v15313_v36 }
 0x1b4   : > { %3752 = vst.msk [vmem:[#allocation2 + $0x2f8] sm:$0xff] %vm3656_vm1, %v3623_v2  ;;  %3735 = vst.msk [vmem:[#allocation2 + $0x270] sm:$0xff] %vm3656_vm1, %v3606_v3  ;;  %13676 = vmatmul.mubr.msk.bf16.gmra.mrb[200].mxu1 %vm479_vm0, %v15313_v36  ;;  %13639 = vmatprep.mubr.msk.bf16.mxu0 %vm479_vm0, %v15318_v38 }
 0x1b5   : > { %3751 = vst.msk [vmem:[#allocation2 + $0x2f0] sm:$0xff] %vm3656_vm1, %v3622_v5  ;;  %13679 = vmatprep.mubr.msk.bf16.mxu1 %vm479_vm0, %v15318_v38 }
 0x1b6   : > { %v13389_v6 = vpop.f32.mrb[96].mxu0 }
 0x1b7   : > { %v13429_v7 = vpop.f32.mrb[96].mxu1  ;;  %v1672_v29 = vpop.f32.mrb[97].mxu0 }
 0x1b8   : > { %v1857_v8 = vpop.f32.mrb[97].mxu1  ;;  %v13390_v9 = vpop.f32.mrb[98].mxu0 }
 0x1b9   : > { %v3625_v30 = vpack.c.bf16 %v13390_v9, %v13389_v6  ;;  %v13430_v11 = vpop.f32.mrb[98].mxu1  ;;  %v1675_v12 = vpop.f32.mrb[99].mxu0 }
 0x1ba   : > { %v3641_v13 = vpack.c.bf16 %v13430_v11, %v13429_v7  ;;  %v3624_v14 = vpack.c.bf16 %v1675_v12, %v1672_v29  ;;  %v1860_v15 = vpop.f32.mrb[99].mxu1 }
 0x1bb   : > { %3754 = vst.msk [vmem:[#allocation2 + $0x308] sm:$0xff] %vm3656_vm1, %v3625_v30  ;;  %v3640_v16 = vpack.c.bf16 %v1860_v15, %v1857_v8  ;;  %13640 = vmatmul.mubr.msk.bf16.gmra.mrb[204].mxu0 %vm479_vm0, %v15333_v43 }
 0x1bc   : > { %3770 = vst.msk [vmem:[#allocation2 + $0x388] sm:$0xff] %vm3656_vm1, %v3641_v13  ;;  %3753 = vst.msk [vmem:[#allocation2 + $0x300] sm:$0xff] %vm3656_vm1, %v3624_v14  ;;  %13680 = vmatmul.mubr.msk.bf16.gmra.mrb[204].mxu1 %vm479_vm0, %v15333_v43  ;;  %13643 = vmatprep.mubr.msk.bf16.mxu0 %vm479_vm0, %v15335_v44 }
 0x1bd   : > { %3769 = vst.msk [vmem:[#allocation2 + $0x380] sm:$0xff] %vm3656_vm1, %v3640_v16  ;;  %13683 = vmatprep.mubr.msk.bf16.mxu1 %vm479_vm0, %v15335_v44 }
 0x1be   : > { %v13393_v24 = vpop.f32.mrb[100].mxu0 }
 0x1bf   : > { %v13433_v19 = vpop.f32.mrb[100].mxu1  ;;  %v1688_v20 = vpop.f32.mrb[101].mxu0 }
 0x1c0   : > { %v1873_v31 = vpop.f32.mrb[101].mxu1  ;;  %v13394_v21 = vpop.f32.mrb[102].mxu0 }
 0x1c1   : > { %v3627_v22 = vpack.c.bf16 %v13394_v21, %v13393_v24  ;;  %v13434_v23 = vpop.f32.mrb[102].mxu1  ;;  %v1691_v25 = vpop.f32.mrb[103].mxu0 }
 0x1c2   : > { %v3643_v26 = vpack.c.bf16 %v13434_v23, %v13433_v19  ;;  %v3626_v32 = vpack.c.bf16 %v1691_v25, %v1688_v20  ;;  %v1876_v40 = vpop.f32.mrb[103].mxu1 }
 0x1c3   : > { %3756 = vst.msk [vmem:[#allocation2 + $0x318] sm:$0xff] %vm3656_vm1, %v3627_v22  ;;  %v3642_v33 = vpack.c.bf16 %v1876_v40, %v1873_v31  ;;  %13644 = vmatmul.mubr.msk.bf16.gmra.mrb[208].mxu0 %vm479_vm0, %v15349_v49 }
 0x1c4   : > { %3772 = vst.msk [vmem:[#allocation2 + $0x398] sm:$0xff] %vm3656_vm1, %v3643_v26  ;;  %3755 = vst.msk [vmem:[#allocation2 + $0x310] sm:$0xff] %vm3656_vm1, %v3626_v32  ;;  %13684 = vmatmul.mubr.msk.bf16.gmra.mrb[208].mxu1 %vm479_vm0, %v15349_v49  ;;  %13647 = vmatprep.mubr.msk.bf16.mxu0 %vm479_vm0, %v15351_v50 }
 0x1c5   : > { %3771 = vst.msk [vmem:[#allocation2 + $0x390] sm:$0xff] %vm3656_vm1, %v3642_v33  ;;  %13687 = vmatprep.mubr.msk.bf16.mxu1 %vm479_vm0, %v15351_v50 }
 0x1c6   : > { %v13397_v34 = vpop.f32.mrb[104].mxu0 }
 0x1c7   : > { %v13437_v45 = vpop.f32.mrb[104].mxu1  ;;  %v1704_v35 = vpop.f32.mrb[105].mxu0 }
 0x1c8   : > { %v1889_v37 = vpop.f32.mrb[105].mxu1  ;;  %v13398_v39 = vpop.f32.mrb[106].mxu0 }
 0x1c9   : > { %v3629_v41 = vpack.c.bf16 %v13398_v39, %v13397_v34  ;;  %v13438_v42 = vpop.f32.mrb[106].mxu1  ;;  %v1707_v46 = vpop.f32.mrb[107].mxu0 }
 0x1ca   : > { %v3645_v47 = vpack.c.bf16 %v13438_v42, %v13437_v45  ;;  %v3628_v48 = vpack.c.bf16 %v1707_v46, %v1704_v35  ;;  %v1892_v51 = vpop.f32.mrb[107].mxu1 }
 0x1cb   : > { %3758 = vst.msk [vmem:[#allocation2 + $0x328] sm:$0xff] %vm3656_vm1, %v3629_v41  ;;  %v3644_v52 = vpack.c.bf16 %v1892_v51, %v1889_v37  ;;  %13648 = vmatmul.mubr.msk.bf16.gmra.mrb[212].mxu0 %vm479_vm0, %v15365_v55 }
 0x1cc   : > { %3774 = vst.msk [vmem:[#allocation2 + $0x3a8] sm:$0xff] %vm3656_vm1, %v3645_v47  ;;  %3757 = vst.msk [vmem:[#allocation2 + $0x320] sm:$0xff] %vm3656_vm1, %v3628_v48  ;;  %13688 = vmatmul.mubr.msk.bf16.gmra.mrb[212].mxu1 %vm479_vm0, %v15365_v55  ;;  %13651 = vmatprep.mubr.msk.bf16.mxu0 %vm479_vm0, %v15367_v56 }
 0x1cd   : > { %3773 = vst.msk [vmem:[#allocation2 + $0x3a0] sm:$0xff] %vm3656_vm1, %v3644_v52  ;;  %13691 = vmatprep.mubr.msk.bf16.mxu1 %vm479_vm0, %v15367_v56 }
 0x1ce   : > { %v13401_v53 = vpop.f32.mrb[108].mxu0 }
 0x1cf   : > { %v13441_v54 = vpop.f32.mrb[108].mxu1  ;;  %v1720_v57 = vpop.f32.mrb[109].mxu0 }
 0x1d0   : > { %v1905_v58 = vpop.f32.mrb[109].mxu1  ;;  %v13402_v59 = vpop.f32.mrb[110].mxu0 }
 0x1d1   : > { %v3631_v60 = vpack.c.bf16 %v13402_v59, %v13401_v53  ;;  %v13442_v63 = vpop.f32.mrb[110].mxu1  ;;  %v1723_v0 = vpop.f32.mrb[111].mxu0 }
 0x1d2   : > { %v3647_v2 = vpack.c.bf16 %v13442_v63, %v13441_v54  ;;  %v3630_v3 = vpack.c.bf16 %v1723_v0, %v1720_v57  ;;  %v1908_v4 = vpop.f32.mrb[111].mxu1 }
 0x1d3   : > { %3760 = vst.msk [vmem:[#allocation2 + $0x338] sm:$0xff] %vm3656_vm1, %v3631_v60  ;;  %v3646_v5 = vpack.c.bf16 %v1908_v4, %v1905_v58  ;;  %13652 = vmatmul.mubr.msk.bf16.gmra.mrb[216].mxu0 %vm479_vm0, %v15381_v61 }
 0x1d4   : > { %3776 = vst.msk [vmem:[#allocation2 + $0x3b8] sm:$0xff] %vm3656_vm1, %v3647_v2  ;;  %3759 = vst.msk [vmem:[#allocation2 + $0x330] sm:$0xff] %vm3656_vm1, %v3630_v3  ;;  %13692 = vmatmul.mubr.msk.bf16.gmra.mrb[216].mxu1 %vm479_vm0, %v15381_v61  ;;  %13655 = vmatprep.mubr.msk.bf16.mxu0 %vm479_vm0, %v15383_v62 }
 0x1d5   : > { %3775 = vst.msk [vmem:[#allocation2 + $0x3b0] sm:$0xff] %vm3656_vm1, %v3646_v5  ;;  %13695 = vmatprep.mubr.msk.bf16.mxu1 %vm479_vm0, %v15383_v62 }
 0x1d6   : > { %v13405_v6 = vpop.f32.mrb[112].mxu0 }
 0x1d7   : > { %v13445_v7 = vpop.f32.mrb[112].mxu1  ;;  %v1736_v29 = vpop.f32.mrb[113].mxu0 }
 0x1d8   : > { %v1921_v8 = vpop.f32.mrb[113].mxu1  ;;  %v13406_v9 = vpop.f32.mrb[114].mxu0 }
 0x1d9   : > { %v3633_v30 = vpack.c.bf16 %v13406_v9, %v13405_v6  ;;  %v13446_v11 = vpop.f32.mrb[114].mxu1  ;;  %v1739_v12 = vpop.f32.mrb[115].mxu0 }
 0x1da   : > { %v3649_v13 = vpack.c.bf16 %v13446_v11, %v13445_v7  ;;  %v3632_v14 = vpack.c.bf16 %v1739_v12, %v1736_v29  ;;  %v1924_v15 = vpop.f32.mrb[115].mxu1 }
 0x1db   : > { %3762 = vst.msk [vmem:[#allocation2 + $0x348] sm:$0xff] %vm3656_vm1, %v3633_v30  ;;  %v3648_v16 = vpack.c.bf16 %v1924_v15, %v1921_v8  ;;  %13656 = vmatmul.mubr.msk.bf16.gmra.mrb[220].mxu0 %vm479_vm0, %v15395_v1 }
 0x1dc   : > { %3778 = vst.msk [vmem:[#allocation2 + $0x3c8] sm:$0xff] %vm3656_vm1, %v3649_v13  ;;  %3761 = vst.msk [vmem:[#allocation2 + $0x340] sm:$0xff] %vm3656_vm1, %v3632_v14  ;;  %13696 = vmatmul.mubr.msk.bf16.gmra.mrb[220].mxu1 %vm479_vm0, %v15395_v1  ;;  %13707 = vmatprep.mubr.msk.bf16.mxu0 %vm479_vm0, %v15242_v10 }
 0x1dd   : > { %3777 = vst.msk [vmem:[#allocation2 + $0x3c0] sm:$0xff] %vm3656_vm1, %v3648_v16  ;;  %13747 = vmatprep.mubr.msk.bf16.mxu1 %vm479_vm0, %v15242_v10 }
 0x1de   : > { %v13409_v24 = vpop.f32.mrb[116].mxu0 }
 0x1df   : > { %v13449_v19 = vpop.f32.mrb[116].mxu1  ;;  %v1752_v20 = vpop.f32.mrb[117].mxu0 }
 0x1e0   : > { %v1937_v31 = vpop.f32.mrb[117].mxu1  ;;  %v13410_v21 = vpop.f32.mrb[118].mxu0 }
 0x1e1   : > { %v3635_v22 = vpack.c.bf16 %v13410_v21, %v13409_v24  ;;  %v13450_v23 = vpop.f32.mrb[118].mxu1  ;;  %v1755_v25 = vpop.f32.mrb[119].mxu0 }
 0x1e2   : > { %v3651_v26 = vpack.c.bf16 %v13450_v23, %v13449_v19  ;;  %v3634_v32 = vpack.c.bf16 %v1755_v25, %v1752_v20  ;;  %v1940_v40 = vpop.f32.mrb[119].mxu1 }
 0x1e3   : > { %3764 = vst.msk [vmem:[#allocation2 + $0x358] sm:$0xff] %vm3656_vm1, %v3635_v22  ;;  %v3650_v33 = vpack.c.bf16 %v1940_v40, %v1937_v31  ;;  %13708 = vmatmul.mubr.msk.bf16.vlgmr.msra.gmra.mrb[224].mxu0 %vm479_vm0, %v15258_v17 }
 0x1e4   : > { %3780 = vst.msk [vmem:[#allocation2 + $0x3d8] sm:$0xff] %vm3656_vm1, %v3651_v26  ;;  %3763 = vst.msk [vmem:[#allocation2 + $0x350] sm:$0xff] %vm3656_vm1, %v3634_v32  ;;  %13748 = vmatmul.mubr.msk.bf16.vlgmr.msra.gmra.mrb[224].mxu1 %vm479_vm0, %v15258_v17  ;;  %13711 = vmatprep.mubr.msk.bf16.mxu0 %vm479_vm0, %v15260_v18 }
 0x1e5   : > { %3779 = vst.msk [vmem:[#allocation2 + $0x3d0] sm:$0xff] %vm3656_vm1, %v3650_v33  ;;  %13751 = vmatprep.mubr.msk.bf16.mxu1 %vm479_vm0, %v15260_v18 }
 0x1e6   : > { %v13413_v10 = vpop.f32.mrb[120].mxu0 }
 0x1e7   : > { %v13453_v34 = vpop.f32.mrb[120].mxu1  ;;  %v1768_v45 = vpop.f32.mrb[121].mxu0 }
 0x1e8   : > { %v1953_v35 = vpop.f32.mrb[121].mxu1  ;;  %v13414_v37 = vpop.f32.mrb[122].mxu0 }
 0x1e9   : > { %v3637_v39 = vpack.c.bf16 %v13414_v37, %v13413_v10  ;;  %v13454_v41 = vpop.f32.mrb[122].mxu1  ;;  %v1771_v42 = vpop.f32.mrb[123].mxu0 }
 0x1ea   : > { %v3653_v46 = vpack.c.bf16 %v13454_v41, %v13453_v34  ;;  %v3636_v47 = vpack.c.bf16 %v1771_v42, %v1768_v45  ;;  %v1956_v48 = vpop.f32.mrb[123].mxu1 }
 0x1eb   : > { %3766 = vst.msk [vmem:[#allocation2 + $0x368] sm:$0xff] %vm3656_vm1, %v3637_v39  ;;  %v3652_v17 = vpack.c.bf16 %v1956_v48, %v1953_v35  ;;  %13712 = vmatmul.mubr.msk.bf16.gmra.mrb[228].mxu0 %vm479_vm0, %v15286_v27 }
 0x1ec   : > { %3782 = vst.msk [vmem:[#allocation2 + $0x3e8] sm:$0xff] %vm3656_vm1, %v3653_v46  ;;  %3765 = vst.msk [vmem:[#allocation2 + $0x360] sm:$0xff] %vm3656_vm1, %v3636_v47  ;;  %13752 = vmatmul.mubr.msk.bf16.gmra.mrb[228].mxu1 %vm479_vm0, %v15286_v27  ;;  %13715 = vmatprep.mubr.msk.bf16.mxu0 %vm479_vm0, %v15288_v28 }
 0x1ed   : > { %3781 = vst.msk [vmem:[#allocation2 + $0x3e0] sm:$0xff] %vm3656_vm1, %v3652_v17  ;;  %13755 = vmatprep.mubr.msk.bf16.mxu1 %vm479_vm0, %v15288_v28 }
 0x1ee   : > { %v13417_v18 = vpop.f32.mrb[124].mxu0 }
 0x1ef   : > { %v13457_v51 = vpop.f32.mrb[124].mxu1  ;;  %v1784_v52 = vpop.f32.mrb[125].mxu0 }
 0x1f0   : > { %v1969_v53 = vpop.f32.mrb[125].mxu1  ;;  %v13418_v54 = vpop.f32.mrb[126].mxu0 }
 0x1f1   : > { %v3639_v57 = vpack.c.bf16 %v13418_v54, %v13417_v18  ;;  %v13458_v58 = vpop.f32.mrb[126].mxu1  ;;  %v1787_v59 = vpop.f32.mrb[127].mxu0 }
 0x1f2   : > { %v3655_v60 = vpack.c.bf16 %v13458_v58, %v13457_v51  ;;  %v3638_v63 = vpack.c.bf16 %v1787_v59, %v1784_v52  ;;  %v1972_v0 = vpop.f32.mrb[127].mxu1 }
 0x1f3   : > { %3768 = vst.msk [vmem:[#allocation2 + $0x378] sm:$0xff] %vm3656_vm1, %v3639_v57  ;;  %v3654_v27 = vpack.c.bf16 %v1972_v0, %v1969_v53  ;;  %13716 = vmatmul.mubr.msk.bf16.gmra.mrb[232].mxu0 %vm479_vm0, %v15313_v36 }
 0x1f4   : > { %3784 = vst.msk [vmem:[#allocation2 + $0x3f8] sm:$0xff] %vm3656_vm1, %v3655_v60  ;;  %3767 = vst.msk [vmem:[#allocation2 + $0x370] sm:$0xff] %vm3656_vm1, %v3638_v63  ;;  %13756 = vmatmul.mubr.msk.bf16.gmra.mrb[232].mxu1 %vm479_vm0, %v15313_v36  ;;  %13719 = vmatprep.mubr.msk.bf16.mxu0 %vm479_vm0, %v15318_v38 }
 0x1f5   : > { %3783 = vst.msk [vmem:[#allocation2 + $0x3f0] sm:$0xff] %vm3656_vm1, %v3654_v27  ;;  %13759 = vmatprep.mubr.msk.bf16.mxu1 %vm479_vm0, %v15318_v38 }
 0x1f6   : > { %v13469_v28 = vpop.f32.mrb[128].mxu0 }
 0x1f7   : > { %v13509_v2 = vpop.f32.mrb[128].mxu1  ;;  %v2106_v3 = vpop.f32.mrb[129].mxu0 }
 0x1f8   : > { %v2291_v4 = vpop.f32.mrb[129].mxu1  ;;  %v13470_v5 = vpop.f32.mrb[130].mxu0 }
 0x1f9   : > { %v3786_v6 = vpack.c.bf16 %v13470_v5, %v13469_v28  ;;  %v13510_v7 = vpop.f32.mrb[130].mxu1  ;;  %v2109_v29 = vpop.f32.mrb[131].mxu0 }
 0x1fa   : > { %v3802_v8 = vpack.c.bf16 %v13510_v7, %v13509_v2  ;;  %v3785_v9 = vpack.c.bf16 %v2109_v29, %v2106_v3  ;;  %v2294_v30 = vpop.f32.mrb[131].mxu1 }
 0x1fb   : > { %3914 = vst.msk [vmem:[#allocation3 + $0x8] sm:$0xff] %vm3656_vm1, %v3786_v6  ;;  %v3801_v36 = vpack.c.bf16 %v2294_v30, %v2291_v4  ;;  %13720 = vmatmul.mubr.msk.bf16.gmra.mrb[236].mxu0 %vm479_vm0, %v15333_v43 }
 0x1fc   : > { %3930 = vst.msk [vmem:[#allocation3 + $0x88] sm:$0xff] %vm3656_vm1, %v3802_v8  ;;  %3913 = vst.msk [vmem:[#allocation3] sm:$0xff] %vm3656_vm1, %v3785_v9  ;;  %13760 = vmatmul.mubr.msk.bf16.gmra.mrb[236].mxu1 %vm479_vm0, %v15333_v43  ;;  %13723 = vmatprep.mubr.msk.bf16.mxu0 %vm479_vm0, %v15335_v44 }
 0x1fd   : > { %3929 = vst.msk [vmem:[#allocation3 + $0x80] sm:$0xff] %vm3656_vm1, %v3801_v36  ;;  %13763 = vmatprep.mubr.msk.bf16.mxu1 %vm479_vm0, %v15335_v44 }
 0x1fe   : > { %v13473_v38 = vpop.f32.mrb[132].mxu0 }
 0x1ff   : > { %v13513_v11 = vpop.f32.mrb[132].mxu1  ;;  %v2122_v12 = vpop.f32.mrb[133].mxu0 }
 0x200   : > { %v2307_v13 = vpop.f32.mrb[133].mxu1  ;;  %v13474_v14 = vpop.f32.mrb[134].mxu0 }
 0x201   : > { %v3788_v15 = vpack.c.bf16 %v13474_v14, %v13473_v38  ;;  %v13514_v16 = vpop.f32.mrb[134].mxu1  ;;  %v2125_v24 = vpop.f32.mrb[135].mxu0 }
 0x202   : > { %v3804_v19 = vpack.c.bf16 %v13514_v16, %v13513_v11  ;;  %v3787_v20 = vpack.c.bf16 %v2125_v24, %v2122_v12  ;;  %v2310_v31 = vpop.f32.mrb[135].mxu1 }
 0x203   : > { %3916 = vst.msk [vmem:[#allocation3 + $0x18] sm:$0xff] %vm3656_vm1, %v3788_v15  ;;  %v3803_v43 = vpack.c.bf16 %v2310_v31, %v2307_v13  ;;  %13724 = vmatmul.mubr.msk.bf16.gmra.mrb[240].mxu0 %vm479_vm0, %v15349_v49 }
 0x204   : > { %3932 = vst.msk [vmem:[#allocation3 + $0x98] sm:$0xff] %vm3656_vm1, %v3804_v19  ;;  %3915 = vst.msk [vmem:[#allocation3 + $0x10] sm:$0xff] %vm3656_vm1, %v3787_v20  ;;  %13764 = vmatmul.mubr.msk.bf16.gmra.mrb[240].mxu1 %vm479_vm0, %v15349_v49  ;;  %13727 = vmatprep.mubr.msk.bf16.mxu0 %vm479_vm0, %v15351_v50 }
 0x205   : > { %3931 = vst.msk [vmem:[#allocation3 + $0x90] sm:$0xff] %vm3656_vm1, %v3803_v43  ;;  %13767 = vmatprep.mubr.msk.bf16.mxu1 %vm479_vm0, %v15351_v50 }
 0x206   : > { %v13477_v44 = vpop.f32.mrb[136].mxu0 }
 0x207   : > { %v13517_v21 = vpop.f32.mrb[136].mxu1  ;;  %v2138_v22 = vpop.f32.mrb[137].mxu0 }
 0x208   : > { %v2323_v23 = vpop.f32.mrb[137].mxu1  ;;  %v13478_v25 = vpop.f32.mrb[138].mxu0 }
 0x209   : > { %v3790_v26 = vpack.c.bf16 %v13478_v25, %v13477_v44  ;;  %v13518_v32 = vpop.f32.mrb[138].mxu1  ;;  %v2141_v40 = vpop.f32.mrb[139].mxu0 }
 0x20a   : > { %v3806_v33 = vpack.c.bf16 %v13518_v32, %v13517_v21  ;;  %v3789_v10 = vpack.c.bf16 %v2141_v40, %v2138_v22  ;;  %v2326_v34 = vpop.f32.mrb[139].mxu1 }
 0x20b   : > { %3918 = vst.msk [vmem:[#allocation3 + $0x28] sm:$0xff] %vm3656_vm1, %v3790_v26  ;;  %v3805_v49 = vpack.c.bf16 %v2326_v34, %v2323_v23  ;;  %13728 = vmatmul.mubr.msk.bf16.gmra.mrb[244].mxu0 %vm479_vm0, %v15365_v55 }
 0x20c   : > { %3934 = vst.msk [vmem:[#allocation3 + $0xa8] sm:$0xff] %vm3656_vm1, %v3806_v33  ;;  %3917 = vst.msk [vmem:[#allocation3 + $0x20] sm:$0xff] %vm3656_vm1, %v3789_v10  ;;  %13768 = vmatmul.mubr.msk.bf16.gmra.mrb[244].mxu1 %vm479_vm0, %v15365_v55  ;;  %13731 = vmatprep.mubr.msk.bf16.mxu0 %vm479_vm0, %v15367_v56 }
 0x20d   : > { %3933 = vst.msk [vmem:[#allocation3 + $0xa0] sm:$0xff] %vm3656_vm1, %v3805_v49  ;;  %13771 = vmatprep.mubr.msk.bf16.mxu1 %vm479_vm0, %v15367_v56 }
 0x20e   : > { %v13481_v50 = vpop.f32.mrb[140].mxu0 }
 0x20f   : > { %v13521_v45 = vpop.f32.mrb[140].mxu1  ;;  %v2154_v35 = vpop.f32.mrb[141].mxu0 }
 0x210   : > { %v2339_v37 = vpop.f32.mrb[141].mxu1  ;;  %v13482_v39 = vpop.f32.mrb[142].mxu0 }
 0x211   : > { %v3792_v41 = vpack.c.bf16 %v13482_v39, %v13481_v50  ;;  %v13522_v42 = vpop.f32.mrb[142].mxu1  ;;  %v2157_v46 = vpop.f32.mrb[143].mxu0 }
 0x212   : > { %v3808_v47 = vpack.c.bf16 %v13522_v42, %v13521_v45  ;;  %v3791_v48 = vpack.c.bf16 %v2157_v46, %v2154_v35  ;;  %v2342_v17 = vpop.f32.mrb[143].mxu1 }
 0x213   : > { %3920 = vst.msk [vmem:[#allocation3 + $0x38] sm:$0xff] %vm3656_vm1, %v3792_v41  ;;  %v3807_v55 = vpack.c.bf16 %v2342_v17, %v2339_v37  ;;  %13732 = vmatmul.mubr.msk.bf16.gmra.mrb[248].mxu0 %vm479_vm0, %v15381_v61 }
 0x214   : > { %3936 = vst.msk [vmem:[#allocation3 + $0xb8] sm:$0xff] %vm3656_vm1, %v3808_v47  ;;  %3919 = vst.msk [vmem:[#allocation3 + $0x30] sm:$0xff] %vm3656_vm1, %v3791_v48  ;;  %13772 = vmatmul.mubr.msk.bf16.gmra.mrb[248].mxu1 %vm479_vm0, %v15381_v61  ;;  %13735 = vmatprep.mubr.msk.bf16.mxu0 %vm479_vm0, %v15383_v62 }
 0x215   : > { %3935 = vst.msk [vmem:[#allocation3 + $0xb0] sm:$0xff] %vm3656_vm1, %v3807_v55  ;;  %13775 = vmatprep.mubr.msk.bf16.mxu1 %vm479_vm0, %v15383_v62 }
 0x216   : > { %v13485_v56 = vpop.f32.mrb[144].mxu0 }
 0x217   : > { %v13525_v18 = vpop.f32.mrb[144].mxu1  ;;  %v2170_v51 = vpop.f32.mrb[145].mxu0 }
 0x218   : > { %v2355_v52 = vpop.f32.mrb[145].mxu1  ;;  %v13486_v53 = vpop.f32.mrb[146].mxu0 }
 0x219   : > { %v3794_v54 = vpack.c.bf16 %v13486_v53, %v13485_v56  ;;  %v13526_v57 = vpop.f32.mrb[146].mxu1  ;;  %v2173_v58 = vpop.f32.mrb[147].mxu0 }
 0x21a   : > { %v3810_v59 = vpack.c.bf16 %v13526_v57, %v13525_v18  ;;  %v3793_v60 = vpack.c.bf16 %v2173_v58, %v2170_v51  ;;  %v2358_v63 = vpop.f32.mrb[147].mxu1 }
 0x21b   : > { %3922 = vst.msk [vmem:[#allocation3 + $0x48] sm:$0xff] %vm3656_vm1, %v3794_v54  ;;  %v3809_v61 = vpack.c.bf16 %v2358_v63, %v2355_v52  ;;  %13736 = vmatmul.mubr.msk.bf16.gmra.mrb[252].mxu0 %vm479_vm0, %v15395_v1 }
 0x21c   : > { %3938 = vst.msk [vmem:[#allocation3 + $0xc8] sm:$0xff] %vm3656_vm1, %v3810_v59  ;;  %3921 = vst.msk [vmem:[#allocation3 + $0x40] sm:$0xff] %vm3656_vm1, %v3793_v60  ;;  %13776 = vmatmul.mubr.msk.bf16.gmra.mrb[252].mxu1 %vm479_vm0, %v15395_v1 }
 0x21d   : > { %3937 = vst.msk [vmem:[#allocation3 + $0xc0] sm:$0xff] %vm3656_vm1, %v3809_v61 }
 0x21e   : > { %v13489_v62 = vpop.f32.mrb[148].mxu0 }
 0x21f   : > { %v13529_v0 = vpop.f32.mrb[148].mxu1  ;;  %v2186_v27 = vpop.f32.mrb[149].mxu0 }
 0x220   : > { %v2371_v28 = vpop.f32.mrb[149].mxu1  ;;  %v13490_v2 = vpop.f32.mrb[150].mxu0 }
 0x221   : > { %v3796_v3 = vpack.c.bf16 %v13490_v2, %v13489_v62  ;;  %v13530_v4 = vpop.f32.mrb[150].mxu1  ;;  %v2189_v5 = vpop.f32.mrb[151].mxu0 }
 0x222   : > { %v3812_v6 = vpack.c.bf16 %v13530_v4, %v13529_v0  ;;  %v3795_v7 = vpack.c.bf16 %v2189_v5, %v2186_v27  ;;  %v2374_v29 = vpop.f32.mrb[151].mxu1 }
 0x223   : > { %3924 = vst.msk [vmem:[#allocation3 + $0x58] sm:$0xff] %vm3656_vm1, %v3796_v3  ;;  %v3811_v8 = vpack.c.bf16 %v2374_v29, %v2371_v28 }
 0x224   : > { %3940 = vst.msk [vmem:[#allocation3 + $0xd8] sm:$0xff] %vm3656_vm1, %v3812_v6  ;;  %3923 = vst.msk [vmem:[#allocation3 + $0x50] sm:$0xff] %vm3656_vm1, %v3795_v7 }
 0x225   : > { %3939 = vst.msk [vmem:[#allocation3 + $0xd0] sm:$0xff] %vm3656_vm1, %v3811_v8 }
 0x226   : > { %v13493_v1 = vpop.f32.mrb[152].mxu0 }
 0x227   : > { %v13533_v9 = vpop.f32.mrb[152].mxu1  ;;  %v2202_v30 = vpop.f32.mrb[153].mxu0 }
 0x228   : > { %v2387_v36 = vpop.f32.mrb[153].mxu1  ;;  %v13494_v38 = vpop.f32.mrb[154].mxu0 }
 0x229   : > { %v3798_v11 = vpack.c.bf16 %v13494_v38, %v13493_v1  ;;  %v13534_v12 = vpop.f32.mrb[154].mxu1  ;;  %v2205_v13 = vpop.f32.mrb[155].mxu0 }
 0x22a   : > { %v3814_v14 = vpack.c.bf16 %v13534_v12, %v13533_v9  ;;  %v3797_v15 = vpack.c.bf16 %v2205_v13, %v2202_v30  ;;  %v2390_v16 = vpop.f32.mrb[155].mxu1 }
 0x22b   : > { %3926 = vst.msk [vmem:[#allocation3 + $0x68] sm:$0xff] %vm3656_vm1, %v3798_v11  ;;  %v3813_v24 = vpack.c.bf16 %v2390_v16, %v2387_v36 }
 0x22c   : > { %3942 = vst.msk [vmem:[#allocation3 + $0xe8] sm:$0xff] %vm3656_vm1, %v3814_v14  ;;  %3925 = vst.msk [vmem:[#allocation3 + $0x60] sm:$0xff] %vm3656_vm1, %v3797_v15 }
 0x22d   : > { %3941 = vst.msk [vmem:[#allocation3 + $0xe0] sm:$0xff] %vm3656_vm1, %v3813_v24 }
 0x22e   : > { %v13497_v19 = vpop.f32.mrb[156].mxu0 }
 0x22f   : > { %v13537_v20 = vpop.f32.mrb[156].mxu1  ;;  %v2218_v31 = vpop.f32.mrb[157].mxu0 }
 0x230   : > { %v2403_v43 = vpop.f32.mrb[157].mxu1  ;;  %v13498_v44 = vpop.f32.mrb[158].mxu0 }
 0x231   : > { %v3800_v21 = vpack.c.bf16 %v13498_v44, %v13497_v19  ;;  %v13538_v22 = vpop.f32.mrb[158].mxu1  ;;  %v2221_v23 = vpop.f32.mrb[159].mxu0 }
 0x232   : > { %v3816_v25 = vpack.c.bf16 %v13538_v22, %v13537_v20  ;;  %v3799_v26 = vpack.c.bf16 %v2221_v23, %v2218_v31  ;;  %v2406_v32 = vpop.f32.mrb[159].mxu1 }
 0x233   : > { %3928 = vst.msk [vmem:[#allocation3 + $0x78] sm:$0xff] %vm3656_vm1, %v3800_v21  ;;  %v3815_v40 = vpack.c.bf16 %v2406_v32, %v2403_v43 }
 0x234   : > { %3944 = vst.msk [vmem:[#allocation3 + $0xf8] sm:$0xff] %vm3656_vm1, %v3816_v25  ;;  %3927 = vst.msk [vmem:[#allocation3 + $0x70] sm:$0xff] %vm3656_vm1, %v3799_v26 }
 0x235   : > { %3943 = vst.msk [vmem:[#allocation3 + $0xf0] sm:$0xff] %vm3656_vm1, %v3815_v40 }
 0x236   : > { %v13549_v33 = vpop.f32.mrb[160].mxu0 }
 0x237   : > { %v13589_v10 = vpop.f32.mrb[160].mxu1  ;;  %v2476_v34 = vpop.f32.mrb[161].mxu0 }
 0x238   : > { %v2661_v49 = vpop.f32.mrb[161].mxu1  ;;  %v13550_v50 = vpop.f32.mrb[162].mxu0 }
 0x239   : > { %v3818_v45 = vpack.c.bf16 %v13550_v50, %v13549_v33  ;;  %v13590_v35 = vpop.f32.mrb[162].mxu1  ;;  %v2479_v37 = vpop.f32.mrb[163].mxu0 }
 0x23a   : > { %v3834_v39 = vpack.c.bf16 %v13590_v35, %v13589_v10  ;;  %v3817_v41 = vpack.c.bf16 %v2479_v37, %v2476_v34  ;;  %v2664_v42 = vpop.f32.mrb[163].mxu1 }
 0x23b   : > { %3946 = vst.msk [vmem:[#allocation3 + $0x108] sm:$0xff] %vm3656_vm1, %v3818_v45  ;;  %v3833_v46 = vpack.c.bf16 %v2664_v42, %v2661_v49 }
 0x23c   : > { %3962 = vst.msk [vmem:[#allocation3 + $0x188] sm:$0xff] %vm3656_vm1, %v3834_v39  ;;  %3945 = vst.msk [vmem:[#allocation3 + $0x100] sm:$0xff] %vm3656_vm1, %v3817_v41 }
 0x23d   : > { %3961 = vst.msk [vmem:[#allocation3 + $0x180] sm:$0xff] %vm3656_vm1, %v3833_v46 }
 0x23e   : > { %v13553_v47 = vpop.f32.mrb[164].mxu0 }
 0x23f   : > { %v13593_v48 = vpop.f32.mrb[164].mxu1  ;;  %v2492_v17 = vpop.f32.mrb[165].mxu0 }
 0x240   : > { %v2677_v55 = vpop.f32.mrb[165].mxu1  ;;  %v13554_v56 = vpop.f32.mrb[166].mxu0 }
 0x241   : > { %v3820_v18 = vpack.c.bf16 %v13554_v56, %v13553_v47  ;;  %v13594_v51 = vpop.f32.mrb[166].mxu1  ;;  %v2495_v52 = vpop.f32.mrb[167].mxu0 }
 0x242   : > { %v3836_v53 = vpack.c.bf16 %v13594_v51, %v13593_v48  ;;  %v3819_v54 = vpack.c.bf16 %v2495_v52, %v2492_v17  ;;  %v2680_v57 = vpop.f32.mrb[167].mxu1 }
 0x243   : > { %3948 = vst.msk [vmem:[#allocation3 + $0x118] sm:$0xff] %vm3656_vm1, %v3820_v18  ;;  %v3835_v58 = vpack.c.bf16 %v2680_v57, %v2677_v55 }
 0x244   : > { %3964 = vst.msk [vmem:[#allocation3 + $0x198] sm:$0xff] %vm3656_vm1, %v3836_v53  ;;  %3947 = vst.msk [vmem:[#allocation3 + $0x110] sm:$0xff] %vm3656_vm1, %v3819_v54 }
 0x245   : > { %3963 = vst.msk [vmem:[#allocation3 + $0x190] sm:$0xff] %vm3656_vm1, %v3835_v58 }
 0x246   : > { %v13557_v59 = vpop.f32.mrb[168].mxu0 }
 0x247   : > { %v13597_v60 = vpop.f32.mrb[168].mxu1  ;;  %v2508_v63 = vpop.f32.mrb[169].mxu0 }
 0x248   : > { %v2693_v61 = vpop.f32.mrb[169].mxu1  ;;  %v13558_v62 = vpop.f32.mrb[170].mxu0 }
 0x249   : > { %v3822_v0 = vpack.c.bf16 %v13558_v62, %v13557_v59  ;;  %v13598_v27 = vpop.f32.mrb[170].mxu1  ;;  %v2511_v28 = vpop.f32.mrb[171].mxu0 }
 0x24a   : > { %v3838_v2 = vpack.c.bf16 %v13598_v27, %v13597_v60  ;;  %v3821_v3 = vpack.c.bf16 %v2511_v28, %v2508_v63  ;;  %v2696_v4 = vpop.f32.mrb[171].mxu1 }
 0x24b   : > { %3950 = vst.msk [vmem:[#allocation3 + $0x128] sm:$0xff] %vm3656_vm1, %v3822_v0  ;;  %v3837_v5 = vpack.c.bf16 %v2696_v4, %v2693_v61 }
 0x24c   : > { %3966 = vst.msk [vmem:[#allocation3 + $0x1a8] sm:$0xff] %vm3656_vm1, %v3838_v2  ;;  %3949 = vst.msk [vmem:[#allocation3 + $0x120] sm:$0xff] %vm3656_vm1, %v3821_v3 }
 0x24d   : > { %3965 = vst.msk [vmem:[#allocation3 + $0x1a0] sm:$0xff] %vm3656_vm1, %v3837_v5 }
 0x24e   : > { %v13561_v6 = vpop.f32.mrb[172].mxu0 }
 0x24f   : > { %v13601_v7 = vpop.f32.mrb[172].mxu1  ;;  %v2524_v29 = vpop.f32.mrb[173].mxu0 }
 0x250   : > { %v2709_v8 = vpop.f32.mrb[173].mxu1  ;;  %v13562_v1 = vpop.f32.mrb[174].mxu0 }
 0x251   : > { %v3824_v9 = vpack.c.bf16 %v13562_v1, %v13561_v6  ;;  %v13602_v30 = vpop.f32.mrb[174].mxu1  ;;  %v2527_v36 = vpop.f32.mrb[175].mxu0 }
 0x252   : > { %v3840_v38 = vpack.c.bf16 %v13602_v30, %v13601_v7  ;;  %v3823_v11 = vpack.c.bf16 %v2527_v36, %v2524_v29  ;;  %v2712_v12 = vpop.f32.mrb[175].mxu1 }
 0x253   : > { %3952 = vst.msk [vmem:[#allocation3 + $0x138] sm:$0xff] %vm3656_vm1, %v3824_v9  ;;  %v3839_v13 = vpack.c.bf16 %v2712_v12, %v2709_v8 }
 0x254   : > { %3968 = vst.msk [vmem:[#allocation3 + $0x1b8] sm:$0xff] %vm3656_vm1, %v3840_v38  ;;  %3951 = vst.msk [vmem:[#allocation3 + $0x130] sm:$0xff] %vm3656_vm1, %v3823_v11 }
 0x255   : > { %3967 = vst.msk [vmem:[#allocation3 + $0x1b0] sm:$0xff] %vm3656_vm1, %v3839_v13 }
 0x256   : > { %v13565_v14 = vpop.f32.mrb[176].mxu0 }
 0x257   : > { %v13605_v15 = vpop.f32.mrb[176].mxu1  ;;  %v2540_v16 = vpop.f32.mrb[177].mxu0 }
 0x258   : > { %v2725_v24 = vpop.f32.mrb[177].mxu1  ;;  %v13566_v19 = vpop.f32.mrb[178].mxu0 }
 0x259   : > { %v3826_v20 = vpack.c.bf16 %v13566_v19, %v13565_v14  ;;  %v13606_v31 = vpop.f32.mrb[178].mxu1  ;;  %v2543_v43 = vpop.f32.mrb[179].mxu0 }
 0x25a   : > { %v3842_v44 = vpack.c.bf16 %v13606_v31, %v13605_v15  ;;  %v3825_v21 = vpack.c.bf16 %v2543_v43, %v2540_v16  ;;  %v2728_v22 = vpop.f32.mrb[179].mxu1 }
 0x25b   : > { %3954 = vst.msk [vmem:[#allocation3 + $0x148] sm:$0xff] %vm3656_vm1, %v3826_v20  ;;  %v3841_v23 = vpack.c.bf16 %v2728_v22, %v2725_v24 }
 0x25c   : > { %3970 = vst.msk [vmem:[#allocation3 + $0x1c8] sm:$0xff] %vm3656_vm1, %v3842_v44  ;;  %3953 = vst.msk [vmem:[#allocation3 + $0x140] sm:$0xff] %vm3656_vm1, %v3825_v21 }
 0x25d   : > { %3969 = vst.msk [vmem:[#allocation3 + $0x1c0] sm:$0xff] %vm3656_vm1, %v3841_v23 }
 0x25e   : > { %v13569_v25 = vpop.f32.mrb[180].mxu0 }
 0x25f   : > { %v13609_v26 = vpop.f32.mrb[180].mxu1  ;;  %v2556_v32 = vpop.f32.mrb[181].mxu0 }
 0x260   : > { %v2741_v40 = vpop.f32.mrb[181].mxu1  ;;  %v13570_v33 = vpop.f32.mrb[182].mxu0 }
 0x261   : > { %v3828_v10 = vpack.c.bf16 %v13570_v33, %v13569_v25  ;;  %v13610_v34 = vpop.f32.mrb[182].mxu1  ;;  %v2559_v49 = vpop.f32.mrb[183].mxu0 }
 0x262   : > { %v3844_v50 = vpack.c.bf16 %v13610_v34, %v13609_v26  ;;  %v3827_v45 = vpack.c.bf16 %v2559_v49, %v2556_v32  ;;  %v2744_v35 = vpop.f32.mrb[183].mxu1 }
 0x263   : > { %3956 = vst.msk [vmem:[#allocation3 + $0x158] sm:$0xff] %vm3656_vm1, %v3828_v10  ;;  %v3843_v37 = vpack.c.bf16 %v2744_v35, %v2741_v40 }
 0x264   : > { %3972 = vst.msk [vmem:[#allocation3 + $0x1d8] sm:$0xff] %vm3656_vm1, %v3844_v50  ;;  %3955 = vst.msk [vmem:[#allocation3 + $0x150] sm:$0xff] %vm3656_vm1, %v3827_v45 }
 0x265   : > { %3971 = vst.msk [vmem:[#allocation3 + $0x1d0] sm:$0xff] %vm3656_vm1, %v3843_v37 }
 0x266   : > { %v13573_v39 = vpop.f32.mrb[184].mxu0 }
 0x267   : > { %v13613_v41 = vpop.f32.mrb[184].mxu1  ;;  %v2572_v42 = vpop.f32.mrb[185].mxu0 }
 0x268   : > { %v2757_v46 = vpop.f32.mrb[185].mxu1  ;;  %v13574_v47 = vpop.f32.mrb[186].mxu0 }
 0x269   : > { %v3830_v48 = vpack.c.bf16 %v13574_v47, %v13573_v39  ;;  %v13614_v17 = vpop.f32.mrb[186].mxu1  ;;  %v2575_v55 = vpop.f32.mrb[187].mxu0 }
 0x26a   : > { %v3846_v56 = vpack.c.bf16 %v13614_v17, %v13613_v41  ;;  %v3829_v18 = vpack.c.bf16 %v2575_v55, %v2572_v42  ;;  %v2760_v51 = vpop.f32.mrb[187].mxu1 }
 0x26b   : > { %3958 = vst.msk [vmem:[#allocation3 + $0x168] sm:$0xff] %vm3656_vm1, %v3830_v48  ;;  %v3845_v52 = vpack.c.bf16 %v2760_v51, %v2757_v46 }
 0x26c   : > { %3974 = vst.msk [vmem:[#allocation3 + $0x1e8] sm:$0xff] %vm3656_vm1, %v3846_v56  ;;  %3957 = vst.msk [vmem:[#allocation3 + $0x160] sm:$0xff] %vm3656_vm1, %v3829_v18 }
 0x26d   : > { %3973 = vst.msk [vmem:[#allocation3 + $0x1e0] sm:$0xff] %vm3656_vm1, %v3845_v52 }
 0x26e   : > { %v13577_v53 = vpop.f32.mrb[188].mxu0 }
 0x26f   : > { %v13617_v54 = vpop.f32.mrb[188].mxu1  ;;  %v2588_v57 = vpop.f32.mrb[189].mxu0 }
 0x270   : > { %v2773_v58 = vpop.f32.mrb[189].mxu1  ;;  %v13578_v59 = vpop.f32.mrb[190].mxu0 }
 0x271   : > { %v3832_v60 = vpack.c.bf16 %v13578_v59, %v13577_v53  ;;  %v13618_v63 = vpop.f32.mrb[190].mxu1  ;;  %v2591_v61 = vpop.f32.mrb[191].mxu0 }
 0x272   : > { %v3848_v62 = vpack.c.bf16 %v13618_v63, %v13617_v54  ;;  %v3831_v0 = vpack.c.bf16 %v2591_v61, %v2588_v57  ;;  %v2776_v27 = vpop.f32.mrb[191].mxu1 }
 0x273   : > { %3960 = vst.msk [vmem:[#allocation3 + $0x178] sm:$0xff] %vm3656_vm1, %v3832_v60  ;;  %v3847_v28 = vpack.c.bf16 %v2776_v27, %v2773_v58 }
 0x274   : > { %3976 = vst.msk [vmem:[#allocation3 + $0x1f8] sm:$0xff] %vm3656_vm1, %v3848_v62  ;;  %3959 = vst.msk [vmem:[#allocation3 + $0x170] sm:$0xff] %vm3656_vm1, %v3831_v0 }
 0x275   : > { %3975 = vst.msk [vmem:[#allocation3 + $0x1f0] sm:$0xff] %vm3656_vm1, %v3847_v28 }
 0x276   : > { %v13629_v2 = vpop.f32.mrb[192].mxu0 }
 0x277   : > { %v13669_v3 = vpop.f32.mrb[192].mxu1  ;;  %v2846_v4 = vpop.f32.mrb[193].mxu0 }
 0x278   : > { %v3031_v5 = vpop.f32.mrb[193].mxu1  ;;  %v13630_v6 = vpop.f32.mrb[194].mxu0 }
 0x279   : > { %v3850_v7 = vpack.c.bf16 %v13630_v6, %v13629_v2  ;;  %v13670_v29 = vpop.f32.mrb[194].mxu1  ;;  %v2849_v8 = vpop.f32.mrb[195].mxu0 }
 0x27a   : > { %v3866_v1 = vpack.c.bf16 %v13670_v29, %v13669_v3  ;;  %v3849_v9 = vpack.c.bf16 %v2849_v8, %v2846_v4  ;;  %v3034_v30 = vpop.f32.mrb[195].mxu1 }
 0x27b   : > { %3978 = vst.msk [vmem:[#allocation3 + $0x208] sm:$0xff] %vm3656_vm1, %v3850_v7  ;;  %v3865_v36 = vpack.c.bf16 %v3034_v30, %v3031_v5 }
 0x27c   : > { %3994 = vst.msk [vmem:[#allocation3 + $0x288] sm:$0xff] %vm3656_vm1, %v3866_v1  ;;  %3977 = vst.msk [vmem:[#allocation3 + $0x200] sm:$0xff] %vm3656_vm1, %v3849_v9 }
 0x27d   : > { %3993 = vst.msk [vmem:[#allocation3 + $0x280] sm:$0xff] %vm3656_vm1, %v3865_v36 }
 0x27e   : > { %v13633_v38 = vpop.f32.mrb[196].mxu0 }
 0x27f   : > { %v13673_v11 = vpop.f32.mrb[196].mxu1  ;;  %v2862_v12 = vpop.f32.mrb[197].mxu0 }
 0x280   : > { %v3047_v13 = vpop.f32.mrb[197].mxu1  ;;  %v13634_v14 = vpop.f32.mrb[198].mxu0 }
 0x281   : > { %v3852_v15 = vpack.c.bf16 %v13634_v14, %v13633_v38  ;;  %v13674_v16 = vpop.f32.mrb[198].mxu1  ;;  %v2865_v24 = vpop.f32.mrb[199].mxu0 }
 0x282   : > { %v3868_v19 = vpack.c.bf16 %v13674_v16, %v13673_v11  ;;  %v3851_v20 = vpack.c.bf16 %v2865_v24, %v2862_v12  ;;  %v3050_v31 = vpop.f32.mrb[199].mxu1 }
 0x283   : > { %3980 = vst.msk [vmem:[#allocation3 + $0x218] sm:$0xff] %vm3656_vm1, %v3852_v15  ;;  %v3867_v43 = vpack.c.bf16 %v3050_v31, %v3047_v13 }
 0x284   : > { %3996 = vst.msk [vmem:[#allocation3 + $0x298] sm:$0xff] %vm3656_vm1, %v3868_v19  ;;  %3979 = vst.msk [vmem:[#allocation3 + $0x210] sm:$0xff] %vm3656_vm1, %v3851_v20 }
 0x285   : > { %3995 = vst.msk [vmem:[#allocation3 + $0x290] sm:$0xff] %vm3656_vm1, %v3867_v43 }
 0x286   : > { %v13637_v44 = vpop.f32.mrb[200].mxu0 }
 0x287   : > { %v13677_v21 = vpop.f32.mrb[200].mxu1  ;;  %v2878_v22 = vpop.f32.mrb[201].mxu0 }
 0x288   : > { %v3063_v23 = vpop.f32.mrb[201].mxu1  ;;  %v13638_v25 = vpop.f32.mrb[202].mxu0 }
 0x289   : > { %v3854_v26 = vpack.c.bf16 %v13638_v25, %v13637_v44  ;;  %v13678_v32 = vpop.f32.mrb[202].mxu1  ;;  %v2881_v40 = vpop.f32.mrb[203].mxu0 }
 0x28a   : > { %v3870_v33 = vpack.c.bf16 %v13678_v32, %v13677_v21  ;;  %v3853_v10 = vpack.c.bf16 %v2881_v40, %v2878_v22  ;;  %v3066_v34 = vpop.f32.mrb[203].mxu1 }
 0x28b   : > { %3982 = vst.msk [vmem:[#allocation3 + $0x228] sm:$0xff] %vm3656_vm1, %v3854_v26  ;;  %v3869_v49 = vpack.c.bf16 %v3066_v34, %v3063_v23 }
 0x28c   : > { %3998 = vst.msk [vmem:[#allocation3 + $0x2a8] sm:$0xff] %vm3656_vm1, %v3870_v33  ;;  %3981 = vst.msk [vmem:[#allocation3 + $0x220] sm:$0xff] %vm3656_vm1, %v3853_v10 }
 0x28d   : > { %3997 = vst.msk [vmem:[#allocation3 + $0x2a0] sm:$0xff] %vm3656_vm1, %v3869_v49 }
 0x28e   : > { %v13641_v50 = vpop.f32.mrb[204].mxu0 }
 0x28f   : > { %v13681_v45 = vpop.f32.mrb[204].mxu1  ;;  %v2894_v35 = vpop.f32.mrb[205].mxu0 }
 0x290   : > { %v3079_v37 = vpop.f32.mrb[205].mxu1  ;;  %v13642_v39 = vpop.f32.mrb[206].mxu0 }
 0x291   : > { %v3856_v41 = vpack.c.bf16 %v13642_v39, %v13641_v50  ;;  %v13682_v42 = vpop.f32.mrb[206].mxu1  ;;  %v2897_v46 = vpop.f32.mrb[207].mxu0 }
 0x292   : > { %v3872_v47 = vpack.c.bf16 %v13682_v42, %v13681_v45  ;;  %v3855_v48 = vpack.c.bf16 %v2897_v46, %v2894_v35  ;;  %v3082_v17 = vpop.f32.mrb[207].mxu1 }
 0x293   : > { %3984 = vst.msk [vmem:[#allocation3 + $0x238] sm:$0xff] %vm3656_vm1, %v3856_v41  ;;  %v3871_v55 = vpack.c.bf16 %v3082_v17, %v3079_v37 }
 0x294   : > { %4000 = vst.msk [vmem:[#allocation3 + $0x2b8] sm:$0xff] %vm3656_vm1, %v3872_v47  ;;  %3983 = vst.msk [vmem:[#allocation3 + $0x230] sm:$0xff] %vm3656_vm1, %v3855_v48 }
 0x295   : > { %3999 = vst.msk [vmem:[#allocation3 + $0x2b0] sm:$0xff] %vm3656_vm1, %v3871_v55 }
 0x296   : > { %v13645_v56 = vpop.f32.mrb[208].mxu0 }
 0x297   : > { %v13685_v18 = vpop.f32.mrb[208].mxu1  ;;  %v2910_v51 = vpop.f32.mrb[209].mxu0 }
 0x298   : > { %v3095_v52 = vpop.f32.mrb[209].mxu1  ;;  %v13646_v53 = vpop.f32.mrb[210].mxu0 }
 0x299   : > { %v3858_v54 = vpack.c.bf16 %v13646_v53, %v13645_v56  ;;  %v13686_v57 = vpop.f32.mrb[210].mxu1  ;;  %v2913_v58 = vpop.f32.mrb[211].mxu0 }
 0x29a   : > { %v3874_v59 = vpack.c.bf16 %v13686_v57, %v13685_v18  ;;  %v3857_v60 = vpack.c.bf16 %v2913_v58, %v2910_v51  ;;  %v3098_v63 = vpop.f32.mrb[211].mxu1 }
 0x29b   : > { %3986 = vst.msk [vmem:[#allocation3 + $0x248] sm:$0xff] %vm3656_vm1, %v3858_v54  ;;  %v3873_v61 = vpack.c.bf16 %v3098_v63, %v3095_v52 }
 0x29c   : > { %4002 = vst.msk [vmem:[#allocation3 + $0x2c8] sm:$0xff] %vm3656_vm1, %v3874_v59  ;;  %3985 = vst.msk [vmem:[#allocation3 + $0x240] sm:$0xff] %vm3656_vm1, %v3857_v60 }
 0x29d   : > { %4001 = vst.msk [vmem:[#allocation3 + $0x2c0] sm:$0xff] %vm3656_vm1, %v3873_v61 }
 0x29e   : > { %v13649_v62 = vpop.f32.mrb[212].mxu0 }
 0x29f   : > { %v13689_v0 = vpop.f32.mrb[212].mxu1  ;;  %v2926_v27 = vpop.f32.mrb[213].mxu0 }
 0x2a0   : > { %v3111_v28 = vpop.f32.mrb[213].mxu1  ;;  %v13650_v2 = vpop.f32.mrb[214].mxu0 }
 0x2a1   : > { %v3860_v3 = vpack.c.bf16 %v13650_v2, %v13649_v62  ;;  %v13690_v4 = vpop.f32.mrb[214].mxu1  ;;  %v2929_v5 = vpop.f32.mrb[215].mxu0 }
 0x2a2   : > { %v3876_v6 = vpack.c.bf16 %v13690_v4, %v13689_v0  ;;  %v3859_v7 = vpack.c.bf16 %v2929_v5, %v2926_v27  ;;  %v3114_v29 = vpop.f32.mrb[215].mxu1 }
 0x2a3   : > { %3988 = vst.msk [vmem:[#allocation3 + $0x258] sm:$0xff] %vm3656_vm1, %v3860_v3  ;;  %v3875_v8 = vpack.c.bf16 %v3114_v29, %v3111_v28 }
 0x2a4   : > { %4004 = vst.msk [vmem:[#allocation3 + $0x2d8] sm:$0xff] %vm3656_vm1, %v3876_v6  ;;  %3987 = vst.msk [vmem:[#allocation3 + $0x250] sm:$0xff] %vm3656_vm1, %v3859_v7 }
 0x2a5   : > { %4003 = vst.msk [vmem:[#allocation3 + $0x2d0] sm:$0xff] %vm3656_vm1, %v3875_v8 }
 0x2a6   : > { %v13653_v1 = vpop.f32.mrb[216].mxu0 }
 0x2a7   : > { %v13693_v9 = vpop.f32.mrb[216].mxu1  ;;  %v2942_v30 = vpop.f32.mrb[217].mxu0 }
 0x2a8   : > { %v3127_v36 = vpop.f32.mrb[217].mxu1  ;;  %v13654_v38 = vpop.f32.mrb[218].mxu0 }
 0x2a9   : > { %v3862_v11 = vpack.c.bf16 %v13654_v38, %v13653_v1  ;;  %v13694_v12 = vpop.f32.mrb[218].mxu1  ;;  %v2945_v13 = vpop.f32.mrb[219].mxu0 }
 0x2aa   : > { %v3878_v14 = vpack.c.bf16 %v13694_v12, %v13693_v9  ;;  %v3861_v15 = vpack.c.bf16 %v2945_v13, %v2942_v30  ;;  %v3130_v16 = vpop.f32.mrb[219].mxu1 }
 0x2ab   : > { %3990 = vst.msk [vmem:[#allocation3 + $0x268] sm:$0xff] %vm3656_vm1, %v3862_v11  ;;  %v3877_v24 = vpack.c.bf16 %v3130_v16, %v3127_v36 }
 0x2ac   : > { %4006 = vst.msk [vmem:[#allocation3 + $0x2e8] sm:$0xff] %vm3656_vm1, %v3878_v14  ;;  %3989 = vst.msk [vmem:[#allocation3 + $0x260] sm:$0xff] %vm3656_vm1, %v3861_v15 }
 0x2ad   : > { %4005 = vst.msk [vmem:[#allocation3 + $0x2e0] sm:$0xff] %vm3656_vm1, %v3877_v24 }
 0x2ae   : > { %v13657_v19 = vpop.f32.mrb[220].mxu0 }
 0x2af   : > { %v13697_v20 = vpop.f32.mrb[220].mxu1  ;;  %v2958_v31 = vpop.f32.mrb[221].mxu0 }
 0x2b0   : > { %v3143_v43 = vpop.f32.mrb[221].mxu1  ;;  %v13658_v44 = vpop.f32.mrb[222].mxu0 }
 0x2b1   : > { %v3864_v21 = vpack.c.bf16 %v13658_v44, %v13657_v19  ;;  %v13698_v22 = vpop.f32.mrb[222].mxu1  ;;  %v2961_v23 = vpop.f32.mrb[223].mxu0 }
 0x2b2   : > { %v3880_v25 = vpack.c.bf16 %v13698_v22, %v13697_v20  ;;  %v3863_v26 = vpack.c.bf16 %v2961_v23, %v2958_v31  ;;  %v3146_v32 = vpop.f32.mrb[223].mxu1 }
 0x2b3   : > { %3992 = vst.msk [vmem:[#allocation3 + $0x278] sm:$0xff] %vm3656_vm1, %v3864_v21  ;;  %v3879_v40 = vpack.c.bf16 %v3146_v32, %v3143_v43 }
 0x2b4   : > { %4008 = vst.msk [vmem:[#allocation3 + $0x2f8] sm:$0xff] %vm3656_vm1, %v3880_v25  ;;  %3991 = vst.msk [vmem:[#allocation3 + $0x270] sm:$0xff] %vm3656_vm1, %v3863_v26 }
 0x2b5   : > { %4007 = vst.msk [vmem:[#allocation3 + $0x2f0] sm:$0xff] %vm3656_vm1, %v3879_v40 }
 0x2b6   : > { %v13709_v33 = vpop.f32.mrb[224].mxu0 }
 0x2b7   : > { %v13749_v10 = vpop.f32.mrb[224].mxu1  ;;  %v3216_v34 = vpop.f32.mrb[225].mxu0 }
 0x2b8   : > { %v3401_v49 = vpop.f32.mrb[225].mxu1  ;;  %v13710_v50 = vpop.f32.mrb[226].mxu0 }
 0x2b9   : > { %v3882_v45 = vpack.c.bf16 %v13710_v50, %v13709_v33  ;;  %v13750_v35 = vpop.f32.mrb[226].mxu1  ;;  %v3219_v37 = vpop.f32.mrb[227].mxu0 }
 0x2ba   : > { %v3898_v39 = vpack.c.bf16 %v13750_v35, %v13749_v10  ;;  %v3881_v41 = vpack.c.bf16 %v3219_v37, %v3216_v34  ;;  %v3404_v42 = vpop.f32.mrb[227].mxu1 }
 0x2bb   : > { %4010 = vst.msk [vmem:[#allocation3 + $0x308] sm:$0xff] %vm3656_vm1, %v3882_v45  ;;  %v3897_v46 = vpack.c.bf16 %v3404_v42, %v3401_v49 }
 0x2bc   : > { %4026 = vst.msk [vmem:[#allocation3 + $0x388] sm:$0xff] %vm3656_vm1, %v3898_v39  ;;  %4009 = vst.msk [vmem:[#allocation3 + $0x300] sm:$0xff] %vm3656_vm1, %v3881_v41 }
 0x2bd   : > { %4025 = vst.msk [vmem:[#allocation3 + $0x380] sm:$0xff] %vm3656_vm1, %v3897_v46 }
 0x2be   : > { %v13713_v47 = vpop.f32.mrb[228].mxu0 }
 0x2bf   : > { %v13753_v48 = vpop.f32.mrb[228].mxu1  ;;  %v3232_v17 = vpop.f32.mrb[229].mxu0 }
 0x2c0   : > { %v3417_v55 = vpop.f32.mrb[229].mxu1  ;;  %v13714_v56 = vpop.f32.mrb[230].mxu0 }
 0x2c1   : > { %v3884_v18 = vpack.c.bf16 %v13714_v56, %v13713_v47  ;;  %v13754_v51 = vpop.f32.mrb[230].mxu1  ;;  %v3235_v52 = vpop.f32.mrb[231].mxu0 }
 0x2c2   : > { %v3900_v53 = vpack.c.bf16 %v13754_v51, %v13753_v48  ;;  %v3883_v54 = vpack.c.bf16 %v3235_v52, %v3232_v17  ;;  %v3420_v57 = vpop.f32.mrb[231].mxu1 }
 0x2c3   : > { %4012 = vst.msk [vmem:[#allocation3 + $0x318] sm:$0xff] %vm3656_vm1, %v3884_v18  ;;  %v3899_v58 = vpack.c.bf16 %v3420_v57, %v3417_v55 }
 0x2c4   : > { %4028 = vst.msk [vmem:[#allocation3 + $0x398] sm:$0xff] %vm3656_vm1, %v3900_v53  ;;  %4011 = vst.msk [vmem:[#allocation3 + $0x310] sm:$0xff] %vm3656_vm1, %v3883_v54 }
 0x2c5   : > { %4027 = vst.msk [vmem:[#allocation3 + $0x390] sm:$0xff] %vm3656_vm1, %v3899_v58 }
 0x2c6   : > { %v13717_v59 = vpop.f32.mrb[232].mxu0 }
 0x2c7   : > { %v13757_v60 = vpop.f32.mrb[232].mxu1  ;;  %v3248_v63 = vpop.f32.mrb[233].mxu0 }
 0x2c8   : > { %v3433_v61 = vpop.f32.mrb[233].mxu1  ;;  %v13718_v62 = vpop.f32.mrb[234].mxu0 }
 0x2c9   : > { %v3886_v0 = vpack.c.bf16 %v13718_v62, %v13717_v59  ;;  %v13758_v27 = vpop.f32.mrb[234].mxu1  ;;  %v3251_v28 = vpop.f32.mrb[235].mxu0 }
 0x2ca   : > { %v3902_v2 = vpack.c.bf16 %v13758_v27, %v13757_v60  ;;  %v3885_v3 = vpack.c.bf16 %v3251_v28, %v3248_v63  ;;  %v3436_v4 = vpop.f32.mrb[235].mxu1 }
 0x2cb   : > { %4014 = vst.msk [vmem:[#allocation3 + $0x328] sm:$0xff] %vm3656_vm1, %v3886_v0  ;;  %v3901_v5 = vpack.c.bf16 %v3436_v4, %v3433_v61 }
 0x2cc   : > { %4030 = vst.msk [vmem:[#allocation3 + $0x3a8] sm:$0xff] %vm3656_vm1, %v3902_v2  ;;  %4013 = vst.msk [vmem:[#allocation3 + $0x320] sm:$0xff] %vm3656_vm1, %v3885_v3 }
 0x2cd   : > { %4029 = vst.msk [vmem:[#allocation3 + $0x3a0] sm:$0xff] %vm3656_vm1, %v3901_v5 }
 0x2ce   : > { %v13721_v6 = vpop.f32.mrb[236].mxu0 }
 0x2cf   : > { %v13761_v7 = vpop.f32.mrb[236].mxu1  ;;  %v3264_v29 = vpop.f32.mrb[237].mxu0 }
 0x2d0   : > { %v3449_v8 = vpop.f32.mrb[237].mxu1  ;;  %v13722_v1 = vpop.f32.mrb[238].mxu0 }
 0x2d1   : > { %v3888_v9 = vpack.c.bf16 %v13722_v1, %v13721_v6  ;;  %v13762_v30 = vpop.f32.mrb[238].mxu1  ;;  %v3267_v36 = vpop.f32.mrb[239].mxu0 }
 0x2d2   : > { %v3904_v38 = vpack.c.bf16 %v13762_v30, %v13761_v7  ;;  %v3887_v11 = vpack.c.bf16 %v3267_v36, %v3264_v29  ;;  %v3452_v12 = vpop.f32.mrb[239].mxu1 }
 0x2d3   : > { %4016 = vst.msk [vmem:[#allocation3 + $0x338] sm:$0xff] %vm3656_vm1, %v3888_v9  ;;  %v3903_v13 = vpack.c.bf16 %v3452_v12, %v3449_v8 }
 0x2d4   : > { %4032 = vst.msk [vmem:[#allocation3 + $0x3b8] sm:$0xff] %vm3656_vm1, %v3904_v38  ;;  %4015 = vst.msk [vmem:[#allocation3 + $0x330] sm:$0xff] %vm3656_vm1, %v3887_v11 }
 0x2d5   : > { %4031 = vst.msk [vmem:[#allocation3 + $0x3b0] sm:$0xff] %vm3656_vm1, %v3903_v13 }
 0x2d6   : > { %v13725_v14 = vpop.f32.mrb[240].mxu0 }
 0x2d7   : > { %v13765_v15 = vpop.f32.mrb[240].mxu1  ;;  %v3280_v16 = vpop.f32.mrb[241].mxu0 }
 0x2d8   : > { %v3465_v24 = vpop.f32.mrb[241].mxu1  ;;  %v13726_v19 = vpop.f32.mrb[242].mxu0 }
 0x2d9   : > { %v3890_v20 = vpack.c.bf16 %v13726_v19, %v13725_v14  ;;  %v13766_v31 = vpop.f32.mrb[242].mxu1  ;;  %v3283_v43 = vpop.f32.mrb[243].mxu0 }
 0x2da   : > { %v3906_v44 = vpack.c.bf16 %v13766_v31, %v13765_v15  ;;  %v3889_v21 = vpack.c.bf16 %v3283_v43, %v3280_v16  ;;  %v3468_v22 = vpop.f32.mrb[243].mxu1 }
 0x2db   : > { %4018 = vst.msk [vmem:[#allocation3 + $0x348] sm:$0xff] %vm3656_vm1, %v3890_v20  ;;  %v3905_v23 = vpack.c.bf16 %v3468_v22, %v3465_v24 }
 0x2dc   : > { %4034 = vst.msk [vmem:[#allocation3 + $0x3c8] sm:$0xff] %vm3656_vm1, %v3906_v44  ;;  %4017 = vst.msk [vmem:[#allocation3 + $0x340] sm:$0xff] %vm3656_vm1, %v3889_v21 }
 0x2dd   : > { %4033 = vst.msk [vmem:[#allocation3 + $0x3c0] sm:$0xff] %vm3656_vm1, %v3905_v23 }
 0x2de   : > { %v13729_v25 = vpop.f32.mrb[244].mxu0 }
 0x2df   : > { %v13769_v26 = vpop.f32.mrb[244].mxu1  ;;  %v3296_v32 = vpop.f32.mrb[245].mxu0 }
 0x2e0   : > { %v3481_v40 = vpop.f32.mrb[245].mxu1  ;;  %v13730_v33 = vpop.f32.mrb[246].mxu0 }
 0x2e1   : > { %v3892_v10 = vpack.c.bf16 %v13730_v33, %v13729_v25  ;;  %v13770_v34 = vpop.f32.mrb[246].mxu1  ;;  %v3299_v49 = vpop.f32.mrb[247].mxu0 }
 0x2e2   : > { %v3908_v50 = vpack.c.bf16 %v13770_v34, %v13769_v26  ;;  %v3891_v45 = vpack.c.bf16 %v3299_v49, %v3296_v32  ;;  %v3484_v35 = vpop.f32.mrb[247].mxu1 }
 0x2e3   : > { %4020 = vst.msk [vmem:[#allocation3 + $0x358] sm:$0xff] %vm3656_vm1, %v3892_v10  ;;  %v3907_v37 = vpack.c.bf16 %v3484_v35, %v3481_v40 }
 0x2e4   : > { %4036 = vst.msk [vmem:[#allocation3 + $0x3d8] sm:$0xff] %vm3656_vm1, %v3908_v50  ;;  %4019 = vst.msk [vmem:[#allocation3 + $0x350] sm:$0xff] %vm3656_vm1, %v3891_v45 }
 0x2e5   : > { %4035 = vst.msk [vmem:[#allocation3 + $0x3d0] sm:$0xff] %vm3656_vm1, %v3907_v37 }
 0x2e6   : > { %v13733_v39 = vpop.f32.mrb[248].mxu0 }
 0x2e7   : > { %v13773_v41 = vpop.f32.mrb[248].mxu1  ;;  %v3312_v42 = vpop.f32.mrb[249].mxu0 }
 0x2e8   : > { %v3497_v46 = vpop.f32.mrb[249].mxu1  ;;  %v13734_v47 = vpop.f32.mrb[250].mxu0 }
 0x2e9   : > { %v3894_v48 = vpack.c.bf16 %v13734_v47, %v13733_v39  ;;  %v13774_v17 = vpop.f32.mrb[250].mxu1  ;;  %v3315_v55 = vpop.f32.mrb[251].mxu0 }
 0x2ea   : > { %v3910_v56 = vpack.c.bf16 %v13774_v17, %v13773_v41  ;;  %v3893_v18 = vpack.c.bf16 %v3315_v55, %v3312_v42  ;;  %v3500_v51 = vpop.f32.mrb[251].mxu1 }
 0x2eb   : > { %4022 = vst.msk [vmem:[#allocation3 + $0x368] sm:$0xff] %vm3656_vm1, %v3894_v48  ;;  %v3909_v52 = vpack.c.bf16 %v3500_v51, %v3497_v46 }
 0x2ec   : > { %4038 = vst.msk [vmem:[#allocation3 + $0x3e8] sm:$0xff] %vm3656_vm1, %v3910_v56  ;;  %4021 = vst.msk [vmem:[#allocation3 + $0x360] sm:$0xff] %vm3656_vm1, %v3893_v18 }
 0x2ed   : > { %4037 = vst.msk [vmem:[#allocation3 + $0x3e0] sm:$0xff] %vm3656_vm1, %v3909_v52 }
 0x2ee   : > { %v13737_v53 = vpop.f32.mrb[252].mxu0 }
 0x2ef   : > { %v13777_v54 = vpop.f32.mrb[252].mxu1  ;;  %v3328_v57 = vpop.f32.mrb[253].mxu0 }
 0x2f0   : > { %v3513_v58 = vpop.f32.mrb[253].mxu1  ;;  %v13738_v59 = vpop.f32.mrb[254].mxu0 }
 0x2f1   : > { %v3896_v60 = vpack.c.bf16 %v13738_v59, %v13737_v53  ;;  %v13778_v63 = vpop.f32.mrb[254].mxu1  ;;  %v3331_v61 = vpop.f32.mrb[255].mxu0 }
 0x2f2   : > { %v3912_v62 = vpack.c.bf16 %v13778_v63, %v13777_v54  ;;  %v3895_v0 = vpack.c.bf16 %v3331_v61, %v3328_v57  ;;  %v3516_v27 = vpop.f32.mrb[255].mxu1 }
 0x2f3   : > { %4024 = vst.msk [vmem:[#allocation3 + $0x378] sm:$0xff] %vm3656_vm1, %v3896_v60  ;;  %v3911_v28 = vpack.c.bf16 %v3516_v27, %v3513_v58 }
 0x2f4   : > { %4040 = vst.msk [vmem:[#allocation3 + $0x3f8] sm:$0xff] %vm3656_vm1, %v3912_v62  ;;  %4023 = vst.msk [vmem:[#allocation3 + $0x370] sm:$0xff] %vm3656_vm1, %v3895_v0 }
 0x2f5   : > { %4039 = vst.msk [vmem:[#allocation3 + $0x3f0] sm:$0xff] %vm3656_vm1, %v3911_v28 }
 0x2f6 PF: > { %v14291_v2 = vld [vmem:[%s20637_s2] sm:$0xff]   ;;  %v14293_v4 = vld [vmem:[%s20637_s2 + $0x8] sm:$0xff]   ;;  %v14295_v6 = vld [vmem:[%s20637_s2 + $0x10] sm:$0xff]   ;;  %vm4153_vm2 = vcmask 523264   ;;  %vm5570_vm3 = vcmask 64512   ;;  %vm9971_vm4 = vcmask 1043456  }
 0x2f7   : > { %v14292_v3 = vld [vmem:[%s20637_s2 + $0x20] sm:$0xff]   ;;  %13779 = vmatprep.subr.bf16.mxu0 %v14291_v2  ;;  %v14294_v5 = vld [vmem:[%s20637_s2 + $0x28] sm:$0xff]   ;;  %v14296_v7 = vld [vmem:[%s20637_s2 + $0x30] sm:$0xff]  }
 0x2f8   : > { %13803 = vmatprep.subr.bf16.mxu1 %v14292_v3  ;;  %13780 = vmatpush3.bf16.msra.mxu0 %v14291_v2  ;;  %v14297_v29 = vld [vmem:[%s20637_s2 + $0x18] sm:$0xff]   ;;  %v4041_v8 = vld [vmem:[%s15209_s18] sm:$0xff]  ;;  %v4042_v1 = vld [vmem:[%s15209_s18 + $0x8] sm:$0xff] }
 0x2f9   : > { %13804 = vmatpush3.bf16.msra.mxu1 %v14292_v3  ;;  %13781 = vmatprep.subr.bf16.mxu0 %v14293_v4  ;;  %v14298_v9 = vld [vmem:[%s20637_s2 + $0x38] sm:$0xff]   ;;  %v16294_v30 = vpack.c.bf16 %v4042_v1, %v4041_v8  ;;  %v4043_v36 = vld [vmem:[%s15209_s18 + $0x10] sm:$0xff]  ;;  %v4045_v11 = vld [vmem:[%s15209_s18 + $0x20] sm:$0xff] }
 0x2fa   : > { %13805 = vmatprep.subr.bf16.mxu1 %v14294_v5  ;;  %v4044_v38 = vld [vmem:[%s15209_s18 + $0x18] sm:$0xff]  ;;  %v4046_v12 = vld [vmem:[%s15209_s18 + $0x28] sm:$0xff]  ;;  %v14299_v13 = vld [vmem:[%s20637_s2 + $0x40] sm:$0xff]  }
 0x2fb   : > { %13787 = vmatprep.mubr.msk.bf16.mxu0 %vm4153_vm2, %v16294_v30  ;;  %13811 = vmatprep.mubr.msk.bf16.mxu1 %vm4153_vm2, %v16294_v30  ;;  %v14300_v14 = vld [vmem:[%s20637_s2 + $0x60] sm:$0xff]   ;;  %v16310_v15 = vpack.c.bf16 %v4044_v38, %v4043_v36  ;;  %v16312_v16 = vpack.c.bf16 %v4046_v12, %v4045_v11  ;;  %v4047_v24 = vld [vmem:[%s15209_s18 + $0x30] sm:$0xff]  ;;  %v4048_v19 = vld [vmem:[%s15209_s18 + $0x38] sm:$0xff] }
 0x2fc   : > { %13782 = vmatpush3.bf16.msra.mxu0 %v14293_v4  ;;  %v14301_v20 = vld [vmem:[%s20637_s2 + $0x48] sm:$0xff]   ;;  %v4049_v43 = vld [vmem:[%s15209_s18 + $0x40] sm:$0xff]  ;;  %v14303_v21 = vld [vmem:[%s20637_s2 + $0x50] sm:$0xff]   ;;  %v16335_v22 = vpack.c.bf16 %v4048_v19, %v4047_v24 }
 0x2fd   : > { %13806 = vmatpush3.bf16.msra.mxu1 %v14294_v5  ;;  %13783 = vmatprep.subr.bf16.mxu0 %v14295_v6  ;;  %v14302_v31 = vld [vmem:[%s20637_s2 + $0x68] sm:$0xff]   ;;  %v14304_v23 = vld [vmem:[%s20637_s2 + $0x70] sm:$0xff]   ;;  %v4052_v32 = vld [vmem:[%s15209_s18 + $0x58] sm:$0xff] }
 0x2fe   : > { %13807 = vmatprep.subr.bf16.mxu1 %v14296_v7  ;;  %v4050_v44 = vld [vmem:[%s15209_s18 + $0x48] sm:$0xff]  ;;  %v4051_v26 = vld [vmem:[%s15209_s18 + $0x50] sm:$0xff]  ;;  %v14305_v40 = vld [vmem:[%s20637_s2 + $0x58] sm:$0xff]  }
 0x2ff   : > { %v16340_v25 = vpack.c.bf16 %v4050_v44, %v4049_v43  ;;  %v14306_v33 = vld [vmem:[%s20637_s2 + $0x78] sm:$0xff]   ;;  %v4053_v10 = vld [vmem:[%s15209_s18 + $0x60] sm:$0xff]  ;;  %v4054_v34 = vld [vmem:[%s15209_s18 + $0x68] sm:$0xff]  ;;  %v16363_v50 = vpack.c.bf16 %v4052_v32, %v4051_v26 }
 0x300   : > { %13784 = vmatpush3.bf16.msra.mxu0 %v14295_v6  ;;  %v14307_v49 = vld [vmem:[%s20637_s2 + $0x80] sm:$0xff]   ;;  %v16368_v35 = vpack.c.bf16 %v4054_v34, %v4053_v10  ;;  %v4055_v37 = vld [vmem:[%s15209_s18 + $0x70] sm:$0xff]  ;;  %v4056_v39 = vld [vmem:[%s15209_s18 + $0x78] sm:$0xff] }
 0x301   : > { %13808 = vmatpush3.bf16.msra.mxu1 %v14296_v7  ;;  %13785 = vmatprep.subr.bf16.mxu0 %v14297_v29  ;;  %v14308_v45 = vld [vmem:[%s20637_s2 + $0xa0] sm:$0xff]   ;;  %v16380_v41 = vpack.c.bf16 %v4056_v39, %v4055_v37  ;;  %v14309_v42 = vld [vmem:[%s20637_s2 + $0x88] sm:$0xff]   ;;  %v14311_v47 = vld [vmem:[%s20637_s2 + $0x90] sm:$0xff]  }
 0x302   : > { %13809 = vmatprep.subr.bf16.mxu1 %v14298_v9  ;;  %v14310_v46 = vld [vmem:[%s20637_s2 + $0xa8] sm:$0xff]   ;;  %v14312_v48 = vld [vmem:[%s20637_s2 + $0xb0] sm:$0xff]   ;;  %v14313_v17 = vld [vmem:[%s20637_s2 + $0x98] sm:$0xff]  }
 0x303   : > { %v14314_v55 = vld [vmem:[%s20637_s2 + $0xb8] sm:$0xff]   ;;  %v14315_v56 = vld [vmem:[%s20637_s2 + $0xc0] sm:$0xff]   ;;  %v14317_v51 = vld [vmem:[%s20637_s2 + $0xc8] sm:$0xff]  }
 0x304   : > { %13786 = vmatpush3.bf16.msra.mxu0 %v14297_v29  ;;  %v14316_v18 = vld [vmem:[%s20637_s2 + $0xe0] sm:$0xff]   ;;  %v14318_v52 = vld [vmem:[%s20637_s2 + $0xe8] sm:$0xff]   ;;  %v14319_v53 = vld [vmem:[%s20637_s2 + $0xd0] sm:$0xff]  }
 0x305   : > { %13810 = vmatpush3.bf16.msra.mxu1 %v14298_v9  ;;  %13827 = vmatprep.subr.bf16.mxu0 %v14299_v13  ;;  %v14320_v54 = vld [vmem:[%s20637_s2 + $0xf0] sm:$0xff]   ;;  %v14321_v57 = vld [vmem:[%s20637_s2 + $0xd8] sm:$0xff]   ;;  %v5322_v59 = vld [vmem:[#allocation2 + $0x40] sm:$0xff] }
 0x306   : > { %13851 = vmatprep.subr.bf16.mxu1 %v14300_v14  ;;  %v14322_v58 = vld [vmem:[%s20637_s2 + $0xf8] sm:$0xff]   ;;  %v5338_v60 = vld [vmem:[#allocation2 + $0xc0] sm:$0xff]  ;;  %v5323_v27 = vld [vmem:[#allocation2 + $0x48] sm:$0xff] }
 0x307   : > { %13788 = vmatmul.mubr.msk.bf16.vlgmr.msra.gmra.mrb[0].mxu0 %vm4153_vm2, %v16310_v15  ;;  %v5314_v63 = vld [vmem:[#allocation2] sm:$0xff]  ;;  %v5339_v28 = vld [vmem:[#allocation2 + $0xc8] sm:$0xff]  ;;  %v5324_v6 = vld [vmem:[#allocation2 + $0x50] sm:$0xff] }
 0x308   : > { %13812 = vmatmul.mubr.msk.bf16.vlgmr.msra.gmra.mrb[0].mxu1 %vm4153_vm2, %v16310_v15  ;;  %13791 = vmatprep.mubr.msk.bf16.mxu0 %vm4153_vm2, %v16312_v16  ;;  %v5330_v61 = vld [vmem:[#allocation2 + $0x80] sm:$0xff]  ;;  %v5596_v62 = vsel %vm5570_vm3, %v5314_v63, 0  ;;  %v5315_v2 = vld [vmem:[#allocation2 + $0x8] sm:$0xff]  ;;  %v5340_v7 = vld [vmem:[#allocation2 + $0xd0] sm:$0xff] }
 0x309   : > { %13815 = vmatprep.mubr.msk.bf16.mxu1 %vm4153_vm2, %v16312_v16  ;;  %13828 = vmatpush3.bf16.msra.mxu0 %v14299_v13  ;;  %v5781_v0 = vsel %vm5570_vm3, %v5330_v61, 0  ;;  %v5331_v3 = vld [vmem:[#allocation2 + $0x88] sm:$0xff]  ;;  %v5599_v4 = vsel %vm5570_vm3, %v5315_v2, 0  ;;  %v5316_v29 = vld [vmem:[#allocation2 + $0x10] sm:$0xff]  ;;  %v5341_v36 = vld [vmem:[#allocation2 + $0xd8] sm:$0xff] }
 0x30a   : > { %13852 = vmatpush3.bf16.msra.mxu1 %v14300_v14  ;;  %13829 = vmatprep.subr.bf16.mxu0 %v14301_v20  ;;  %v5784_v5 = vsel %vm5570_vm3, %v5331_v3, 0  ;;  %v5332_v8 = vld [vmem:[#allocation2 + $0x90] sm:$0xff]  ;;  %v5602_v1 = vsel %vm5570_vm3, %v5316_v29, 0  ;;  %v5317_v38 = vld [vmem:[#allocation2 + $0x18] sm:$0xff]  ;;  %v5326_v14 = vld [vmem:[#allocation2 + $0x60] sm:$0xff] }
 0x30b   : > { %13853 = vmatprep.subr.bf16.mxu1 %v14302_v31  ;;  %v5787_v9 = vsel %vm5570_vm3, %v5332_v8, 0  ;;  %v5333_v11 = vld [vmem:[#allocation2 + $0x98] sm:$0xff]  ;;  %v5605_v12 = vsel %vm5570_vm3, %v5317_v38, 0  ;;  %v5334_v24 = vld [vmem:[#allocation2 + $0xa0] sm:$0xff]  ;;  %v5343_v43 = vld [vmem:[#allocation2 + $0xe8] sm:$0xff] }
 0x30c   : > { %v5790_v13 = vsel %vm5570_vm3, %v5333_v11, 0  ;;  %v5319_v44 = vld [vmem:[#allocation2 + $0x28] sm:$0xff]  ;;  %v5344_v26 = vld [vmem:[#allocation2 + $0xf0] sm:$0xff]  ;;  %v5329_v34 = vld [vmem:[#allocation2 + $0x78] sm:$0xff] }
 0x30d   : > { %13830 = vmatpush3.bf16.msra.mxu0 %v14301_v20  ;;  %v5793_v20 = vsel %vm5570_vm3, %v5334_v24, 0  ;;  %v5320_v32 = vld [vmem:[#allocation2 + $0x30] sm:$0xff]  ;;  %v5354_v39 = vld [vmem:[#allocation2 + $0x140] sm:$0xff]  ;;  %v5355_v29 = vld [vmem:[#allocation2 + $0x148] sm:$0xff] }
 0x30e   : > { %13854 = vmatpush3.bf16.msra.mxu1 %v14302_v31  ;;  %13831 = vmatprep.subr.bf16.mxu0 %v14303_v21  ;;  %v5327_v31 = vld [vmem:[#allocation2 + $0x68] sm:$0xff]  ;;  %v5346_v61 = vld [vmem:[#allocation2 + $0x100] sm:$0xff] }
 0x30f   : > { %13792 = vmatmul.mubr.msk.bf16.gmra.mrb[4].mxu0 %vm4153_vm2, %v16335_v22  ;;  %13855 = vmatprep.subr.bf16.mxu1 %v14304_v23  ;;  %v5966_v2 = vsel %vm5570_vm3, %v5346_v61, 0  ;;  %v5371_v8 = vld [vmem:[#allocation2 + $0x1c8] sm:$0xff] }
 0x310   : > { %13816 = vmatmul.mubr.msk.bf16.gmra.mrb[4].mxu1 %vm4153_vm2, %v16335_v22  ;;  %13795 = vmatprep.mubr.msk.bf16.mxu0 %vm4153_vm2, %v16340_v25 }
 0x311   : > { %13819 = vmatprep.mubr.msk.bf16.mxu1 %vm4153_vm2, %v16340_v25  ;;  %13832 = vmatpush3.bf16.msra.mxu0 %v14303_v21  ;;  %v5335_v21 = vld [vmem:[#allocation2 + $0xa8] sm:$0xff] }
 0x312   : > { %13856 = vmatpush3.bf16.msra.mxu1 %v14304_v23  ;;  %13833 = vmatprep.subr.bf16.mxu0 %v14305_v40  ;;  %v5796_v23 = vsel %vm5570_vm3, %v5335_v21, 0 }
 0x313   : > { %13857 = vmatprep.subr.bf16.mxu1 %v14306_v33 }
 0x315   : > { %13834 = vmatpush3.bf16.msra.mxu0 %v14305_v40  ;;  %v5336_v40 = vld [vmem:[#allocation2 + $0xb0] sm:$0xff] }
 0x316   : > { %13858 = vmatpush3.bf16.msra.mxu1 %v14306_v33  ;;  %13875 = vmatprep.subr.bf16.mxu0 %v14307_v49  ;;  %v5614_v33 = vsel %vm5570_vm3, %v5320_v32, 0  ;;  %v5799_v10 = vsel %vm5570_vm3, %v5336_v40, 0  ;;  %v5372_v32 = vld [vmem:[#allocation2 + $0x1d0] sm:$0xff] }
 0x317   : > { %13796 = vmatmul.mubr.msk.bf16.gmra.mrb[8].mxu0 %vm4153_vm2, %v16363_v50  ;;  %13899 = vmatprep.subr.bf16.mxu1 %v14308_v45 }
 0x318   : > { %13820 = vmatmul.mubr.msk.bf16.gmra.mrb[8].mxu1 %vm4153_vm2, %v16363_v50  ;;  %13799 = vmatprep.mubr.msk.bf16.mxu0 %vm4153_vm2, %v16368_v35 }
 0x319   : > { %13823 = vmatprep.mubr.msk.bf16.mxu1 %vm4153_vm2, %v16368_v35 }
 0x31f   : > { %13800 = vmatmul.mubr.msk.bf16.gmra.mrb[12].mxu0 %vm4153_vm2, %v16380_v41 }
 0x320   : > { %13824 = vmatmul.mubr.msk.bf16.gmra.mrb[12].mxu1 %vm4153_vm2, %v16380_v41  ;;  %13835 = vmatprep.mubr.msk.bf16.mxu0 %vm4153_vm2, %v16294_v30 }
 0x321   : > { %13859 = vmatprep.mubr.msk.bf16.mxu1 %vm4153_vm2, %v16294_v30 }
 0x327   : > { %13836 = vmatmul.mubr.msk.bf16.vlgmr.msra.gmra.mrb[16].mxu0 %vm4153_vm2, %v16310_v15 }
 0x328   : > { %13860 = vmatmul.mubr.msk.bf16.vlgmr.msra.gmra.mrb[16].mxu1 %vm4153_vm2, %v16310_v15  ;;  %13839 = vmatprep.mubr.msk.bf16.mxu0 %vm4153_vm2, %v16312_v16 }
 0x329   : > { %13863 = vmatprep.mubr.msk.bf16.mxu1 %vm4153_vm2, %v16312_v16  ;;  %13876 = vmatpush3.bf16.msra.mxu0 %v14307_v49  ;;  %v5345_v49 = vld [vmem:[#allocation2 + $0xf8] sm:$0xff] }
 0x32a   : > { %13900 = vmatpush3.bf16.msra.mxu1 %v14308_v45  ;;  %13877 = vmatprep.subr.bf16.mxu0 %v14309_v42  ;;  %v5337_v45 = vld [vmem:[#allocation2 + $0xb8] sm:$0xff] }
 0x32b   : > { %13901 = vmatprep.subr.bf16.mxu1 %v14310_v46  ;;  %v5802_v37 = vsel %vm5570_vm3, %v5337_v45, 0 }
 0x32d   : > { %13878 = vmatpush3.bf16.msra.mxu0 %v14309_v42 }
 0x32e   : > { %13902 = vmatpush3.bf16.msra.mxu1 %v14310_v46  ;;  %13879 = vmatprep.subr.bf16.mxu0 %v14311_v47 }
 0x32f   : > { %13840 = vmatmul.mubr.msk.bf16.gmra.mrb[20].mxu0 %vm4153_vm2, %v16335_v22  ;;  %13903 = vmatprep.subr.bf16.mxu1 %v14312_v48 }
 0x330   : > { %13864 = vmatmul.mubr.msk.bf16.gmra.mrb[20].mxu1 %vm4153_vm2, %v16335_v22  ;;  %13843 = vmatprep.mubr.msk.bf16.mxu0 %vm4153_vm2, %v16340_v25 }
 0x331   : > { %13867 = vmatprep.mubr.msk.bf16.mxu1 %vm4153_vm2, %v16340_v25  ;;  %13880 = vmatpush3.bf16.msra.mxu0 %v14311_v47 }
 0x332   : > { %13904 = vmatpush3.bf16.msra.mxu1 %v14312_v48  ;;  %13881 = vmatprep.subr.bf16.mxu0 %v14313_v17 }
 0x333   : > { %13905 = vmatprep.subr.bf16.mxu1 %v14314_v55 }
 0x335   : > { %13882 = vmatpush3.bf16.msra.mxu0 %v14313_v17 }
 0x336   : > { %13906 = vmatpush3.bf16.msra.mxu1 %v14314_v55  ;;  %13923 = vmatprep.subr.bf16.mxu0 %v14315_v56 }
 0x337   : > { %13844 = vmatmul.mubr.msk.bf16.gmra.mrb[24].mxu0 %vm4153_vm2, %v16363_v50  ;;  %13947 = vmatprep.subr.bf16.mxu1 %v14316_v18 }
 0x338   : > { %13868 = vmatmul.mubr.msk.bf16.gmra.mrb[24].mxu1 %vm4153_vm2, %v16363_v50  ;;  %13847 = vmatprep.mubr.msk.bf16.mxu0 %vm4153_vm2, %v16368_v35 }
 0x339   : > { %13871 = vmatprep.mubr.msk.bf16.mxu1 %vm4153_vm2, %v16368_v35 }
 0x33f   : > { %13848 = vmatmul.mubr.msk.bf16.gmra.mrb[28].mxu0 %vm4153_vm2, %v16380_v41 }
 0x340   : > { %13872 = vmatmul.mubr.msk.bf16.gmra.mrb[28].mxu1 %vm4153_vm2, %v16380_v41  ;;  %13883 = vmatprep.mubr.msk.bf16.mxu0 %vm4153_vm2, %v16294_v30 }
 0x341   : > { %13907 = vmatprep.mubr.msk.bf16.mxu1 %vm4153_vm2, %v16294_v30 }
 0x347   : > { %13884 = vmatmul.mubr.msk.bf16.vlgmr.msra.gmra.mrb[32].mxu0 %vm4153_vm2, %v16310_v15 }
 0x348   : > { %13908 = vmatmul.mubr.msk.bf16.vlgmr.msra.gmra.mrb[32].mxu1 %vm4153_vm2, %v16310_v15  ;;  %13924 = vmatpush3.bf16.msra.mxu0 %v14315_v56 }
 0x349   : > { %13948 = vmatpush3.bf16.msra.mxu1 %v14316_v18  ;;  %13887 = vmatprep.mubr.msk.bf16.mxu0 %vm4153_vm2, %v16312_v16 }
 0x34a   : > { %13911 = vmatprep.mubr.msk.bf16.mxu1 %vm4153_vm2, %v16312_v16  ;;  %13925 = vmatprep.subr.bf16.mxu0 %v14317_v51 }
 0x34b   : > { %13949 = vmatprep.subr.bf16.mxu1 %v14318_v52 }
 0x34c   : > { %13926 = vmatpush3.bf16.msra.mxu0 %v14317_v51 }
 0x34d   : > { %13950 = vmatpush3.bf16.msra.mxu1 %v14318_v52  ;;  %13927 = vmatprep.subr.bf16.mxu0 %v14319_v53 }
 0x34e   : > { %13951 = vmatprep.subr.bf16.mxu1 %v14320_v54 }
 0x34f   : > { %13888 = vmatmul.mubr.msk.bf16.gmra.mrb[36].mxu0 %vm4153_vm2, %v16335_v22 }
 0x350   : > { %13912 = vmatmul.mubr.msk.bf16.gmra.mrb[36].mxu1 %vm4153_vm2, %v16335_v22  ;;  %13891 = vmatprep.mubr.msk.bf16.mxu0 %vm4153_vm2, %v16340_v25 }
 0x351   : > { %13915 = vmatprep.mubr.msk.bf16.mxu1 %vm4153_vm2, %v16340_v25  ;;  %13928 = vmatpush3.bf16.msra.mxu0 %v14319_v53 }
 0x352   : > { %13952 = vmatpush3.bf16.msra.mxu1 %v14320_v54  ;;  %13929 = vmatprep.subr.bf16.mxu0 %v14321_v57 }
 0x353   : > { %13953 = vmatprep.subr.bf16.mxu1 %v14322_v58 }
 0x355   : > { %13930 = vmatpush3.bf16.msra.mxu0 %v14321_v57 }
 0x356   : > { %13954 = vmatpush3.bf16.msra.mxu1 %v14322_v58  ;;  %14115 = vmatprep.subr.msk.bf16.mxu0 %vm5570_vm3, %v5322_v59 }
 0x357   : > { %13892 = vmatmul.mubr.msk.bf16.gmra.mrb[40].mxu0 %vm4153_vm2, %v16363_v50  ;;  %14123 = vmatprep.subr.msk.bf16.mxu1 %vm5570_vm3, %v5338_v60 }
 0x358   : > { %13916 = vmatmul.mubr.msk.bf16.gmra.mrb[40].mxu1 %vm4153_vm2, %v16363_v50  ;;  %13895 = vmatprep.mubr.msk.bf16.mxu0 %vm4153_vm2, %v16368_v35 }
 0x359   : > { %13919 = vmatprep.mubr.msk.bf16.mxu1 %vm4153_vm2, %v16368_v35 }
 0x35f   : > { %13896 = vmatmul.mubr.msk.bf16.gmra.mrb[44].mxu0 %vm4153_vm2, %v16380_v41 }
 0x360   : > { %13920 = vmatmul.mubr.msk.bf16.gmra.mrb[44].mxu1 %vm4153_vm2, %v16380_v41  ;;  %13931 = vmatprep.mubr.msk.bf16.mxu0 %vm4153_vm2, %v16294_v30 }
 0x361   : > { %13955 = vmatprep.mubr.msk.bf16.mxu1 %vm4153_vm2, %v16294_v30  ;;  %v5325_v30 = vld [vmem:[#allocation2 + $0x58] sm:$0xff] }
 0x367   : > { %13932 = vmatmul.mubr.msk.bf16.vlgmr.msra.gmra.mrb[48].mxu0 %vm4153_vm2, %v16310_v15 }
 0x368   : > { %13956 = vmatmul.mubr.msk.bf16.vlgmr.msra.gmra.mrb[48].mxu1 %vm4153_vm2, %v16310_v15  ;;  %12300 = vmatpush3.bf16.xpose.msra.mxu0 %v5596_v62  ;;  %v5342_v15 = vld [vmem:[#allocation2 + $0xe0] sm:$0xff] }
 0x369   : > { %12332 = vmatpush3.bf16.xpose.msra.mxu1 %v5781_v0  ;;  %14116 = vmatprep.subr.msk.bf16.mxu0 %vm5570_vm3, %v5323_v27  ;;  %v5362_v62 = vld [vmem:[#allocation2 + $0x180] sm:$0xff] }
 0x36a   : > { %14124 = vmatprep.subr.msk.bf16.mxu1 %vm5570_vm3, %v5339_v28  ;;  %13935 = vmatprep.mubr.msk.bf16.mxu0 %vm4153_vm2, %v16312_v16  ;;  %v6151_v3 = vsel %vm5570_vm3, %v5362_v62, 0 }
 0x36b   : > { %13959 = vmatprep.mubr.msk.bf16.mxu1 %vm4153_vm2, %v16312_v16  ;;  %v5318_v16 = vld [vmem:[#allocation2 + $0x20] sm:$0xff] }
 0x36c   : > { %v5608_v19 = vsel %vm5570_vm3, %v5318_v16, 0 }
 0x36f   : > { %13936 = vmatmul.mubr.msk.bf16.gmra.mrb[52].mxu0 %vm4153_vm2, %v16335_v22 }
 0x370   : > { %12302 = vmatpush3.bf16.xpose.msra.mxu0 %v5599_v4  ;;  %13960 = vmatmul.mubr.msk.bf16.gmra.mrb[52].mxu1 %vm4153_vm2, %v16335_v22  ;;  %v5611_v22 = vsel %vm5570_vm3, %v5319_v44, 0 }
 0x371   : > { %12334 = vmatpush3.bf16.xpose.msra.mxu1 %v5784_v5  ;;  %14117 = vmatprep.subr.msk.bf16.mxu0 %vm5570_vm3, %v5324_v6 }
 0x372   : > { %14125 = vmatprep.subr.msk.bf16.mxu1 %vm5570_vm3, %v5340_v7  ;;  %13939 = vmatprep.mubr.msk.bf16.mxu0 %vm4153_vm2, %v16340_v25 }
 0x373   : > { %13963 = vmatprep.mubr.msk.bf16.mxu1 %vm4153_vm2, %v16340_v25  ;;  %v5328_v25 = vld [vmem:[#allocation2 + $0x70] sm:$0xff] }
 0x377   : > { %13940 = vmatmul.mubr.msk.bf16.gmra.mrb[56].mxu0 %vm4153_vm2, %v16363_v50 }
 0x378   : > { %12304 = vmatpush3.bf16.xpose.msra.mxu0 %v5602_v1  ;;  %13964 = vmatmul.mubr.msk.bf16.gmra.mrb[56].mxu1 %vm4153_vm2, %v16363_v50  ;;  %v5321_v50 = vld [vmem:[#allocation2 + $0x38] sm:$0xff] }
 0x379   : > { %12336 = vmatpush3.bf16.xpose.msra.mxu1 %v5787_v9  ;;  %14118 = vmatprep.subr.msk.bf16.mxu0 %vm5570_vm3, %v5325_v30 }
 0x37a   : > { %14126 = vmatprep.subr.msk.bf16.mxu1 %vm5570_vm3, %v5341_v36  ;;  %13943 = vmatprep.mubr.msk.bf16.mxu0 %vm4153_vm2, %v16368_v35 }
 0x37b   : > { %13967 = vmatprep.mubr.msk.bf16.mxu1 %vm4153_vm2, %v16368_v35  ;;  %v5617_v35 = vsel %vm5570_vm3, %v5321_v50, 0 }
 0x37f   : > { %13944 = vmatmul.mubr.msk.bf16.gmra.mrb[60].mxu0 %vm4153_vm2, %v16380_v41 }
 0x380   : > { %12306 = vmatpush3.bf16.xpose.msra.mxu0 %v5605_v12  ;;  %13968 = vmatmul.mubr.msk.bf16.gmra.mrb[60].mxu1 %vm4153_vm2, %v16380_v41  ;;  %v5370_v41 = vld [vmem:[#allocation2 + $0x1c0] sm:$0xff] }
 0x381   : > { %12338 = vmatpush3.bf16.xpose.msra.mxu1 %v5790_v13  ;;  %14119 = vmatprep.subr.msk.bf16.mxu0 %vm5570_vm3, %v5326_v14 }
 0x382   : > { %14127 = vmatprep.subr.msk.bf16.mxu1 %vm5570_vm3, %v5342_v15 }
 0x388   : > { %12308 = vmatpush3.bf16.xpose.msra.mxu0 %v5608_v19  ;;  %v5347_v19 = vld [vmem:[#allocation2 + $0x108] sm:$0xff] }
 0x389   : > { %12340 = vmatpush3.bf16.xpose.msra.mxu1 %v5793_v20  ;;  %14120 = vmatprep.subr.msk.bf16.mxu0 %vm5570_vm3, %v5327_v31  ;;  %v5363_v20 = vld [vmem:[#allocation2 + $0x188] sm:$0xff] }
 0x38a   : > { %14128 = vmatprep.subr.msk.bf16.mxu1 %vm5570_vm3, %v5343_v43 }
 0x390   : > { %12310 = vmatpush3.bf16.xpose.msra.mxu0 %v5611_v22  ;;  %v5969_v22 = vsel %vm5570_vm3, %v5347_v19, 0 }
 0x391   : > { %12342 = vmatpush3.bf16.xpose.msra.mxu1 %v5796_v23  ;;  %14121 = vmatprep.subr.msk.bf16.mxu0 %vm5570_vm3, %v5328_v25  ;;  %v6154_v23 = vsel %vm5570_vm3, %v5363_v20, 0 }
 0x392   : > { %14129 = vmatprep.subr.msk.bf16.mxu1 %vm5570_vm3, %v5344_v26  ;;  %v5356_v26 = vld [vmem:[#allocation2 + $0x150] sm:$0xff] }
 0x398   : > { %12312 = vmatpush3.bf16.xpose.msra.mxu0 %v5614_v33 }
 0x399   : > { %12344 = vmatpush3.bf16.xpose.msra.mxu1 %v5799_v10  ;;  %14122 = vmatprep.subr.msk.bf16.mxu0 %vm5570_vm3, %v5329_v34 }
 0x39a   : > { %14130 = vmatprep.subr.msk.bf16.mxu1 %vm5570_vm3, %v5345_v49 }
 0x3a0   : > { %12314 = vmatpush3.bf16.xpose.msra.mxu0 %v5617_v35 }
 0x3a1   : > { %12346 = vmatpush3.bf16.xpose.msra.mxu1 %v5802_v37  ;;  %14131 = vmatprep.subr.msk.bf16.mxu0 %vm5570_vm3, %v5354_v39 }
 0x3a2   : > { %14139 = vmatprep.subr.msk.bf16.mxu1 %vm5570_vm3, %v5370_v41 }
 0x3da   : > { %v13789_v42 = vpop.f32.mrb[0].mxu0 }
 0x3db   : > { %v5124_v46 = vmul.f32 0.35355338, %v13789_v42  ;;  %v13813_v47 = vpop.f32.mrb[0].mxu1  ;;  %v4212_v48 = vpop.f32.mrb[1].mxu0 }
 0x3dc   : > { %v5140_v17 = vmul.f32 0.35355338, %v13813_v47  ;;  %v5122_v55 = vmul.f32 0.35355338, %v4212_v48  ;;  %v4333_v56 = vpop.f32.mrb[1].mxu1  ;;  %v13790_v18 = vpop.f32.mrb[2].mxu0 }
 0x3dd   : > { %v5138_v51 = vmul.f32 0.35355338, %v4333_v56  ;;  %v5125_v52 = vmul.f32 0.35355338, %v13790_v18  ;;  %v13814_v53 = vpop.f32.mrb[2].mxu1  ;;  %v4215_v54 = vpop.f32.mrb[3].mxu0 }
 0x3de   : > { %v5141_v57 = vmul.f32 0.35355338, %v13814_v53  ;;  %v5123_v58 = vmul.f32 0.35355338, %v4215_v54  ;;  %v4336_v59 = vpop.f32.mrb[3].mxu1  ;;  %v5348_v48 = vld [vmem:[#allocation2 + $0x110] sm:$0xff] }
 0x3df   : > { %v5251_v60 = vpack.c.bf16 %v5125_v52, %v5124_v46  ;;  %v5139_v63 = vmul.f32 0.35355338, %v4336_v59  ;;  %v5972_v53 = vsel %vm5570_vm3, %v5348_v48, 0  ;;  %v5373_v59 = vld [vmem:[#allocation2 + $0x1d8] sm:$0xff] }
 0x3e0   : > { %v5259_v0 = vpack.c.bf16 %v5141_v57, %v5140_v17  ;;  %v5250_v27 = vpack.c.bf16 %v5123_v58, %v5122_v55  ;;  %v5364_v17 = vld [vmem:[#allocation2 + $0x190] sm:$0xff]  ;;  %v5357_v58 = vld [vmem:[#allocation2 + $0x158] sm:$0xff] }
 0x3e1   : > { %v5258_v28 = vpack.c.bf16 %v5139_v63, %v5138_v51  ;;  %v6157_v54 = vsel %vm5570_vm3, %v5364_v17, 0 }
 0x3e2   : > { %12315 = vmatprep.mubr.msk.bf16.mxu0 %vm5570_vm3, %v5250_v27  ;;  %v13793_v4 = vpop.f32.mrb[4].mxu0 }
 0x3e3   : > { %12347 = vmatprep.mubr.msk.bf16.mxu1 %vm5570_vm3, %v5258_v28  ;;  %12316 = vmatmul.mubr.msk.bf16.vlgmr.msra.gmra.mrb[64].mxu0 %vm5570_vm3, %v5250_v27  ;;  %v5128_v5 = vmul.f32 0.35355338, %v13793_v4  ;;  %v4228_v6 = vpop.f32.mrb[5].mxu0  ;;  %v13817_v7 = vpop.f32.mrb[4].mxu1 }
 0x3e4   : > { %12348 = vmatmul.mubr.msk.bf16.vlgmr.msra.gmra.mrb[64].mxu1 %vm5570_vm3, %v5258_v28  ;;  %12317 = vmatprep.mubr.msk.bf16.mxu0 %vm5570_vm3, %v5251_v60  ;;  %v5126_v1 = vmul.f32 0.35355338, %v4228_v6  ;;  %v13794_v9 = vpop.f32.mrb[6].mxu0  ;;  %v5144_v30 = vmul.f32 0.35355338, %v13817_v7  ;;  %v4349_v36 = vpop.f32.mrb[5].mxu1 }
 0x3e5   : > { %12349 = vmatprep.mubr.msk.bf16.mxu1 %vm5570_vm3, %v5259_v0  ;;  %12364 = vmatpush3.bf16.xpose.msra.mxu0 %v5966_v2  ;;  %v5129_v38 = vmul.f32 0.35355338, %v13794_v9  ;;  %v4231_v11 = vpop.f32.mrb[7].mxu0  ;;  %v5142_v12 = vmul.f32 0.35355338, %v4349_v36  ;;  %v13818_v13 = vpop.f32.mrb[6].mxu1 }
 0x3e6   : > { %12396 = vmatpush3.bf16.xpose.msra.mxu1 %v6151_v3  ;;  %v5127_v14 = vmul.f32 0.35355338, %v4231_v11  ;;  %14132 = vmatprep.subr.msk.bf16.mxu0 %vm5570_vm3, %v5355_v29  ;;  %v5145_v15 = vmul.f32 0.35355338, %v13818_v13  ;;  %v4352_v16 = vpop.f32.mrb[7].mxu1 }
 0x3e7   : > { %v16567_v24 = vpack.c.bf16 %v5129_v38, %v5128_v5  ;;  %14140 = vmatprep.subr.msk.bf16.mxu1 %vm5570_vm3, %v5371_v8  ;;  %v5143_v31 = vmul.f32 0.35355338, %v4352_v16  ;;  %v5349_v8 = vld [vmem:[#allocation2 + $0x118] sm:$0xff]  ;;  %v5374_v16 = vld [vmem:[#allocation2 + $0x1e0] sm:$0xff] }
 0x3e8   : > { %v5252_v43 = vpack.c.bf16 %v5127_v14, %v5126_v1  ;;  %v16570_v44 = vpack.c.bf16 %v5145_v15, %v5144_v30  ;;  %v5365_v1 = vld [vmem:[#allocation2 + $0x198] sm:$0xff]  ;;  %v5358_v15 = vld [vmem:[#allocation2 + $0x160] sm:$0xff] }
 0x3e9   : > { %v5260_v21 = vpack.c.bf16 %v5143_v31, %v5142_v12  ;;  %v5975_v12 = vsel %vm5570_vm3, %v5349_v8, 0  ;;  %v6160_v13 = vsel %vm5570_vm3, %v5365_v1, 0  ;;  %v5360_v8 = vld [vmem:[#allocation2 + $0x170] sm:$0xff] }
 0x3ea   : > { %v13797_v25 = vpop.f32.mrb[8].mxu0  ;;  %v5376_v1 = vld [vmem:[#allocation2 + $0x1f0] sm:$0xff] }
 0x3eb   : > { %12318 = vmatmul.mubr.msk.bf16.gmra.mrb[68].mxu0 %vm5570_vm3, %v5251_v60  ;;  %v5132_v40 = vmul.f32 0.35355338, %v13797_v25  ;;  %v4244_v33 = vpop.f32.mrb[9].mxu0  ;;  %v13821_v10 = vpop.f32.mrb[8].mxu1 }
 0x3ec   : > { %12350 = vmatmul.mubr.msk.bf16.gmra.mrb[68].mxu1 %vm5570_vm3, %v5259_v0  ;;  %12319 = vmatprep.mubr.msk.bf16.mxu0 %vm5570_vm3, %v5252_v43  ;;  %v5130_v34 = vmul.f32 0.35355338, %v4244_v33  ;;  %v13798_v49 = vpop.f32.mrb[10].mxu0  ;;  %v5148_v50 = vmul.f32 0.35355338, %v13821_v10  ;;  %v4365_v45 = vpop.f32.mrb[9].mxu1 }
 0x3ed   : > { %12366 = vmatpush3.bf16.xpose.msra.mxu0 %v5969_v22  ;;  %12351 = vmatprep.mubr.msk.bf16.mxu1 %vm5570_vm3, %v5260_v21  ;;  %v5133_v35 = vmul.f32 0.35355338, %v13798_v49  ;;  %v4247_v37 = vpop.f32.mrb[11].mxu0  ;;  %v5146_v39 = vmul.f32 0.35355338, %v4365_v45  ;;  %v13822_v41 = vpop.f32.mrb[10].mxu1 }
 0x3ee   : > { %12398 = vmatpush3.bf16.xpose.msra.mxu1 %v6154_v23  ;;  %14133 = vmatprep.subr.msk.bf16.mxu0 %vm5570_vm3, %v5356_v26  ;;  %v5131_v42 = vmul.f32 0.35355338, %v4247_v37  ;;  %v5149_v46 = vmul.f32 0.35355338, %v13822_v41  ;;  %v4368_v47 = vpop.f32.mrb[11].mxu1  ;;  %v5350_v10 = vld [vmem:[#allocation2 + $0x120] sm:$0xff] }
 0x3ef   : > { %14141 = vmatprep.subr.msk.bf16.mxu1 %vm5570_vm3, %v5372_v32  ;;  %v16580_v55 = vpack.c.bf16 %v5133_v35, %v5132_v40  ;;  %v5147_v56 = vmul.f32 0.35355338, %v4368_v47  ;;  %v5375_v47 = vld [vmem:[#allocation2 + $0x1e8] sm:$0xff] }
 0x3f0   : > { %v16582_v18 = vpack.c.bf16 %v5131_v42, %v5130_v34  ;;  %v16584_v51 = vpack.c.bf16 %v5149_v46, %v5148_v50  ;;  %v5366_v34 = vld [vmem:[#allocation2 + $0x1a0] sm:$0xff]  ;;  %v5359_v46 = vld [vmem:[#allocation2 + $0x168] sm:$0xff] }
 0x3f1   : > { %v16586_v52 = vpack.c.bf16 %v5147_v56, %v5146_v39  ;;  %v5978_v39 = vsel %vm5570_vm3, %v5350_v10, 0  ;;  %v6163_v41 = vsel %vm5570_vm3, %v5366_v34, 0 }
 0x3f2   : > { %v13801_v57 = vpop.f32.mrb[12].mxu0 }
 0x3f3   : > { %12320 = vmatmul.mubr.msk.bf16.gmra.mrb[72].mxu0 %vm5570_vm3, %v5252_v43  ;;  %v5136_v60 = vmul.f32 0.35355338, %v13801_v57  ;;  %v4260_v63 = vpop.f32.mrb[13].mxu0  ;;  %v13825_v61 = vpop.f32.mrb[12].mxu1 }
 0x3f4   : > { %12352 = vmatmul.mubr.msk.bf16.gmra.mrb[72].mxu1 %vm5570_vm3, %v5260_v21  ;;  %12321 = vmatprep.mubr.msk.bf16.mxu0 %vm5570_vm3, %v16567_v24  ;;  %v5134_v62 = vmul.f32 0.35355338, %v4260_v63  ;;  %v13802_v0 = vpop.f32.mrb[14].mxu0  ;;  %v5152_v27 = vmul.f32 0.35355338, %v13825_v61  ;;  %v4381_v28 = vpop.f32.mrb[13].mxu1 }
 0x3f5   : > { %12353 = vmatprep.mubr.msk.bf16.mxu1 %vm5570_vm3, %v16570_v44  ;;  %12368 = vmatpush3.bf16.xpose.msra.mxu0 %v5972_v53  ;;  %v5137_v2 = vmul.f32 0.35355338, %v13802_v0  ;;  %v4263_v3 = vpop.f32.mrb[15].mxu0  ;;  %v5150_v4 = vmul.f32 0.35355338, %v4381_v28  ;;  %v13826_v5 = vpop.f32.mrb[14].mxu1 }
 0x3f6   : > { %12400 = vmatpush3.bf16.xpose.msra.mxu1 %v6157_v54  ;;  %14134 = vmatprep.subr.msk.bf16.mxu0 %vm5570_vm3, %v5357_v58  ;;  %v5135_v6 = vmul.f32 0.35355338, %v4263_v3  ;;  %v5153_v7 = vmul.f32 0.35355338, %v13826_v5  ;;  %v4384_v29 = vpop.f32.mrb[15].mxu1  ;;  %v5351_v0 = vld [vmem:[#allocation2 + $0x128] sm:$0xff] }
 0x3f7   : > { %14142 = vmatprep.subr.msk.bf16.mxu1 %vm5570_vm3, %v5373_v59  ;;  %v16598_v9 = vpack.c.bf16 %v5137_v2, %v5136_v60  ;;  %v5151_v30 = vmul.f32 0.35355338, %v4384_v29 }
 0x3f8   : > { %v16600_v36 = vpack.c.bf16 %v5135_v6, %v5134_v62  ;;  %v16602_v38 = vpack.c.bf16 %v5153_v7, %v5152_v27  ;;  %v5367_v27 = vld [vmem:[#allocation2 + $0x1a8] sm:$0xff]  ;;  %v5981_v6 = vsel %vm5570_vm3, %v5351_v0, 0 }
 0x3f9   : > { %v16604_v11 = vpack.c.bf16 %v5151_v30, %v5150_v4  ;;  %v6166_v7 = vsel %vm5570_vm3, %v5367_v27, 0 }
 0x3fa   : > { %v13837_v14 = vpop.f32.mrb[16].mxu0 }
 0x3fb   : > { %12322 = vmatmul.mubr.msk.bf16.gmra.mrb[76].mxu0 %vm5570_vm3, %v16567_v24  ;;  %v5156_v19 = vmul.f32 0.35355338, %v13837_v14  ;;  %v4454_v20 = vpop.f32.mrb[17].mxu0  ;;  %v13861_v31 = vpop.f32.mrb[16].mxu1 }
 0x3fc   : > { %12354 = vmatmul.mubr.msk.bf16.gmra.mrb[76].mxu1 %vm5570_vm3, %v16570_v44  ;;  %12323 = vmatprep.mubr.msk.bf16.mxu0 %vm5570_vm3, %v16582_v18  ;;  %v5154_v43 = vmul.f32 0.35355338, %v4454_v20  ;;  %v13838_v21 = vpop.f32.mrb[18].mxu0  ;;  %v5172_v22 = vmul.f32 0.35355338, %v13861_v31  ;;  %v4575_v23 = vpop.f32.mrb[17].mxu1 }
 0x3fd   : > { %12370 = vmatpush3.bf16.xpose.msra.mxu0 %v5975_v12  ;;  %12355 = vmatprep.mubr.msk.bf16.mxu1 %vm5570_vm3, %v16586_v52  ;;  %v5157_v24 = vmul.f32 0.35355338, %v13838_v21  ;;  %v4457_v25 = vpop.f32.mrb[19].mxu0  ;;  %v5170_v26 = vmul.f32 0.35355338, %v4575_v23  ;;  %v13862_v32 = vpop.f32.mrb[18].mxu1 }
 0x3fe   : > { %12402 = vmatpush3.bf16.xpose.msra.mxu1 %v6160_v13  ;;  %14135 = vmatprep.subr.msk.bf16.mxu0 %vm5570_vm3, %v5358_v15  ;;  %v5155_v40 = vmul.f32 0.35355338, %v4457_v25  ;;  %v5173_v44 = vmul.f32 0.35355338, %v13862_v32  ;;  %v4578_v33 = vpop.f32.mrb[19].mxu1  ;;  %v5352_v23 = vld [vmem:[#allocation2 + $0x130] sm:$0xff] }
 0x3ff   : > { %14143 = vmatprep.subr.msk.bf16.mxu1 %vm5570_vm3, %v5374_v16  ;;  %v16618_v49 = vpack.c.bf16 %v5157_v24, %v5156_v19  ;;  %v5171_v50 = vmul.f32 0.35355338, %v4578_v33  ;;  %v5368_v24 = vld [vmem:[#allocation2 + $0x1b0] sm:$0xff]  ;;  %v5984_v33 = vsel %vm5570_vm3, %v5352_v23, 0 }
 0x400   : > { %v16620_v45 = vpack.c.bf16 %v5155_v40, %v5154_v43  ;;  %v16622_v35 = vpack.c.bf16 %v5173_v44, %v5172_v22  ;;  %v6169_v10 = vsel %vm5570_vm3, %v5368_v24, 0 }
 0x401   : > { %v16624_v37 = vpack.c.bf16 %v5171_v50, %v5170_v26  ;;  %v5361_v50 = vld [vmem:[#allocation2 + $0x178] sm:$0xff] }
 0x402   : > { %v13841_v42 = vpop.f32.mrb[20].mxu0 }
 0x403   : > { %12324 = vmatmul.mubr.msk.bf16.gmra.mrb[80].mxu0 %vm5570_vm3, %v16582_v18  ;;  %v5160_v48 = vmul.f32 0.35355338, %v13841_v42  ;;  %v4470_v17 = vpop.f32.mrb[21].mxu0  ;;  %v13865_v56 = vpop.f32.mrb[20].mxu1 }
 0x404   : > { %12356 = vmatmul.mubr.msk.bf16.gmra.mrb[80].mxu1 %vm5570_vm3, %v16586_v52  ;;  %12325 = vmatprep.mubr.msk.bf16.mxu0 %vm5570_vm3, %v16580_v55  ;;  %v5158_v53 = vmul.f32 0.35355338, %v4470_v17  ;;  %v13842_v54 = vpop.f32.mrb[22].mxu0  ;;  %v5176_v57 = vmul.f32 0.35355338, %v13865_v56  ;;  %v4591_v58 = vpop.f32.mrb[21].mxu1 }
 0x405   : > { %12357 = vmatprep.mubr.msk.bf16.mxu1 %vm5570_vm3, %v16584_v51  ;;  %12372 = vmatpush3.bf16.xpose.msra.mxu0 %v5978_v39  ;;  %v5161_v18 = vmul.f32 0.35355338, %v13842_v54  ;;  %v4473_v59 = vpop.f32.mrb[23].mxu0  ;;  %v5174_v60 = vmul.f32 0.35355338, %v4591_v58  ;;  %v13866_v63 = vpop.f32.mrb[22].mxu1 }
 0x406   : > { %12404 = vmatpush3.bf16.xpose.msra.mxu1 %v6163_v41  ;;  %14136 = vmatprep.subr.msk.bf16.mxu0 %vm5570_vm3, %v5359_v46  ;;  %v5159_v61 = vmul.f32 0.35355338, %v4473_v59  ;;  %v5177_v52 = vmul.f32 0.35355338, %v13866_v63  ;;  %v4594_v62 = vpop.f32.mrb[23].mxu1  ;;  %v5377_v39 = vld [vmem:[#allocation2 + $0x1f8] sm:$0xff] }
 0x407   : > { %14144 = vmatprep.subr.msk.bf16.mxu1 %vm5570_vm3, %v5375_v47  ;;  %v16638_v28 = vpack.c.bf16 %v5161_v18, %v5160_v48  ;;  %v5175_v2 = vmul.f32 0.35355338, %v4594_v62  ;;  %v5353_v59 = vld [vmem:[#allocation2 + $0x138] sm:$0xff] }
 0x408   : > { %v16640_v3 = vpack.c.bf16 %v5159_v61, %v5158_v53  ;;  %v16642_v4 = vpack.c.bf16 %v5177_v52, %v5176_v57  ;;  %v5987_v27 = vsel %vm5570_vm3, %v5353_v59, 0  ;;  %v5395_v59 = vld [vmem:[#allocation2 + $0x288] sm:$0xff] }
 0x409   : > { %v16644_v5 = vpack.c.bf16 %v5175_v2, %v5174_v60  ;;  %v5369_v60 = vld [vmem:[#allocation2 + $0x1b8] sm:$0xff] }
 0x40a   : > { %v13845_v29 = vpop.f32.mrb[24].mxu0  ;;  %v6172_v2 = vsel %vm5570_vm3, %v5369_v60, 0 }
 0x40b   : > { %12326 = vmatmul.mubr.msk.bf16.gmra.mrb[84].mxu0 %vm5570_vm3, %v16580_v55  ;;  %v5164_v30 = vmul.f32 0.35355338, %v13845_v29  ;;  %v4486_v12 = vpop.f32.mrb[25].mxu0  ;;  %v13869_v13 = vpop.f32.mrb[24].mxu1  ;;  %v5402_v29 = vld [vmem:[#allocation2 + $0x2c0] sm:$0xff] }
 0x40c   : > { %12358 = vmatmul.mubr.msk.bf16.gmra.mrb[84].mxu1 %vm5570_vm3, %v16584_v51  ;;  %12327 = vmatprep.mubr.msk.bf16.mxu0 %vm5570_vm3, %v16600_v36  ;;  %v5162_v14 = vmul.f32 0.35355338, %v4486_v12  ;;  %v13846_v15 = vpop.f32.mrb[26].mxu0  ;;  %v5180_v16 = vmul.f32 0.35355338, %v13869_v13  ;;  %v4607_v19 = vpop.f32.mrb[25].mxu1 }
 0x40d   : > { %12374 = vmatpush3.bf16.xpose.msra.mxu0 %v5981_v6  ;;  %12359 = vmatprep.mubr.msk.bf16.mxu1 %vm5570_vm3, %v16604_v11  ;;  %v5165_v55 = vmul.f32 0.35355338, %v13846_v15  ;;  %v4489_v20 = vpop.f32.mrb[27].mxu0  ;;  %v5178_v31 = vmul.f32 0.35355338, %v4607_v19  ;;  %v13870_v43 = vpop.f32.mrb[26].mxu1 }
 0x40e   : > { %12406 = vmatpush3.bf16.xpose.msra.mxu1 %v6166_v7  ;;  %14137 = vmatprep.subr.msk.bf16.mxu0 %vm5570_vm3, %v5360_v8  ;;  %v5163_v21 = vmul.f32 0.35355338, %v4489_v20  ;;  %v5181_v51 = vmul.f32 0.35355338, %v13870_v43  ;;  %v4610_v22 = vpop.f32.mrb[27].mxu1  ;;  %v5386_v7 = vld [vmem:[#allocation2 + $0x240] sm:$0xff] }
 0x40f   : > { %14145 = vmatprep.subr.msk.bf16.mxu1 %vm5570_vm3, %v5376_v1  ;;  %v16658_v25 = vpack.c.bf16 %v5165_v55, %v5164_v30  ;;  %v5179_v26 = vmul.f32 0.35355338, %v4610_v22  ;;  %v5378_v43 = vld [vmem:[#allocation2 + $0x200] sm:$0xff] }
 0x410   : > { %v16660_v32 = vpack.c.bf16 %v5163_v21, %v5162_v14  ;;  %v16662_v40 = vpack.c.bf16 %v5181_v51, %v5180_v16  ;;  %v5394_v21 = vld [vmem:[#allocation2 + $0x280] sm:$0xff] }
 0x411   : > { %v16664_v44 = vpack.c.bf16 %v5179_v26, %v5178_v31 }
 0x412   : > { %v13849_v34 = vpop.f32.mrb[28].mxu0 }
 0x413   : > { %12328 = vmatmul.mubr.msk.bf16.gmra.mrb[88].mxu0 %vm5570_vm3, %v16600_v36  ;;  %v5168_v41 = vmul.f32 0.35355338, %v13849_v34  ;;  %v4502_v42 = vpop.f32.mrb[29].mxu0  ;;  %v13873_v46 = vpop.f32.mrb[28].mxu1 }
 0x414   : > { %12360 = vmatmul.mubr.msk.bf16.gmra.mrb[88].mxu1 %vm5570_vm3, %v16604_v11  ;;  %12329 = vmatprep.mubr.msk.bf16.mxu0 %vm5570_vm3, %v16598_v9  ;;  %v5166_v47 = vmul.f32 0.35355338, %v4502_v42  ;;  %v13850_v48 = vpop.f32.mrb[30].mxu0  ;;  %v5184_v17 = vmul.f32 0.35355338, %v13873_v46  ;;  %v4623_v56 = vpop.f32.mrb[29].mxu1 }
 0x415   : > { %12361 = vmatprep.mubr.msk.bf16.mxu1 %vm5570_vm3, %v16602_v38  ;;  %12376 = vmatpush3.bf16.xpose.msra.mxu0 %v5984_v33  ;;  %v5169_v36 = vmul.f32 0.35355338, %v13850_v48  ;;  %v4505_v53 = vpop.f32.mrb[31].mxu0  ;;  %v5182_v54 = vmul.f32 0.35355338, %v4623_v56  ;;  %v13874_v57 = vpop.f32.mrb[30].mxu1 }
 0x416   : > { %12408 = vmatpush3.bf16.xpose.msra.mxu1 %v6169_v10  ;;  %14138 = vmatprep.subr.msk.bf16.mxu0 %vm5570_vm3, %v5361_v50  ;;  %v5167_v58 = vmul.f32 0.35355338, %v4505_v53  ;;  %v5185_v11 = vmul.f32 0.35355338, %v13874_v57  ;;  %v4626_v18 = vpop.f32.mrb[31].mxu1  ;;  %v6336_v33 = vsel %vm5570_vm3, %v5378_v43, 0 }
 0x417   : > { %14146 = vmatprep.subr.msk.bf16.mxu1 %vm5570_vm3, %v5377_v39  ;;  %v16678_v63 = vpack.c.bf16 %v5169_v36, %v5168_v41  ;;  %v5183_v61 = vmul.f32 0.35355338, %v4626_v18  ;;  %v6521_v10 = vsel %vm5570_vm3, %v5394_v21, 0  ;;  %v5387_v50 = vld [vmem:[#allocation2 + $0x248] sm:$0xff]  ;;  %v5380_v21 = vld [vmem:[#allocation2 + $0x210] sm:$0xff] }
 0x418   : > { %v16680_v52 = vpack.c.bf16 %v5167_v58, %v5166_v47  ;;  %v16682_v62 = vpack.c.bf16 %v5185_v11, %v5184_v17  ;;  %v5403_v39 = vld [vmem:[#allocation2 + $0x2c8] sm:$0xff] }
 0x419   : > { %v16684_v0 = vpack.c.bf16 %v5183_v61, %v5182_v54  ;;  %v5379_v18 = vld [vmem:[#allocation2 + $0x208] sm:$0xff] }
 0x41a   : > { %v13885_v6 = vpop.f32.mrb[32].mxu0 }
 0x41b   : > { %12330 = vmatmul.mubr.msk.bf16.gmra.mrb[92].mxu0 %vm5570_vm3, %v16598_v9  ;;  %v5188_v8 = vmul.f32 0.35355338, %v13885_v6  ;;  %v4696_v1 = vpop.f32.mrb[33].mxu0  ;;  %v13909_v30 = vpop.f32.mrb[32].mxu1  ;;  %v6339_v6 = vsel %vm5570_vm3, %v5379_v18, 0 }
 0x41c   : > { %12362 = vmatmul.mubr.msk.bf16.gmra.mrb[92].mxu1 %vm5570_vm3, %v16602_v38  ;;  %12379 = vmatprep.mubr.msk.bf16.mxu0 %vm5570_vm3, %v16620_v45  ;;  %v5186_v12 = vmul.f32 0.35355338, %v4696_v1  ;;  %v13886_v13 = vpop.f32.mrb[34].mxu0  ;;  %v5204_v14 = vmul.f32 0.35355338, %v13909_v30  ;;  %v4817_v15 = vpop.f32.mrb[33].mxu1 }
 0x41d   : > { %12378 = vmatpush3.bf16.xpose.msra.mxu0 %v5987_v27  ;;  %12411 = vmatprep.mubr.msk.bf16.mxu1 %vm5570_vm3, %v16624_v37  ;;  %v5189_v9 = vmul.f32 0.35355338, %v13886_v13  ;;  %v4699_v16 = vpop.f32.mrb[35].mxu0  ;;  %v5202_v19 = vmul.f32 0.35355338, %v4817_v15  ;;  %v13910_v55 = vpop.f32.mrb[34].mxu1 }
 0x41e   : > { %12410 = vmatpush3.bf16.xpose.msra.mxu1 %v6172_v2  ;;  %14147 = vmatprep.subr.msk.bf16.mxu0 %vm5570_vm3, %v5386_v7  ;;  %v5187_v20 = vmul.f32 0.35355338, %v4699_v16  ;;  %v5205_v38 = vmul.f32 0.35355338, %v13910_v55  ;;  %v4820_v31 = vpop.f32.mrb[35].mxu1  ;;  %v6524_v7 = vsel %vm5570_vm3, %v5395_v59, 0 }
 0x41f   : > { %14155 = vmatprep.subr.msk.bf16.mxu1 %vm5570_vm3, %v5402_v29  ;;  %v16698_v51 = vpack.c.bf16 %v5189_v9, %v5188_v8  ;;  %v5203_v22 = vmul.f32 0.35355338, %v4820_v31  ;;  %v5388_v8 = vld [vmem:[#allocation2 + $0x250] sm:$0xff] }
 0x420   : > { %v16700_v23 = vpack.c.bf16 %v5187_v20, %v5186_v12  ;;  %v16702_v24 = vpack.c.bf16 %v5205_v38, %v5204_v14  ;;  %v5404_v1 = vld [vmem:[#allocation2 + $0x2d0] sm:$0xff] }
 0x421   : > { %v16704_v26 = vpack.c.bf16 %v5203_v22, %v5202_v19  ;;  %v5396_v22 = vld [vmem:[#allocation2 + $0x290] sm:$0xff] }
 0x422   : > { %v13889_v34 = vpop.f32.mrb[36].mxu0 }
 0x423   : > { %v5192_v41 = vmul.f32 0.35355338, %v13889_v34  ;;  %v4712_v42 = vpop.f32.mrb[37].mxu0  ;;  %v13913_v46 = vpop.f32.mrb[36].mxu1 }
 0x424   : > { %12380 = vmatmul.mubr.msk.bf16.vlgmr.msra.gmra.mrb[96].mxu0 %vm5570_vm3, %v16620_v45  ;;  %v5190_v47 = vmul.f32 0.35355338, %v4712_v42  ;;  %v13890_v48 = vpop.f32.mrb[38].mxu0  ;;  %v5208_v17 = vmul.f32 0.35355338, %v13913_v46  ;;  %v4833_v56 = vpop.f32.mrb[37].mxu1 }
 0x425   : > { %12412 = vmatmul.mubr.msk.bf16.vlgmr.msra.gmra.mrb[96].mxu1 %vm5570_vm3, %v16624_v37  ;;  %12381 = vmatprep.mubr.msk.bf16.mxu0 %vm5570_vm3, %v16618_v49  ;;  %v5193_v36 = vmul.f32 0.35355338, %v13890_v48  ;;  %v4715_v53 = vpop.f32.mrb[39].mxu0  ;;  %v5206_v54 = vmul.f32 0.35355338, %v4833_v56  ;;  %v13914_v57 = vpop.f32.mrb[38].mxu1 }
 0x426   : > { %12413 = vmatprep.mubr.msk.bf16.mxu1 %vm5570_vm3, %v16622_v35  ;;  %12428 = vmatpush3.bf16.xpose.msra.mxu0 %v6336_v33  ;;  %v5191_v58 = vmul.f32 0.35355338, %v4715_v53  ;;  %v5209_v45 = vmul.f32 0.35355338, %v13914_v57  ;;  %v4836_v11 = vpop.f32.mrb[39].mxu1  ;;  %v5389_v46 = vld [vmem:[#allocation2 + $0x258] sm:$0xff] }
 0x427   : > { %12460 = vmatpush3.bf16.xpose.msra.mxu1 %v6521_v10  ;;  %14148 = vmatprep.subr.msk.bf16.mxu0 %vm5570_vm3, %v5387_v50  ;;  %v16717_v37 = vpack.c.bf16 %v5193_v36, %v5192_v41  ;;  %v5207_v60 = vmul.f32 0.35355338, %v4836_v11  ;;  %v6527_v41 = vsel %vm5570_vm3, %v5396_v22, 0 }
 0x428   : > { %14156 = vmatprep.subr.msk.bf16.mxu1 %vm5570_vm3, %v5403_v39  ;;  %v16720_v61 = vpack.c.bf16 %v5191_v58, %v5190_v47  ;;  %v16722_v27 = vpack.c.bf16 %v5209_v45, %v5208_v17  ;;  %v6342_v39 = vsel %vm5570_vm3, %v5380_v21, 0  ;;  %v5405_v47 = vld [vmem:[#allocation2 + $0x2d8] sm:$0xff] }
 0x429   : > { %v16724_v2 = vpack.c.bf16 %v5207_v60, %v5206_v54 }
 0x42a   : > { %v13893_v29 = vpop.f32.mrb[40].mxu0 }
 0x42b   : > { %v5196_v30 = vmul.f32 0.35355338, %v13893_v29  ;;  %v4728_v12 = vpop.f32.mrb[41].mxu0  ;;  %v13917_v13 = vpop.f32.mrb[40].mxu1 }
 0x42c   : > { %12382 = vmatmul.mubr.msk.bf16.gmra.mrb[100].mxu0 %vm5570_vm3, %v16618_v49  ;;  %v5194_v14 = vmul.f32 0.35355338, %v4728_v12  ;;  %v13894_v15 = vpop.f32.mrb[42].mxu0  ;;  %v5212_v9 = vmul.f32 0.35355338, %v13917_v13  ;;  %v4849_v16 = vpop.f32.mrb[41].mxu1 }
 0x42d   : > { %12414 = vmatmul.mubr.msk.bf16.gmra.mrb[100].mxu1 %vm5570_vm3, %v16622_v35  ;;  %12383 = vmatprep.mubr.msk.bf16.mxu0 %vm5570_vm3, %v16640_v3  ;;  %v5197_v19 = vmul.f32 0.35355338, %v13894_v15  ;;  %v4731_v55 = vpop.f32.mrb[43].mxu0  ;;  %v5210_v20 = vmul.f32 0.35355338, %v4849_v16  ;;  %v13918_v38 = vpop.f32.mrb[42].mxu1 }
 0x42e   : > { %12430 = vmatpush3.bf16.xpose.msra.mxu0 %v6339_v6  ;;  %12415 = vmatprep.mubr.msk.bf16.mxu1 %vm5570_vm3, %v16644_v5  ;;  %v5195_v31 = vmul.f32 0.35355338, %v4731_v55  ;;  %v5213_v49 = vmul.f32 0.35355338, %v13918_v38  ;;  %v4852_v43 = vpop.f32.mrb[43].mxu1  ;;  %v5381_v6 = vld [vmem:[#allocation2 + $0x218] sm:$0xff] }
 0x42f   : > { %12462 = vmatpush3.bf16.xpose.msra.mxu1 %v6524_v7  ;;  %14149 = vmatprep.subr.msk.bf16.mxu0 %vm5570_vm3, %v5388_v8  ;;  %v16737_v35 = vpack.c.bf16 %v5197_v19, %v5196_v30  ;;  %v5211_v33 = vmul.f32 0.35355338, %v4852_v43  ;;  %v5397_v7 = vld [vmem:[#allocation2 + $0x298] sm:$0xff]  ;;  %v6345_v12 = vsel %vm5570_vm3, %v5381_v6, 0  ;;  %v5390_v15 = vld [vmem:[#allocation2 + $0x260] sm:$0xff] }
 0x430   : > { %14157 = vmatprep.subr.msk.bf16.mxu1 %vm5570_vm3, %v5404_v1  ;;  %v16740_v10 = vpack.c.bf16 %v5195_v31, %v5194_v14  ;;  %v16742_v34 = vpack.c.bf16 %v5213_v49, %v5212_v9  ;;  %v6530_v13 = vsel %vm5570_vm3, %v5397_v7, 0  ;;  %v5406_v9 = vld [vmem:[#allocation2 + $0x2e0] sm:$0xff] }
 0x431   : > { %v16744_v50 = vpack.c.bf16 %v5211_v33, %v5210_v20 }
 0x432   : > { %v13897_v42 = vpop.f32.mrb[44].mxu0 }
 0x433   : > { %v5200_v48 = vmul.f32 0.35355338, %v13897_v42  ;;  %v4744_v17 = vpop.f32.mrb[45].mxu0  ;;  %v13921_v56 = vpop.f32.mrb[44].mxu1  ;;  %v5382_v42 = vld [vmem:[#allocation2 + $0x220] sm:$0xff] }
 0x434   : > { %12384 = vmatmul.mubr.msk.bf16.gmra.mrb[104].mxu0 %vm5570_vm3, %v16640_v3  ;;  %v5198_v36 = vmul.f32 0.35355338, %v4744_v17  ;;  %v13898_v53 = vpop.f32.mrb[46].mxu0  ;;  %v5216_v54 = vmul.f32 0.35355338, %v13921_v56  ;;  %v4865_v57 = vpop.f32.mrb[45].mxu1 }
 0x435   : > { %12416 = vmatmul.mubr.msk.bf16.gmra.mrb[104].mxu1 %vm5570_vm3, %v16644_v5  ;;  %12385 = vmatprep.mubr.msk.bf16.mxu0 %vm5570_vm3, %v16638_v28  ;;  %v5201_v58 = vmul.f32 0.35355338, %v13898_v53  ;;  %v4747_v45 = vpop.f32.mrb[47].mxu0  ;;  %v5214_v11 = vmul.f32 0.35355338, %v4865_v57  ;;  %v13922_v18 = vpop.f32.mrb[46].mxu1 }
 0x436   : > { %12417 = vmatprep.mubr.msk.bf16.mxu1 %vm5570_vm3, %v16642_v4  ;;  %12432 = vmatpush3.bf16.xpose.msra.mxu0 %v6342_v39  ;;  %v5199_v59 = vmul.f32 0.35355338, %v4747_v45  ;;  %v5217_v3 = vmul.f32 0.35355338, %v13922_v18  ;;  %v4868_v60 = vpop.f32.mrb[47].mxu1  ;;  %v5391_v57 = vld [vmem:[#allocation2 + $0x268] sm:$0xff] }
 0x437   : > { %12464 = vmatpush3.bf16.xpose.msra.mxu1 %v6527_v41  ;;  %14150 = vmatprep.subr.msk.bf16.mxu0 %vm5570_vm3, %v5389_v46  ;;  %v16757_v5 = vpack.c.bf16 %v5201_v58, %v5200_v48  ;;  %v5215_v29 = vmul.f32 0.35355338, %v4868_v60  ;;  %v5398_v46 = vld [vmem:[#allocation2 + $0x2a0] sm:$0xff]  ;;  %v5407_v58 = vld [vmem:[#allocation2 + $0x2e8] sm:$0xff] }
 0x438   : > { %14158 = vmatprep.subr.msk.bf16.mxu1 %vm5570_vm3, %v5405_v47  ;;  %v16760_v8 = vpack.c.bf16 %v5199_v59, %v5198_v36  ;;  %v16762_v1 = vpack.c.bf16 %v5217_v3, %v5216_v54  ;;  %v6348_v36 = vsel %vm5570_vm3, %v5382_v42, 0  ;;  %v6533_v53 = vsel %vm5570_vm3, %v5398_v46, 0 }
 0x439   : > { %v16764_v30 = vpack.c.bf16 %v5215_v29, %v5214_v11 }
 0x43a   : > { %v13933_v14 = vpop.f32.mrb[48].mxu0 }
 0x43b   : > { %v5220_v16 = vmul.f32 0.35355338, %v13933_v14  ;;  %v4938_v19 = vpop.f32.mrb[49].mxu0  ;;  %v13957_v55 = vpop.f32.mrb[48].mxu1 }
 0x43c   : > { %12386 = vmatmul.mubr.msk.bf16.gmra.mrb[108].mxu0 %vm5570_vm3, %v16638_v28  ;;  %v5218_v20 = vmul.f32 0.35355338, %v4938_v19  ;;  %v13934_v38 = vpop.f32.mrb[50].mxu0  ;;  %v5236_v31 = vmul.f32 0.35355338, %v13957_v55  ;;  %v5059_v49 = vpop.f32.mrb[49].mxu1 }
 0x43d   : > { %12418 = vmatmul.mubr.msk.bf16.gmra.mrb[108].mxu1 %vm5570_vm3, %v16642_v4  ;;  %12387 = vmatprep.mubr.msk.bf16.mxu0 %vm5570_vm3, %v16660_v32  ;;  %v5221_v43 = vmul.f32 0.35355338, %v13934_v38  ;;  %v4941_v21 = vpop.f32.mrb[51].mxu0  ;;  %v5234_v22 = vmul.f32 0.35355338, %v5059_v49  ;;  %v13958_v33 = vpop.f32.mrb[50].mxu1 }
 0x43e   : > { %12434 = vmatpush3.bf16.xpose.msra.mxu0 %v6345_v12  ;;  %12419 = vmatprep.mubr.msk.bf16.mxu1 %vm5570_vm3, %v16664_v44  ;;  %v5219_v39 = vmul.f32 0.35355338, %v4941_v21  ;;  %v5237_v28 = vmul.f32 0.35355338, %v13958_v33  ;;  %v5062_v41 = vpop.f32.mrb[51].mxu1  ;;  %v5392_v21 = vld [vmem:[#allocation2 + $0x270] sm:$0xff] }
 0x43f   : > { %12466 = vmatpush3.bf16.xpose.msra.mxu1 %v6530_v13  ;;  %14151 = vmatprep.subr.msk.bf16.mxu0 %vm5570_vm3, %v5390_v15  ;;  %v16777_v4 = vpack.c.bf16 %v5221_v43, %v5220_v16  ;;  %v5235_v47 = vmul.f32 0.35355338, %v5062_v41  ;;  %v5399_v16 = vld [vmem:[#allocation2 + $0x2a8] sm:$0xff] }
 0x440   : > { %14159 = vmatprep.subr.msk.bf16.mxu1 %vm5570_vm3, %v5406_v9  ;;  %v16780_v48 = vpack.c.bf16 %v5219_v39, %v5218_v20  ;;  %v16782_v17 = vpack.c.bf16 %v5237_v28, %v5236_v31  ;;  %v5383_v9 = vld [vmem:[#allocation2 + $0x228] sm:$0xff]  ;;  %v6536_v49 = vsel %vm5570_vm3, %v5399_v16, 0 }
 0x441   : > { %v16784_v56 = vpack.c.bf16 %v5235_v47, %v5234_v22  ;;  %v6351_v31 = vsel %vm5570_vm3, %v5383_v9, 0  ;;  %v5408_v22 = vld [vmem:[#allocation2 + $0x2f0] sm:$0xff] }
 0x442   : > { %v13937_v54 = vpop.f32.mrb[52].mxu0 }
 0x443   : > { %v5224_v45 = vmul.f32 0.35355338, %v13937_v54  ;;  %v4954_v11 = vpop.f32.mrb[53].mxu0  ;;  %v13961_v18 = vpop.f32.mrb[52].mxu1 }
 0x444   : > { %12388 = vmatmul.mubr.msk.bf16.gmra.mrb[112].mxu0 %vm5570_vm3, %v16660_v32  ;;  %v5222_v59 = vmul.f32 0.35355338, %v4954_v11  ;;  %v13938_v3 = vpop.f32.mrb[54].mxu0  ;;  %v5240_v60 = vmul.f32 0.35355338, %v13961_v18  ;;  %v5075_v6 = vpop.f32.mrb[53].mxu1 }
 0x445   : > { %12420 = vmatmul.mubr.msk.bf16.gmra.mrb[112].mxu1 %vm5570_vm3, %v16664_v44  ;;  %12389 = vmatprep.mubr.msk.bf16.mxu0 %vm5570_vm3, %v16658_v25  ;;  %v5225_v7 = vmul.f32 0.35355338, %v13938_v3  ;;  %v4957_v29 = vpop.f32.mrb[55].mxu0  ;;  %v5238_v12 = vmul.f32 0.35355338, %v5075_v6  ;;  %v13962_v13 = vpop.f32.mrb[54].mxu1 }
 0x446   : > { %12421 = vmatprep.mubr.msk.bf16.mxu1 %vm5570_vm3, %v16662_v40  ;;  %12436 = vmatpush3.bf16.xpose.msra.mxu0 %v6348_v36  ;;  %v5223_v14 = vmul.f32 0.35355338, %v4957_v29  ;;  %v5241_v32 = vmul.f32 0.35355338, %v13962_v13  ;;  %v5078_v15 = vpop.f32.mrb[55].mxu1  ;;  %v5384_v11 = vld [vmem:[#allocation2 + $0x230] sm:$0xff] }
 0x447   : > { %12468 = vmatpush3.bf16.xpose.msra.mxu1 %v6533_v53  ;;  %14152 = vmatprep.subr.msk.bf16.mxu0 %vm5570_vm3, %v5391_v57  ;;  %v16797_v44 = vpack.c.bf16 %v5225_v7, %v5224_v45  ;;  %v5239_v19 = vmul.f32 0.35355338, %v5078_v15  ;;  %v5400_v18 = vld [vmem:[#allocation2 + $0x2b0] sm:$0xff]  ;;  %v6354_v7 = vsel %vm5570_vm3, %v5384_v11, 0  ;;  %v5393_v13 = vld [vmem:[#allocation2 + $0x278] sm:$0xff] }
 0x448   : > { %14160 = vmatprep.subr.msk.bf16.mxu1 %vm5570_vm3, %v5407_v58  ;;  %v16800_v55 = vpack.c.bf16 %v5223_v14, %v5222_v59  ;;  %v16802_v20 = vpack.c.bf16 %v5241_v32, %v5240_v60  ;;  %v6539_v29 = vsel %vm5570_vm3, %v5400_v18, 0  ;;  %v5409_v14 = vld [vmem:[#allocation2 + $0x2f8] sm:$0xff]  ;;  %v5419_v18 = vld [vmem:[#allocation2 + $0x348] sm:$0xff] }
 0x449   : > { %v16804_v38 = vpack.c.bf16 %v5239_v19, %v5238_v12 }
 0x44a   : > { %v13941_v43 = vpop.f32.mrb[56].mxu0 }
 0x44b   : > { %v5228_v33 = vmul.f32 0.35355338, %v13941_v43  ;;  %v4970_v39 = vpop.f32.mrb[57].mxu0  ;;  %v13965_v28 = vpop.f32.mrb[56].mxu1 }
 0x44c   : > { %12390 = vmatmul.mubr.msk.bf16.gmra.mrb[116].mxu0 %vm5570_vm3, %v16658_v25  ;;  %v5226_v41 = vmul.f32 0.35355338, %v4970_v39  ;;  %v13942_v42 = vpop.f32.mrb[58].mxu0  ;;  %v5244_v46 = vmul.f32 0.35355338, %v13965_v28  ;;  %v5091_v47 = vpop.f32.mrb[57].mxu1 }
 0x44d   : > { %12422 = vmatmul.mubr.msk.bf16.gmra.mrb[116].mxu1 %vm5570_vm3, %v16662_v40  ;;  %12391 = vmatprep.mubr.msk.bf16.mxu0 %vm5570_vm3, %v16680_v52  ;;  %v5229_v36 = vmul.f32 0.35355338, %v13942_v42  ;;  %v4973_v53 = vpop.f32.mrb[59].mxu0  ;;  %v5242_v54 = vmul.f32 0.35355338, %v5091_v47  ;;  %v13966_v57 = vpop.f32.mrb[58].mxu1 }
 0x44e   : > { %12438 = vmatpush3.bf16.xpose.msra.mxu0 %v6351_v31  ;;  %12423 = vmatprep.mubr.msk.bf16.mxu1 %vm5570_vm3, %v16684_v0  ;;  %v5227_v58 = vmul.f32 0.35355338, %v4973_v53  ;;  %v5245_v25 = vmul.f32 0.35355338, %v13966_v57  ;;  %v5094_v45 = vpop.f32.mrb[59].mxu1  ;;  %v5385_v42 = vld [vmem:[#allocation2 + $0x238] sm:$0xff] }
 0x44f   : > { %12470 = vmatpush3.bf16.xpose.msra.mxu1 %v6536_v49  ;;  %14153 = vmatprep.subr.msk.bf16.mxu0 %vm5570_vm3, %v5392_v21  ;;  %v16817_v40 = vpack.c.bf16 %v5229_v36, %v5228_v33  ;;  %v5243_v59 = vmul.f32 0.35355338, %v5094_v45  ;;  %v5401_v36 = vld [vmem:[#allocation2 + $0x2b8] sm:$0xff]  ;;  %v5426_v45 = vld [vmem:[#allocation2 + $0x380] sm:$0xff] }
 0x450   : > { %14161 = vmatprep.subr.msk.bf16.mxu1 %vm5570_vm3, %v5408_v22  ;;  %v16820_v3 = vpack.c.bf16 %v5227_v58, %v5226_v41  ;;  %v16822_v60 = vpack.c.bf16 %v5245_v25, %v5244_v46  ;;  %v6542_v57 = vsel %vm5570_vm3, %v5401_v36, 0  ;;  %v5418_v58 = vld [vmem:[#allocation2 + $0x340] sm:$0xff] }
 0x451   : > { %v16824_v6 = vpack.c.bf16 %v5243_v59, %v5242_v54  ;;  %v6357_v54 = vsel %vm5570_vm3, %v5385_v42, 0  ;;  %v5434_v25 = vld [vmem:[#allocation2 + $0x3c0] sm:$0xff]  ;;  %v5435_v59 = vld [vmem:[#allocation2 + $0x3c8] sm:$0xff]  ;;  %v5432_v42 = vld [vmem:[#allocation2 + $0x3b0] sm:$0xff] }
 0x452   : > { %v13945_v12 = vpop.f32.mrb[60].mxu0 }
 0x453   : > { %v5232_v32 = vmul.f32 0.35355338, %v13945_v12  ;;  %v4986_v15 = vpop.f32.mrb[61].mxu0  ;;  %v13969_v9 = vpop.f32.mrb[60].mxu1  ;;  %v5420_v12 = vld [vmem:[#allocation2 + $0x350] sm:$0xff] }
 0x454   : > { %12392 = vmatmul.mubr.msk.bf16.gmra.mrb[120].mxu0 %vm5570_vm3, %v16680_v52  ;;  %v5230_v16 = vmul.f32 0.35355338, %v4986_v15  ;;  %v13946_v19 = vpop.f32.mrb[62].mxu0  ;;  %v5248_v31 = vmul.f32 0.35355338, %v13969_v9  ;;  %v5107_v49 = vpop.f32.mrb[61].mxu1 }
 0x455   : > { %12424 = vmatmul.mubr.msk.bf16.gmra.mrb[120].mxu1 %vm5570_vm3, %v16684_v0  ;;  %12393 = vmatprep.mubr.msk.bf16.mxu0 %vm5570_vm3, %v16678_v63  ;;  %v5233_v43 = vmul.f32 0.35355338, %v13946_v19  ;;  %v4989_v21 = vpop.f32.mrb[63].mxu0  ;;  %v5246_v22 = vmul.f32 0.35355338, %v5107_v49  ;;  %v13970_v33 = vpop.f32.mrb[62].mxu1 }
 0x456   : > { %12425 = vmatprep.mubr.msk.bf16.mxu1 %vm5570_vm3, %v16682_v62  ;;  %12440 = vmatpush3.bf16.xpose.msra.mxu0 %v6354_v7  ;;  %v5231_v39 = vmul.f32 0.35355338, %v4989_v21  ;;  %v5249_v52 = vmul.f32 0.35355338, %v13970_v33  ;;  %v5110_v28 = vpop.f32.mrb[63].mxu1  ;;  %v5427_v7 = vld [vmem:[#allocation2 + $0x388] sm:$0xff] }
 0x457   : > { %12472 = vmatpush3.bf16.xpose.msra.mxu1 %v6539_v29  ;;  %14154 = vmatprep.subr.msk.bf16.mxu0 %vm5570_vm3, %v5393_v13  ;;  %v16837_v41 = vpack.c.bf16 %v5233_v43, %v5232_v32  ;;  %v5247_v0 = vmul.f32 0.35355338, %v5110_v28  ;;  %v5436_v13 = vld [vmem:[#allocation2 + $0x3d0] sm:$0xff]  ;;  %v5421_v15 = vld [vmem:[#allocation2 + $0x358] sm:$0xff]  ;;  %v5438_v49 = vld [vmem:[#allocation2 + $0x3e0] sm:$0xff] }
 0x458   : > { %14162 = vmatprep.subr.msk.bf16.mxu1 %vm5570_vm3, %v5409_v14  ;;  %v16840_v46 = vpack.c.bf16 %v5231_v39, %v5230_v16  ;;  %v16842_v47 = vpack.c.bf16 %v5249_v52, %v5248_v31  ;;  %v5428_v14 = vld [vmem:[#allocation2 + $0x390] sm:$0xff]  ;;  %v5437_v9 = vld [vmem:[#allocation2 + $0x3d8] sm:$0xff]  ;;  %v5422_v31 = vld [vmem:[#allocation2 + $0x360] sm:$0xff] }
 0x459   : > { %v16844_v53 = vpack.c.bf16 %v5247_v0, %v5246_v22  ;;  %v5429_v16 = vld [vmem:[#allocation2 + $0x398] sm:$0xff]  ;;  %v5430_v43 = vld [vmem:[#allocation2 + $0x3a0] sm:$0xff]  ;;  %v5423_v22 = vld [vmem:[#allocation2 + $0x368] sm:$0xff] }
 0x45a   : > { %v5439_v33 = vld [vmem:[#allocation2 + $0x3e8] sm:$0xff]  ;;  %v5424_v28 = vld [vmem:[#allocation2 + $0x370] sm:$0xff] }
 0x45b   : > { %v5431_v39 = vld [vmem:[#allocation2 + $0x3a8] sm:$0xff]  ;;  %v5440_v0 = vld [vmem:[#allocation2 + $0x3f0] sm:$0xff] }
 0x45c   : > { %12394 = vmatmul.mubr.msk.bf16.gmra.mrb[124].mxu0 %vm5570_vm3, %v16678_v63  ;;  %v5410_v63 = vld [vmem:[#allocation2 + $0x300] sm:$0xff] }
 0x45d   : > { %12426 = vmatmul.mubr.msk.bf16.gmra.mrb[124].mxu1 %vm5570_vm3, %v16682_v62  ;;  %12443 = vmatprep.mubr.msk.bf16.mxu0 %vm5570_vm3, %v16700_v23  ;;  %v6706_v11 = vsel %vm5570_vm3, %v5410_v63, 0  ;;  %v6891_v62 = vsel %vm5570_vm3, %v5426_v45, 0 }
 0x45e   : > { %12442 = vmatpush3.bf16.xpose.msra.mxu0 %v6357_v54  ;;  %12475 = vmatprep.mubr.msk.bf16.mxu1 %vm5570_vm3, %v16704_v26  ;;  %v5425_v54 = vld [vmem:[#allocation2 + $0x378] sm:$0xff] }
 0x45f   : > { %12474 = vmatpush3.bf16.xpose.msra.mxu1 %v6542_v57  ;;  %14163 = vmatprep.subr.msk.bf16.mxu0 %vm5570_vm3, %v5418_v58  ;;  %v5441_v57 = vld [vmem:[#allocation2 + $0x3f8] sm:$0xff] }
 0x460   : > { %14171 = vmatprep.subr.msk.bf16.mxu1 %vm5570_vm3, %v5434_v25  ;;  %v5433_v58 = vld [vmem:[#allocation2 + $0x3b8] sm:$0xff] }
 0x465   : > { %12444 = vmatmul.mubr.msk.bf16.vlgmr.msra.gmra.mrb[128].mxu0 %vm5570_vm3, %v16700_v23  ;;  %v5411_v23 = vld [vmem:[#allocation2 + $0x308] sm:$0xff] }
 0x466   : > { %12476 = vmatmul.mubr.msk.bf16.vlgmr.msra.gmra.mrb[128].mxu1 %vm5570_vm3, %v16704_v26  ;;  %12445 = vmatprep.mubr.msk.bf16.mxu0 %vm5570_vm3, %v16698_v51  ;;  %v6709_v29 = vsel %vm5570_vm3, %v5411_v23, 0  ;;  %v6894_v26 = vsel %vm5570_vm3, %v5427_v7, 0 }
 0x467   : > { %12477 = vmatprep.mubr.msk.bf16.mxu1 %vm5570_vm3, %v16702_v24  ;;  %12492 = vmatpush3.bf16.xpose.msra.mxu0 %v6706_v11 }
 0x468   : > { %12524 = vmatpush3.bf16.xpose.msra.mxu1 %v6891_v62  ;;  %14164 = vmatprep.subr.msk.bf16.mxu0 %vm5570_vm3, %v5419_v18 }
 0x469   : > { %14172 = vmatprep.subr.msk.bf16.mxu1 %vm5570_vm3, %v5435_v59 }
 0x46d   : > { %12446 = vmatmul.mubr.msk.bf16.gmra.mrb[132].mxu0 %vm5570_vm3, %v16698_v51  ;;  %v5412_v51 = vld [vmem:[#allocation2 + $0x310] sm:$0xff] }
 0x46e   : > { %12478 = vmatmul.mubr.msk.bf16.gmra.mrb[132].mxu1 %vm5570_vm3, %v16702_v24  ;;  %12447 = vmatprep.mubr.msk.bf16.mxu0 %vm5570_vm3, %v16720_v61  ;;  %v6712_v32 = vsel %vm5570_vm3, %v5412_v51, 0  ;;  %v6897_v24 = vsel %vm5570_vm3, %v5428_v14, 0 }
 0x46f   : > { %12479 = vmatprep.mubr.msk.bf16.mxu1 %vm5570_vm3, %v16724_v2  ;;  %12494 = vmatpush3.bf16.xpose.msra.mxu0 %v6709_v29 }
 0x470   : > { %12526 = vmatpush3.bf16.xpose.msra.mxu1 %v6894_v26  ;;  %14165 = vmatprep.subr.msk.bf16.mxu0 %vm5570_vm3, %v5420_v12 }
 0x471   : > { %14173 = vmatprep.subr.msk.bf16.mxu1 %vm5570_vm3, %v5436_v13 }
 0x475   : > { %12448 = vmatmul.mubr.msk.bf16.gmra.mrb[136].mxu0 %vm5570_vm3, %v16720_v61  ;;  %v5413_v61 = vld [vmem:[#allocation2 + $0x318] sm:$0xff] }
 0x476   : > { %12480 = vmatmul.mubr.msk.bf16.gmra.mrb[136].mxu1 %vm5570_vm3, %v16724_v2  ;;  %12449 = vmatprep.mubr.msk.bf16.mxu0 %vm5570_vm3, %v16717_v37  ;;  %v6715_v19 = vsel %vm5570_vm3, %v5413_v61, 0  ;;  %v6900_v2 = vsel %vm5570_vm3, %v5429_v16, 0 }
 0x477   : > { %12481 = vmatprep.mubr.msk.bf16.mxu1 %vm5570_vm3, %v16722_v27  ;;  %12496 = vmatpush3.bf16.xpose.msra.mxu0 %v6712_v32 }
 0x478   : > { %12528 = vmatpush3.bf16.xpose.msra.mxu1 %v6897_v24  ;;  %14166 = vmatprep.subr.msk.bf16.mxu0 %vm5570_vm3, %v5421_v15 }
 0x479   : > { %14174 = vmatprep.subr.msk.bf16.mxu1 %vm5570_vm3, %v5437_v9 }
 0x47d   : > { %12450 = vmatmul.mubr.msk.bf16.gmra.mrb[140].mxu0 %vm5570_vm3, %v16717_v37  ;;  %v5414_v37 = vld [vmem:[#allocation2 + $0x320] sm:$0xff] }
 0x47e   : > { %12482 = vmatmul.mubr.msk.bf16.gmra.mrb[140].mxu1 %vm5570_vm3, %v16722_v27  ;;  %12451 = vmatprep.mubr.msk.bf16.mxu0 %vm5570_vm3, %v16740_v10  ;;  %v6718_v21 = vsel %vm5570_vm3, %v5414_v37, 0  ;;  %v6903_v27 = vsel %vm5570_vm3, %v5430_v43, 0 }
 0x47f   : > { %12483 = vmatprep.mubr.msk.bf16.mxu1 %vm5570_vm3, %v16744_v50  ;;  %12498 = vmatpush3.bf16.xpose.msra.mxu0 %v6715_v19 }
 0x480   : > { %12530 = vmatpush3.bf16.xpose.msra.mxu1 %v6900_v2  ;;  %14167 = vmatprep.subr.msk.bf16.mxu0 %vm5570_vm3, %v5422_v31 }
 0x481   : > { %14175 = vmatprep.subr.msk.bf16.mxu1 %vm5570_vm3, %v5438_v49 }
 0x485   : > { %12452 = vmatmul.mubr.msk.bf16.gmra.mrb[144].mxu0 %vm5570_vm3, %v16740_v10  ;;  %v5415_v10 = vld [vmem:[#allocation2 + $0x328] sm:$0xff] }
 0x486   : > { %12484 = vmatmul.mubr.msk.bf16.gmra.mrb[144].mxu1 %vm5570_vm3, %v16744_v50  ;;  %12453 = vmatprep.mubr.msk.bf16.mxu0 %vm5570_vm3, %v16737_v35  ;;  %v6721_v52 = vsel %vm5570_vm3, %v5415_v10, 0  ;;  %v6906_v50 = vsel %vm5570_vm3, %v5431_v39, 0 }
 0x487   : > { %12485 = vmatprep.mubr.msk.bf16.mxu1 %vm5570_vm3, %v16742_v34  ;;  %12500 = vmatpush3.bf16.xpose.msra.mxu0 %v6718_v21 }
 0x488   : > { %12532 = vmatpush3.bf16.xpose.msra.mxu1 %v6903_v27  ;;  %14168 = vmatprep.subr.msk.bf16.mxu0 %vm5570_vm3, %v5423_v22 }
 0x489   : > { %14176 = vmatprep.subr.msk.bf16.mxu1 %vm5570_vm3, %v5439_v33 }
 0x48d   : > { %12454 = vmatmul.mubr.msk.bf16.gmra.mrb[148].mxu0 %vm5570_vm3, %v16737_v35  ;;  %v5416_v35 = vld [vmem:[#allocation2 + $0x330] sm:$0xff] }
 0x48e   : > { %12486 = vmatmul.mubr.msk.bf16.gmra.mrb[148].mxu1 %vm5570_vm3, %v16742_v34  ;;  %12455 = vmatprep.mubr.msk.bf16.mxu0 %vm5570_vm3, %v16760_v8  ;;  %v6724_v36 = vsel %vm5570_vm3, %v5416_v35, 0  ;;  %v6909_v34 = vsel %vm5570_vm3, %v5432_v42, 0 }
 0x48f   : > { %12487 = vmatprep.mubr.msk.bf16.mxu1 %vm5570_vm3, %v16764_v30  ;;  %12502 = vmatpush3.bf16.xpose.msra.mxu0 %v6721_v52 }
 0x490   : > { %12534 = vmatpush3.bf16.xpose.msra.mxu1 %v6906_v50  ;;  %14169 = vmatprep.subr.msk.bf16.mxu0 %vm5570_vm3, %v5424_v28 }
 0x491   : > { %14177 = vmatprep.subr.msk.bf16.mxu1 %vm5570_vm3, %v5440_v0 }
 0x495   : > { %12456 = vmatmul.mubr.msk.bf16.gmra.mrb[152].mxu0 %vm5570_vm3, %v16760_v8  ;;  %v5417_v8 = vld [vmem:[#allocation2 + $0x338] sm:$0xff] }
 0x496   : > { %12488 = vmatmul.mubr.msk.bf16.gmra.mrb[152].mxu1 %vm5570_vm3, %v16764_v30  ;;  %12457 = vmatprep.mubr.msk.bf16.mxu0 %vm5570_vm3, %v16757_v5  ;;  %v6727_v25 = vsel %vm5570_vm3, %v5417_v8, 0  ;;  %v6912_v30 = vsel %vm5570_vm3, %v5433_v58, 0 }
 0x497   : > { %12489 = vmatprep.mubr.msk.bf16.mxu1 %vm5570_vm3, %v16762_v1  ;;  %12504 = vmatpush3.bf16.xpose.msra.mxu0 %v6724_v36 }
 0x498   : > { %12536 = vmatpush3.bf16.xpose.msra.mxu1 %v6909_v34  ;;  %14170 = vmatprep.subr.msk.bf16.mxu0 %vm5570_vm3, %v5425_v54 }
 0x499   : > { %14178 = vmatprep.subr.msk.bf16.mxu1 %vm5570_vm3, %v5441_v57 }
 0x49d   : > { %12458 = vmatmul.mubr.msk.bf16.gmra.mrb[156].mxu0 %vm5570_vm3, %v16757_v5 }
 0x49e   : > { %12490 = vmatmul.mubr.msk.bf16.gmra.mrb[156].mxu1 %vm5570_vm3, %v16762_v1  ;;  %12507 = vmatprep.mubr.msk.bf16.mxu0 %vm5570_vm3, %v16780_v48 }
 0x49f   : > { %12506 = vmatpush3.bf16.xpose.msra.mxu0 %v6727_v25  ;;  %12539 = vmatprep.mubr.msk.bf16.mxu1 %vm5570_vm3, %v16784_v56 }
 0x4a0   : > { %12538 = vmatpush3.bf16.xpose.msra.mxu1 %v6912_v30 }
 0x4a6   : > { %12508 = vmatmul.mubr.msk.bf16.vlgmr.msra.gmra.mrb[160].mxu0 %vm5570_vm3, %v16780_v48 }
 0x4a7   : > { %12540 = vmatmul.mubr.msk.bf16.vlgmr.msra.gmra.mrb[160].mxu1 %vm5570_vm3, %v16784_v56  ;;  %12509 = vmatprep.mubr.msk.bf16.mxu0 %vm5570_vm3, %v16777_v4 }
 0x4a8   : > { %12541 = vmatprep.mubr.msk.bf16.mxu1 %vm5570_vm3, %v16782_v17 }
 0x4ae   : > { %12510 = vmatmul.mubr.msk.bf16.gmra.mrb[164].mxu0 %vm5570_vm3, %v16777_v4 }
 0x4af   : > { %12542 = vmatmul.mubr.msk.bf16.gmra.mrb[164].mxu1 %vm5570_vm3, %v16782_v17  ;;  %12511 = vmatprep.mubr.msk.bf16.mxu0 %vm5570_vm3, %v16800_v55 }
 0x4b0   : > { %12543 = vmatprep.mubr.msk.bf16.mxu1 %vm5570_vm3, %v16804_v38 }
 0x4b6   : > { %12512 = vmatmul.mubr.msk.bf16.gmra.mrb[168].mxu0 %vm5570_vm3, %v16800_v55  ;;  %v16970_v5 = vpop.f32.mrb[64].mxu0 }
 0x4b7   : > { %12544 = vmatmul.mubr.msk.bf16.gmra.mrb[168].mxu1 %vm5570_vm3, %v16804_v38  ;;  %12513 = vmatprep.mubr.msk.bf16.mxu0 %vm5570_vm3, %v16797_v44  ;;  %v16976_v1 = vpop.f32.mrb[64].mxu1  ;;  %v16978_v4 = vpop.f32.mrb[65].mxu0 }
 0x4b8   : > { %12545 = vmatprep.mubr.msk.bf16.mxu1 %vm5570_vm3, %v16802_v20  ;;  %v16982_v48 = vpop.f32.mrb[65].mxu1  ;;  %v16984_v17 = vpop.f32.mrb[66].mxu0  ;;  %v7051_v56 = vmax.f32 %v16970_v5, %v16978_v4 }
 0x4b9   : > { %v16988_v55 = vpop.f32.mrb[66].mxu1  ;;  %v16990_v38 = vpop.f32.mrb[67].mxu0  ;;  %v7099_v63 = vmax.f32 %v16976_v1, %v16982_v48 }
 0x4ba   : > { %v16994_v45 = vpop.f32.mrb[67].mxu1  ;;  %7052 = vmax.xlane.f32.xlu0 %v7051_v56  ;;  %v7054_v11 = vmax.f32 %v16984_v17, %v16990_v38 }
 0x4bb   : > { %7100 = vmax.xlane.f32.xlu1 %v7099_v63  ;;  %v7102_v62 = vmax.f32 %v16988_v55, %v16994_v45 }
 0x4be   : > { %12514 = vmatmul.mubr.msk.bf16.gmra.mrb[172].mxu0 %vm5570_vm3, %v16797_v44  ;;  %7055 = vmax.xlane.f32.xlu0 %v7054_v11  ;;  %v17002_v18 = vpop.f32.mrb[68].mxu0 }
 0x4bf   : > { %12546 = vmatmul.mubr.msk.bf16.gmra.mrb[172].mxu1 %vm5570_vm3, %v16802_v20  ;;  %12515 = vmatprep.mubr.msk.bf16.mxu0 %vm5570_vm3, %v16820_v3  ;;  %v17008_v59 = vpop.f32.mrb[68].mxu1  ;;  %v17010_v23 = vpop.f32.mrb[69].mxu0 }
 0x4c0   : > { %12547 = vmatprep.mubr.msk.bf16.mxu1 %vm5570_vm3, %v16824_v6  ;;  %7103 = vmax.xlane.f32.xlu1 %v7102_v62  ;;  %v17014_v7 = vpop.f32.mrb[69].mxu1  ;;  %v17016_v44 = vpop.f32.mrb[70].mxu0  ;;  %v7057_v29 = vmax.f32 %v17002_v18, %v17010_v23 }
 0x4c1   : > { %v17020_v26 = vpop.f32.mrb[70].mxu1  ;;  %v17022_v20 = vpop.f32.mrb[71].mxu0  ;;  %v7105_v12 = vmax.f32 %v17008_v59, %v17014_v7 }
 0x4c2   : > { %v17026_v13 = vpop.f32.mrb[71].mxu1  ;;  %7058 = vmax.xlane.f32.xlu0 %v7057_v29  ;;  %v7060_v51 = vmax.f32 %v17016_v44, %v17022_v20 }
 0x4c3   : > { %v7108_v14 = vmax.f32 %v17020_v26, %v17026_v13 }
 0x4c4   : > { %7061 = vmax.xlane.f32.xlu1 %v7060_v51 }
 0x4c6   : > { %12516 = vmatmul.mubr.msk.bf16.gmra.mrb[176].mxu0 %vm5570_vm3, %v16820_v3  ;;  %7106 = vmax.xlane.f32.xlu0 %v7105_v12  ;;  %v17034_v32 = vpop.f32.mrb[72].mxu0 }
 0x4c7   : > { %12548 = vmatmul.mubr.msk.bf16.gmra.mrb[176].mxu1 %vm5570_vm3, %v16824_v6  ;;  %12517 = vmatprep.mubr.msk.bf16.mxu0 %vm5570_vm3, %v16817_v40  ;;  %v17040_v24 = vpop.f32.mrb[72].mxu1  ;;  %v17042_v15 = vpop.f32.mrb[73].mxu0 }
 0x4c8   : > { %12549 = vmatprep.mubr.msk.bf16.mxu1 %vm5570_vm3, %v16822_v60  ;;  %v17046_v9 = vpop.f32.mrb[73].mxu1  ;;  %7109 = vmax.xlane.f32.xlu1 %v7108_v14  ;;  %v17048_v3 = vpop.f32.mrb[74].mxu0  ;;  %v7063_v61 = vmax.f32 %v17034_v32, %v17042_v15 }
 0x4c9   : > { %v17052_v16 = vpop.f32.mrb[74].mxu1  ;;  %v17054_v6 = vpop.f32.mrb[75].mxu0  ;;  %v7111_v19 = vmax.f32 %v17040_v24, %v17046_v9 }
 0x4ca   : > { %v17058_v2 = vpop.f32.mrb[75].mxu1  ;;  %7064 = vmax.xlane.f32.xlu0 %v7063_v61  ;;  %v7066_v31 = vmax.f32 %v17048_v3, %v17054_v6 }
 0x4cb   : > { %v7114_v49 = vmax.f32 %v17052_v16, %v17058_v2 }
 0x4cc   : > { %7067 = vmax.xlane.f32.xlu1 %v7066_v31 }
 0x4ce   : > { %12518 = vmatmul.mubr.msk.bf16.gmra.mrb[180].mxu0 %vm5570_vm3, %v16817_v40  ;;  %7112 = vmax.xlane.f32.xlu0 %v7111_v19  ;;  %v17066_v37 = vpop.f32.mrb[76].mxu0 }
 0x4cf   : > { %12550 = vmatmul.mubr.msk.bf16.gmra.mrb[180].mxu1 %vm5570_vm3, %v16822_v60  ;;  %12519 = vmatprep.mubr.msk.bf16.mxu0 %vm5570_vm3, %v16840_v46  ;;  %v17072_v43 = vpop.f32.mrb[76].mxu1  ;;  %v17074_v21 = vpop.f32.mrb[77].mxu0 }
 0x4d0   : > { %12551 = vmatprep.mubr.msk.bf16.mxu1 %vm5570_vm3, %v16844_v53  ;;  %v17078_v27 = vpop.f32.mrb[77].mxu1  ;;  %7115 = vmax.xlane.f32.xlu1 %v7114_v49  ;;  %v17080_v40 = vpop.f32.mrb[78].mxu0  ;;  %v7069_v22 = vmax.f32 %v17066_v37, %v17074_v21 }
 0x4d1   : > { %v17084_v33 = vpop.f32.mrb[78].mxu1  ;;  %v17086_v60 = vpop.f32.mrb[79].mxu0  ;;  %v7117_v10 = vmax.f32 %v17072_v43, %v17078_v27 }
 0x4d2   : > { %v17090_v39 = vpop.f32.mrb[79].mxu1  ;;  %7070 = vmax.xlane.f32.xlu0 %v7069_v22  ;;  %v7072_v52 = vmax.f32 %v17080_v40, %v17086_v60 }
 0x4d3   : > { %v7120_v50 = vmax.f32 %v17084_v33, %v17090_v39 }
 0x4d4   : > { %7073 = vmax.xlane.f32.xlu1 %v7072_v52 }
 0x4d6   : > { %12520 = vmatmul.mubr.msk.bf16.gmra.mrb[184].mxu0 %vm5570_vm3, %v16840_v46  ;;  %7118 = vmax.xlane.f32.xlu0 %v7117_v10  ;;  %v17098_v28 = vpop.f32.mrb[80].mxu0 }
 0x4d7   : > { %12552 = vmatmul.mubr.msk.bf16.gmra.mrb[184].mxu1 %vm5570_vm3, %v16844_v53  ;;  %12521 = vmatprep.mubr.msk.bf16.mxu0 %vm5570_vm3, %v16837_v41  ;;  %v17104_v0 = vpop.f32.mrb[80].mxu1  ;;  %v17106_v35 = vpop.f32.mrb[81].mxu0 }
 0x4d8   : > { %12553 = vmatprep.mubr.msk.bf16.mxu1 %vm5570_vm3, %v16842_v47  ;;  %v17110_v42 = vpop.f32.mrb[81].mxu1  ;;  %7121 = vmax.xlane.f32.xlu1 %v7120_v50  ;;  %v17112_v46 = vpop.f32.mrb[82].mxu0  ;;  %v7075_v36 = vmax.f32 %v17098_v28, %v17106_v35 }
 0x4d9   : > { %v17116_v34 = vpop.f32.mrb[82].mxu1  ;;  %v17118_v53 = vpop.f32.mrb[83].mxu0  ;;  %v7123_v54 = vmax.f32 %v17104_v0, %v17110_v42 }
 0x4da   : > { %v17122_v57 = vpop.f32.mrb[83].mxu1  ;;  %7076 = vmax.xlane.f32.xlu0 %v7075_v36  ;;  %v7078_v8 = vmax.f32 %v17112_v46, %v17118_v53 }
 0x4db   : > { %v7126_v58 = vmax.f32 %v17116_v34, %v17122_v57 }
 0x4dc   : > { %7079 = vmax.xlane.f32.xlu1 %v7078_v8 }
 0x4de   : > { %12522 = vmatmul.mubr.msk.bf16.gmra.mrb[188].mxu0 %vm5570_vm3, %v16837_v41  ;;  %7124 = vmax.xlane.f32.xlu0 %v7123_v54  ;;  %v17130_v25 = vpop.f32.mrb[84].mxu0 }
 0x4df   : > { %12554 = vmatmul.mubr.msk.bf16.gmra.mrb[188].mxu1 %vm5570_vm3, %v16842_v47  ;;  %v17134_v30 = vpop.f32.mrb[84].mxu1  ;;  %v17136_v56 = vpop.f32.mrb[85].mxu0 }
 0x4e0   : > { %v17138_v63 = vpop.f32.mrb[85].mxu1  ;;  %7127 = vmax.xlane.f32.xlu1 %v7126_v58  ;;  %v17140_v11 = vpop.f32.mrb[86].mxu0  ;;  %v7081_v62 = vmax.f32 %v17130_v25, %v17136_v56 }
 0x4e1   : > { %21270 = vst [vmem:[#allocation4_spill] sm:$0xff] %v17138_v63  ;;  %v17144_v29 = vpop.f32.mrb[86].mxu1  ;;  %v17146_v41 = vpop.f32.mrb[87].mxu0  ;;  %v7129_v12 = vmax.f32 %v17134_v30, %v17138_v63 }
 0x4e2   : > { %21271 = vst [vmem:[#allocation5_spill] sm:$0xff] %v17144_v29  ;;  %v17150_v47 = vpop.f32.mrb[87].mxu1  ;;  %7082 = vmax.xlane.f32.xlu0 %v7081_v62  ;;  %v7084_v51 = vmax.f32 %v17140_v11, %v17146_v41 }
 0x4e3   : > { %21272 = vst [vmem:[#allocation6_spill] sm:$0xff] %v17150_v47  ;;  %v7132_v14 = vmax.f32 %v17144_v29, %v17150_v47 }
 0x4e4   : > { %7085 = vmax.xlane.f32.xlu1 %v7084_v51 }
 0x4e6   : > { %7130 = vmax.xlane.f32.xlu0 %v7129_v12  ;;  %v17156_v61 = vpop.f32.mrb[88].mxu0 }
 0x4e7   : > { %21273 = vst [vmem:[#allocation7_spill] sm:$0xff] %v17156_v61  ;;  %v17158_v19 = vpop.f32.mrb[88].mxu1  ;;  %v17160_v31 = vpop.f32.mrb[89].mxu0 }
 0x4e8   : > { %21274 = vst [vmem:[#allocation8_spill] sm:$0xff] %v17158_v19  ;;  %21275 = vst [vmem:[#allocation9_spill] sm:$0xff] %v17160_v31  ;;  %v17162_v49 = vpop.f32.mrb[89].mxu1  ;;  %7133 = vmax.xlane.f32.xlu1 %v7132_v14  ;;  %v17164_v22 = vpop.f32.mrb[90].mxu0  ;;  %v7087_v10 = vmax.f32 %v17156_v61, %v17160_v31 }
 0x4e9   : > { %21276 = vst [vmem:[#allocation10_spill] sm:$0xff] %v17162_v49  ;;  %21277 = vst [vmem:[#allocation11_spill] sm:$0xff] %v17164_v22  ;;  %v17168_v52 = vpop.f32.mrb[90].mxu1  ;;  %v17170_v50 = vpop.f32.mrb[91].mxu0  ;;  %v7135_v36 = vmax.f32 %v17158_v19, %v17162_v49 }
 0x4ea   : > { %21278 = vst [vmem:[#allocation12_spill] sm:$0xff] %v17168_v52  ;;  %21279 = vst [vmem:[#allocation13_spill] sm:$0xff] %v17170_v50  ;;  %v17174_v54 = vpop.f32.mrb[91].mxu1  ;;  %7088 = vmax.xlane.f32.xlu0 %v7087_v10  ;;  %v7090_v8 = vmax.f32 %v17164_v22, %v17170_v50 }
 0x4eb   : > { %21280 = vst [vmem:[#allocation14_spill] sm:$0xff] %v17174_v54  ;;  %v7138_v58 = vmax.f32 %v17168_v52, %v17174_v54 }
 0x4ec   : > { %7091 = vmax.xlane.f32.xlu1 %v7090_v8 }
 0x4ee   : > { %7136 = vmax.xlane.f32.xlu0 %v7135_v36  ;;  %v17180_v62 = vpop.f32.mrb[92].mxu0 }
 0x4ef   : > { %21281 = vst [vmem:[#allocation15_spill] sm:$0xff] %v17180_v62  ;;  %v17182_v12 = vpop.f32.mrb[92].mxu1  ;;  %v17184_v51 = vpop.f32.mrb[93].mxu0 }
 0x4f0   : > { %21282 = vst [vmem:[#allocation16_spill] sm:$0xff] %v17182_v12  ;;  %21283 = vst [vmem:[#allocation17_spill] sm:$0xff] %v17184_v51  ;;  %v17186_v14 = vpop.f32.mrb[93].mxu1  ;;  %7139 = vmax.xlane.f32.xlu1 %v7138_v58  ;;  %v17188_v49 = vpop.f32.mrb[94].mxu0  ;;  %v7093_v10 = vmax.f32 %v17180_v62, %v17184_v51 }
 0x4f1   : > { %21284 = vst [vmem:[#allocation18_spill] sm:$0xff] %v17186_v14  ;;  %21285 = vst [vmem:[#allocation19_spill] sm:$0xff] %v17188_v49  ;;  %v17192_v19 = vpop.f32.mrb[94].mxu1  ;;  %v17194_v50 = vpop.f32.mrb[95].mxu0  ;;  %v7141_v36 = vmax.f32 %v17182_v12, %v17186_v14 }
 0x4f2   : > { %21286 = vst [vmem:[#allocation20_spill] sm:$0xff] %v17192_v19  ;;  %21287 = vst [vmem:[#allocation21_spill] sm:$0xff] %v17194_v50  ;;  %v17198_v8 = vpop.f32.mrb[95].mxu1  ;;  %7094 = vmax.xlane.f32.xlu0 %v7093_v10  ;;  %v7096_v54 = vmax.f32 %v17188_v49, %v17194_v50 }
 0x4f3   : > { %21288 = vst [vmem:[#allocation22_spill] sm:$0xff] %v17198_v8  ;;  %v7144_v58 = vmax.f32 %v17192_v19, %v17198_v8 }
 0x4f4   : > { %7097 = vmax.xlane.f32.xlu1 %v7096_v54 }
 0x4f6   : > { %7142 = vmax.xlane.f32.xlu0 %v7141_v36 }
 0x4f7   : > { %v17204_v52 = vpop.f32.mrb[96].mxu0 }
 0x4f8   : > { %21289 = vst [vmem:[#allocation23_spill] sm:$0xff] %v17204_v52  ;;  %v17206_v51 = vpop.f32.mrb[96].mxu1  ;;  %v17208_v62 = vpop.f32.mrb[97].mxu0  ;;  %7145 = vmax.xlane.f32.xlu1 %v7144_v58 }
 0x4f9   : > { %21290 = vst [vmem:[#allocation24_spill] sm:$0xff] %v17206_v51  ;;  %21291 = vst [vmem:[#allocation25_spill] sm:$0xff] %v17208_v62  ;;  %v17210_v22 = vpop.f32.mrb[97].mxu1  ;;  %v17212_v14 = vpop.f32.mrb[98].mxu0  ;;  %v7147_v10 = vmax.f32 %v17204_v52, %v17208_v62 }
 0x4fa   : > { %21292 = vst [vmem:[#allocation26_spill] sm:$0xff] %v17210_v22  ;;  %21293 = vst [vmem:[#allocation27_spill] sm:$0xff] %v17212_v14  ;;  %v17216_v12 = vpop.f32.mrb[98].mxu1  ;;  %v17218_v50 = vpop.f32.mrb[99].mxu0  ;;  %v7195_v54 = vmax.f32 %v17206_v51, %v17210_v22 }
 0x4fb   : > { %21294 = vst [vmem:[#allocation28_spill] sm:$0xff] %v17216_v12  ;;  %21295 = vst [vmem:[#allocation29_spill] sm:$0xff] %v17218_v50  ;;  %v17222_v36 = vpop.f32.mrb[99].mxu1  ;;  %7148 = vmax.xlane.f32.xlu0 %v7147_v10  ;;  %v7150_v58 = vmax.f32 %v17212_v14, %v17218_v50 }
 0x4fc   : > { %21296 = vst [vmem:[#allocation30_spill] sm:$0xff] %v17222_v36  ;;  %v7198_v8 = vmax.f32 %v17216_v12, %v17222_v36 }
 0x4fd   : > { %7151 = vmax.xlane.f32.xlu1 %v7150_v58 }
 0x4ff   : > { %7196 = vmax.xlane.f32.xlu0 %v7195_v54  ;;  %v17228_v19 = vpop.f32.mrb[100].mxu0 }
 0x500   : > { %21297 = vst [vmem:[#allocation31_spill] sm:$0xff] %v17228_v19  ;;  %v17230_v62 = vpop.f32.mrb[100].mxu1  ;;  %v17232_v52 = vpop.f32.mrb[101].mxu0 }
 0x501   : > { %21298 = vst [vmem:[#allocation32_spill] sm:$0xff] %v17230_v62  ;;  %21299 = vst [vmem:[#allocation33_spill] sm:$0xff] %v17232_v52  ;;  %v17234_v49 = vpop.f32.mrb[101].mxu1  ;;  %7199 = vmax.xlane.f32.xlu1 %v7198_v8  ;;  %v17236_v22 = vpop.f32.mrb[102].mxu0  ;;  %v7153_v10 = vmax.f32 %v17228_v19, %v17232_v52 }
 0x502   : > { %21300 = vst [vmem:[#allocation34_spill] sm:$0xff] %v17234_v49  ;;  %21301 = vst [vmem:[#allocation35_spill] sm:$0xff] %v17236_v22  ;;  %v17240_v51 = vpop.f32.mrb[102].mxu1  ;;  %v17242_v50 = vpop.f32.mrb[103].mxu0  ;;  %v7201_v54 = vmax.f32 %v17230_v62, %v17234_v49 }
 0x503   : > { %21302 = vst [vmem:[#allocation36_spill] sm:$0xff] %v17240_v51  ;;  %21303 = vst [vmem:[#allocation37_spill] sm:$0xff] %v17242_v50  ;;  %v17246_v58 = vpop.f32.mrb[103].mxu1  ;;  %7154 = vmax.xlane.f32.xlu0 %v7153_v10  ;;  %v7156_v36 = vmax.f32 %v17236_v22, %v17242_v50 }
 0x504   : > { %21304 = vst [vmem:[#allocation38_spill] sm:$0xff] %v17246_v58  ;;  %v7204_v8 = vmax.f32 %v17240_v51, %v17246_v58 }
 0x505   : > { %7157 = vmax.xlane.f32.xlu1 %v7156_v36 }
 0x507   : > { %7202 = vmax.xlane.f32.xlu0 %v7201_v54  ;;  %v17252_v12 = vpop.f32.mrb[104].mxu0 }
 0x508   : > { %21305 = vst [vmem:[#allocation39_spill] sm:$0xff] %v17252_v12  ;;  %v17254_v52 = vpop.f32.mrb[104].mxu1  ;;  %v17256_v19 = vpop.f32.mrb[105].mxu0 }
 0x509   : > { %21306 = vst [vmem:[#allocation40_spill] sm:$0xff] %v17254_v52  ;;  %21307 = vst [vmem:[#allocation41_spill] sm:$0xff] %v17256_v19  ;;  %v17258_v14 = vpop.f32.mrb[105].mxu1  ;;  %7205 = vmax.xlane.f32.xlu1 %v7204_v8  ;;  %v17260_v49 = vpop.f32.mrb[106].mxu0  ;;  %v7159_v10 = vmax.f32 %v17252_v12, %v17256_v19 }
 0x50a   : > { %21308 = vst [vmem:[#allocation42_spill] sm:$0xff] %v17258_v14  ;;  %21309 = vst [vmem:[#allocation43_spill] sm:$0xff] %v17260_v49  ;;  %v17264_v62 = vpop.f32.mrb[106].mxu1  ;;  %v17266_v50 = vpop.f32.mrb[107].mxu0  ;;  %v7207_v36 = vmax.f32 %v17254_v52, %v17258_v14 }
 0x50b   : > { %21310 = vst [vmem:[#allocation44_spill] sm:$0xff] %v17264_v62  ;;  %21311 = vst [vmem:[#allocation45_spill] sm:$0xff] %v17266_v50  ;;  %v17270_v54 = vpop.f32.mrb[107].mxu1  ;;  %7160 = vmax.xlane.f32.xlu0 %v7159_v10  ;;  %v7162_v58 = vmax.f32 %v17260_v49, %v17266_v50 }
 0x50c   : > { %21312 = vst [vmem:[#allocation46_spill] sm:$0xff] %v17270_v54  ;;  %v7210_v8 = vmax.f32 %v17264_v62, %v17270_v54 }
 0x50d   : > { %7163 = vmax.xlane.f32.xlu1 %v7162_v58 }
 0x50f   : > { %7208 = vmax.xlane.f32.xlu0 %v7207_v36  ;;  %v17276_v51 = vpop.f32.mrb[108].mxu0 }
 0x510   : > { %21313 = vst [vmem:[#allocation47_spill] sm:$0xff] %v17276_v51  ;;  %v17278_v19 = vpop.f32.mrb[108].mxu1  ;;  %v17280_v12 = vpop.f32.mrb[109].mxu0 }
 0x511   : > { %21314 = vst [vmem:[#allocation48_spill] sm:$0xff] %v17278_v19  ;;  %21315 = vst [vmem:[#allocation49_spill] sm:$0xff] %v17280_v12  ;;  %v17282_v22 = vpop.f32.mrb[109].mxu1  ;;  %7211 = vmax.xlane.f32.xlu1 %v7210_v8  ;;  %v17284_v14 = vpop.f32.mrb[110].mxu0  ;;  %v7165_v10 = vmax.f32 %v17276_v51, %v17280_v12 }
 0x512   : > { %21316 = vst [vmem:[#allocation50_spill] sm:$0xff] %v17282_v22  ;;  %21317 = vst [vmem:[#allocation51_spill] sm:$0xff] %v17284_v14  ;;  %v17288_v52 = vpop.f32.mrb[110].mxu1  ;;  %v17290_v50 = vpop.f32.mrb[111].mxu0  ;;  %v7213_v58 = vmax.f32 %v17278_v19, %v17282_v22 }
 0x513   : > { %21318 = vst [vmem:[#allocation52_spill] sm:$0xff] %v17288_v52  ;;  %21319 = vst [vmem:[#allocation53_spill] sm:$0xff] %v17290_v50  ;;  %v17294_v36 = vpop.f32.mrb[111].mxu1  ;;  %7166 = vmax.xlane.f32.xlu0 %v7165_v10  ;;  %v7168_v54 = vmax.f32 %v17284_v14, %v17290_v50 }
 0x514   : > { %21320 = vst [vmem:[#allocation54_spill] sm:$0xff] %v17294_v36  ;;  %v7216_v8 = vmax.f32 %v17288_v52, %v17294_v36 }
 0x515   : > { %7169 = vmax.xlane.f32.xlu1 %v7168_v54 }
 0x517   : > { %7214 = vmax.xlane.f32.xlu0 %v7213_v58  ;;  %v17300_v62 = vpop.f32.mrb[112].mxu0 }
 0x518   : > { %21321 = vst [vmem:[#allocation55_spill] sm:$0xff] %v17300_v62  ;;  %v17302_v12 = vpop.f32.mrb[112].mxu1  ;;  %v17304_v51 = vpop.f32.mrb[113].mxu0 }
 0x519   : > { %21322 = vst [vmem:[#allocation56_spill] sm:$0xff] %v17302_v12  ;;  %21323 = vst [vmem:[#allocation57_spill] sm:$0xff] %v17304_v51  ;;  %v17306_v49 = vpop.f32.mrb[113].mxu1  ;;  %7217 = vmax.xlane.f32.xlu1 %v7216_v8  ;;  %v17308_v22 = vpop.f32.mrb[114].mxu0  ;;  %v7171_v10 = vmax.f32 %v17300_v62, %v17304_v51 }
 0x51a   : > { %21324 = vst [vmem:[#allocation58_spill] sm:$0xff] %v17306_v49  ;;  %21325 = vst [vmem:[#allocation59_spill] sm:$0xff] %v17308_v22  ;;  %v17312_v19 = vpop.f32.mrb[114].mxu1  ;;  %v17314_v50 = vpop.f32.mrb[115].mxu0  ;;  %v7219_v54 = vmax.f32 %v17302_v12, %v17306_v49 }
 0x51b   : > { %21326 = vst [vmem:[#allocation60_spill] sm:$0xff] %v17312_v19  ;;  %21327 = vst [vmem:[#allocation61_spill] sm:$0xff] %v17314_v50  ;;  %v17318_v58 = vpop.f32.mrb[115].mxu1  ;;  %7172 = vmax.xlane.f32.xlu0 %v7171_v10  ;;  %v7174_v36 = vmax.f32 %v17308_v22, %v17314_v50 }
 0x51c   : > { %21328 = vst [vmem:[#allocation62_spill] sm:$0xff] %v17318_v58  ;;  %v7222_v8 = vmax.f32 %v17312_v19, %v17318_v58 }
 0x51d   : > { %7175 = vmax.xlane.f32.xlu1 %v7174_v36 }
 0x51f   : > { %7220 = vmax.xlane.f32.xlu0 %v7219_v54  ;;  %v17324_v52 = vpop.f32.mrb[116].mxu0 }
 0x520   : > { %21329 = vst [vmem:[#allocation63_spill] sm:$0xff] %v17324_v52  ;;  %v17326_v51 = vpop.f32.mrb[116].mxu1  ;;  %v17328_v62 = vpop.f32.mrb[117].mxu0 }
 0x521   : > { %21330 = vst [vmem:[#allocation64_spill] sm:$0xff] %v17326_v51  ;;  %21331 = vst [vmem:[#allocation65_spill] sm:$0xff] %v17328_v62  ;;  %v17330_v14 = vpop.f32.mrb[117].mxu1  ;;  %7223 = vmax.xlane.f32.xlu1 %v7222_v8  ;;  %v17332_v49 = vpop.f32.mrb[118].mxu0  ;;  %v7177_v10 = vmax.f32 %v17324_v52, %v17328_v62 }
 0x522   : > { %21332 = vst [vmem:[#allocation66_spill] sm:$0xff] %v17330_v14  ;;  %21333 = vst [vmem:[#allocation67_spill] sm:$0xff] %v17332_v49  ;;  %v17336_v12 = vpop.f32.mrb[118].mxu1  ;;  %v17338_v50 = vpop.f32.mrb[119].mxu0  ;;  %v7225_v36 = vmax.f32 %v17326_v51, %v17330_v14 }
 0x523   : > { %21334 = vst [vmem:[#allocation68_spill] sm:$0xff] %v17336_v12  ;;  %21335 = vst [vmem:[#allocation69_spill] sm:$0xff] %v17338_v50  ;;  %v17342_v54 = vpop.f32.mrb[119].mxu1  ;;  %7178 = vmax.xlane.f32.xlu0 %v7177_v10  ;;  %v7180_v58 = vmax.f32 %v17332_v49, %v17338_v50 }
 0x524   : > { %21336 = vst [vmem:[#allocation70_spill] sm:$0xff] %v17342_v54  ;;  %v7228_v8 = vmax.f32 %v17336_v12, %v17342_v54 }
 0x525   : > { %7181 = vmax.xlane.f32.xlu1 %v7180_v58 }
 0x527   : > { %7226 = vmax.xlane.f32.xlu0 %v7225_v36  ;;  %v17348_v19 = vpop.f32.mrb[120].mxu0 }
 0x528   : > { %21337 = vst [vmem:[#allocation71_spill] sm:$0xff] %v17348_v19  ;;  %v17350_v62 = vpop.f32.mrb[120].mxu1  ;;  %v17352_v52 = vpop.f32.mrb[121].mxu0 }
 0x529   : > { %21338 = vst [vmem:[#allocation72_spill] sm:$0xff] %v17350_v62  ;;  %21339 = vst [vmem:[#allocation73_spill] sm:$0xff] %v17352_v52  ;;  %v17354_v22 = vpop.f32.mrb[121].mxu1  ;;  %7229 = vmax.xlane.f32.xlu1 %v7228_v8  ;;  %v17356_v14 = vpop.f32.mrb[122].mxu0  ;;  %v7183_v10 = vmax.f32 %v17348_v19, %v17352_v52 }
 0x52a   : > { %21340 = vst [vmem:[#allocation74_spill] sm:$0xff] %v17354_v22  ;;  %21341 = vst [vmem:[#allocation75_spill] sm:$0xff] %v17356_v14  ;;  %v17360_v51 = vpop.f32.mrb[122].mxu1  ;;  %v17362_v50 = vpop.f32.mrb[123].mxu0  ;;  %v7231_v58 = vmax.f32 %v17350_v62, %v17354_v22 }
 0x52b   : > { %21342 = vst [vmem:[#allocation76_spill] sm:$0xff] %v17360_v51  ;;  %21343 = vst [vmem:[#allocation77_spill] sm:$0xff] %v17362_v50  ;;  %v17366_v36 = vpop.f32.mrb[123].mxu1  ;;  %7184 = vmax.xlane.f32.xlu0 %v7183_v10  ;;  %v7186_v54 = vmax.f32 %v17356_v14, %v17362_v50 }
 0x52c   : > { %21344 = vst [vmem:[#allocation78_spill] sm:$0xff] %v17366_v36  ;;  %v7234_v8 = vmax.f32 %v17360_v51, %v17366_v36 }
 0x52d   : > { %7187 = vmax.xlane.f32.xlu1 %v7186_v54 }
 0x52f   : > { %7232 = vmax.xlane.f32.xlu0 %v7231_v58  ;;  %v17372_v12 = vpop.f32.mrb[124].mxu0 }
 0x530   : > { %21345 = vst [vmem:[#allocation79_spill] sm:$0xff] %v17372_v12  ;;  %v17374_v52 = vpop.f32.mrb[124].mxu1  ;;  %v17376_v19 = vpop.f32.mrb[125].mxu0 }
 0x531   : > { %21346 = vst [vmem:[#allocation80_spill] sm:$0xff] %v17374_v52  ;;  %21347 = vst [vmem:[#allocation81_spill] sm:$0xff] %v17376_v19  ;;  %v17378_v49 = vpop.f32.mrb[125].mxu1  ;;  %7235 = vmax.xlane.f32.xlu1 %v7234_v8  ;;  %v17380_v22 = vpop.f32.mrb[126].mxu0  ;;  %v7189_v10 = vmax.f32 %v17372_v12, %v17376_v19 }
 0x532   : > { %21348 = vst [vmem:[#allocation82_spill] sm:$0xff] %v17378_v49  ;;  %21349 = vst [vmem:[#allocation83_spill] sm:$0xff] %v17380_v22  ;;  %v17384_v62 = vpop.f32.mrb[126].mxu1  ;;  %v17386_v50 = vpop.f32.mrb[127].mxu0  ;;  %v7237_v54 = vmax.f32 %v17374_v52, %v17378_v49 }
 0x533   : > { %21350 = vst [vmem:[#allocation84_spill] sm:$0xff] %v17384_v62  ;;  %21351 = vst [vmem:[#allocation85_spill] sm:$0xff] %v17386_v50  ;;  %v17390_v58 = vpop.f32.mrb[127].mxu1  ;;  %7190 = vmax.xlane.f32.xlu0 %v7189_v10  ;;  %v7192_v36 = vmax.f32 %v17380_v22, %v17386_v50 }
 0x534   : > { %21352 = vst [vmem:[#allocation86_spill] sm:$0xff] %v17390_v58  ;;  %v7240_v8 = vmax.f32 %v17384_v62, %v17390_v58 }
 0x535   : > { %7193 = vmax.xlane.f32.xlu1 %v7192_v36 }
 0x537   : > { %7238 = vmax.xlane.f32.xlu0 %v7237_v54 }
 0x538   : > { %v17396_v51 = vpop.f32.mrb[128].mxu0 }
 0x539   : > { %21353 = vst [vmem:[#allocation87_spill] sm:$0xff] %v17396_v51  ;;  %v17398_v19 = vpop.f32.mrb[128].mxu1  ;;  %v17400_v12 = vpop.f32.mrb[129].mxu0  ;;  %7241 = vmax.xlane.f32.xlu1 %v7240_v8 }
 0x53a   : > { %21354 = vst [vmem:[#allocation88_spill] sm:$0xff] %v17398_v19  ;;  %21355 = vst [vmem:[#allocation89_spill] sm:$0xff] %v17400_v12  ;;  %v17402_v14 = vpop.f32.mrb[129].mxu1  ;;  %v17404_v49 = vpop.f32.mrb[130].mxu0  ;;  %v7243_v10 = vmax.f32 %v17396_v51, %v17400_v12 }
 0x53b   : > { %21356 = vst [vmem:[#allocation90_spill] sm:$0xff] %v17402_v14  ;;  %21357 = vst [vmem:[#allocation91_spill] sm:$0xff] %v17404_v49  ;;  %v17408_v52 = vpop.f32.mrb[130].mxu1  ;;  %v17410_v50 = vpop.f32.mrb[131].mxu0  ;;  %v7291_v36 = vmax.f32 %v17398_v19, %v17402_v14 }
 0x53c   : > { %21358 = vst [vmem:[#allocation92_spill] sm:$0xff] %v17408_v52  ;;  %21359 = vst [vmem:[#allocation93_spill] sm:$0xff] %v17410_v50  ;;  %v17414_v54 = vpop.f32.mrb[131].mxu1  ;;  %7244 = vmax.xlane.f32.xlu0 %v7243_v10  ;;  %v7246_v8 = vmax.f32 %v17404_v49, %v17410_v50 }
 0x53d   : > { %21360 = vst [vmem:[#allocation94_spill] sm:$0xff] %v17414_v54  ;;  %v7294_v58 = vmax.f32 %v17408_v52, %v17414_v54 }
 0x53e   : > { %7247 = vmax.xlane.f32.xlu1 %v7246_v8 }
 0x540   : > { %7292 = vmax.xlane.f32.xlu0 %v7291_v36  ;;  %v17420_v62 = vpop.f32.mrb[132].mxu0 }
 0x541   : > { %21361 = vst [vmem:[#allocation95_spill] sm:$0xff] %v17420_v62  ;;  %v17422_v12 = vpop.f32.mrb[132].mxu1  ;;  %v17424_v51 = vpop.f32.mrb[133].mxu0 }
 0x542   : > { %21362 = vst [vmem:[#allocation96_spill] sm:$0xff] %v17422_v12  ;;  %21363 = vst [vmem:[#allocation97_spill] sm:$0xff] %v17424_v51  ;;  %v17426_v22 = vpop.f32.mrb[133].mxu1  ;;  %7295 = vmax.xlane.f32.xlu1 %v7294_v58  ;;  %v17428_v14 = vpop.f32.mrb[134].mxu0  ;;  %v7249_v10 = vmax.f32 %v17420_v62, %v17424_v51 }
 0x543   : > { %21364 = vst [vmem:[#allocation98_spill] sm:$0xff] %v17426_v22  ;;  %21365 = vst [vmem:[#allocation99_spill] sm:$0xff] %v17428_v14  ;;  %v17432_v19 = vpop.f32.mrb[134].mxu1  ;;  %v17434_v50 = vpop.f32.mrb[135].mxu0  ;;  %v7297_v36 = vmax.f32 %v17422_v12, %v17426_v22 }
 0x544   : > { %21366 = vst [vmem:[#allocation100_spill] sm:$0xff] %v17432_v19  ;;  %21367 = vst [vmem:[#allocation101_spill] sm:$0xff] %v17434_v50  ;;  %v17438_v8 = vpop.f32.mrb[135].mxu1  ;;  %7250 = vmax.xlane.f32.xlu0 %v7249_v10  ;;  %v7252_v54 = vmax.f32 %v17428_v14, %v17434_v50 }
 0x545   : > { %21368 = vst [vmem:[#allocation102_spill] sm:$0xff] %v17438_v8  ;;  %v7300_v58 = vmax.f32 %v17432_v19, %v17438_v8 }
 0x546   : > { %7253 = vmax.xlane.f32.xlu1 %v7252_v54 }
 0x547   : > { %v7053_v52 = vpop.xlane.xlu0 %7052 }
 0x548   : > { %7298 = vmax.xlane.f32.xlu0 %v7297_v36  ;;  %v17444_v51 = vpop.f32.mrb[136].mxu0  ;;  %v7101_v62 = vpop.xlane.xlu1 %7100  ;;  %v7435_v49 = vsub.f32 %v16970_v5, %v7053_v52  ;;  %v7436_v31 = vsub.f32 %v16978_v4, %v7053_v52 }
 0x549   : > { %21369 = vst [vmem:[#allocation103_spill] sm:$0xff] %v17444_v51  ;;  %v17448_v22 = vpop.f32.mrb[136].mxu1  ;;  %v7467_v10 = vsub.f32 %v16976_v1, %v7101_v62  ;;  %v7468_v12 = vsub.f32 %v16982_v48, %v7101_v62  ;;  %v17452_v50 = vpop.f32.mrb[137].mxu0 }
 0x54a   : > { %21370 = vst [vmem:[#allocation104_spill] sm:$0xff] %v17448_v22  ;;  %21371 = vst [vmem:[#allocation105_spill] sm:$0xff] %v17452_v50  ;;  %v17454_v14 = vpop.f32.mrb[137].mxu1  ;;  %v7691_v54 = vmul.f32 1.442695, %v7435_v49  ;;  %7301 = vmax.xlane.f32.xlu1 %v7300_v58  ;;  %v17456_v36 = vpop.f32.mrb[138].mxu0  ;;  %v7255_v8 = vmax.f32 %v17444_v51, %v17452_v50 }
 0x54b   : > { %21372 = vst [vmem:[#allocation106_spill] sm:$0xff] %v17454_v14  ;;  %21373 = vst [vmem:[#allocation107_spill] sm:$0xff] %v17456_v36  ;;  %v7693_v5 = vmul.f32 1.442695, %v7436_v31  ;;  %v17460_v19 = vpop.f32.mrb[138].mxu1  ;;  %v17462_v4 = vpop.f32.mrb[139].mxu0  ;;  %v7303_v1 = vmax.f32 %v17448_v22, %v17454_v14 }
 0x54c   : > { %21374 = vst [vmem:[#allocation108_spill] sm:$0xff] %v17460_v19  ;;  %21375 = vst [vmem:[#allocation109_spill] sm:$0xff] %v17462_v4  ;;  %v7755_v48 = vmul.f32 1.442695, %v7467_v10  ;;  %v17466_v52 = vpop.f32.mrb[139].mxu1  ;;  %7256 = vmax.xlane.f32.xlu0 %v7255_v8  ;;  %v7056_v62 = vpop.xlane.xlu0 %7055  ;;  %v7258_v49 = vmax.f32 %v17456_v36, %v17462_v4  ;;  %14323 = vpow2.f32 %v7691_v54 }
 0x54d   : > { %21376 = vst [vmem:[#allocation110_spill] sm:$0xff] %v17466_v52  ;;  %v7757_v58 = vmul.f32 1.442695, %v7468_v12  ;;  %v7104_v61 = vpop.xlane.xlu1 %7103  ;;  %v7437_v50 = vsub.f32 %v16984_v17, %v7056_v62  ;;  %v7438_v31 = vsub.f32 %v16990_v38, %v7056_v62  ;;  %v7306_v51 = vmax.f32 %v17460_v19, %v17466_v52 }
 0x54e   : > { %v7469_v14 = vsub.f32 %v16988_v55, %v7104_v61  ;;  %v7470_v10 = vsub.f32 %v16994_v45, %v7104_v61  ;;  %7259 = vmax.xlane.f32.xlu1 %v7258_v49  ;;  %14325 = vpow2.f32 %v7693_v5 }
 0x54f   : > { %v7695_v8 = vmul.f32 1.442695, %v7437_v50  ;;  %14327 = vpow2.f32 %v7755_v48  ;;  %v7697_v22 = vmul.f32 1.442695, %v7438_v31 }
 0x550   : > { %7304 = vmax.xlane.f32.xlu0 %v7303_v1  ;;  %v17476_v12 = vpop.f32.mrb[140].mxu0  ;;  %v7059_v4 = vpop.xlane.xlu0 %7058  ;;  %14329 = vpow2.f32 %v7757_v58  ;;  %v7759_v17 = vmul.f32 1.442695, %v7469_v14  ;;  %v7761_v54 = vmul.f32 1.442695, %v7470_v10 }
 0x551   : > { %21377 = vst [vmem:[#allocation111_spill] sm:$0xff] %v17476_v12  ;;  %v17478_v38 = vpop.f32.mrb[140].mxu1  ;;  %v17480_v62 = vpop.f32.mrb[141].mxu0  ;;  %14331 = vpow2.f32 %v7695_v8  ;;  %v7440_v10 = vsub.f32 %v17010_v23, %v7059_v4 }
 0x552   : > { %21378 = vst [vmem:[#allocation112_spill] sm:$0xff] %v17478_v38  ;;  %21379 = vst [vmem:[#allocation113_spill] sm:$0xff] %v17480_v62  ;;  %v17482_v55 = vpop.f32.mrb[141].mxu1  ;;  %7307 = vmax.xlane.f32.xlu1 %v7306_v51  ;;  %v17484_v45 = vpop.f32.mrb[142].mxu0  ;;  %v7261_v61 = vmax.f32 %v17476_v12, %v17480_v62  ;;  %14333 = vpow2.f32 %v7697_v22  ;;  %v7439_v51 = vsub.f32 %v17002_v18, %v7059_v4 }
 0x553   : > { %21380 = vst [vmem:[#allocation114_spill] sm:$0xff] %v17482_v55  ;;  %21381 = vst [vmem:[#allocation115_spill] sm:$0xff] %v17484_v45  ;;  %v17488_v50 = vpop.f32.mrb[142].mxu1  ;;  %v7062_v5 = vpop.xlane.xlu1 %7061  ;;  %v7309_v14 = vmax.f32 %v17478_v38, %v17482_v55  ;;  %14335 = vpow2.f32 %v7759_v17 }
 0x554   : > { %21382 = vst [vmem:[#allocation116_spill] sm:$0xff] %v17488_v50  ;;  %v17492_v1 = vpop.f32.mrb[143].mxu1  ;;  %v17494_v48 = vpop.f32.mrb[143].mxu0  ;;  %7262 = vmax.xlane.f32.xlu0 %v7261_v61  ;;  %14337 = vpow2.f32 %v7761_v54  ;;  %v7441_v22 = vsub.f32 %v17016_v44, %v7062_v5  ;;  %v7442_v17 = vsub.f32 %v17022_v20, %v7062_v5  ;;  %v7699_v38 = vmul.f32 1.442695, %v7439_v51 }
 0x555   : > { %21383 = vst [vmem:[#allocation117_spill] sm:$0xff] %v17492_v1  ;;  %21384 = vst [vmem:[#allocation118_spill] sm:$0xff] %v17494_v48  ;;  %v7107_v49 = vpop.xlane.xlu0 %7106  ;;  %v7264_v58 = vmax.f32 %v17484_v45, %v17494_v48  ;;  %v7312_v31 = vmax.f32 %v17488_v50, %v17492_v1  ;;  %v7701_v44 = vmul.f32 1.442695, %v7440_v10 }
 0x556   : > { %v17503_v55 = vpop.eup %14323  ;;  %v7471_v48 = vsub.f32 %v17008_v59, %v7107_v49  ;;  %v7472_v4 = vsub.f32 %v17014_v7, %v7107_v49  ;;  %v7705_v7 = vmul.f32 1.442695, %v7442_v17  ;;  %14339 = vpow2.f32 %v7699_v38 }
 0x557   : > { %7265 = vmax.xlane.f32.xlu1 %v7264_v58  ;;  %v7110_v8 = vpop.xlane.xlu1 %7109  ;;  %21385 = vst [vmem:[#allocation119_spill] sm:$0xff] %v17503_v55  ;;  %14341 = vpow2.f32 %v7701_v44 }
 0x558   : > { %7310 = vmax.xlane.f32.xlu0 %v7309_v14  ;;  %v17506_v18 = vpop.f32.mrb[144].mxu0  ;;  %v17508_v61 = vpop.eup %14325  ;;  %v7703_v14 = vmul.f32 1.442695, %v7441_v22  ;;  %v7473_v12 = vsub.f32 %v17020_v26, %v7110_v8  ;;  %v7765_v17 = vmul.f32 1.442695, %v7472_v4 }
 0x559   : > { %21386 = vst [vmem:[#allocation120_spill] sm:$0xff] %v17506_v18  ;;  %21387 = vst [vmem:[#allocation121_spill] sm:$0xff] %v17508_v61  ;;  %v17511_v1 = vpop.f32.mrb[144].mxu1  ;;  %v17513_v54 = vpop.xlane.xlu0 %7064  ;;  %v8203_v51 = vadd.f32 %v17508_v61, %v17503_v55 }
 0x55a   : > { %21388 = vst [vmem:[#allocation122_spill] sm:$0xff] %v17511_v1  ;;  %v17515_v23 = vpop.eup %14327  ;;  %v17518_v58 = vpop.f32.mrb[145].mxu1  ;;  %14343 = vpow2.f32 %v7703_v14 }
 0x55b   : > { %21389 = vst [vmem:[#allocation123_spill] sm:$0xff] %v17515_v23  ;;  %21390 = vst [vmem:[#allocation124_spill] sm:$0xff] %v17518_v58  ;;  %v17520_v20 = vpop.f32.mrb[145].mxu0  ;;  %v17522_v5 = vpop.eup %14329  ;;  %7313 = vmax.xlane.f32.xlu1 %v7312_v31  ;;  %v7763_v31 = vmul.f32 1.442695, %v7471_v48  ;;  %14345 = vpow2.f32 %v7705_v7  ;;  %v21414_v36 = vmax.f32 %v17511_v1, %v17518_v58 }
 0x55c   : > { %21391 = vst [vmem:[#allocation125_spill] sm:$0xff] %v17520_v20  ;;  %21392 = vst [vmem:[#allocation126_spill] sm:$0xff] %v17522_v5  ;;  %v17524_v50 = vpop.f32.mrb[146].mxu1  ;;  %v17526_v59 = vpop.f32.mrb[146].mxu0  ;;  %v7267_v10 = vmax.f32 %v17506_v18, %v17520_v20  ;;  %8204 = vadd.xlane.f32.xlu0 %v8203_v51  ;;  %v7474_v20 = vsub.f32 %v17026_v13, %v7110_v8  ;;  %v8251_v26 = vadd.f32 %v17522_v5, %v17515_v23 }
 0x55d   : > { %21393 = vst [vmem:[#allocation127_spill] sm:$0xff] %v17524_v50  ;;  %21394 = vst [vmem:[#allocation128_spill] sm:$0xff] %v17526_v59  ;;  %v17532_v45 = vpop.eup %14331  ;;  %v17534_v49 = vpop.f32.mrb[147].mxu1  ;;  %14347 = vpow2.f32 %v7763_v31  ;;  %v7767_v8 = vmul.f32 1.442695, %v7473_v12  ;;  %v7444_v12 = vsub.f32 %v17042_v15, %v17513_v54 }
 0x55e   : > { %21395 = vst [vmem:[#allocation129_spill] sm:$0xff] %v17532_v45  ;;  %21396 = vst [vmem:[#allocation130_spill] sm:$0xff] %v17534_v49  ;;  %v17536_v62 = vpop.xlane.xlu1 %7067  ;;  %v17541_v52 = vpop.f32.mrb[147].mxu0  ;;  %14349 = vpow2.f32 %v7765_v17  ;;  %v7769_v7 = vmul.f32 1.442695, %v7474_v20  ;;  %v5450_v17 = vld [vmem:[#allocation3 + $0x40] sm:$0xff]  ;;  %v7443_v20 = vsub.f32 %v17034_v32, %v17513_v54 }
 0x55f   : > { %21397 = vst [vmem:[#allocation131_spill] sm:$0xff] %v17541_v52  ;;  %v17543_v61 = vpop.xlane.xlu0 %7112  ;;  %v17545_v55 = vpop.eup %14333  ;;  %v7270_v44 = vmax.f32 %v17526_v59, %v17541_v52  ;;  %14351 = vpow2.f32 %v7767_v8  ;;  %12555 = vmatprep.subr.bf16.mxu0 %v5450_v17  ;;  %v7445_v32 = vsub.f32 %v17048_v3, %v17536_v62  ;;  %v5443_v54 = vld [vmem:[#allocation3 + $0x8] sm:$0xff]  ;;  %v7709_v47 = vmul.f32 1.442695, %v7444_v12 }
 0x560   : > { %21398 = vst [vmem:[#allocation132_spill] sm:$0xff] %v17545_v55  ;;  %v17548_v18 = vpop.eup %14335  ;;  %v8206_v38 = vadd.f32 %v17545_v55, %v17532_v45  ;;  %v17558_v22 = vpop.f32.mrb[148].mxu0  ;;  %8252 = vadd.xlane.f32.xlu0 %v8251_v26  ;;  %14353 = vpow2.f32 %v7769_v7  ;;  %v7446_v7 = vsub.f32 %v17054_v6, %v17536_v62  ;;  %v7707_v3 = vmul.f32 1.442695, %v7443_v20 }
 0x561   : > { %21399 = vst [vmem:[#allocation133_spill] sm:$0xff] %v17548_v18  ;;  %v17554_v48 = vpop.eup %14337  ;;  %21401 = vst [vmem:[#allocation135_spill] sm:$0xff] %v17558_v22  ;;  %v17564_v4 = vpop.f32.mrb[148].mxu1  ;;  %v7476_v20 = vsub.f32 %v17046_v9, %v17543_v61 }
 0x562   : > { %21400 = vst [vmem:[#allocation134_spill] sm:$0xff] %v17554_v48  ;;  %v17556_v51 = vpop.xlane.xlu1 %7115  ;;  %8207 = vadd.xlane.f32.xlu1 %v8206_v38  ;;  %21402 = vst [vmem:[#allocation136_spill] sm:$0xff] %v17564_v4  ;;  %v17568_v5 = vpop.f32.mrb[149].mxu1  ;;  %v8254_v31 = vadd.f32 %v17554_v48, %v17548_v18  ;;  %v5442_v18 = vld [vmem:[#allocation3] sm:$0xff]  ;;  %14355 = vpow2.f32 %v7707_v3 }
 0x563   : > { %v17566_v14 = vpop.xlane.xlu0 %7070  ;;  %21403 = vst [vmem:[#allocation137_spill] sm:$0xff] %v17568_v5  ;;  %v17570_v23 = vpop.f32.mrb[149].mxu0  ;;  %12556 = vmatpush3.bf16.msra.mxu0 %v5442_v18  ;;  %v7475_v18 = vsub.f32 %v17040_v24, %v17543_v61  ;;  %v7713_v61 = vmul.f32 1.442695, %v7446_v7  ;;  %v21423_v7 = vmax.f32 %v17524_v50, %v17534_v49  ;;  %14357 = vpow2.f32 %v7709_v47 }
 0x564   : > { %21404 = vst [vmem:[#allocation138_spill] sm:$0xff] %v17570_v23  ;;  %v17572_v55 = vpop.f32.mrb[150].mxu0  ;;  %v17574_v45 = vpop.f32.mrb[150].mxu1  ;;  %7268 = vmax.xlane.f32.xlu0 %v7267_v10  ;;  %v5451_v10 = vld [vmem:[#allocation3 + $0x48] sm:$0xff]  ;;  %v7773_v3 = vmul.f32 1.442695, %v7476_v20 }
 0x565   : > { %21405 = vst [vmem:[#allocation139_spill] sm:$0xff] %v17572_v55  ;;  %21406 = vst [vmem:[#allocation140_spill] sm:$0xff] %v17574_v45  ;;  %v17580_v38 = vpop.f32.mrb[151].mxu1  ;;  %v17586_v13 = vpop.f32.mrb[151].mxu0  ;;  %12557 = vmatprep.subr.bf16.mxu0 %v5451_v10  ;;  %v5458_v10 = vld [vmem:[#allocation3 + $0x80] sm:$0xff]  ;;  %v5468_v20 = vld [vmem:[#allocation3 + $0xd0] sm:$0xff] }
 0x566   : > { %21407 = vst [vmem:[#allocation141_spill] sm:$0xff] %v17580_v38  ;;  %v17582_v26 = vpop.xlane.xlu1 %7073  ;;  %8255 = vadd.xlane.f32.xlu1 %v8254_v31  ;;  %21408 = vst [vmem:[#allocation142_spill] sm:$0xff] %v17586_v13  ;;  %v17594_v59 = vpop.eup %14339  ;;  %v5466_v31 = vld [vmem:[#allocation3 + $0xc0] sm:$0xff] }
 0x567   : > { %v17588_v52 = vpop.xlane.xlu0 %7118  ;;  %21409 = vst [vmem:[#allocation143_spill] sm:$0xff] %v17594_v59  ;;  %v17600_v19 = vpop.eup %14341  ;;  %12619 = vmatprep.subr.bf16.mxu1 %v5466_v31  ;;  %12558 = vmatpush3.bf16.msra.mxu0 %v5443_v54 }
 0x568   : > { %21410 = vst [vmem:[#allocation144_spill] sm:$0xff] %v17600_v19  ;;  %v17606_v15 = vpop.f32.mrb[152].mxu0  ;;  %v17608_v17 = vpop.eup %14343  ;;  %7316 = vmax.xlane.f32.xlu0 %v21414_v36  ;;  %12620 = vmatpush3.bf16.msra.mxu1 %v5458_v10  ;;  %v7711_v36 = vmul.f32 1.442695, %v7445_v32  ;;  %v8209_v12 = vadd.f32 %v17600_v19, %v17594_v59  ;;  %v7477_v10 = vsub.f32 %v17052_v16, %v17556_v51  ;;  %v5467_v19 = vld [vmem:[#allocation3 + $0xc8] sm:$0xff] }
 0x569   : > { %21411 = vst [vmem:[#allocation145_spill] sm:$0xff] %v17606_v15  ;;  %21412 = vst [vmem:[#allocation146_spill] sm:$0xff] %v17608_v17  ;;  %v17612_v8 = vpop.f32.mrb[152].mxu1  ;;  %v17621_v31 = vpop.eup %14345  ;;  %v7478_v59 = vsub.f32 %v17058_v2, %v17556_v51  ;;  %v5459_v15 = vld [vmem:[#allocation3 + $0x88] sm:$0xff]  ;;  %v7447_v2 = vsub.f32 %v17066_v37, %v17566_v14  ;;  %12621 = vmatprep.subr.bf16.mxu1 %v5467_v19  ;;  %v5453_v37 = vld [vmem:[#allocation3 + $0x58] sm:$0xff] }
 0x56a   : > { %v17604_v48 = vpop.xlane.xlu1 %7121  ;;  %7271 = vmax.xlane.f32.xlu1 %v7270_v44  ;;  %21413 = vst [vmem:[#allocation147_spill] sm:$0xff] %v17612_v8  ;;  %21415 = vst [vmem:[#allocation148_spill] sm:$0xff] %v17621_v31  ;;  %v17625_v24 = vpop.f32.mrb[153].mxu1  ;;  %v7771_v8 = vmul.f32 1.442695, %v7475_v18  ;;  %14359 = vpow2.f32 %v7711_v36 }
 0x56b   : > { %v17617_v6 = vpop.xlane.xlu0 %7076  ;;  %21416 = vst [vmem:[#allocation149_spill] sm:$0xff] %v17625_v24  ;;  %v17627_v44 = vpop.f32.mrb[153].mxu0  ;;  %v5452_v24 = vld [vmem:[#allocation3 + $0x50] sm:$0xff]  ;;  %14361 = vpow2.f32 %v7713_v61  ;;  %v7775_v19 = vmul.f32 1.442695, %v7477_v10 }
 0x56c   : > { %21417 = vst [vmem:[#allocation150_spill] sm:$0xff] %v17627_v44  ;;  %v17629_v29 = vpop.eup %14347  ;;  %v17633_v1 = vpop.f32.mrb[154].mxu0  ;;  %8210 = vadd.xlane.f32.xlu0 %v8209_v12  ;;  %v5444_v44 = vld [vmem:[#allocation3 + $0x10] sm:$0xff]  ;;  %12559 = vmatprep.subr.bf16.mxu0 %v5452_v24  ;;  %v7448_v12 = vsub.f32 %v17074_v21, %v17566_v14  ;;  %v7449_v24 = vsub.f32 %v17080_v40, %v17582_v26  ;;  %v5445_v14 = vld [vmem:[#allocation3 + $0x18] sm:$0xff]  ;;  %14363 = vpow2.f32 %v7771_v8  ;;  %v7777_v51 = vmul.f32 1.442695, %v7478_v59 }
 0x56d   : > { %21418 = vst [vmem:[#allocation151_spill] sm:$0xff] %v17629_v29  ;;  %21419 = vst [vmem:[#allocation152_spill] sm:$0xff] %v17633_v1  ;;  %v17635_v62 = vpop.f32.mrb[154].mxu1  ;;  %v17639_v9 = vpop.eup %14349  ;;  %12560 = vmatpush3.bf16.msra.mxu0 %v5444_v44  ;;  %12622 = vmatpush3.bf16.msra.mxu1 %v5459_v15  ;;  %v7450_v15 = vsub.f32 %v17086_v60, %v17582_v26  ;;  %v5460_v10 = vld [vmem:[#allocation3 + $0x90] sm:$0xff]  ;;  %14365 = vpow2.f32 %v7773_v3  ;;  %v7715_v40 = vmul.f32 1.442695, %v7447_v2 }
 0x56e   : > { %21420 = vst [vmem:[#allocation153_spill] sm:$0xff] %v17635_v62  ;;  %21421 = vst [vmem:[#allocation154_spill] sm:$0xff] %v17639_v9  ;;  %v17645_v63 = vpop.f32.mrb[155].mxu1  ;;  %v17647_v58 = vpop.xlane.xlu1 %7079  ;;  %7319 = vmax.xlane.f32.xlu1 %v21423_v7  ;;  %v8212_v7 = vadd.f32 %v17621_v31, %v17608_v17  ;;  %v8257_v47 = vadd.f32 %v17639_v9, %v17629_v29  ;;  %12561 = vmatprep.subr.bf16.mxu0 %v5453_v37  ;;  %v7717_v59 = vmul.f32 1.442695, %v7448_v12 }
 0x56f   : > { %21422 = vst [vmem:[#allocation155_spill] sm:$0xff] %v17645_v63  ;;  %v17656_v16 = vpop.f32.mrb[155].mxu0  ;;  %v17658_v32 = vpop.xlane.xlu0 %7124  ;;  %12623 = vmatprep.subr.bf16.mxu1 %v5468_v20  ;;  %v7479_v29 = vsub.f32 %v17072_v43, %v17588_v52  ;;  %v7480_v60 = vsub.f32 %v17078_v27, %v17588_v52  ;;  %14367 = vpow2.f32 %v7775_v19  ;;  %v7719_v43 = vmul.f32 1.442695, %v7449_v24  ;;  %v5446_v27 = vld [vmem:[#allocation3 + $0x20] sm:$0xff] }
 0x570   : > { %21424 = vst [vmem:[#allocation156_spill] sm:$0xff] %v17656_v16  ;;  %v17664_v18 = vpop.eup %14351  ;;  %v17678_v21 = vpop.f32.mrb[156].mxu0  ;;  %8258 = vadd.xlane.f32.xlu0 %v8257_v47  ;;  %v7481_v2 = vsub.f32 %v17084_v33, %v17604_v48  ;;  %v5454_v47 = vld [vmem:[#allocation3 + $0x60] sm:$0xff]  ;;  %14369 = vpow2.f32 %v7777_v51  ;;  %v7721_v26 = vmul.f32 1.442695, %v7450_v15  ;;  %v21435_v33 = vmax.f32 %v17558_v22, %v17570_v23 }
 0x571   : > { %21425 = vst [vmem:[#allocation157_spill] sm:$0xff] %v17664_v18  ;;  %v17672_v54 = vpop.eup %14353  ;;  %21427 = vst [vmem:[#allocation159_spill] sm:$0xff] %v17678_v21  ;;  %v17682_v44 = vpop.f32.mrb[156].mxu1  ;;  %12562 = vmatpush3.bf16.msra.mxu0 %v5445_v14  ;;  %12624 = vmatpush3.bf16.msra.mxu1 %v5460_v10  ;;  %v5469_v10 = vld [vmem:[#allocation3 + $0xd8] sm:$0xff]  ;;  %14371 = vpow2.f32 %v7715_v40  ;;  %v7779_v51 = vmul.f32 1.442695, %v7479_v29  ;;  %v7451_v29 = vsub.f32 %v17098_v28, %v17617_v6 }
 0x572   : > { %21426 = vst [vmem:[#allocation158_spill] sm:$0xff] %v17672_v54  ;;  %v17676_v36 = vpop.xlane.xlu1 %7127  ;;  %8213 = vadd.xlane.f32.xlu1 %v8212_v7  ;;  %21428 = vst [vmem:[#allocation160_spill] sm:$0xff] %v17682_v44  ;;  %v17688_v37 = vpop.f32.mrb[157].mxu1  ;;  %v8260_v3 = vadd.f32 %v17672_v54, %v17664_v18  ;;  %v7482_v18 = vsub.f32 %v17090_v39, %v17604_v48  ;;  %v5461_v54 = vld [vmem:[#allocation3 + $0x98] sm:$0xff]  ;;  %12563 = vmatprep.subr.bf16.mxu0 %v5454_v47  ;;  %14373 = vpow2.f32 %v7717_v59  ;;  %v5447_v59 = vld [vmem:[#allocation3 + $0x28] sm:$0xff] }
 0x573   : > { %v17684_v61 = vpop.xlane.xlu0 %7082  ;;  %21429 = vst [vmem:[#allocation161_spill] sm:$0xff] %v17688_v37  ;;  %v17690_v20 = vpop.f32.mrb[157].mxu0  ;;  %12625 = vmatprep.subr.bf16.mxu1 %v5469_v10  ;;  %v7781_v15 = vmul.f32 1.442695, %v7480_v60  ;;  %14375 = vpow2.f32 %v7719_v43  ;;  %v7783_v9 = vmul.f32 1.442695, %v7481_v2  ;;  %v7452_v40 = vsub.f32 %v17106_v35, %v17617_v6 }
 0x574   : > { %21430 = vst [vmem:[#allocation162_spill] sm:$0xff] %v17690_v20  ;;  %v17696_v8 = vpop.f32.mrb[158].mxu0  ;;  %v17698_v7 = vpop.f32.mrb[158].mxu1  ;;  %7274 = vmax.xlane.f32.xlu0 %v21435_v33  ;;  %v5470_v33 = vld [vmem:[#allocation3 + $0xe0] sm:$0xff]  ;;  %14377 = vpow2.f32 %v7721_v26  ;;  %v21439_v43 = vmax.f32 %v17572_v55, %v17586_v13  ;;  %v21440_v28 = vmax.f32 %v17564_v4, %v17568_v5  ;;  %v7453_v10 = vsub.f32 %v17112_v46, %v17647_v58 }
 0x575   : > { %21431 = vst [vmem:[#allocation163_spill] sm:$0xff] %v17696_v8  ;;  %21432 = vst [vmem:[#allocation164_spill] sm:$0xff] %v17698_v7  ;;  %v17706_v52 = vpop.f32.mrb[159].mxu1  ;;  %v17714_v24 = vpop.f32.mrb[159].mxu0  ;;  %12564 = vmatpush3.bf16.msra.mxu0 %v5446_v27  ;;  %12626 = vmatpush3.bf16.msra.mxu1 %v5461_v54  ;;  %v5462_v60 = vld [vmem:[#allocation3 + $0xa0] sm:$0xff]  ;;  %14379 = vpow2.f32 %v7779_v51  ;;  %v7483_v5 = vsub.f32 %v17104_v0, %v17658_v32  ;;  %v5472_v0 = vld [vmem:[#allocation3 + $0xf0] sm:$0xff] }
 0x576   : > { %21433 = vst [vmem:[#allocation165_spill] sm:$0xff] %v17706_v52  ;;  %v17708_v12 = vpop.xlane.xlu1 %7085  ;;  %8261 = vadd.xlane.f32.xlu1 %v8260_v3  ;;  %21434 = vst [vmem:[#allocation166_spill] sm:$0xff] %v17714_v24  ;;  %v17723_v48 = vpop.eup %14355  ;;  %v5455_v3 = vld [vmem:[#allocation3 + $0x68] sm:$0xff]  ;;  %12627 = vmatprep.subr.bf16.mxu1 %v5470_v33  ;;  %v7785_v54 = vmul.f32 1.442695, %v7482_v18  ;;  %14381 = vpow2.f32 %v7781_v15  ;;  %v7454_v33 = vsub.f32 %v17118_v53, %v17647_v58 }
 0x577   : > { %v17719_v14 = vpop.xlane.xlu0 %7130  ;;  %21436 = vst [vmem:[#allocation167_spill] sm:$0xff] %v17723_v48  ;;  %v17725_v19 = vpop.eup %14357  ;;  %12565 = vmatprep.subr.bf16.mxu0 %v5455_v3  ;;  %14383 = vpow2.f32 %v7783_v9  ;;  %v7723_v17 = vmul.f32 1.442695, %v7451_v29  ;;  %v7725_v15 = vmul.f32 1.442695, %v7452_v40  ;;  %v5471_v29 = vld [vmem:[#allocation3 + $0xe8] sm:$0xff] }
 0x578   : > { %21437 = vst [vmem:[#allocation168_spill] sm:$0xff] %v17725_v19  ;;  %v17733_v27 = vpop.eup %14359  ;;  %7322 = vmax.xlane.f32.xlu0 %v21440_v28  ;;  %v8215_v46 = vadd.f32 %v17725_v19, %v17723_v48  ;;  %v5456_v28 = vld [vmem:[#allocation3 + $0x70] sm:$0xff]  ;;  %14385 = vpow2.f32 %v7785_v54  ;;  %v7727_v19 = vmul.f32 1.442695, %v7453_v10  ;;  %v7484_v54 = vsub.f32 %v17110_v42, %v17658_v32  ;;  %v5457_v32 = vld [vmem:[#allocation3 + $0x78] sm:$0xff] }
 0x579   : > { %21438 = vst [vmem:[#allocation169_spill] sm:$0xff] %v17733_v27  ;;  %v17741_v2 = vpop.f32.mrb[160].mxu0  ;;  %v17745_v6 = vpop.eup %14361  ;;  %12566 = vmatpush3.bf16.msra.mxu0 %v5447_v59  ;;  %12628 = vmatpush3.bf16.msra.mxu1 %v5462_v60  ;;  %v21451_v59 = vmax.f32 %v17574_v45, %v17580_v38  ;;  %v5448_v40 = vld [vmem:[#allocation3 + $0x30] sm:$0xff]  ;;  %v5463_v60 = vld [vmem:[#allocation3 + $0xa8] sm:$0xff]  ;;  %v7485_v45 = vsub.f32 %v17116_v34, %v17676_v36  ;;  %14387 = vpow2.f32 %v7723_v17  ;;  %v5449_v34 = vld [vmem:[#allocation3 + $0x38] sm:$0xff] }
 0x57a   : > { %v17731_v47 = vpop.xlane.xlu1 %7133  ;;  %7277 = vmax.xlane.f32.xlu1 %v21439_v43  ;;  %21441 = vst [vmem:[#allocation170_spill] sm:$0xff] %v17741_v2  ;;  %21442 = vst [vmem:[#allocation171_spill] sm:$0xff] %v17745_v6  ;;  %v17749_v26 = vpop.f32.mrb[160].mxu1  ;;  %12567 = vmatprep.subr.bf16.mxu0 %v5456_v28  ;;  %v8218_v10 = vadd.f32 %v17745_v6, %v17733_v27  ;;  %v7486_v28 = vsub.f32 %v17122_v57, %v17676_v36  ;;  %14389 = vpow2.f32 %v7725_v15  ;;  %v5473_v15 = vld [vmem:[#allocation3 + $0xf8] sm:$0xff] }
 0x57b   : > { %v17743_v35 = vpop.xlane.xlu0 %7088  ;;  %21443 = vst [vmem:[#allocation172_spill] sm:$0xff] %v17749_v26  ;;  %v17751_v18 = vpop.f32.mrb[161].mxu0  ;;  %12629 = vmatprep.subr.bf16.mxu1 %v5471_v29  ;;  %v5464_v29 = vld [vmem:[#allocation3 + $0xb0] sm:$0xff]  ;;  %14391 = vpow2.f32 %v7727_v19  ;;  %v7789_v57 = vmul.f32 1.442695, %v7484_v54  ;;  %v7456_v36 = vsub.f32 %v17136_v56, %v17684_v61  ;;  %v7458_v54 = vsub.f32 %v17146_v41, %v17708_v12 }
 0x57c   : > { %21444 = vst [vmem:[#allocation173_spill] sm:$0xff] %v17751_v18  ;;  %v17753_v3 = vpop.eup %14363  ;;  %v17757_v43 = vpop.f32.mrb[161].mxu1  ;;  %8216 = vadd.xlane.f32.xlu0 %v8215_v46 }
 0x57d   : > { %21445 = vst [vmem:[#allocation174_spill] sm:$0xff] %v17753_v3  ;;  %21446 = vst [vmem:[#allocation175_spill] sm:$0xff] %v17757_v43  ;;  %v17761_v39 = vpop.f32.mrb[162].mxu0  ;;  %v17765_v51 = vpop.eup %14365  ;;  %12568 = vmatpush3.bf16.msra.mxu0 %v5448_v40  ;;  %12630 = vmatpush3.bf16.msra.mxu1 %v5463_v60  ;;  %v7455_v40 = vsub.f32 %v17130_v25, %v17684_v61  ;;  %v7791_v25 = vmul.f32 1.442695, %v7485_v45  ;;  %v21468_v45 = vld [vmem:[#allocation145_spill] sm:$0xff] }
 0x57e   : > { %21447 = vst [vmem:[#allocation176_spill] sm:$0xff] %v17761_v39  ;;  %21448 = vst [vmem:[#allocation177_spill] sm:$0xff] %v17765_v51  ;;  %v17769_v58 = vpop.f32.mrb[162].mxu1  ;;  %v17771_v31 = vpop.xlane.xlu1 %7091  ;;  %7325 = vmax.xlane.f32.xlu1 %v21451_v59  ;;  %v7729_v59 = vmul.f32 1.442695, %v7454_v33  ;;  %v8263_v42 = vadd.f32 %v17765_v51, %v17753_v3  ;;  %12569 = vmatprep.subr.bf16.mxu0 %v5457_v32 }
 0x57f   : > { %21449 = vst [vmem:[#allocation178_spill] sm:$0xff] %v17769_v58  ;;  %v17775_v48 = vpop.f32.mrb[163].mxu1  ;;  %v17780_v9 = vpop.f32.mrb[163].mxu0  ;;  %12631 = vmatprep.subr.bf16.mxu1 %v5472_v0  ;;  %v7787_v3 = vmul.f32 1.442695, %v7483_v5 }
 0x580   : > { %21450 = vst [vmem:[#allocation179_spill] sm:$0xff] %v17775_v48  ;;  %21452 = vst [vmem:[#allocation180_spill] sm:$0xff] %v17780_v9  ;;  %v17782_v53 = vpop.eup %14367  ;;  %v17790_v38 = vpop.xlane.xlu0 %7136  ;;  %8264 = vadd.xlane.f32.xlu0 %v8263_v42  ;;  %14393 = vpow2.f32 %v7729_v59  ;;  %v7793_v61 = vmul.f32 1.442695, %v7486_v28  ;;  %v7487_v28 = vsub.f32 %v17134_v30, %v17719_v14 }
 0x581   : > { %21453 = vst [vmem:[#allocation181_spill] sm:$0xff] %v17782_v53  ;;  %v17792_v46 = vpop.eup %14369  ;;  %v17810_v60 = vpop.f32.mrb[164].mxu0  ;;  %12570 = vmatpush3.bf16.msra.mxu0 %v5449_v34  ;;  %12632 = vmatpush3.bf16.msra.mxu1 %v5464_v29  ;;  %14395 = vpow2.f32 %v7787_v3  ;;  %v7731_v29 = vmul.f32 1.442695, %v7455_v40 }
 0x582   : > { %21454 = vst [vmem:[#allocation182_spill] sm:$0xff] %v17792_v46  ;;  %v17800_v4 = vpop.eup %14371  ;;  %v17804_v33 = vpop.xlane.xlu1 %7139  ;;  %8219 = vadd.xlane.f32.xlu1 %v8218_v10  ;;  %21457 = vst [vmem:[#allocation185_spill] sm:$0xff] %v17810_v60  ;;  %v7457_v10 = vsub.f32 %v17140_v11, %v17708_v12  ;;  %v8266_v19 = vadd.f32 %v17792_v46, %v17782_v53  ;;  %12633 = vmatprep.subr.bf16.mxu1 %v5473_v15  ;;  %v5465_v53 = vld [vmem:[#allocation3 + $0xb8] sm:$0xff]  ;;  %v21469_v11 = vld [vmem:[#allocation150_spill] sm:$0xff]  ;;  %14397 = vpow2.f32 %v7789_v57 }
 0x583   : > { %21455 = vst [vmem:[#allocation183_spill] sm:$0xff] %v17800_v4  ;;  %v17806_v27 = vpop.eup %14373  ;;  %v17816_v0 = vpop.f32.mrb[164].mxu1  ;;  %v21470_v46 = vmax.f32 %v21468_v45, %v21469_v11  ;;  %v7733_v15 = vmul.f32 1.442695, %v7456_v36  ;;  %14399 = vpow2.f32 %v7791_v25  ;;  %v7737_v57 = vmul.f32 1.442695, %v7458_v54 }
 0x584   : > { %21456 = vst [vmem:[#allocation184_spill] sm:$0xff] %v17806_v27  ;;  %v17812_v17 = vpop.eup %14375  ;;  %21459 = vst [vmem:[#allocation187_spill] sm:$0xff] %v17816_v0  ;;  %v17818_v32 = vpop.xlane.xlu0 %7094  ;;  %v7735_v23 = vmul.f32 1.442695, %v7457_v10  ;;  %14401 = vpow2.f32 %v7793_v61  ;;  %v21475_v36 = vld [vmem:[#allocation5_spill] sm:$0xff]  ;;  %v21476_v45 = vld [vmem:[#allocation6_spill] sm:$0xff]  ;;  %v21477_v25 = vmax.f32 %v17633_v1, %v17656_v16 }
 0x585   : > { %21458 = vst [vmem:[#allocation186_spill] sm:$0xff] %v17812_v17  ;;  %v17820_v5 = vpop.eup %14377  ;;  %v17824_v42 = vpop.f32.mrb[165].mxu1  ;;  %7280 = vmax.xlane.f32.xlu0 %v21470_v46  ;;  %12634 = vmatpush3.bf16.msra.mxu1 %v5465_v53  ;;  %v7489_v3 = vsub.f32 %v21475_v36, %v17731_v47  ;;  %14403 = vpow2.f32 %v7731_v29  ;;  %v7795_v11 = vmul.f32 1.442695, %v7487_v28  ;;  %v7490_v49 = vsub.f32 %v21476_v45, %v17731_v47  ;;  %v21479_v10 = vld [vmem:[#allocation149_spill] sm:$0xff]  ;;  %v21483_v54 = vld [vmem:[#allocation7_spill] sm:$0xff] }
 0x586   : > { %21460 = vst [vmem:[#allocation188_spill] sm:$0xff] %v17820_v5  ;;  %21461 = vst [vmem:[#allocation189_spill] sm:$0xff] %v17824_v42  ;;  %v17826_v51 = vpop.f32.mrb[165].mxu0  ;;  %v17830_v56 = vpop.eup %14379  ;;  %8267 = vadd.xlane.f32.xlu1 %v8266_v19  ;;  %v21474_v19 = vld [vmem:[#allocation4_spill] sm:$0xff]  ;;  %14405 = vpow2.f32 %v7733_v15  ;;  %v7459_v29 = vsub.f32 %v21483_v54, %v17743_v35  ;;  %v8221_v45 = vadd.f32 %v17806_v27, %v17800_v4  ;;  %v21490_v4 = vld [vmem:[#allocation11_spill] sm:$0xff] }
 0x587   : > { %21462 = vst [vmem:[#allocation190_spill] sm:$0xff] %v17826_v51  ;;  %21463 = vst [vmem:[#allocation191_spill] sm:$0xff] %v17830_v56  ;;  %v17838_v59 = vpop.f32.mrb[166].mxu0  ;;  %v17840_v6 = vpop.f32.mrb[166].mxu1  ;;  %v7488_v22 = vsub.f32 %v21474_v19, %v17719_v14  ;;  %v21478_v14 = vld [vmem:[#allocation147_spill] sm:$0xff]  ;;  %14407 = vpow2.f32 %v7735_v23  ;;  %v8224_v54 = vadd.f32 %v17820_v5, %v17812_v17  ;;  %v7461_v27 = vsub.f32 %v21490_v4, %v17771_v31  ;;  %v21494_v17 = vld [vmem:[#allocation13_spill] sm:$0xff] }
 0x588   : > { %21464 = vst [vmem:[#allocation192_spill] sm:$0xff] %v17838_v59  ;;  %21465 = vst [vmem:[#allocation193_spill] sm:$0xff] %v17840_v6  ;;  %v17842_v34 = vpop.eup %14381  ;;  %v17846_v41 = vpop.f32.mrb[167].mxu1  ;;  %v21480_v19 = vmax.f32 %v21478_v14, %v21479_v10  ;;  %14409 = vpow2.f32 %v7737_v57  ;;  %v7799_v16 = vmul.f32 1.442695, %v7489_v3  ;;  %v7462_v5 = vsub.f32 %v21494_v17, %v17771_v31  ;;  %v21498_v31 = vld [vmem:[#allocation29_spill] sm:$0xff] }
 0x589   : > { %21466 = vst [vmem:[#allocation194_spill] sm:$0xff] %v17842_v34  ;;  %21467 = vst [vmem:[#allocation195_spill] sm:$0xff] %v17846_v41  ;;  %v17848_v12 = vpop.xlane.xlu1 %7097  ;;  %v17853_v13 = vpop.eup %14383  ;;  %14411 = vpow2.f32 %v7795_v11  ;;  %v7801_v1 = vmul.f32 1.442695, %v7490_v49  ;;  %v21496_v23 = vmax.f32 %v17635_v62, %v17645_v63  ;;  %v21497_v49 = vld [vmem:[#allocation27_spill] sm:$0xff]  ;;  %v21502_v17 = vld [vmem:[#allocation8_spill] sm:$0xff] }
 0x58a   : > { %21471 = vst [vmem:[#allocation196_spill] sm:$0xff] %v17853_v13  ;;  %v17857_v40 = vpop.f32.mrb[167].mxu0  ;;  %v17859_v55 = vpop.xlane.xlu0 %7142  ;;  %7283 = vmax.xlane.f32.xlu1 %v21477_v25  ;;  %7328 = vmax.xlane.f32.xlu0 %v21480_v19  ;;  %v7797_v25 = vmul.f32 1.442695, %v7488_v22  ;;  %v21486_v19 = vld [vmem:[#allocation9_spill] sm:$0xff]  ;;  %v21518_v6 = vld [vmem:[#allocation15_spill] sm:$0xff] }
 0x58b   : > { %21472 = vst [vmem:[#allocation197_spill] sm:$0xff] %v17857_v40  ;;  %v17861_v30 = vpop.eup %14385  ;;  %v17879_v53 = vpop.f32.mrb[168].mxu0  ;;  %v7460_v46 = vsub.f32 %v21486_v19, %v17743_v35  ;;  %v7743_v11 = vmul.f32 1.442695, %v7461_v27  ;;  %v21522_v0 = vld [vmem:[#allocation17_spill] sm:$0xff] }
 0x58c   : > { %21473 = vst [vmem:[#allocation198_spill] sm:$0xff] %v17861_v30  ;;  %21481 = vst [vmem:[#allocation4_spill] sm:$0xff] %v17879_v53  ;;  %v17881_v61 = vpop.eup %14387  ;;  %v17885_v28 = vpop.f32.mrb[168].mxu1  ;;  %14413 = vpow2.f32 %v7797_v25  ;;  %v8272_v62 = vadd.f32 %v17861_v30, %v17853_v13  ;;  %v21504_v25 = vld [vmem:[#allocation10_spill] sm:$0xff]  ;;  %v21515_v13 = vld [vmem:[#allocation33_spill] sm:$0xff]  ;;  %v7464_v40 = vsub.f32 %v21522_v0, %v17818_v32 }
 0x58d   : > { %v17871_v50 = vpop.xlane.xlu1 %7145  ;;  %21482 = vst [vmem:[#allocation5_spill] sm:$0xff] %v17881_v61  ;;  %21484 = vst [vmem:[#allocation6_spill] sm:$0xff] %v17885_v28  ;;  %v17891_v36 = vpop.eup %14389  ;;  %v7741_v63 = vmul.f32 1.442695, %v7460_v46  ;;  %14415 = vpow2.f32 %v7799_v16  ;;  %v7491_v28 = vsub.f32 %v21502_v17, %v17790_v38  ;;  %v7745_v46 = vmul.f32 1.442695, %v7462_v5 }
 0x58e   : > { %v17887_v47 = vpop.xlane.xlu0 %7148  ;;  %21485 = vst [vmem:[#allocation7_spill] sm:$0xff] %v17891_v36  ;;  %v17895_v10 = vpop.f32.mrb[169].mxu1  ;;  %7331 = vmax.xlane.f32.xlu1 %v21496_v23  ;;  %8222 = vadd.xlane.f32.xlu0 %v8221_v45  ;;  %v8269_v45 = vadd.f32 %v17842_v34, %v17830_v56  ;;  %14417 = vpow2.f32 %v7801_v1  ;;  %v17956_v16 = vadd.f32 %v17891_v36, %v17881_v61  ;;  %v21507_v17 = vld [vmem:[#allocation12_spill] sm:$0xff]  ;;  %v21512_v61 = vld [vmem:[#allocation14_spill] sm:$0xff]  ;;  %v21526_v0 = vld [vmem:[#allocation35_spill] sm:$0xff] }
 0x58f   : > { %21487 = vst [vmem:[#allocation9_spill] sm:$0xff] %v17895_v10  ;;  %v17897_v15 = vpop.f32.mrb[169].mxu0  ;;  %v17901_v14 = vpop.eup %14391  ;;  %v7739_v10 = vmul.f32 1.442695, %v7459_v29  ;;  %v7492_v29 = vsub.f32 %v21504_v25, %v17790_v38  ;;  %v7493_v1 = vsub.f32 %v21507_v17, %v17804_v33  ;;  %v21508_v5 = vld [vmem:[#allocation28_spill] sm:$0xff]  ;;  %v21509_v38 = vld [vmem:[#allocation30_spill] sm:$0xff]  ;;  %v7494_v36 = vsub.f32 %v21512_v61, %v17804_v33 }
 0x590   : > { %21488 = vst [vmem:[#allocation199_spill] sm:$0xff] %v17897_v15  ;;  %21489 = vst [vmem:[#allocation200_spill] sm:$0xff] %v17901_v14  ;;  %v17907_v22 = vpop.f32.mrb[170].mxu0  ;;  %v17909_v35 = vpop.f32.mrb[170].mxu1  ;;  %v21514_v17 = vld [vmem:[#allocation31_spill] sm:$0xff]  ;;  %v21524_v33 = vmax.f32 %v17678_v21, %v17690_v20  ;;  %v21556_v21 = vld [vmem:[#allocation22_spill] sm:$0xff] }
 0x591   : > { %21491 = vst [vmem:[#allocation11_spill] sm:$0xff] %v17907_v22  ;;  %21492 = vst [vmem:[#allocation201_spill] sm:$0xff] %v17909_v35  ;;  %v17911_v19 = vpop.eup %14393  ;;  %v17917_v57 = vpop.f32.mrb[171].mxu1  ;;  %14419 = vpow2.f32 %v7739_v10  ;;  %v7803_v41 = vmul.f32 1.442695, %v7491_v28  ;;  %v21532_v28 = vld [vmem:[#allocation19_spill] sm:$0xff] }
 0x592   : > { %21493 = vst [vmem:[#allocation202_spill] sm:$0xff] %v17911_v19  ;;  %21495 = vst [vmem:[#allocation13_spill] sm:$0xff] %v17917_v57  ;;  %v17919_v4 = vpop.xlane.xlu1 %7151  ;;  %v17930_v3 = vpop.f32.mrb[171].mxu0  ;;  %8225 = vadd.xlane.f32.xlu1 %v8224_v54  ;;  %8270 = vadd.xlane.f32.xlu0 %v8269_v45  ;;  %14421 = vpow2.f32 %v7741_v63  ;;  %v7463_v63 = vsub.f32 %v21518_v6, %v17818_v32  ;;  %v7809_v20 = vmul.f32 1.442695, %v7494_v36 }
 0x593   : > { %21499 = vst [vmem:[#allocation27_spill] sm:$0xff] %v17930_v3  ;;  %v17932_v15 = vpop.xlane.xlu0 %7196  ;;  %v17934_v53 = vpop.eup %14395  ;;  %14423 = vpow2.f32 %v7743_v11  ;;  %v7805_v3 = vmul.f32 1.442695, %v7492_v29  ;;  %v21531_v29 = vld [vmem:[#allocation34_spill] sm:$0xff]  ;;  %v8230_v59 = vadd.f32 %v17911_v19, %v17901_v14  ;;  %v7749_v36 = vmul.f32 1.442695, %v7464_v40 }
 0x594   : > { %21500 = vst [vmem:[#allocation29_spill] sm:$0xff] %v17934_v53  ;;  %v17940_v23 = vpop.eup %14397  ;;  %v17952_v56 = vpop.f32.mrb[172].mxu0  ;;  %14425 = vpow2.f32 %v7745_v46  ;;  %v21527_v46 = vld [vmem:[#allocation37_spill] sm:$0xff]  ;;  %v7747_v32 = vmul.f32 1.442695, %v7463_v63 }
 0x595   : > { %21501 = vst [vmem:[#allocation203_spill] sm:$0xff] %v17940_v23  ;;  %v17946_v57 = vpop.eup %14399  ;;  %21505 = vst [vmem:[#allocation10_spill] sm:$0xff] %v17952_v56  ;;  %v17966_v54 = vpop.f32.mrb[172].mxu1  ;;  %14427 = vpow2.f32 %v7803_v41  ;;  %v21537_v41 = vmax.f32 %v17682_v44, %v17688_v37 }
 0x596   : > { %21503 = vst [vmem:[#allocation8_spill] sm:$0xff] %v17946_v57  ;;  %v17950_v35 = vpop.xlane.xlu1 %7199  ;;  %v17958_v27 = vpop.eup %14401  ;;  %21510 = vst [vmem:[#allocation12_spill] sm:$0xff] %v17966_v54  ;;  %8273 = vadd.xlane.f32.xlu1 %v8272_v62  ;;  %7286 = vmax.xlane.f32.xlu0 %v21524_v33  ;;  %v7807_v54 = vmul.f32 1.442695, %v7493_v1  ;;  %v21530_v1 = vld [vmem:[#allocation32_spill] sm:$0xff]  ;;  %14429 = vpow2.f32 %v7805_v3  ;;  %v21534_v33 = vld [vmem:[#allocation21_spill] sm:$0xff] }
 0x597   : > { %21506 = vst [vmem:[#allocation204_spill] sm:$0xff] %v17958_v27  ;;  %v17968_v45 = vpop.xlane.xlu0 %7154  ;;  %v17970_v30 = vpop.eup %14403 }
 0x598   : > { %21511 = vst [vmem:[#allocation28_spill] sm:$0xff] %v17970_v30  ;;  %v17974_v10 = vpop.f32.mrb[173].mxu1  ;;  %v17980_v22 = vpop.f32.mrb[173].mxu0  ;;  %14431 = vpow2.f32 %v7807_v54 }
 0x599   : > { %21513 = vst [vmem:[#allocation30_spill] sm:$0xff] %v17974_v10  ;;  %21516 = vst [vmem:[#allocation14_spill] sm:$0xff] %v17980_v22  ;;  %v17982_v25 = vpop.eup %14405  ;;  %v17988_v61 = vpop.f32.mrb[174].mxu0  ;;  %14433 = vpow2.f32 %v7809_v20 }
 0x59a   : > { %21517 = vst [vmem:[#allocation31_spill] sm:$0xff] %v17982_v25  ;;  %21519 = vst [vmem:[#allocation33_spill] sm:$0xff] %v17988_v61  ;;  %v17990_v42 = vpop.f32.mrb[174].mxu1  ;;  %v17992_v34 = vpop.eup %14407  ;;  %7334 = vmax.xlane.f32.xlu0 %v21537_v41  ;;  %14435 = vpow2.f32 %v7747_v32 }
 0x59b   : > { %21520 = vst [vmem:[#allocation15_spill] sm:$0xff] %v17990_v42  ;;  %21521 = vst [vmem:[#allocation205_spill] sm:$0xff] %v17992_v34  ;;  %v17998_v11 = vpop.f32.mrb[175].mxu1  ;;  %v18000_v6 = vpop.xlane.xlu1 %7157  ;;  %v7465_v42 = vsub.f32 %v21532_v28, %v17848_v12  ;;  %v8275_v28 = vadd.f32 %v17940_v23, %v17934_v53  ;;  %v21546_v53 = vld [vmem:[#allocation18_spill] sm:$0xff]  ;;  %14437 = vpow2.f32 %v7749_v36 }
 0x59c   : > { %21523 = vst [vmem:[#allocation17_spill] sm:$0xff] %v17998_v11  ;;  %v18005_v10 = vpop.eup %14409  ;;  %v18013_v22 = vpop.f32.mrb[175].mxu0  ;;  %v21536_v11 = vmax.f32 %v17696_v8, %v17714_v24  ;;  %v7496_v23 = vsub.f32 %v21546_v53, %v17859_v55 }
 0x59d   : > { %21525 = vst [vmem:[#allocation206_spill] sm:$0xff] %v18005_v10  ;;  %21528 = vst [vmem:[#allocation35_spill] sm:$0xff] %v18013_v22  ;;  %v18015_v56 = vpop.xlane.xlu0 %7202  ;;  %v18017_v62 = vpop.eup %14411  ;;  %v7466_v22 = vsub.f32 %v21534_v33, %v17848_v12  ;;  %v21540_v12 = vld [vmem:[#allocation16_spill] sm:$0xff] }
 0x59e   : > { %21529 = vst [vmem:[#allocation37_spill] sm:$0xff] %v18017_v62  ;;  %v18029_v51 = vpop.eup %14413  ;;  %7289 = vmax.xlane.f32.xlu1 %v21536_v11  ;;  %v18041_v63 = vpop.f32.mrb[176].mxu0  ;;  %v7495_v40 = vsub.f32 %v21540_v12, %v17859_v55  ;;  %v21548_v12 = vld [vmem:[#allocation39_spill] sm:$0xff]  ;;  %v7751_v11 = vmul.f32 1.442695, %v7465_v42  ;;  %v21558_v55 = vmax.f32 %v17698_v7, %v17706_v52  ;;  %8228 = vadd.xlane.f32.xlu0 %v17956_v16  ;;  %v21567_v42 = vld [vmem:[#allocation25_spill] sm:$0xff] }
 0x59f   : > { %21533 = vst [vmem:[#allocation32_spill] sm:$0xff] %v18029_v51  ;;  %v18033_v61 = vpop.xlane.xlu1 %7205  ;;  %21538 = vst [vmem:[#allocation19_spill] sm:$0xff] %v18041_v63  ;;  %v18045_v3 = vpop.eup %14415  ;;  %v7753_v24 = vmul.f32 1.442695, %v7466_v22  ;;  %v21565_v22 = vld [vmem:[#allocation42_spill] sm:$0xff] }
 0x5a0   : > { %21535 = vst [vmem:[#allocation34_spill] sm:$0xff] %v18033_v61  ;;  %21539 = vst [vmem:[#allocation21_spill] sm:$0xff] %v18045_v3  ;;  %v18053_v19 = vpop.f32.mrb[176].mxu1  ;;  %v18057_v37 = vpop.eup %14417  ;;  %v21552_v61 = vld [vmem:[#allocation20_spill] sm:$0xff]  ;;  %v7811_v36 = vmul.f32 1.442695, %v7495_v40  ;;  %14439 = vpow2.f32 %v7751_v11  ;;  %v21586_v11 = vmax.f32 %v17741_v2, %v17751_v18  ;;  %v21593_v18 = vsub.f32 %v21498_v31, %v17919_v4 }
 0x5a1   : > { %21543 = vst [vmem:[#allocation16_spill] sm:$0xff] %v18053_v19  ;;  %v18055_v41 = vpop.xlane.xlu0 %7160  ;;  %21545 = vst [vmem:[#allocation208_spill] sm:$0xff] %v18057_v37  ;;  %v18061_v54 = vpop.f32.mrb[177].mxu1  ;;  %v7497_v20 = vsub.f32 %v21552_v61, %v17871_v50  ;;  %v21564_v40 = vld [vmem:[#allocation40_spill] sm:$0xff]  ;;  %v21566_v19 = vld [vmem:[#allocation23_spill] sm:$0xff]  ;;  %14441 = vpow2.f32 %v7753_v24 }
 0x5a2   : > { %21544 = vst [vmem:[#allocation207_spill] sm:$0xff] %v18055_v41  ;;  %21547 = vst [vmem:[#allocation18_spill] sm:$0xff] %v18061_v54  ;;  %v18067_v8 = vpop.f32.mrb[177].mxu0  ;;  %v18069_v14 = vpop.eup %14419  ;;  %v7498_v41 = vsub.f32 %v21556_v21, %v17871_v50  ;;  %7337 = vmax.xlane.f32.xlu1 %v21558_v55  ;;  %v21560_v50 = vld [vmem:[#allocation43_spill] sm:$0xff]  ;;  %v7813_v55 = vmul.f32 1.442695, %v7496_v23  ;;  %8276 = vadd.xlane.f32.xlu0 %v8275_v28  ;;  %14443 = vpow2.f32 %v7811_v36 }
 0x5a3   : > { %21550 = vst [vmem:[#allocation39_spill] sm:$0xff] %v18067_v8  ;;  %21551 = vst [vmem:[#allocation209_spill] sm:$0xff] %v18069_v14  ;;  %v18075_v53 = vpop.f32.mrb[178].mxu0  ;;  %v18077_v33 = vpop.f32.mrb[178].mxu1  ;;  %v7815_v21 = vmul.f32 1.442695, %v7497_v20 }
 0x5a4   : > { %21553 = vst [vmem:[#allocation20_spill] sm:$0xff] %v18075_v53  ;;  %21554 = vst [vmem:[#allocation210_spill] sm:$0xff] %v18077_v33  ;;  %v18079_v44 = vpop.eup %14421  ;;  %v18085_v32 = vpop.f32.mrb[179].mxu1  ;;  %v7499_v33 = vsub.f32 %v21566_v19, %v17887_v47  ;;  %14445 = vpow2.f32 %v7813_v55  ;;  %v21576_v28 = vld [vmem:[#allocation47_spill] sm:$0xff]  ;;  %v8278_v19 = vadd.f32 %v17958_v27, %v17946_v57  ;;  %v21584_v57 = vld [vmem:[#allocation26_spill] sm:$0xff] }
 0x5a5   : > { %21555 = vst [vmem:[#allocation211_spill] sm:$0xff] %v18079_v44  ;;  %21557 = vst [vmem:[#allocation22_spill] sm:$0xff] %v18085_v32  ;;  %v18087_v61 = vpop.xlane.xlu1 %7163  ;;  %v18093_v54 = vpop.eup %14423  ;;  %14447 = vpow2.f32 %v7815_v21  ;;  %v7532_v27 = vsub.f32 %v21584_v57, %v17932_v15  ;;  %v21589_v57 = vld [vmem:[#allocation51_spill] sm:$0xff] }
 0x5a6   : > { %21559 = vst [vmem:[#allocation212_spill] sm:$0xff] %v18093_v54  ;;  %v18101_v8 = vpop.f32.mrb[179].mxu0  ;;  %v18103_v63 = vpop.xlane.xlu0 %7208  ;;  %v7817_v54 = vmul.f32 1.442695, %v7498_v41  ;;  %8231 = vadd.xlane.f32.xlu1 %v8230_v59  ;;  %v7819_v32 = vmul.f32 1.442695, %v7499_v33  ;;  %7340 = vmax.xlane.f32.xlu0 %v21586_v11 }
 0x5a7   : > { %21562 = vst [vmem:[#allocation43_spill] sm:$0xff] %v18101_v8  ;;  %v18105_v52 = vpop.eup %14425  ;;  %v18119_v16 = vpop.f32.mrb[180].mxu0  ;;  %v21595_v33 = vld [vmem:[#allocation50_spill] sm:$0xff] }
 0x5a8   : > { %21563 = vst [vmem:[#allocation213_spill] sm:$0xff] %v18105_v52  ;;  %v7500_v52 = vsub.f32 %v21567_v42, %v17887_v47  ;;  %21569 = vst [vmem:[#allocation42_spill] sm:$0xff] %v18119_v16  ;;  %v18121_v7 = vpop.eup %14427  ;;  %v18127_v24 = vpop.f32.mrb[180].mxu1  ;;  %14449 = vpow2.f32 %v7817_v54 }
 0x5a9   : > { %v18117_v23 = vpop.xlane.xlu1 %7211  ;;  %21570 = vst [vmem:[#allocation23_spill] sm:$0xff] %v18121_v7  ;;  %21573 = vst [vmem:[#allocation25_spill] sm:$0xff] %v18127_v24  ;;  %v18131_v47 = vpop.eup %14429  ;;  %v21590_v24 = vld [vmem:[#allocation53_spill] sm:$0xff]  ;;  %14451 = vpow2.f32 %v7819_v32  ;;  %v21600_v32 = vld [vmem:[#allocation52_spill] sm:$0xff] }
 0x5aa   : > { %21568 = vst [vmem:[#allocation40_spill] sm:$0xff] %v18117_v23  ;;  %v18129_v41 = vpop.xlane.xlu0 %7166  ;;  %21574 = vst [vmem:[#allocation214_spill] sm:$0xff] %v18131_v47  ;;  %v18133_v59 = vpop.f32.mrb[181].mxu1  ;;  %v21580_v23 = vld [vmem:[#allocation24_spill] sm:$0xff]  ;;  %v7821_v36 = vmul.f32 1.442695, %v7500_v52  ;;  %8279 = vadd.xlane.f32.xlu1 %v8278_v19  ;;  %v21588_v52 = vsub.f32 %v21497_v49, %v17919_v4 }
 0x5ab   : > { %21575 = vst [vmem:[#allocation215_spill] sm:$0xff] %v18133_v59  ;;  %v18139_v53 = vpop.f32.mrb[181].mxu0  ;;  %v18143_v20 = vpop.eup %14431  ;;  %v7531_v55 = vsub.f32 %v21580_v23, %v17932_v15  ;;  %v7825_v49 = vmul.f32 1.442695, %v21593_v18  ;;  %v21594_v15 = vld [vmem:[#allocation48_spill] sm:$0xff]  ;;  %v21597_v18 = vmax.f32 %v17749_v26, %v17757_v43  ;;  %v8236_v26 = vadd.f32 %v18005_v10, %v17992_v34  ;;  %v21624_v10 = vld [vmem:[#allocation58_spill] sm:$0xff] }
 0x5ac   : > { %21578 = vst [vmem:[#allocation47_spill] sm:$0xff] %v18139_v53  ;;  %21579 = vst [vmem:[#allocation216_spill] sm:$0xff] %v18143_v20  ;;  %v18149_v47 = vpop.f32.mrb[182].mxu0  ;;  %v18151_v42 = vpop.f32.mrb[182].mxu1  ;;  %v7823_v54 = vmul.f32 1.442695, %v21588_v52  ;;  %14453 = vpow2.f32 %v7821_v36  ;;  %v8233_v36 = vadd.f32 %v17982_v25, %v17970_v30  ;;  %v21615_v25 = vmax.f32 %v17769_v58, %v17775_v48 }
 0x5ad   : > { %21581 = vst [vmem:[#allocation24_spill] sm:$0xff] %v18149_v47  ;;  %21582 = vst [vmem:[#allocation217_spill] sm:$0xff] %v18151_v42  ;;  %v18153_v8 = vpop.eup %14433  ;;  %v18159_v21 = vpop.f32.mrb[183].mxu1  ;;  %v7883_v53 = vmul.f32 1.442695, %v7531_v55  ;;  %7388 = vmax.xlane.f32.xlu0 %v21597_v18  ;;  %v21605_v18 = vld [vmem:[#allocation55_spill] sm:$0xff]  ;;  %v8281_v34 = vadd.f32 %v18029_v51, %v18017_v62  ;;  %v21622_v62 = vsub.f32 %v21515_v13, %v17968_v45 }
 0x5ae   : > { %21583 = vst [vmem:[#allocation218_spill] sm:$0xff] %v18153_v8  ;;  %21585 = vst [vmem:[#allocation26_spill] sm:$0xff] %v18159_v21  ;;  %v18161_v23 = vpop.xlane.xlu1 %7169  ;;  %v18166_v59 = vpop.eup %14435  ;;  %v7885_v42 = vmul.f32 1.442695, %v7532_v27  ;;  %14455 = vpow2.f32 %v7823_v54  ;;  %v21601_v27 = vld [vmem:[#allocation54_spill] sm:$0xff]  ;;  %v21606_v54 = vld [vmem:[#allocation57_spill] sm:$0xff]  ;;  %v21625_v48 = vsub.f32 %v21526_v0, %v18000_v6 }
 0x5af   : > { %21587 = vst [vmem:[#allocation219_spill] sm:$0xff] %v18166_v59  ;;  %v18177_v19 = vpop.f32.mrb[183].mxu0  ;;  %v18179_v16 = vpop.xlane.xlu0 %7214  ;;  %14457 = vpow2.f32 %v7825_v49  ;;  %v21630_v0 = vld [vmem:[#allocation62_spill] sm:$0xff] }
 0x5b0   : > { %21591 = vst [vmem:[#allocation51_spill] sm:$0xff] %v18177_v19  ;;  %v18181_v11 = vpop.eup %14437  ;;  %v18200_v4 = vpop.f32.mrb[184].mxu0  ;;  %14459 = vpow2.f32 %v7883_v53  ;;  %v21613_v53 = vsub.f32 %v21509_v38, %v17950_v35 }
 0x5b1   : > { %21592 = vst [vmem:[#allocation53_spill] sm:$0xff] %v18181_v11  ;;  %v21596_v11 = vmax.f32 %v17761_v39, %v17780_v9  ;;  %21598 = vst [vmem:[#allocation48_spill] sm:$0xff] %v18200_v4  ;;  %v18202_v31 = vpop.eup %14439  ;;  %v18208_v52 = vpop.f32.mrb[184].mxu1  ;;  %v21609_v39 = vsub.f32 %v21508_v5, %v17950_v35  ;;  %14461 = vpow2.f32 %v7885_v42  ;;  %8234 = vadd.xlane.f32.xlu0 %v8233_v36 }
 0x5b2   : > { %v18192_v59 = vpop.xlane.xlu1 %7217  ;;  %21599 = vst [vmem:[#allocation50_spill] sm:$0xff] %v18202_v31  ;;  %21602 = vst [vmem:[#allocation52_spill] sm:$0xff] %v18208_v52  ;;  %v18214_v2 = vpop.f32.mrb[185].mxu1  ;;  %v7889_v30 = vmul.f32 1.442695, %v21613_v53  ;;  %v21617_v35 = vsub.f32 %v21514_v17, %v17968_v45  ;;  %v21623_v53 = vld [vmem:[#allocation56_spill] sm:$0xff]  ;;  %v21626_v52 = vsub.f32 %v21527_v46, %v18000_v6 }
 0x5b3   : > { %7343 = vmax.xlane.f32.xlu1 %v21596_v11  ;;  %v18210_v21 = vpop.xlane.xlu0 %7172  ;;  %v18212_v11 = vpop.eup %14441  ;;  %21604 = vst [vmem:[#allocation220_spill] sm:$0xff] %v18214_v2  ;;  %v7887_v49 = vmul.f32 1.442695, %v21609_v39  ;;  %v21618_v39 = vld [vmem:[#allocation59_spill] sm:$0xff]  ;;  %v21619_v2 = vld [vmem:[#allocation61_spill] sm:$0xff] }
 0x5b4   : > { %21603 = vst [vmem:[#allocation54_spill] sm:$0xff] %v18212_v11  ;;  %v18220_v9 = vpop.f32.mrb[185].mxu0  ;;  %v18224_v55 = vpop.eup %14443  ;;  %v7827_v38 = vmul.f32 1.442695, %v21617_v35  ;;  %v7829_v17 = vmul.f32 1.442695, %v21622_v62 }
 0x5b5   : > { %21607 = vst [vmem:[#allocation55_spill] sm:$0xff] %v18220_v9  ;;  %21608 = vst [vmem:[#allocation57_spill] sm:$0xff] %v18224_v55  ;;  %v18231_v47 = vpop.f32.mrb[186].mxu0  ;;  %v18233_v43 = vpop.f32.mrb[186].mxu1  ;;  %14463 = vpow2.f32 %v7887_v49  ;;  %v7833_v13 = vmul.f32 1.442695, %v21626_v52  ;;  %8282 = vadd.xlane.f32.xlu0 %v8281_v34 }
 0x5b6   : > { %21610 = vst [vmem:[#allocation221_spill] sm:$0xff] %v18231_v47  ;;  %21611 = vst [vmem:[#allocation222_spill] sm:$0xff] %v18233_v43  ;;  %v18237_v11 = vpop.eup %14445  ;;  %v18244_v5 = vpop.f32.mrb[187].mxu1  ;;  %v7831_v43 = vmul.f32 1.442695, %v21625_v48  ;;  %14465 = vpow2.f32 %v7889_v30  ;;  %v21629_v49 = vld [vmem:[#allocation60_spill] sm:$0xff]  ;;  %v8284_v48 = vadd.f32 %v18057_v37, %v18045_v3  ;;  %v21638_v47 = vsub.f32 %v21530_v1, %v18015_v56 }
 0x5b7   : > { %21612 = vst [vmem:[#allocation223_spill] sm:$0xff] %v18237_v11  ;;  %21614 = vst [vmem:[#allocation224_spill] sm:$0xff] %v18244_v5  ;;  %v18246_v19 = vpop.xlane.xlu1 %7175  ;;  %7391 = vmax.xlane.f32.xlu1 %v21615_v25  ;;  %v18253_v42 = vpop.eup %14447  ;;  %14467 = vpow2.f32 %v7827_v38  ;;  %v21634_v34 = vld [vmem:[#allocation63_spill] sm:$0xff]  ;;  %v21635_v52 = vld [vmem:[#allocation65_spill] sm:$0xff]  ;;  %v21642_v3 = vsub.f32 %v21531_v29, %v18015_v56 }
 0x5b8   : > { %21616 = vst [vmem:[#allocation225_spill] sm:$0xff] %v18253_v42  ;;  %v18264_v25 = vpop.f32.mrb[187].mxu0  ;;  %v18266_v36 = vpop.xlane.xlu0 %7220  ;;  %14469 = vpow2.f32 %v7829_v17  ;;  %v7891_v17 = vmul.f32 1.442695, %v21638_v47  ;;  %v21644_v47 = vld [vmem:[#allocation190_spill] sm:$0xff]  ;;  %v21650_v29 = vld [vmem:[#allocation67_spill] sm:$0xff] }
 0x5b9   : > { %21620 = vst [vmem:[#allocation59_spill] sm:$0xff] %v18264_v25  ;;  %v18268_v58 = vpop.eup %14449  ;;  %v18287_v62 = vpop.f32.mrb[188].mxu0  ;;  %14471 = vpow2.f32 %v7831_v43  ;;  %v7893_v37 = vmul.f32 1.442695, %v21642_v3  ;;  %v21645_v9 = vmax.f32 %v17810_v60, %v21644_v47  ;;  %v21654_v47 = vld [vmem:[#allocation38_spill] sm:$0xff] }
 0x5ba   : > { %21621 = vst [vmem:[#allocation61_spill] sm:$0xff] %v18268_v58  ;;  %21627 = vst [vmem:[#allocation56_spill] sm:$0xff] %v18287_v62  ;;  %v18289_v35 = vpop.eup %14451  ;;  %v18295_v30 = vpop.f32.mrb[188].mxu1  ;;  %14473 = vpow2.f32 %v7833_v13  ;;  %v21648_v13 = vld [vmem:[#allocation34_spill] sm:$0xff] }
 0x5bb   : > { %v18285_v45 = vpop.xlane.xlu1 %7223  ;;  %8237 = vadd.xlane.f32.xlu1 %v8236_v26  ;;  %21628 = vst [vmem:[#allocation58_spill] sm:$0xff] %v18289_v35  ;;  %21631 = vst [vmem:[#allocation60_spill] sm:$0xff] %v18295_v30  ;;  %v18299_v6 = vpop.eup %14453  ;;  %7346 = vmax.xlane.f32.xlu0 %v21645_v9  ;;  %v21647_v30 = vld [vmem:[#allocation36_spill] sm:$0xff]  ;;  %v21655_v60 = vsub.f32 %v21654_v47, %v21648_v13  ;;  %v21657_v3 = vld [vmem:[#allocation66_spill] sm:$0xff]  ;;  %14475 = vpow2.f32 %v7891_v17  ;;  %v8239_v17 = vadd.f32 %v18079_v44, %v18069_v14 }
 0x5bc   : > { %v18297_v51 = vpop.xlane.xlu0 %7178  ;;  %21632 = vst [vmem:[#allocation62_spill] sm:$0xff] %v18299_v6  ;;  %v18301_v26 = vpop.f32.mrb[189].mxu1  ;;  %14477 = vpow2.f32 %v7893_v37  ;;  %v21669_v37 = vsub.f32 %v21560_v50, %v18087_v61  ;;  %v21698_v50 = vsub.f32 %v21576_v28, %v18129_v41 }
 0x5bd   : > { %21633 = vst [vmem:[#allocation226_spill] sm:$0xff] %v18301_v26  ;;  %v18307_v25 = vpop.f32.mrb[189].mxu0  ;;  %v18311_v5 = vpop.eup %14455 }
 0x5be   : > { %21636 = vst [vmem:[#allocation63_spill] sm:$0xff] %v18307_v25  ;;  %21637 = vst [vmem:[#allocation65_spill] sm:$0xff] %v18311_v5  ;;  %v18318_v4 = vpop.f32.mrb[190].mxu0  ;;  %v18320_v46 = vpop.f32.mrb[190].mxu1  ;;  %v21658_v25 = vld [vmem:[#allocation207_spill] sm:$0xff] }
 0x5bf   : > { %21639 = vst [vmem:[#allocation227_spill] sm:$0xff] %v18318_v4  ;;  %21640 = vst [vmem:[#allocation228_spill] sm:$0xff] %v18320_v46  ;;  %v18322_v38 = vpop.eup %14457  ;;  %v18329_v5 = vpop.f32.mrb[191].mxu1  ;;  %8285 = vadd.xlane.f32.xlu1 %v8284_v48  ;;  %v21666_v4 = vld [vmem:[#allocation189_spill] sm:$0xff] }
 0x5c0   : > { %21641 = vst [vmem:[#allocation229_spill] sm:$0xff] %v18322_v38  ;;  %21643 = vst [vmem:[#allocation230_spill] sm:$0xff] %v18329_v5  ;;  %v18331_v1 = vpop.xlane.xlu1 %7181  ;;  %v18336_v26 = vpop.eup %14459  ;;  %v21649_v38 = vsub.f32 %v21647_v30, %v21648_v13  ;;  %v7897_v30 = vmul.f32 1.442695, %v21655_v60  ;;  %v21662_v13 = vld [vmem:[#allocation192_spill] sm:$0xff]  ;;  %v21665_v5 = vld [vmem:[#allocation187_spill] sm:$0xff] }
 0x5c1   : > { %21646 = vst [vmem:[#allocation231_spill] sm:$0xff] %v18336_v26  ;;  %v18347_v48 = vpop.f32.mrb[191].mxu0  ;;  %v18349_v62 = vpop.xlane.xlu0 %7226  ;;  %v21659_v26 = vsub.f32 %v21548_v12, %v21658_v25  ;;  %v21667_v56 = vmax.f32 %v21665_v5, %v21666_v4  ;;  %v21682_v5 = vld [vmem:[#allocation195_spill] sm:$0xff] }
 0x5c2   : > { %v7895_v6 = vmul.f32 1.442695, %v21649_v38  ;;  %21652 = vst [vmem:[#allocation36_spill] sm:$0xff] %v18347_v48  ;;  %v18351_v9 = vpop.eup %14461  ;;  %v21663_v38 = vld [vmem:[#allocation197_spill] sm:$0xff] }
 0x5c3   : > { %21653 = vst [vmem:[#allocation34_spill] sm:$0xff] %v18351_v9  ;;  %v7835_v35 = vmul.f32 1.442695, %v21659_v26  ;;  %v21660_v9 = vld [vmem:[#allocation41_spill] sm:$0xff]  ;;  %v21664_v48 = vmax.f32 %v21662_v13, %v21663_v38  ;;  %7394 = vmax.xlane.f32.xlu0 %v21667_v56  ;;  %v18378_v12 = vpop.eup %14463  ;;  %v21670_v26 = vld [vmem:[#allocation68_spill] sm:$0xff] }
 0x5c4   : > { %v21661_v43 = vsub.f32 %v21660_v9, %v21658_v25  ;;  %v18368_v60 = vpop.xlane.xlu1 %7229  ;;  %21668 = vst [vmem:[#allocation67_spill] sm:$0xff] %v18378_v12  ;;  %14479 = vpow2.f32 %v7895_v6  ;;  %v7839_v25 = vmul.f32 1.442695, %v21669_v37  ;;  %v21671_v9 = vld [vmem:[#allocation70_spill] sm:$0xff]  ;;  %v18389_v4 = vpop.eup %14465  ;;  %v21673_v56 = vld [vmem:[#allocation45_spill] sm:$0xff]  ;;  %v21675_v6 = vld [vmem:[#allocation71_spill] sm:$0xff] }
 0x5c5   : > { %7349 = vmax.xlane.f32.xlu1 %v21664_v48  ;;  %v18387_v46 = vpop.xlane.xlu0 %7184  ;;  %21672 = vst [vmem:[#allocation38_spill] sm:$0xff] %v18389_v4  ;;  %14481 = vpow2.f32 %v7897_v30  ;;  %v21674_v14 = vsub.f32 %v21673_v56, %v18087_v61  ;;  %v18398_v38 = vpop.eup %14467  ;;  %v21678_v48 = vsub.f32 %v21564_v40, %v18103_v63  ;;  %v21680_v61 = vsub.f32 %v21565_v22, %v18103_v63  ;;  %v21681_v56 = vld [vmem:[#allocation193_spill] sm:$0xff]  ;;  %v21684_v37 = vld [vmem:[#allocation212_spill] sm:$0xff]  ;;  %v21686_v40 = vld [vmem:[#allocation214_spill] sm:$0xff] }
 0x5c6   : > { %v7837_v47 = vmul.f32 1.442695, %v21661_v43  ;;  %21677 = vst [vmem:[#allocation66_spill] sm:$0xff] %v18398_v38  ;;  %14483 = vpow2.f32 %v7835_v35  ;;  %v18403_v13 = vpop.eup %14469  ;;  %v21683_v4 = vmax.f32 %v21681_v56, %v21682_v5  ;;  %v21685_v35 = vld [vmem:[#allocation213_spill] sm:$0xff] }
 0x5c7   : > { %v7841_v44 = vmul.f32 1.442695, %v21674_v14  ;;  %v7899_v43 = vmul.f32 1.442695, %v21678_v48  ;;  %21679 = vst [vmem:[#allocation207_spill] sm:$0xff] %v18403_v13  ;;  %8240 = vadd.xlane.f32.xlu0 %v8239_v17  ;;  %v8242_v38 = vadd.f32 %v21685_v35, %v21684_v37  ;;  %v8287_v48 = vadd.f32 %v21686_v40, %v18121_v7  ;;  %v18417_v12 = vpop.eup %14471  ;;  %v21689_v13 = vld [vmem:[#allocation40_spill] sm:$0xff] }
 0x5c8   : > { %14485 = vpow2.f32 %v7837_v47  ;;  %v7901_v14 = vmul.f32 1.442695, %v21680_v61  ;;  %v18408_v30 = vpop.xlane.xlu1 %7187  ;;  %21687 = vst [vmem:[#allocation41_spill] sm:$0xff] %v18417_v12  ;;  %v21688_v47 = vld [vmem:[#allocation44_spill] sm:$0xff]  ;;  %v21691_v61 = vld [vmem:[#allocation75_spill] sm:$0xff]  ;;  %v18428_v56 = vpop.eup %14473  ;;  %v21694_v37 = vld [vmem:[#allocation46_spill] sm:$0xff] }
 0x5c9   : > { %7397 = vmax.xlane.f32.xlu1 %v21683_v4  ;;  %14487 = vpow2.f32 %v7839_v25  ;;  %v21690_v63 = vsub.f32 %v21688_v47, %v21689_v13  ;;  %v18426_v17 = vpop.xlane.xlu0 %7232  ;;  %21693 = vst [vmem:[#allocation68_spill] sm:$0xff] %v18428_v56  ;;  %v21695_v7 = vsub.f32 %v21694_v37, %v21689_v13  ;;  %v21696_v25 = vld [vmem:[#allocation72_spill] sm:$0xff]  ;;  %v21697_v47 = vld [vmem:[#allocation74_spill] sm:$0xff]  ;;  %v7843_v4 = vmul.f32 1.442695, %v21698_v50  ;;  %v21699_v12 = vld [vmem:[#allocation49_spill] sm:$0xff]  ;;  %v18447_v13 = vpop.eup %14475 }
 0x5ca   : > { %14489 = vpow2.f32 %v7841_v44  ;;  %v21700_v56 = vsub.f32 %v21699_v12, %v18129_v41  ;;  %21701 = vst [vmem:[#allocation70_spill] sm:$0xff] %v18447_v13  ;;  %v21703_v50 = vld [vmem:[#allocation76_spill] sm:$0xff]  ;;  %v21704_v41 = vld [vmem:[#allocation78_spill] sm:$0xff]  ;;  %v21710_v12 = vsub.f32 %v21594_v15, %v18179_v16  ;;  %v21717_v15 = vsub.f32 %v21600_v32, %v18192_v59 }
 0x5cb   : > { %v7903_v22 = vmul.f32 1.442695, %v21690_v63  ;;  %v7905_v40 = vmul.f32 1.442695, %v21695_v7  ;;  %14491 = vpow2.f32 %v7899_v43  ;;  %8288 = vadd.xlane.f32.xlu0 %v8287_v48  ;;  %v8290_v7 = vadd.f32 %v18153_v8, %v18143_v20  ;;  %v21714_v63 = vld [vmem:[#allocation199_spill] sm:$0xff]  ;;  %v21723_v32 = vld [vmem:[#allocation82_spill] sm:$0xff] }
 0x5cc   : > { %14493 = vpow2.f32 %v7901_v14  ;;  %v7845_v44 = vmul.f32 1.442695, %v21700_v56  ;;  %v18443_v5 = vpop.xlane.xlu1 %7235  ;;  %v21702_v43 = vsub.f32 %v21589_v57, %v18161_v23  ;;  %v21706_v56 = vsub.f32 %v21590_v24, %v18161_v23  ;;  %v21708_v57 = vld [vmem:[#allocation81_spill] sm:$0xff] }
 0x5cd   : > { %8243 = vadd.xlane.f32.xlu1 %v8242_v38  ;;  %14495 = vpow2.f32 %v7903_v22  ;;  %v18456_v14 = vpop.xlane.xlu0 %7190  ;;  %v18458_v38 = vpop.eup %14477  ;;  %v21707_v22 = vld [vmem:[#allocation79_spill] sm:$0xff]  ;;  %v7907_v37 = vmul.f32 1.442695, %v21710_v12  ;;  %v21712_v24 = vsub.f32 %v21595_v33, %v18179_v16  ;;  %v21719_v16 = vld [vmem:[#allocation85_spill] sm:$0xff]  ;;  %v21725_v33 = vsub.f32 %v21605_v18, %v18210_v21 }
 0x5ce   : > { %v7847_v28 = vmul.f32 1.442695, %v21702_v43  ;;  %21705 = vst [vmem:[#allocation45_spill] sm:$0xff] %v18458_v38  ;;  %14497 = vpow2.f32 %v7905_v40  ;;  %v7849_v48 = vmul.f32 1.442695, %v21706_v56  ;;  %v18467_v35 = vpop.eup %14479  ;;  %v21713_v56 = vld [vmem:[#allocation4_spill] sm:$0xff] }
 0x5cf   : > { %21709 = vst [vmem:[#allocation71_spill] sm:$0xff] %v18467_v35  ;;  %14499 = vpow2.f32 %v7843_v4  ;;  %v18472_v20 = vpop.eup %14481  ;;  %v7909_v23 = vmul.f32 1.442695, %v21712_v24  ;;  %v21715_v43 = vmax.f32 %v21713_v56, %v21714_v63  ;;  %v7911_v4 = vmul.f32 1.442695, %v21717_v15  ;;  %v21729_v56 = vld [vmem:[#allocation27_spill] sm:$0xff] }
 0x5d0   : > { %21711 = vst [vmem:[#allocation44_spill] sm:$0xff] %v18472_v20  ;;  %14501 = vpow2.f32 %v7845_v44  ;;  %v18477_v40 = vpop.xlane.xlu1 %7193  ;;  %v18482_v8 = vpop.eup %14483  ;;  %v21718_v44 = vld [vmem:[#allocation83_spill] sm:$0xff]  ;;  %v7851_v12 = vmul.f32 1.442695, %v21725_v33  ;;  %v21731_v15 = vld [vmem:[#allocation6_spill] sm:$0xff]  ;;  %v21735_v18 = vld [vmem:[#allocation53_spill] sm:$0xff] }
 0x5d1   : > { %8291 = vadd.xlane.f32.xlu1 %v8290_v7  ;;  %7352 = vmax.xlane.f32.xlu0 %v21715_v43  ;;  %21716 = vst [vmem:[#allocation40_spill] sm:$0xff] %v18482_v8  ;;  %14503 = vpow2.f32 %v7847_v28  ;;  %v18491_v24 = vpop.xlane.xlu0 %7238  ;;  %v21721_v43 = vsub.f32 %v21601_v27, %v18192_v59  ;;  %v21722_v28 = vld [vmem:[#allocation80_spill] sm:$0xff]  ;;  %v21727_v59 = vsub.f32 %v21606_v54, %v18210_v21  ;;  %v21734_v35 = vld [vmem:[#allocation219_spill] sm:$0xff] }
 0x5d2   : > { %v18493_v7 = vpop.eup %14485  ;;  %14505 = vpow2.f32 %v7849_v48  ;;  %v8245_v33 = vadd.f32 %v21735_v18, %v21734_v35  ;;  %v21737_v21 = vsub.f32 %v21618_v39, %v18246_v19  ;;  %v21743_v39 = vld [vmem:[#allocation89_spill] sm:$0xff] }
 0x5d3   : > { %21720 = vst [vmem:[#allocation75_spill] sm:$0xff] %v18493_v7  ;;  %v7913_v63 = vmul.f32 1.442695, %v21721_v43  ;;  %v18502_v8 = vpop.eup %14487  ;;  %14507 = vpow2.f32 %v7907_v37  ;;  %v7853_v27 = vmul.f32 1.442695, %v21727_v59  ;;  %v21728_v43 = vld [vmem:[#allocation11_spill] sm:$0xff] }
 0x5d4   : > { %21724 = vst [vmem:[#allocation46_spill] sm:$0xff] %v18502_v8  ;;  %v18507_v20 = vpop.eup %14489  ;;  %14509 = vpow2.f32 %v7909_v23  ;;  %v18512_v48 = vpop.xlane.xlu1 %7241  ;;  %v21730_v7 = vmax.f32 %v21728_v43, %v21729_v56  ;;  %v21732_v8 = vld [vmem:[#allocation9_spill] sm:$0xff]  ;;  %v7855_v54 = vmul.f32 1.442695, %v21737_v21  ;;  %v21738_v23 = vld [vmem:[#allocation84_spill] sm:$0xff]  ;;  %v21739_v56 = vld [vmem:[#allocation86_spill] sm:$0xff] }
 0x5d5   : > { %21726 = vst [vmem:[#allocation72_spill] sm:$0xff] %v18507_v20  ;;  %v21733_v37 = vmax.f32 %v21731_v15, %v21732_v8  ;;  %v18522_v38 = vpop.eup %14491  ;;  %14511 = vpow2.f32 %v7911_v4  ;;  %v18531_v43 = vpop.xlane.xlu0 %7244  ;;  %v21742_v4 = vld [vmem:[#allocation87_spill] sm:$0xff]  ;;  %v21749_v18 = vld [vmem:[#allocation13_spill] sm:$0xff] }
 0x5d6   : > { %7355 = vmax.xlane.f32.xlu1 %v21730_v7  ;;  %21736 = vst [vmem:[#allocation74_spill] sm:$0xff] %v18522_v38  ;;  %v18533_v8 = vpop.eup %14493  ;;  %14513 = vpow2.f32 %v7913_v63  ;;  %v21745_v7 = vsub.f32 %v21623_v53, %v18266_v36  ;;  %v8293_v53 = vadd.f32 %v18237_v11, %v18224_v55  ;;  %v21757_v55 = vsub.f32 %v21630_v0, %v18285_v45 }
 0x5d7   : > { %7400 = vmax.xlane.f32.xlu0 %v21733_v37  ;;  %21740 = vst [vmem:[#allocation49_spill] sm:$0xff] %v18533_v8  ;;  %v21741_v37 = vsub.f32 %v21619_v2, %v18246_v19  ;;  %v18542_v15 = vpop.eup %14495  ;;  %14515 = vpow2.f32 %v7851_v12  ;;  %v21747_v2 = vsub.f32 %v21624_v10, %v18266_v36  ;;  %v21751_v12 = vld [vmem:[#allocation54_spill] sm:$0xff]  ;;  %v21753_v10 = vsub.f32 %v21629_v49, %v18285_v45 }
 0x5d8   : > { %21744 = vst [vmem:[#allocation76_spill] sm:$0xff] %v18542_v15  ;;  %v7915_v59 = vmul.f32 1.442695, %v21745_v7  ;;  %v18547_v38 = vpop.eup %14497  ;;  %14517 = vpow2.f32 %v7853_v27  ;;  %v18552_v63 = vpop.xlane.xlu1 %7247  ;;  %v8248_v21 = vadd.f32 %v21751_v12, %v18202_v31  ;;  %v21754_v27 = vld [vmem:[#allocation91_spill] sm:$0xff]  ;;  %v7921_v11 = vmul.f32 1.442695, %v21757_v55 }
 0x5d9   : > { %v7857_v35 = vmul.f32 1.442695, %v21741_v37  ;;  %21746 = vst [vmem:[#allocation78_spill] sm:$0xff] %v18547_v38  ;;  %v7917_v19 = vmul.f32 1.442695, %v21747_v2  ;;  %v21748_v37 = vld [vmem:[#allocation201_spill] sm:$0xff]  ;;  %v18561_v7 = vpop.eup %14499  ;;  %14519 = vpow2.f32 %v7855_v54  ;;  %v21763_v45 = vsub.f32 %v21635_v52, %v18297_v51 }
 0x5da   : > { %v21750_v8 = vmax.f32 %v21748_v37, %v21749_v18  ;;  %21752 = vst [vmem:[#allocation79_spill] sm:$0xff] %v18561_v7  ;;  %v7919_v36 = vmul.f32 1.442695, %v21753_v10  ;;  %v21755_v18 = vld [vmem:[#allocation93_spill] sm:$0xff]  ;;  %v18572_v37 = vpop.eup %14501  ;;  %v21758_v54 = vld [vmem:[#allocation88_spill] sm:$0xff]  ;;  %v21759_v49 = vld [vmem:[#allocation90_spill] sm:$0xff] }
 0x5db   : > { %8246 = vadd.xlane.f32.xlu0 %v8245_v33  ;;  %v18570_v33 = vpop.xlane.xlu0 %7292  ;;  %21756 = vst [vmem:[#allocation81_spill] sm:$0xff] %v18572_v37  ;;  %14521 = vpow2.f32 %v7857_v35  ;;  %v18581_v12 = vpop.eup %14503  ;;  %v7861_v55 = vmul.f32 1.442695, %v21763_v45  ;;  %v8296_v35 = vadd.f32 %v18268_v58, %v18253_v42  ;;  %v21779_v58 = vld [vmem:[#allocation14_spill] sm:$0xff] }
 0x5dc   : > { %7403 = vmax.xlane.f32.xlu1 %v21750_v8  ;;  %21760 = vst [vmem:[#allocation83_spill] sm:$0xff] %v18581_v12  ;;  %14523 = vpow2.f32 %v7915_v59  ;;  %v21761_v8 = vsub.f32 %v21634_v34, %v18297_v51  ;;  %v18586_v7 = vpop.eup %14505  ;;  %v18591_v0 = vpop.xlane.xlu1 %7295  ;;  %v21765_v34 = vsub.f32 %v21650_v29, %v18331_v1  ;;  %v21767_v51 = vld [vmem:[#allocation94_spill] sm:$0xff]  ;;  %v21772_v29 = vld [vmem:[#allocation97_spill] sm:$0xff] }
 0x5dd   : > { %21762 = vst [vmem:[#allocation85_spill] sm:$0xff] %v18586_v7  ;;  %14525 = vpow2.f32 %v7917_v19  ;;  %v18595_v10 = vpop.eup %14507  ;;  %v21766_v19 = vld [vmem:[#allocation92_spill] sm:$0xff]  ;;  %v21800_v37 = vld [vmem:[#allocation58_spill] sm:$0xff] }
 0x5de   : > { %v7859_v2 = vmul.f32 1.442695, %v21761_v8  ;;  %21764 = vst [vmem:[#allocation80_spill] sm:$0xff] %v18595_v10  ;;  %14527 = vpow2.f32 %v7919_v36  ;;  %v7863_v59 = vmul.f32 1.442695, %v21765_v34  ;;  %v21771_v36 = vld [vmem:[#allocation95_spill] sm:$0xff] }
 0x5df   : > { %8294 = vadd.xlane.f32.xlu0 %v8293_v53  ;;  %v18604_v45 = vpop.xlane.xlu0 %7250  ;;  %14529 = vpow2.f32 %v7921_v11  ;;  %v21769_v53 = vld [vmem:[#allocation69_spill] sm:$0xff]  ;;  %v21774_v8 = vld [vmem:[#allocation64_spill] sm:$0xff]  ;;  %v21777_v11 = vsub.f32 %v21657_v3, %v18349_v62  ;;  %v21790_v3 = vsub.f32 %v21675_v6, %v18387_v46  ;;  %v21801_v6 = vld [vmem:[#allocation62_spill] sm:$0xff] }
 0x5e0   : > { %8249 = vadd.xlane.f32.xlu1 %v8248_v21  ;;  %v18606_v21 = vpop.eup %14509  ;;  %v21770_v31 = vsub.f32 %v21769_v53, %v18331_v1  ;;  %14531 = vpow2.f32 %v7859_v2  ;;  %v21775_v52 = vsub.f32 %v21774_v8, %v18349_v62  ;;  %v18625_v1 = vpop.xlane.xlu1 %7253  ;;  %v21778_v53 = vld [vmem:[#allocation10_spill] sm:$0xff]  ;;  %v21782_v2 = vsub.f32 %v21670_v26, %v18368_v60  ;;  %v21784_v62 = vld [vmem:[#allocation101_spill] sm:$0xff] }
 0x5e1   : > { %21768 = vst [vmem:[#allocation82_spill] sm:$0xff] %v18606_v21  ;;  %v18615_v10 = vpop.eup %14511  ;;  %14533 = vpow2.f32 %v7861_v55  ;;  %v21780_v34 = vmax.f32 %v21778_v53, %v21779_v58  ;;  %v21783_v55 = vld [vmem:[#allocation99_spill] sm:$0xff]  ;;  %v21788_v26 = vld [vmem:[#allocation98_spill] sm:$0xff]  ;;  %v21794_v53 = vld [vmem:[#allocation33_spill] sm:$0xff] }
 0x5e2   : > { %v7865_v42 = vmul.f32 1.442695, %v21770_v31  ;;  %21773 = vst [vmem:[#allocation84_spill] sm:$0xff] %v18615_v10  ;;  %v7923_v7 = vmul.f32 1.442695, %v21775_v52  ;;  %v18620_v12 = vpop.eup %14513  ;;  %14535 = vpow2.f32 %v7863_v59  ;;  %v21787_v59 = vld [vmem:[#allocation96_spill] sm:$0xff] }
 0x5e3   : > { %21776 = vst [vmem:[#allocation86_spill] sm:$0xff] %v18620_v12  ;;  %v7925_v31 = vmul.f32 1.442695, %v21777_v11  ;;  %7358 = vmax.xlane.f32.xlu0 %v21780_v34  ;;  %v18630_v10 = vpop.eup %14515  ;;  %v7927_v8 = vmul.f32 1.442695, %v21782_v2  ;;  %v18639_v11 = vpop.xlane.xlu0 %7298  ;;  %v21786_v34 = vsub.f32 %v21671_v9, %v18368_v60  ;;  %v21797_v2 = vld [vmem:[#allocation12_spill] sm:$0xff] }
 0x5e4   : > { %8297 = vadd.xlane.f32.xlu1 %v8296_v35  ;;  %21781 = vst [vmem:[#allocation87_spill] sm:$0xff] %v18630_v10  ;;  %v18641_v35 = vpop.eup %14517  ;;  %14537 = vpow2.f32 %v7865_v42  ;;  %v7867_v52 = vmul.f32 1.442695, %v21790_v3  ;;  %v21792_v42 = vld [vmem:[#allocation73_spill] sm:$0xff]  ;;  %v8299_v3 = vadd.f32 %v21801_v6, %v21800_v37 }
 0x5e5   : > { %21785 = vst [vmem:[#allocation89_spill] sm:$0xff] %v18641_v35  ;;  %v7929_v58 = vmul.f32 1.442695, %v21786_v34  ;;  %v18650_v10 = vpop.eup %14519  ;;  %14539 = vpow2.f32 %v7923_v7  ;;  %v21793_v60 = vsub.f32 %v21792_v42, %v18387_v46  ;;  %v18660_v34 = vpop.xlane.xlu1 %7301  ;;  %v21795_v35 = vld [vmem:[#allocation35_spill] sm:$0xff]  ;;  %v21803_v46 = vsub.f32 %v21691_v61, %v18408_v30  ;;  %v21804_v42 = vld [vmem:[#allocation100_spill] sm:$0xff] }
 0x5e6   : > { %21789 = vst [vmem:[#allocation91_spill] sm:$0xff] %v18650_v10  ;;  %v18655_v12 = vpop.eup %14521  ;;  %14541 = vpow2.f32 %v7925_v31  ;;  %v21796_v21 = vmax.f32 %v21794_v53, %v21795_v35  ;;  %v21798_v10 = vld [vmem:[#allocation30_spill] sm:$0xff]  ;;  %v21821_v61 = vld [vmem:[#allocation231_spill] sm:$0xff] }
 0x5e7   : > { %21791 = vst [vmem:[#allocation93_spill] sm:$0xff] %v18655_v12  ;;  %v7869_v9 = vmul.f32 1.442695, %v21793_v60  ;;  %v21799_v7 = vmax.f32 %v21797_v2, %v21798_v10  ;;  %v18670_v38 = vpop.eup %14523  ;;  %14543 = vpow2.f32 %v7927_v8  ;;  %v7871_v31 = vmul.f32 1.442695, %v21803_v46  ;;  %v21805_v35 = vld [vmem:[#allocation102_spill] sm:$0xff]  ;;  %v18679_v53 = vpop.xlane.xlu0 %7256 }
 0x5e8   : > { %7361 = vmax.xlane.f32.xlu1 %v21796_v21  ;;  %21802 = vst [vmem:[#allocation88_spill] sm:$0xff] %v18670_v38  ;;  %21806 = vst [vmem:[#allocation90_spill] sm:$0xff] %v18679_v53  ;;  %v18681_v10 = vpop.eup %14525  ;;  %14545 = vpow2.f32 %v7929_v58  ;;  %v21810_v8 = vld [vmem:[#allocation103_spill] sm:$0xff]  ;;  %v21813_v21 = vsub.f32 %v21696_v25, %v18426_v17  ;;  %v21815_v58 = vsub.f32 %v21697_v47, %v18426_v17  ;;  %v21817_v2 = vld [vmem:[#allocation17_spill] sm:$0xff] }
 0x5e9   : > { %7406 = vmax.xlane.f32.xlu0 %v21799_v7  ;;  %21807 = vst [vmem:[#allocation92_spill] sm:$0xff] %v18681_v10  ;;  %v21808_v7 = vld [vmem:[#allocation77_spill] sm:$0xff]  ;;  %v18690_v38 = vpop.eup %14527  ;;  %14547 = vpow2.f32 %v7867_v52  ;;  %v21822_v25 = vld [vmem:[#allocation34_spill] sm:$0xff]  ;;  %v21824_v17 = vsub.f32 %v21703_v50, %v18443_v5 }
 0x5ea   : > { %v21809_v6 = vsub.f32 %v21808_v7, %v18408_v30  ;;  %21812 = vst [vmem:[#allocation94_spill] sm:$0xff] %v18690_v38  ;;  %v7931_v60 = vmul.f32 1.442695, %v21813_v21  ;;  %v18695_v12 = vpop.eup %14529  ;;  %14549 = vpow2.f32 %v7869_v9  ;;  %v7933_v30 = vmul.f32 1.442695, %v21815_v58  ;;  %v21816_v7 = vld [vmem:[#allocation15_spill] sm:$0xff] }
 0x5eb   : > { %21814 = vst [vmem:[#allocation69_spill] sm:$0xff] %v18695_v12  ;;  %v21818_v10 = vmax.f32 %v21816_v7, %v21817_v2  ;;  %v21819_v46 = vld [vmem:[#allocation65_spill] sm:$0xff]  ;;  %v8347_v21 = vadd.f32 %v21822_v25, %v21821_v61  ;;  %v18709_v53 = vpop.eup %14531  ;;  %14551 = vpow2.f32 %v7871_v31  ;;  %v7935_v47 = vmul.f32 1.442695, %v21824_v17  ;;  %v21825_v9 = vld [vmem:[#allocation107_spill] sm:$0xff]  ;;  %v21829_v31 = vld [vmem:[#allocation104_spill] sm:$0xff] }
 0x5ec   : > { %v7873_v37 = vmul.f32 1.442695, %v21809_v6  ;;  %v18700_v6 = vpop.xlane.xlu1 %7259  ;;  %v21820_v52 = vld [vmem:[#allocation229_spill] sm:$0xff]  ;;  %21823 = vst [vmem:[#allocation95_spill] sm:$0xff] %v18709_v53  ;;  %v18720_v7 = vpop.eup %14533  ;;  %v21828_v25 = vsub.f32 %v21704_v41, %v18443_v5  ;;  %v21830_v50 = vld [vmem:[#allocation106_spill] sm:$0xff]  ;;  %v21834_v5 = vsub.f32 %v21708_v57, %v18456_v14  ;;  %v21846_v57 = vsub.f32 %v21722_v28, %v18491_v24 }
 0x5ed   : > { %7409 = vmax.xlane.f32.xlu1 %v21818_v10  ;;  %8300 = vadd.xlane.f32.xlu0 %v8299_v3  ;;  %v8302_v38 = vadd.f32 %v21820_v52, %v21819_v46  ;;  %v21826_v2 = vld [vmem:[#allocation109_spill] sm:$0xff]  ;;  %v18718_v3 = vpop.xlane.xlu0 %7304  ;;  %21827 = vst [vmem:[#allocation97_spill] sm:$0xff] %v18720_v7  ;;  %v18729_v46 = vpop.eup %14535  ;;  %v21832_v10 = vsub.f32 %v21707_v22, %v18456_v14  ;;  %v21836_v17 = vld [vmem:[#allocation38_spill] sm:$0xff] }
 0x5ee   : > { %14553 = vpow2.f32 %v7873_v37  ;;  %v7937_v52 = vmul.f32 1.442695, %v21828_v25  ;;  %21831 = vst [vmem:[#allocation64_spill] sm:$0xff] %v18729_v46  ;;  %v18734_v53 = vpop.eup %14537  ;;  %v7877_v41 = vmul.f32 1.442695, %v21834_v5  ;;  %v21835_v25 = vld [vmem:[#allocation67_spill] sm:$0xff]  ;;  %v21838_v22 = vsub.f32 %v21718_v44, %v18477_v40 }
 0x5ef   : > { %14555 = vpow2.f32 %v7931_v60  ;;  %v7875_v58 = vmul.f32 1.442695, %v21832_v10  ;;  %21833 = vst [vmem:[#allocation99_spill] sm:$0xff] %v18734_v53  ;;  %v8350_v61 = vadd.f32 %v21836_v17, %v21835_v25  ;;  %v18743_v46 = vpop.eup %14539  ;;  %v21840_v14 = vld [vmem:[#allocation110_spill] sm:$0xff]  ;;  %v21842_v17 = vsub.f32 %v21719_v16, %v18477_v40  ;;  %v21843_v25 = vld [vmem:[#allocation111_spill] sm:$0xff]  ;;  %v5498_v10 = vld [vmem:[#allocation3 + $0x1c0] sm:$0xff] }
 0x5f0   : > { %14557 = vpow2.f32 %v7933_v30  ;;  %v18739_v37 = vpop.xlane.xlu1 %7307  ;;  %21837 = vst [vmem:[#allocation101_spill] sm:$0xff] %v18743_v46  ;;  %v7879_v60 = vmul.f32 1.442695, %v21838_v22  ;;  %v21839_v30 = vld [vmem:[#allocation108_spill] sm:$0xff]  ;;  %v21844_v22 = vld [vmem:[#allocation113_spill] sm:$0xff]  ;;  %12747 = vmatprep.subr.bf16.mxu1 %v5498_v10  ;;  %v21848_v40 = vsub.f32 %v21723_v32, %v18491_v24  ;;  %v21850_v46 = vld [vmem:[#allocation39_spill] sm:$0xff]  ;;  %v21853_v28 = vsub.f32 %v21738_v23, %v18512_v48 }
 0x5f1   : > { %8303 = vadd.xlane.f32.xlu1 %v8302_v38  ;;  %8348 = vadd.xlane.f32.xlu0 %v8347_v21  ;;  %14559 = vpow2.f32 %v7935_v47  ;;  %v18752_v5 = vpop.xlane.xlu0 %7262  ;;  %v5482_v38 = vld [vmem:[#allocation3 + $0x140] sm:$0xff]  ;;  %v18754_v21 = vpop.eup %14541  ;;  %v7881_v47 = vmul.f32 1.442695, %v21842_v17  ;;  %v21855_v24 = vld [vmem:[#allocation118_spill] sm:$0xff]  ;;  %v21861_v32 = vsub.f32 %v21742_v4, %v18531_v43  ;;  %v21871_v4 = vsub.f32 %v21754_v27, %v18552_v63 }
 0x5f2   : > { %21841 = vst [vmem:[#allocation96_spill] sm:$0xff] %v18754_v21  ;;  %14561 = vpow2.f32 %v7937_v52  ;;  %12683 = vmatprep.subr.bf16.mxu0 %v5482_v38  ;;  %v18763_v53 = vpop.eup %14543  ;;  %v7939_v21 = vmul.f32 1.442695, %v21846_v57  ;;  %v7941_v16 = vmul.f32 1.442695, %v21848_v40  ;;  %v21849_v38 = vld [vmem:[#allocation19_spill] sm:$0xff] }
 0x5f3   : > { %21845 = vst [vmem:[#allocation98_spill] sm:$0xff] %v18763_v53  ;;  %14563 = vpow2.f32 %v7875_v58  ;;  %v18768_v52 = vpop.eup %14545  ;;  %v21851_v44 = vmax.f32 %v21849_v38, %v21850_v46  ;;  %v7943_v10 = vmul.f32 1.442695, %v21853_v28  ;;  %v21859_v23 = vld [vmem:[#allocation114_spill] sm:$0xff]  ;;  %v7947_v57 = vmul.f32 1.442695, %v21861_v32 }
 0x5f4   : > { %21847 = vst [vmem:[#allocation73_spill] sm:$0xff] %v18768_v52  ;;  %14565 = vpow2.f32 %v7877_v41  ;;  %v18773_v17 = vpop.xlane.xlu1 %7265  ;;  %v18778_v58 = vpop.eup %14547  ;;  %v21854_v41 = vld [vmem:[#allocation115_spill] sm:$0xff]  ;;  %v21867_v28 = vld [vmem:[#allocation16_spill] sm:$0xff]  ;;  %v21873_v32 = vld [vmem:[#allocation117_spill] sm:$0xff] }
 0x5f5   : > { %8351 = vadd.xlane.f32.xlu1 %v8350_v61  ;;  %7364 = vmax.xlane.f32.xlu0 %v21851_v44  ;;  %21852 = vst [vmem:[#allocation100_spill] sm:$0xff] %v18778_v58  ;;  %14567 = vpow2.f32 %v7879_v60  ;;  %v18787_v40 = vpop.xlane.xlu0 %7310  ;;  %v18789_v61 = vpop.eup %14549  ;;  %v21857_v44 = vsub.f32 %v21739_v56, %v18512_v48  ;;  %v21858_v60 = vld [vmem:[#allocation112_spill] sm:$0xff]  ;;  %v21863_v56 = vsub.f32 %v21743_v39, %v18531_v43  ;;  %v21865_v38 = vld [vmem:[#allocation43_spill] sm:$0xff]  ;;  %v21881_v39 = vld [vmem:[#allocation22_spill] sm:$0xff] }
 0x5f6   : > { %21856 = vst [vmem:[#allocation102_spill] sm:$0xff] %v18789_v61  ;;  %14569 = vpow2.f32 %v7881_v47  ;;  %v18798_v58 = vpop.eup %14551  ;;  %v21872_v43 = vld [vmem:[#allocation116_spill] sm:$0xff] }
 0x5f7   : > { %v7945_v46 = vmul.f32 1.442695, %v21857_v44  ;;  %21860 = vst [vmem:[#allocation77_spill] sm:$0xff] %v18798_v58  ;;  %14571 = vpow2.f32 %v7939_v21  ;;  %v7949_v48 = vmul.f32 1.442695, %v21863_v56  ;;  %v21864_v44 = vld [vmem:[#allocation20_spill] sm:$0xff] }
 0x5f8   : > { %v18803_v52 = vpop.eup %14553  ;;  %14573 = vpow2.f32 %v7941_v16  ;;  %v18808_v47 = vpop.xlane.xlu1 %7313  ;;  %v21866_v61 = vmax.f32 %v21864_v44, %v21865_v38  ;;  %v21868_v58 = vld [vmem:[#allocation18_spill] sm:$0xff]  ;;  %v7951_v16 = vmul.f32 1.442695, %v21871_v4 }
 0x5f9   : > { %21862 = vst [vmem:[#allocation103_spill] sm:$0xff] %v18803_v52  ;;  %v21869_v21 = vmax.f32 %v21867_v28, %v21868_v58  ;;  %v18816_v53 = vpop.eup %14555  ;;  %14575 = vpow2.f32 %v7943_v10  ;;  %v8205_v52 = vpop.xlane.xlu0 %8204  ;;  %v21876_v58 = vld [vmem:[#allocation66_spill] sm:$0xff]  ;;  %v21877_v10 = vld [vmem:[#allocation207_spill] sm:$0xff] }
 0x5fa   : > { %7367 = vmax.xlane.f32.xlu1 %v21866_v61  ;;  %21870 = vst [vmem:[#allocation107_spill] sm:$0xff] %v18816_v53  ;;  %v18825_v38 = vpop.eup %14557  ;;  %14577 = vpow2.f32 %v7945_v46  ;;  %v21875_v61 = vsub.f32 %v21755_v18, %v18552_v63  ;;  %v8305_v28 = vadd.f32 %v21877_v10, %v21876_v58  ;;  %v21880_v4 = vld [vmem:[#allocation210_spill] sm:$0xff]  ;;  %v21886_v58 = vld [vmem:[#allocation68_spill] sm:$0xff]  ;;  %v21934_v53 = vld [vmem:[#allocation217_spill] sm:$0xff] }
 0x5fb   : > { %7412 = vmax.xlane.f32.xlu0 %v21869_v21  ;;  %21874 = vst [vmem:[#allocation109_spill] sm:$0xff] %v18825_v38  ;;  %v18832_v44 = vpop.eup %14559  ;;  %14579 = vpow2.f32 %v7947_v57  ;;  %v21882_v56 = vmax.f32 %v21880_v4, %v21881_v39  ;;  %v21887_v57 = vld [vmem:[#allocation45_spill] sm:$0xff] }
 0x5fc   : > { %v7953_v21 = vmul.f32 1.442695, %v21875_v61  ;;  %21878 = vst [vmem:[#allocation104_spill] sm:$0xff] %v18832_v44  ;;  %v18834_v27 = vpop.eup %14561  ;;  %14581 = vpow2.f32 %v7949_v48  ;;  %v8208_v46 = vpop.xlane.xlu1 %8207  ;;  %v21885_v61 = vld [vmem:[#allocation41_spill] sm:$0xff] }
 0x5fd   : > { %21879 = vst [vmem:[#allocation106_spill] sm:$0xff] %v18834_v27  ;;  %v18839_v38 = vpop.eup %14563  ;;  %14583 = vpow2.f32 %v7951_v16  ;;  %v8253_v18 = vpop.xlane.xlu0 %8252  ;;  %v8308_v10 = vadd.f32 %v21886_v58, %v21885_v61  ;;  %v8353_v27 = vadd.f32 %v21887_v57, %v18447_v13  ;;  %v21891_v16 = vsub.f32 %v21759_v49, %v18570_v33  ;;  %v21896_v49 = vld [vmem:[#allocation125_spill] sm:$0xff] }
 0x5fe   : > { %7415 = vmax.xlane.f32.xlu1 %v21882_v56  ;;  %21883 = vst [vmem:[#allocation108_spill] sm:$0xff] %v18839_v38  ;;  %v18841_v63 = vpop.eup %14565  ;;  %14585 = vpow2.f32 %v7953_v21  ;;  %v21889_v56 = vsub.f32 %v21758_v54, %v18570_v33  ;;  %v21893_v13 = vsub.f32 %v21766_v19, %v18591_v0  ;;  %v21932_v38 = vld [vmem:[#allocation121_spill] sm:$0xff] }
 0x5ff   : > { %8306 = vadd.xlane.f32.xlu0 %v8305_v28  ;;  %21884 = vst [vmem:[#allocation110_spill] sm:$0xff] %v18841_v63  ;;  %v18847_v48 = vpop.eup %14567  ;;  %14587 = vrcp.f32 %v8205_v52  ;;  %v8013_v4 = vmul.f32 1.442695, %v21891_v16 }
 0x600   : > { %21888 = vst [vmem:[#allocation111_spill] sm:$0xff] %v18847_v48  ;;  %v8011_v28 = vmul.f32 1.442695, %v21889_v56  ;;  %v18852_v39 = vpop.eup %14569  ;;  %14589 = vrcp.f32 %v8208_v46  ;;  %v8015_v57 = vmul.f32 1.442695, %v21893_v13  ;;  %v8256_v61 = vpop.xlane.xlu1 %8255  ;;  %v21895_v56 = vld [vmem:[#allocation120_spill] sm:$0xff]  ;;  %v21900_v13 = vsub.f32 %v21767_v51, %v18591_v0 }
 0x601   : > { %21890 = vst [vmem:[#allocation113_spill] sm:$0xff] %v18852_v39  ;;  %v18857_v21 = vpop.eup %14571  ;;  %14591 = vrcp.f32 %v8253_v18  ;;  %v18862_v54 = vpop.xlane.xlu0 %7268  ;;  %v21898_v46 = vld [vmem:[#allocation44_spill] sm:$0xff]  ;;  %v21931_v48 = vld [vmem:[#allocation129_spill] sm:$0xff] }
 0x602   : > { %8309 = vadd.xlane.f32.xlu1 %v8308_v10  ;;  %21892 = vst [vmem:[#allocation115_spill] sm:$0xff] %v18857_v21  ;;  %v18864_v52 = vpop.eup %14573  ;;  %14593 = vrcp.f32 %v8256_v61  ;;  %v8017_v19 = vmul.f32 1.442695, %v21900_v13  ;;  %v21902_v61 = vsub.f32 %v21771_v36, %v18604_v45  ;;  %v21904_v10 = vld [vmem:[#allocation47_spill] sm:$0xff]  ;;  %v21909_v36 = vsub.f32 %v21783_v55, %v18625_v1  ;;  %v21925_v39 = vld [vmem:[#allocation40_spill] sm:$0xff] }
 0x603   : > { %8354 = vadd.xlane.f32.xlu0 %v8353_v27  ;;  %21894 = vst [vmem:[#allocation118_spill] sm:$0xff] %v18864_v52  ;;  %v21897_v27 = vld [vmem:[#allocation71_spill] sm:$0xff]  ;;  %v18872_v58 = vpop.eup %14575  ;;  %14595 = vpow2.f32 %v8011_v28  ;;  %v21903_v52 = vld [vmem:[#allocation42_spill] sm:$0xff]  ;;  %v21907_v28 = vsub.f32 %v21772_v29, %v18604_v45  ;;  %v21916_v55 = vsub.f32 %v21784_v62, %v18625_v1 }
 0x604   : > { %v8356_v16 = vadd.f32 %v21898_v46, %v21897_v27  ;;  %21899 = vst [vmem:[#allocation112_spill] sm:$0xff] %v18872_v58  ;;  %v18877_v18 = vpop.eup %14577  ;;  %14597 = vpow2.f32 %v8013_v4  ;;  %v7955_v33 = vmul.f32 1.442695, %v21902_v61  ;;  %v21905_v21 = vmax.f32 %v21903_v52, %v21904_v10  ;;  %v18890_v51 = vpop.xlane.xlu1 %7271  ;;  %v21910_v61 = vld [vmem:[#allocation128_spill] sm:$0xff]  ;;  %v21911_v46 = vld [vmem:[#allocation131_spill] sm:$0xff]  ;;  %v21912_v10 = vld [vmem:[#allocation122_spill] sm:$0xff] }
 0x605   : > { %21901 = vst [vmem:[#allocation114_spill] sm:$0xff] %v18877_v18  ;;  %v18885_v27 = vpop.eup %14579  ;;  %14599 = vpow2.f32 %v8015_v57  ;;  %v7957_v0 = vmul.f32 1.442695, %v21907_v28  ;;  %v18892_v13 = vpop.xlane.xlu0 %7316  ;;  %v21914_v28 = vld [vmem:[#allocation124_spill] sm:$0xff]  ;;  %v21920_v57 = vld [vmem:[#allocation25_spill] sm:$0xff]  ;;  %v21921_v58 = vld [vmem:[#allocation215_spill] sm:$0xff] }
 0x606   : > { %8357 = vadd.xlane.f32.xlu1 %v8356_v16  ;;  %21906 = vst [vmem:[#allocation116_spill] sm:$0xff] %v18885_v27  ;;  %v18894_v4 = vpop.eup %14581  ;;  %v7959_v16 = vmul.f32 1.442695, %v21909_v36  ;;  %14601 = vpow2.f32 %v8017_v19  ;;  %v7961_v36 = vmul.f32 1.442695, %v21916_v55  ;;  %v21918_v27 = vld [vmem:[#allocation51_spill] sm:$0xff]  ;;  %v21922_v45 = vmax.f32 %v21920_v57, %v21921_v58 }
 0x607   : > { %7370 = vmax.xlane.f32.xlu0 %v21905_v21  ;;  %21908 = vst [vmem:[#allocation117_spill] sm:$0xff] %v18894_v4  ;;  %v18905_v29 = vpop.eup %14583  ;;  %14603 = vpow2.f32 %v7955_v33  ;;  %v21917_v21 = vld [vmem:[#allocation24_spill] sm:$0xff]  ;;  %v21923_v19 = vsub.f32 %v21787_v59, %v18639_v11  ;;  %v21926_v1 = vld [vmem:[#allocation75_spill] sm:$0xff] }
 0x608   : > { %21913 = vst [vmem:[#allocation120_spill] sm:$0xff] %v18905_v29  ;;  %v18909_v4 = vpop.eup %14585  ;;  %v21919_v18 = vmax.f32 %v21917_v21, %v21918_v27  ;;  %14605 = vpow2.f32 %v7957_v0  ;;  %v8311_v62 = vadd.f32 %v21926_v1, %v21925_v39  ;;  %v21933_v39 = vld [vmem:[#allocation132_spill] sm:$0xff]  ;;  %v21938_v58 = vld [vmem:[#allocation123_spill] sm:$0xff]  ;;  %v21939_v0 = vld [vmem:[#allocation133_spill] sm:$0xff] }
 0x609   : > { %21915 = vst [vmem:[#allocation125_spill] sm:$0xff] %v18909_v4  ;;  %v14588_v29 = vpop.eup %14587  ;;  %v8019_v52 = vmul.f32 1.442695, %v21923_v19  ;;  %v18923_v4 = vpop.xlane.xlu1 %7319  ;;  %14607 = vpow2.f32 %v7959_v16  ;;  %v21930_v19 = vld [vmem:[#allocation119_spill] sm:$0xff] }
 0x60a   : > { %7373 = vmax.xlane.f32.xlu1 %v21919_v18  ;;  %21924 = vst [vmem:[#allocation128_spill] sm:$0xff] %v18923_v4  ;;  %v8211_v33 = vpop.xlane.xlu0 %8210  ;;  %v14590_v55 = vpop.eup %14589  ;;  %v21927_v18 = vsub.f32 %v21788_v26, %v18639_v11  ;;  %v8715_v21 = vmul.f32 %v14588_v29, %v21930_v19  ;;  %v8716_v44 = vmul.f32 %v14588_v29, %v21932_v38  ;;  %14609 = vpow2.f32 %v7961_v36  ;;  %v21935_v11 = vld [vmem:[#allocation26_spill] sm:$0xff] }
 0x60b   : > { %7418 = vmax.xlane.f32.xlu0 %v21922_v45  ;;  %v14592_v59 = vpop.eup %14591  ;;  %v8717_v63 = vmul.f32 %v14590_v55, %v21931_v48  ;;  %v8718_v1 = vmul.f32 %v14590_v55, %v21933_v39  ;;  %v21936_v26 = vmax.f32 %v21934_v53, %v21935_v11  ;;  %14611 = vpow2.f32 %v8019_v52  ;;  %v21941_v39 = vld [vmem:[#allocation46_spill] sm:$0xff]  ;;  %v5474_v11 = vld [vmem:[#allocation3 + $0x100] sm:$0xff] }
 0x60c   : > { %v8021_v27 = vmul.f32 1.442695, %v21927_v18  ;;  %v14594_v16 = vpop.eup %14593  ;;  %v8747_v57 = vmul.f32 %v14592_v59, %v21938_v58  ;;  %v8314_v29 = vadd.f32 %v18507_v20, %v21941_v39  ;;  %v21942_v36 = vld [vmem:[#allocation126_spill] sm:$0xff]  ;;  %v21947_v52 = vsub.f32 %v21804_v42, %v18660_v34  ;;  %v21951_v42 = vld [vmem:[#allocation135_spill] sm:$0xff] }
 0x60d   : > { %v18941_v18 = vpop.eup %14595  ;;  %v8749_v4 = vmul.f32 %v14594_v16, %v21939_v0  ;;  %v8214_v19 = vpop.xlane.xlu1 %8213  ;;  %v8972_v45 = vpack.c.bf16 %v8718_v1, %v8716_v44  ;;  %v8971_v7 = vpack.c.bf16 %v8717_v63, %v8715_v21  ;;  %v8748_v55 = vmul.f32 %v14592_v59, %v21942_v36  ;;  %v21945_v58 = vld [vmem:[#allocation74_spill] sm:$0xff]  ;;  %v21946_v0 = vld [vmem:[#allocation49_spill] sm:$0xff]  ;;  %v5485_v39 = vld [vmem:[#allocation3 + $0x158] sm:$0xff] }
 0x60e   : > { %7421 = vmax.xlane.f32.xlu1 %v21936_v26  ;;  %21937 = vst [vmem:[#allocation131_spill] sm:$0xff] %v18941_v18  ;;  %v8259_v48 = vpop.xlane.xlu0 %8258  ;;  %v18945_v38 = vpop.eup %14597  ;;  %v21943_v26 = vld [vmem:[#allocation134_spill] sm:$0xff]  ;;  %14613 = vpow2.f32 %v8021_v27  ;;  %v8359_v44 = vadd.f32 %v21946_v0, %v21945_v58  ;;  %v5483_v63 = vld [vmem:[#allocation3 + $0x148] sm:$0xff]  ;;  %v8023_v21 = vmul.f32 1.442695, %v21947_v52 }
 0x60f   : > { %8312 = vadd.xlane.f32.xlu0 %v8311_v62  ;;  %21940 = vst [vmem:[#allocation122_spill] sm:$0xff] %v18945_v38  ;;  %v8750_v62 = vmul.f32 %v14594_v16, %v21943_v26  ;;  %v18951_v53 = vpop.eup %14599  ;;  %9131 = vmatprep.mubr.bf16.mxu0 %v8972_v45  ;;  %v8987_v1 = vpack.c.bf16 %v8749_v4, %v8747_v57  ;;  %14615 = vrcp.f32 %v8211_v33  ;;  %v5490_v4 = vld [vmem:[#allocation3 + $0x180] sm:$0xff]  ;;  %v21952_v33 = vld [vmem:[#allocation138_spill] sm:$0xff]  ;;  %v21997_v38 = vld [vmem:[#allocation151_spill] sm:$0xff] }
 0x610   : > { %21944 = vst [vmem:[#allocation124_spill] sm:$0xff] %v18951_v53  ;;  %9132 = vmatmul.mubr.bf16.vlgmr.msra.gmra.mrb[192].mxu0 %v8971_v7  ;;  %v18958_v36 = vpop.eup %14601  ;;  %v21949_v16 = vsub.f32 %v21805_v35, %v18660_v34  ;;  %14617 = vrcp.f32 %v8214_v19  ;;  %v21953_v35 = vld [vmem:[#allocation78_spill] sm:$0xff]  ;;  %v5475_v19 = vld [vmem:[#allocation3 + $0x108] sm:$0xff] }
 0x611   : > { %v8988_v59 = vpack.c.bf16 %v8750_v62, %v8748_v55  ;;  %21948 = vst [vmem:[#allocation119_spill] sm:$0xff] %v18958_v36  ;;  %v8262_v45 = vpop.xlane.xlu1 %8261  ;;  %12684 = vmatpush3.bf16.msra.mxu0 %v5474_v11  ;;  %v18965_v57 = vpop.eup %14603  ;;  %14619 = vrcp.f32 %v8259_v48  ;;  %v8362_v34 = vadd.f32 %v21953_v35, %v18542_v15  ;;  %v21955_v11 = vld [vmem:[#allocation90_spill] sm:$0xff]  ;;  %v5499_v48 = vld [vmem:[#allocation3 + $0x1c8] sm:$0xff] }
 0x612   : > { %8315 = vadd.xlane.f32.xlu1 %v8314_v29  ;;  %v8025_v27 = vmul.f32 1.442695, %v21949_v16  ;;  %v18963_v26 = vpop.xlane.xlu0 %7274  ;;  %21950 = vst [vmem:[#allocation129_spill] sm:$0xff] %v18965_v57  ;;  %12685 = vmatprep.subr.bf16.mxu0 %v5483_v63  ;;  %v18973_v55 = vpop.eup %14605  ;;  %v21956_v62 = vsub.f32 %v21810_v8, %v21955_v11  ;;  %14621 = vrcp.f32 %v8262_v45  ;;  %v5484_v52 = vld [vmem:[#allocation3 + $0x150] sm:$0xff]  ;;  %v21958_v16 = vld [vmem:[#allocation105_spill] sm:$0xff]  ;;  %v21960_v63 = vsub.f32 %v21825_v9, %v18700_v6  ;;  %v21961_v45 = vld [vmem:[#allocation48_spill] sm:$0xff] }
 0x613   : > { %8360 = vadd.xlane.f32.xlu0 %v8359_v44  ;;  %9228 = vmatprep.mubr.bf16.mxu1 %v8988_v59  ;;  %21954 = vst [vmem:[#allocation121_spill] sm:$0xff] %v18973_v55  ;;  %v18978_v59 = vpop.eup %14607  ;;  %14623 = vpow2.f32 %v8023_v21  ;;  %v21959_v29 = vsub.f32 %v21958_v16, %v21955_v11  ;;  %v5491_v21 = vld [vmem:[#allocation3 + $0x188] sm:$0xff]  ;;  %v21968_v16 = vld [vmem:[#allocation136_spill] sm:$0xff]  ;;  %v21972_v11 = vsub.f32 %v21830_v50, %v18718_v3  ;;  %v5492_v50 = vld [vmem:[#allocation3 + $0x190] sm:$0xff] }
 0x614   : > { %v7963_v44 = vmul.f32 1.442695, %v21956_v62  ;;  %9229 = vmatmul.mubr.bf16.vlgmr.msra.gmra.mrb[192].mxu1 %v8987_v1  ;;  %21957 = vst [vmem:[#allocation132_spill] sm:$0xff] %v18978_v59  ;;  %14625 = vpow2.f32 %v8025_v27  ;;  %v7967_v15 = vmul.f32 1.442695, %v21960_v63  ;;  %v21962_v1 = vld [vmem:[#allocation55_spill] sm:$0xff]  ;;  %v18993_v35 = vpop.eup %14609 }
 0x615   : > { %v7965_v7 = vmul.f32 1.442695, %v21959_v29  ;;  %12748 = vmatpush3.bf16.msra.mxu1 %v5490_v4  ;;  %v18986_v8 = vpop.xlane.xlu1 %7277  ;;  %v21963_v62 = vmax.f32 %v21961_v45, %v21962_v1  ;;  %12686 = vmatpush3.bf16.msra.mxu0 %v5475_v19  ;;  %21964 = vst [vmem:[#allocation123_spill] sm:$0xff] %v18993_v35  ;;  %v21965_v4 = vsub.f32 %v21826_v2, %v18700_v6  ;;  %v21966_v29 = vld [vmem:[#allocation139_spill] sm:$0xff]  ;;  %v21970_v2 = vld [vmem:[#allocation137_spill] sm:$0xff]  ;;  %v19009_v9 = vpop.eup %14611  ;;  %v21978_v1 = vld [vmem:[#allocation52_spill] sm:$0xff] }
 0x616   : > { %8363 = vadd.xlane.f32.xlu1 %v8362_v34  ;;  %v18991_v58 = vpop.xlane.xlu0 %7322  ;;  %v21967_v34 = vld [vmem:[#allocation142_spill] sm:$0xff]  ;;  %12749 = vmatprep.subr.bf16.mxu1 %v5499_v48  ;;  %14627 = vpow2.f32 %v7963_v44  ;;  %v21969_v19 = vsub.f32 %v21829_v31, %v18718_v3  ;;  %21971 = vst [vmem:[#allocation133_spill] sm:$0xff] %v19009_v9  ;;  %v8029_v63 = vmul.f32 1.442695, %v21972_v11  ;;  %v21973_v48 = vld [vmem:[#allocation221_spill] sm:$0xff]  ;;  %v21977_v31 = vsub.f32 %v21839_v30, %v18739_v37  ;;  %v5501_v9 = vld [vmem:[#allocation3 + $0x1d8] sm:$0xff] }
 0x617   : > { %7376 = vmax.xlane.f32.xlu0 %v21963_v62  ;;  %v7969_v27 = vmul.f32 1.442695, %v21965_v4  ;;  %12687 = vmatprep.subr.bf16.mxu0 %v5484_v52  ;;  %v5476_v62 = vld [vmem:[#allocation3 + $0x110] sm:$0xff]  ;;  %14629 = vpow2.f32 %v7965_v7  ;;  %v21974_v52 = vld [vmem:[#allocation59_spill] sm:$0xff]  ;;  %v21979_v7 = vld [vmem:[#allocation220_spill] sm:$0xff] }
 0x618   : > { %v8027_v0 = vmul.f32 1.442695, %v21969_v19  ;;  %v5500_v4 = vld [vmem:[#allocation3 + $0x1d0] sm:$0xff]  ;;  %v21975_v20 = vmax.f32 %v21973_v48, %v21974_v52  ;;  %v19017_v44 = vpop.eup %14613  ;;  %14631 = vpow2.f32 %v7967_v15  ;;  %v8031_v19 = vmul.f32 1.442695, %v21977_v31  ;;  %v21982_v15 = vld [vmem:[#allocation140_spill] sm:$0xff] }
 0x619   : > { %12750 = vmatpush3.bf16.msra.mxu1 %v5491_v21  ;;  %21976 = vst [vmem:[#allocation126_spill] sm:$0xff] %v19017_v44  ;;  %v19022_v6 = vpop.xlane.xlu1 %7325  ;;  %v21980_v45 = vmax.f32 %v21978_v1, %v21979_v7  ;;  %12688 = vmatpush3.bf16.msra.mxu0 %v5476_v62  ;;  %v14616_v11 = vpop.eup %14615  ;;  %14633 = vpow2.f32 %v7969_v27  ;;  %v21983_v30 = vld [vmem:[#allocation141_spill] sm:$0xff]  ;;  %v5477_v48 = vld [vmem:[#allocation3 + $0x118] sm:$0xff]  ;;  %v5486_v52 = vld [vmem:[#allocation3 + $0x160] sm:$0xff] }
 0x61a   : > { %7379 = vmax.xlane.f32.xlu1 %v21975_v20  ;;  %v8217_v3 = vpop.xlane.xlu0 %8216  ;;  %v21981_v20 = vsub.f32 %v21840_v14, %v18739_v37  ;;  %12751 = vmatprep.subr.bf16.mxu1 %v5500_v4  ;;  %v14618_v7 = vpop.eup %14617  ;;  %14635 = vpow2.f32 %v8027_v0  ;;  %v21985_v27 = vld [vmem:[#allocation79_spill] sm:$0xff]  ;;  %v21986_v1 = vld [vmem:[#allocation81_spill] sm:$0xff]  ;;  %v21989_v31 = vld [vmem:[#allocation222_spill] sm:$0xff] }
 0x61b   : > { %7424 = vmax.xlane.f32.xlu0 %v21980_v45  ;;  %12689 = vmatprep.subr.bf16.mxu0 %v5485_v39  ;;  %v21984_v45 = vsub.f32 %v21843_v25, %v18752_v5  ;;  %v8317_v44 = vadd.f32 %v21986_v1, %v21985_v27  ;;  %v21987_v37 = vld [vmem:[#allocation83_spill] sm:$0xff]  ;;  %v21988_v14 = vld [vmem:[#allocation85_spill] sm:$0xff]  ;;  %v14620_v35 = vpop.eup %14619  ;;  %14637 = vpow2.f32 %v8029_v63  ;;  %v21990_v4 = vld [vmem:[#allocation224_spill] sm:$0xff] }
 0x61c   : > { %v8033_v21 = vmul.f32 1.442695, %v21981_v20  ;;  %v8320_v20 = vadd.f32 %v21988_v14, %v21987_v37  ;;  %v21991_v39 = vmax.f32 %v21989_v31, %v21990_v4  ;;  %v21992_v59 = vld [vmem:[#allocation144_spill] sm:$0xff]  ;;  %v21994_v25 = vld [vmem:[#allocation143_spill] sm:$0xff]  ;;  %v14622_v36 = vpop.eup %14621  ;;  %14639 = vpow2.f32 %v8031_v19  ;;  %v21995_v14 = vld [vmem:[#allocation146_spill] sm:$0xff] }
 0x61d   : > { %v7971_v62 = vmul.f32 1.442695, %v21984_v45  ;;  %v8720_v0 = vmul.f32 %v14616_v11, %v21992_v59  ;;  %v21993_v55 = vld [vmem:[#allocation148_spill] sm:$0xff]  ;;  %v8719_v45 = vmul.f32 %v14616_v11, %v21994_v25  ;;  %12752 = vmatpush3.bf16.msra.mxu1 %v5492_v50  ;;  %v8220_v27 = vpop.xlane.xlu1 %8219  ;;  %v8721_v1 = vmul.f32 %v14618_v7, %v21995_v14  ;;  %v21996_v53 = vld [vmem:[#allocation154_spill] sm:$0xff]  ;;  %12690 = vmatpush3.bf16.msra.mxu0 %v5477_v48  ;;  %v22000_v11 = vld [vmem:[#allocation157_spill] sm:$0xff] }
 0x61e   : > { %7427 = vmax.xlane.f32.xlu1 %v21991_v39  ;;  %v8722_v57 = vmul.f32 %v14618_v7, %v21993_v55  ;;  %v8265_v37 = vpop.xlane.xlu0 %8264  ;;  %v8752_v63 = vmul.f32 %v14620_v35, %v21996_v53  ;;  %v8751_v18 = vmul.f32 %v14620_v35, %v21997_v38  ;;  %v19050_v39 = vpop.eup %14623  ;;  %14641 = vpow2.f32 %v8033_v21  ;;  %v21999_v55 = vld [vmem:[#allocation158_spill] sm:$0xff]  ;;  %12753 = vmatprep.subr.bf16.mxu1 %v5501_v9  ;;  %v22002_v7 = vld [vmem:[#allocation80_spill] sm:$0xff]  ;;  %v22048_v31 = vld [vmem:[#allocation171_spill] sm:$0xff] }
 0x61f   : > { %8318 = vadd.xlane.f32.xlu0 %v8317_v44  ;;  %21998 = vst [vmem:[#allocation134_spill] sm:$0xff] %v19050_v39  ;;  %v8754_v4 = vmul.f32 %v14622_v36, %v21999_v55  ;;  %v8753_v50 = vmul.f32 %v14622_v36, %v22000_v11  ;;  %12691 = vmatprep.subr.bf16.mxu0 %v5486_v52  ;;  %v19054_v19 = vpop.eup %14625  ;;  %14643 = vpow2.f32 %v7971_v62  ;;  %v22003_v14 = vld [vmem:[#allocation82_spill] sm:$0xff]  ;;  %v5478_v25 = vld [vmem:[#allocation3 + $0x120] sm:$0xff]  ;;  %v5487_v36 = vld [vmem:[#allocation3 + $0x168] sm:$0xff] }
 0x620   : > { %v8974_v59 = vpack.c.bf16 %v8722_v57, %v8720_v0  ;;  %22001 = vst [vmem:[#allocation135_spill] sm:$0xff] %v19054_v19  ;;  %v8973_v44 = vpack.c.bf16 %v8721_v1, %v8719_v45  ;;  %v8365_v53 = vadd.f32 %v22003_v14, %v22002_v7  ;;  %v22004_v38 = vsub.f32 %v21844_v22, %v18752_v5  ;;  %v19061_v9 = vpop.eup %14627  ;;  %v5493_v5 = vld [vmem:[#allocation3 + $0x198] sm:$0xff]  ;;  %v22010_v0 = vld [vmem:[#allocation84_spill] sm:$0xff] }
 0x621   : > { %14645 = vrcp.f32 %v8217_v3  ;;  %v8990_v57 = vpack.c.bf16 %v8754_v4, %v8752_v63  ;;  %v8989_v48 = vpack.c.bf16 %v8753_v50, %v8751_v18  ;;  %22005 = vst [vmem:[#allocation138_spill] sm:$0xff] %v19061_v9  ;;  %v22006_v52 = vsub.f32 %v21854_v41, %v18773_v17  ;;  %v8268_v21 = vpop.xlane.xlu1 %8267  ;;  %v19068_v22 = vpop.eup %14629  ;;  %v22008_v18 = vld [vmem:[#allocation145_spill] sm:$0xff]  ;;  %v22011_v41 = vld [vmem:[#allocation86_spill] sm:$0xff]  ;;  %12692 = vmatpush3.bf16.msra.mxu0 %v5478_v25 }
 0x622   : > { %v7973_v35 = vmul.f32 1.442695, %v22004_v38  ;;  %9139 = vmatprep.mubr.bf16.mxu0 %v8974_v59  ;;  %8321 = vadd.xlane.f32.xlu1 %v8320_v20  ;;  %14647 = vrcp.f32 %v8220_v27  ;;  %v19066_v62 = vpop.xlane.xlu0 %7280  ;;  %22007 = vst [vmem:[#allocation90_spill] sm:$0xff] %v19068_v22  ;;  %v22009_v20 = vld [vmem:[#allocation150_spill] sm:$0xff]  ;;  %v8368_v45 = vadd.f32 %v22011_v41, %v22010_v0  ;;  %v5502_v27 = vld [vmem:[#allocation3 + $0x1e0] sm:$0xff]  ;;  %v19076_v63 = vpop.eup %14631  ;;  %v22013_v59 = vsub.f32 %v21855_v24, %v18773_v17 }
 0x623   : > { %v7975_v1 = vmul.f32 1.442695, %v22006_v52  ;;  %9140 = vmatmul.mubr.bf16.gmra.mrb[196].mxu0 %v8973_v44  ;;  %8366 = vadd.xlane.f32.xlu0 %v8365_v53  ;;  %14649 = vrcp.f32 %v8265_v37  ;;  %22012 = vst [vmem:[#allocation105_spill] sm:$0xff] %v19076_v63  ;;  %v5479_v37 = vld [vmem:[#allocation3 + $0x128] sm:$0xff]  ;;  %v19081_v11 = vpop.eup %14633  ;;  %v22015_v50 = vsub.f32 %v21858_v60, %v18787_v40  ;;  %v5488_v53 = vld [vmem:[#allocation3 + $0x170] sm:$0xff]  ;;  %v22017_v17 = vsub.f32 %v21859_v23, %v18787_v40  ;;  %v5494_v60 = vld [vmem:[#allocation3 + $0x1a0] sm:$0xff] }
 0x624   : > { %9236 = vmatprep.mubr.bf16.mxu1 %v8990_v57  ;;  %v7977_v55 = vmul.f32 1.442695, %v22013_v59  ;;  %14651 = vrcp.f32 %v8268_v21  ;;  %12693 = vmatprep.subr.bf16.mxu0 %v5487_v36  ;;  %22014 = vst [vmem:[#allocation139_spill] sm:$0xff] %v19081_v11  ;;  %v19086_v25 = vpop.eup %14635  ;;  %v22018_v57 = vld [vmem:[#allocation56_spill] sm:$0xff]  ;;  %v22022_v21 = vsub.f32 %v21872_v43, %v18808_v47  ;;  %v22025_v59 = vld [vmem:[#allocation147_spill] sm:$0xff]  ;;  %v22028_v43 = vld [vmem:[#allocation149_spill] sm:$0xff] }
 0x625   : > { %9237 = vmatmul.mubr.bf16.gmra.mrb[196].mxu1 %v8989_v48  ;;  %14653 = vpow2.f32 %v7973_v35  ;;  %v8035_v44 = vmul.f32 1.442695, %v22015_v50  ;;  %22016 = vst [vmem:[#allocation142_spill] sm:$0xff] %v19086_v25  ;;  %v8037_v24 = vmul.f32 1.442695, %v22017_v17  ;;  %v19091_v38 = vpop.xlane.xlu1 %7283  ;;  %v22019_v48 = vld [vmem:[#allocation63_spill] sm:$0xff]  ;;  %v19098_v52 = vpop.eup %14637  ;;  %12694 = vmatpush3.bf16.msra.mxu0 %v5479_v37  ;;  %v22030_v50 = vsub.f32 %v21895_v56, %v18862_v54 }
 0x626   : > { %8369 = vadd.xlane.f32.xlu1 %v8368_v45  ;;  %12754 = vmatpush3.bf16.msra.mxu1 %v5493_v5  ;;  %14655 = vpow2.f32 %v7975_v1  ;;  %v22020_v36 = vmax.f32 %v22018_v57, %v22019_v48  ;;  %v19096_v35 = vpop.xlane.xlu0 %7328  ;;  %22021 = vst [vmem:[#allocation136_spill] sm:$0xff] %v19098_v52  ;;  %v8039_v1 = vmul.f32 1.442695, %v22022_v21  ;;  %v22023_v5 = vld [vmem:[#allocation152_spill] sm:$0xff]  ;;  %v5503_v17 = vld [vmem:[#allocation3 + $0x1e8] sm:$0xff]  ;;  %v5480_v40 = vld [vmem:[#allocation3 + $0x130] sm:$0xff] }
 0x627   : > { %12755 = vmatprep.subr.bf16.mxu1 %v5502_v27  ;;  %v22024_v23 = vld [vmem:[#allocation156_spill] sm:$0xff]  ;;  %14657 = vpow2.f32 %v7977_v55  ;;  %v22027_v27 = vsub.f32 %v21873_v32, %v18808_v47  ;;  %12695 = vmatprep.subr.bf16.mxu0 %v5488_v53  ;;  %v7979_v37 = vmul.f32 1.442695, %v22030_v50  ;;  %v22031_v45 = vld [vmem:[#allocation227_spill] sm:$0xff]  ;;  %v22035_v32 = vsub.f32 %v21896_v49, %v18862_v54  ;;  %v22037_v21 = vld [vmem:[#allocation226_spill] sm:$0xff] }
 0x628   : > { %7382 = vmax.xlane.f32.xlu0 %v22020_v36  ;;  %v19109_v36 = vpop.eup %14639  ;;  %14659 = vpow2.f32 %v8035_v44  ;;  %v22032_v0 = vld [vmem:[#allocation36_spill] sm:$0xff]  ;;  %v5489_v55 = vld [vmem:[#allocation3 + $0x178] sm:$0xff]  ;;  %v5495_v50 = vld [vmem:[#allocation3 + $0x1a8] sm:$0xff] }
 0x629   : > { %22026 = vst [vmem:[#allocation137_spill] sm:$0xff] %v19109_v36  ;;  %v8041_v4 = vmul.f32 1.442695, %v22027_v27  ;;  %v19116_v3 = vpop.eup %14641  ;;  %v22033_v41 = vmax.f32 %v22031_v45, %v22032_v0  ;;  %14661 = vpow2.f32 %v8037_v24  ;;  %v7981_v53 = vmul.f32 1.442695, %v22035_v32  ;;  %v19129_v27 = vpop.xlane.xlu1 %7331  ;;  %v22036_v44 = vld [vmem:[#allocation60_spill] sm:$0xff]  ;;  %12696 = vmatpush3.bf16.msra.mxu0 %v5480_v40 }
 0x62a   : > { %22029 = vst [vmem:[#allocation140_spill] sm:$0xff] %v19116_v3  ;;  %12756 = vmatpush3.bf16.msra.mxu1 %v5494_v60  ;;  %v19124_v47 = vpop.eup %14643  ;;  %v22038_v7 = vmax.f32 %v22036_v44, %v22037_v21  ;;  %v8223_v56 = vpop.xlane.xlu0 %8222  ;;  %14663 = vpow2.f32 %v8039_v1  ;;  %v22040_v24 = vld [vmem:[#allocation155_spill] sm:$0xff]  ;;  %v5504_v54 = vld [vmem:[#allocation3 + $0x1f0] sm:$0xff]  ;;  %v22041_v32 = vsub.f32 %v21910_v61, %v18890_v51  ;;  %v22043_v44 = vld [vmem:[#allocation89_spill] sm:$0xff]  ;;  %12697 = vmatprep.subr.bf16.mxu0 %v5489_v55 }
 0x62b   : > { %7385 = vmax.xlane.f32.xlu1 %v22033_v41  ;;  %22034 = vst [vmem:[#allocation141_spill] sm:$0xff] %v19124_v47  ;;  %12757 = vmatprep.subr.bf16.mxu1 %v5503_v17  ;;  %v14646_v14 = vpop.eup %14645  ;;  %v22039_v41 = vld [vmem:[#allocation153_spill] sm:$0xff]  ;;  %14665 = vpow2.f32 %v8041_v4  ;;  %v5481_v45 = vld [vmem:[#allocation3 + $0x138] sm:$0xff]  ;;  %v22044_v48 = vld [vmem:[#allocation228_spill] sm:$0xff] }
 0x62c   : > { %7430 = vmax.xlane.f32.xlu0 %v22038_v7  ;;  %v14648_v49 = vpop.eup %14647  ;;  %v7983_v21 = vmul.f32 1.442695, %v22041_v32  ;;  %v22042_v7 = vld [vmem:[#allocation87_spill] sm:$0xff]  ;;  %14667 = vpow2.f32 %v7979_v37  ;;  %v22045_v60 = vld [vmem:[#allocation230_spill] sm:$0xff]  ;;  %v22047_v0 = vld [vmem:[#allocation168_spill] sm:$0xff] }
 0x62d   : > { %v8323_v17 = vadd.f32 %v22043_v44, %v22042_v7  ;;  %v14650_v1 = vpop.eup %14649  ;;  %v22046_v57 = vmax.f32 %v22044_v48, %v22045_v60  ;;  %v8724_v40 = vmul.f32 %v14646_v14, %v22047_v0  ;;  %v8726_v47 = vmul.f32 %v14648_v49, %v22048_v31  ;;  %v22049_v4 = vld [vmem:[#allocation91_spill] sm:$0xff]  ;;  %v22050_v3 = vld [vmem:[#allocation93_spill] sm:$0xff]  ;;  %v8226_v32 = vpop.xlane.xlu1 %8225  ;;  %v22055_v31 = vld [vmem:[#allocation182_spill] sm:$0xff]  ;;  %12698 = vmatpush3.bf16.msra.mxu0 %v5481_v45 }
 0x62e   : > { %v8326_v36 = vadd.f32 %v22050_v3, %v22049_v4  ;;  %12758 = vmatpush3.bf16.msra.mxu1 %v5495_v50  ;;  %v14652_v61 = vpop.eup %14651  ;;  %14669 = vpow2.f32 %v7981_v53  ;;  %v8271_v55 = vpop.xlane.xlu0 %8270  ;;  %v22051_v7 = vld [vmem:[#allocation167_spill] sm:$0xff]  ;;  %v22052_v37 = vld [vmem:[#allocation169_spill] sm:$0xff]  ;;  %v22056_v11 = vld [vmem:[#allocation174_spill] sm:$0xff]  ;;  %v22063_v45 = vsub.f32 %v21912_v10, %v18892_v13 }
 0x62f   : > { %7433 = vmax.xlane.f32.xlu1 %v22046_v57  ;;  %v8723_v44 = vmul.f32 %v14646_v14, %v22051_v7  ;;  %v8725_v52 = vmul.f32 %v14648_v49, %v22052_v37  ;;  %v22053_v25 = vld [vmem:[#allocation177_spill] sm:$0xff]  ;;  %12759 = vmatprep.subr.bf16.mxu1 %v5504_v54  ;;  %v19153_v57 = vpop.eup %14653  ;;  %v8976_v0 = vpack.c.bf16 %v8726_v47, %v8724_v40  ;;  %14671 = vpow2.f32 %v7983_v21  ;;  %v22059_v14 = vld [vmem:[#allocation88_spill] sm:$0xff]  ;;  %v5496_v37 = vld [vmem:[#allocation3 + $0x1b0] sm:$0xff] }
 0x630   : > { %8324 = vadd.xlane.f32.xlu0 %v8323_v17  ;;  %v8756_v60 = vmul.f32 %v14650_v1, %v22053_v25  ;;  %22054 = vst [vmem:[#allocation144_spill] sm:$0xff] %v19153_v57  ;;  %v8758_v48 = vmul.f32 %v14652_v61, %v22055_v31  ;;  %v8755_v4 = vmul.f32 %v14650_v1, %v22056_v11  ;;  %v22057_v50 = vld [vmem:[#allocation181_spill] sm:$0xff]  ;;  %v19158_v53 = vpop.eup %14655  ;;  %v22060_v7 = vld [vmem:[#allocation92_spill] sm:$0xff]  ;;  %14673 = vrcp.f32 %v8223_v56  ;;  %v5505_v1 = vld [vmem:[#allocation3 + $0x1f8] sm:$0xff] }
 0x631   : > { %v8757_v3 = vmul.f32 %v14652_v61, %v22057_v50  ;;  %22058 = vst [vmem:[#allocation148_spill] sm:$0xff] %v19158_v53  ;;  %v8975_v17 = vpack.c.bf16 %v8725_v52, %v8723_v44  ;;  %v8371_v49 = vadd.f32 %v22060_v7, %v22059_v14  ;;  %v22061_v25 = vsub.f32 %v21911_v46, %v18890_v51  ;;  %v19165_v40 = vpop.eup %14657  ;;  %v8274_v21 = vpop.xlane.xlu1 %8273  ;;  %v22065_v51 = vld [vmem:[#allocation159_spill] sm:$0xff]  ;;  %v22067_v56 = vld [vmem:[#allocation94_spill] sm:$0xff]  ;;  %v22102_v7 = vld [vmem:[#allocation188_spill] sm:$0xff] }
 0x632   : > { %9147 = vmatprep.mubr.bf16.mxu0 %v8976_v0  ;;  %v8992_v47 = vpack.c.bf16 %v8758_v48, %v8756_v60  ;;  %22062 = vst [vmem:[#allocation143_spill] sm:$0xff] %v19165_v40  ;;  %v8043_v52 = vmul.f32 1.442695, %v22063_v45  ;;  %14675 = vrcp.f32 %v8226_v32  ;;  %v19170_v44 = vpop.xlane.xlu0 %7286  ;;  %v19172_v46 = vpop.eup %14659  ;;  %v22066_v48 = vld [vmem:[#allocation162_spill] sm:$0xff]  ;;  %v8374_v10 = vadd.f32 %v18695_v12, %v22067_v56  ;;  %12760 = vmatpush3.bf16.msra.mxu1 %v5496_v37  ;;  %v5514_v60 = vld [vmem:[#allocation3 + $0x240] sm:$0xff]  ;;  %v22071_v0 = vld [vmem:[#allocation97_spill] sm:$0xff] }
 0x633   : > { %v7985_v54 = vmul.f32 1.442695, %v22061_v25  ;;  %8327 = vadd.xlane.f32.xlu1 %v8326_v36  ;;  %v8991_v11 = vpack.c.bf16 %v8757_v3, %v8755_v4  ;;  %9148 = vmatmul.mubr.bf16.gmra.mrb[200].mxu0 %v8975_v17  ;;  %22064 = vst [vmem:[#allocation146_spill] sm:$0xff] %v19172_v46  ;;  %14677 = vrcp.f32 %v8271_v55  ;;  %v19180_v4 = vpop.eup %14661  ;;  %v22069_v61 = vsub.f32 %v21914_v28, %v18892_v13  ;;  %v22070_v55 = vld [vmem:[#allocation95_spill] sm:$0xff]  ;;  %v22074_v25 = vld [vmem:[#allocation128_spill] sm:$0xff]  ;;  %v22077_v13 = vld [vmem:[#allocation130_spill] sm:$0xff] }
 0x634   : > { %8372 = vadd.xlane.f32.xlu0 %v8371_v49  ;;  %9244 = vmatprep.mubr.bf16.mxu1 %v8992_v47  ;;  %22068 = vst [vmem:[#allocation154_spill] sm:$0xff] %v19180_v4  ;;  %14679 = vrcp.f32 %v8274_v21  ;;  %v8329_v31 = vadd.f32 %v22071_v0, %v22070_v55  ;;  %v5497_v50 = vld [vmem:[#allocation3 + $0x1b8] sm:$0xff]  ;;  %v19187_v17 = vpop.eup %14663  ;;  %v5530_v45 = vld [vmem:[#allocation3 + $0x2c0] sm:$0xff]  ;;  %v22078_v28 = vsub.f32 %v22077_v13, %v22074_v25  ;;  %v22089_v0 = vld [vmem:[#allocation101_spill] sm:$0xff] }
 0x635   : > { %v8045_v32 = vmul.f32 1.442695, %v22069_v61  ;;  %9245 = vmatmul.mubr.bf16.gmra.mrb[200].mxu1 %v8991_v11  ;;  %12761 = vmatprep.subr.bf16.mxu1 %v5505_v1  ;;  %22072 = vst [vmem:[#allocation151_spill] sm:$0xff] %v19187_v17  ;;  %14681 = vpow2.f32 %v7985_v54  ;;  %v22073_v49 = vld [vmem:[#allocation127_spill] sm:$0xff]  ;;  %v19192_v36 = vpop.eup %14665  ;;  %v19197_v21 = vpop.xlane.xlu1 %7289  ;;  %v22079_v54 = vld [vmem:[#allocation64_spill] sm:$0xff]  ;;  %v22091_v13 = vsub.f32 %v21966_v29, %v18986_v8  ;;  %v22095_v29 = vld [vmem:[#allocation165_spill] sm:$0xff] }
 0x636   : > { %v22075_v37 = vsub.f32 %v22073_v49, %v22074_v25  ;;  %12811 = vmatprep.subr.bf16.mxu0 %v5514_v60  ;;  %22076 = vst [vmem:[#allocation158_spill] sm:$0xff] %v19192_v36  ;;  %14683 = vpow2.f32 %v8043_v52  ;;  %v8049_v11 = vmul.f32 1.442695, %v22078_v28  ;;  %v19199_v1 = vpop.xlane.xlu0 %7334  ;;  %v22080_v61 = vld [vmem:[#allocation99_spill] sm:$0xff]  ;;  %v19203_v49 = vpop.eup %14667  ;;  %v22084_v25 = vld [vmem:[#allocation166_spill] sm:$0xff]  ;;  %v22085_v28 = vld [vmem:[#allocation160_spill] sm:$0xff]  ;;  %12762 = vmatpush3.bf16.msra.mxu1 %v5497_v50 }
 0x637   : > { %8375 = vadd.xlane.f32.xlu1 %v8374_v10  ;;  %v8332_v3 = vadd.f32 %v22080_v61, %v22079_v54  ;;  %22081 = vst [vmem:[#allocation157_spill] sm:$0xff] %v19203_v49  ;;  %v22082_v10 = vsub.f32 %v21951_v42, %v18963_v26  ;;  %v22083_v52 = vld [vmem:[#allocation163_spill] sm:$0xff]  ;;  %14685 = vpow2.f32 %v8045_v32  ;;  %v22087_v54 = vsub.f32 %v21952_v33, %v18963_v26  ;;  %v22088_v42 = vld [vmem:[#allocation161_spill] sm:$0xff]  ;;  %v22090_v56 = vld [vmem:[#allocation96_spill] sm:$0xff] }
 0x638   : > { %v8047_v47 = vmul.f32 1.442695, %v22075_v37  ;;  %8330 = vadd.xlane.f32.xlu0 %v8329_v31  ;;  %v19214_v55 = vpop.eup %14669  ;;  %v8377_v37 = vadd.f32 %v22090_v56, %v22089_v0  ;;  %12875 = vmatprep.subr.bf16.mxu1 %v5530_v45  ;;  %v7991_v31 = vmul.f32 1.442695, %v22091_v13  ;;  %v22093_v26 = vsub.f32 %v21967_v34, %v18986_v8  ;;  %v22097_v0 = vld [vmem:[#allocation73_spill] sm:$0xff]  ;;  %v22106_v36 = vld [vmem:[#allocation186_spill] sm:$0xff] }
 0x639   : > { %v7987_v60 = vmul.f32 1.442695, %v22082_v10  ;;  %22086 = vst [vmem:[#allocation145_spill] sm:$0xff] %v19214_v55  ;;  %v7989_v61 = vmul.f32 1.442695, %v22087_v54  ;;  %v19226_v50 = vpop.eup %14671  ;;  %v19231_v32 = vpop.xlane.xlu1 %7337  ;;  %v22098_v8 = vsub.f32 %v21968_v16, %v18991_v58  ;;  %v22103_v13 = vld [vmem:[#allocation77_spill] sm:$0xff] }
 0x63a   : > { %14687 = vpow2.f32 %v8047_v47  ;;  %22092 = vst [vmem:[#allocation150_spill] sm:$0xff] %v19226_v50  ;;  %v7993_v33 = vmul.f32 1.442695, %v22093_v26  ;;  %v8229_v54 = vpop.xlane.xlu0 %8228  ;;  %v14674_v10 = vpop.eup %14673  ;;  %v22094_v47 = vld [vmem:[#allocation164_spill] sm:$0xff]  ;;  %v22104_v55 = vld [vmem:[#allocation103_spill] sm:$0xff]  ;;  %v22114_v53 = vld [vmem:[#allocation109_spill] sm:$0xff] }
 0x63b   : > { %8333 = vadd.xlane.f32.xlu1 %v8332_v3  ;;  %14689 = vpow2.f32 %v8049_v11  ;;  %v22096_v3 = vld [vmem:[#allocation98_spill] sm:$0xff]  ;;  %v8051_v34 = vmul.f32 1.442695, %v22098_v8  ;;  %v22099_v26 = vld [vmem:[#allocation100_spill] sm:$0xff]  ;;  %v8338_v49 = vadd.f32 %v22104_v55, %v22103_v13  ;;  %v22105_v16 = vld [vmem:[#allocation183_spill] sm:$0xff] }
 0x63c   : > { %8378 = vadd.xlane.f32.xlu0 %v8377_v37  ;;  %14691 = vpow2.f32 %v7987_v60  ;;  %v8380_v56 = vadd.f32 %v22097_v0, %v22096_v3  ;;  %v14676_v11 = vpop.eup %14675  ;;  %v22100_v37 = vld [vmem:[#allocation102_spill] sm:$0xff]  ;;  %v22101_v60 = vld [vmem:[#allocation184_spill] sm:$0xff]  ;;  %v8727_v8 = vmul.f32 %v14674_v10, %v22105_v16 }
 0x63d   : > { %14693 = vpow2.f32 %v7989_v61  ;;  %v8335_v14 = vadd.f32 %v22100_v37, %v22099_v26  ;;  %v14678_v12 = vpop.eup %14677  ;;  %v8728_v45 = vmul.f32 %v14674_v10, %v22101_v60  ;;  %v8730_v50 = vmul.f32 %v14676_v11, %v22102_v7  ;;  %v8232_v61 = vpop.xlane.xlu1 %8231  ;;  %v22107_v26 = vld [vmem:[#allocation194_spill] sm:$0xff]  ;;  %v22110_v7 = vld [vmem:[#allocation191_spill] sm:$0xff]  ;;  %v22111_v40 = vld [vmem:[#allocation196_spill] sm:$0xff] }
 0x63e   : > { %14695 = vpow2.f32 %v7991_v31  ;;  %v14680_v3 = vpop.eup %14679  ;;  %v8277_v0 = vpop.xlane.xlu0 %8276  ;;  %v8729_v17 = vmul.f32 %v14676_v11, %v22106_v36  ;;  %v8760_v37 = vmul.f32 %v14678_v12, %v22107_v26  ;;  %v22109_v60 = vld [vmem:[#allocation198_spill] sm:$0xff]  ;;  %v8759_v46 = vmul.f32 %v14678_v12, %v22110_v7 }
 0x63f   : > { %8381 = vadd.xlane.f32.xlu1 %v8380_v56  ;;  %14697 = vpow2.f32 %v7993_v33  ;;  %v19251_v31 = vpop.eup %14681  ;;  %v8978_v56 = vpack.c.bf16 %v8730_v50, %v8728_v45  ;;  %v8762_v4 = vmul.f32 %v14680_v3, %v22109_v60  ;;  %v8761_v13 = vmul.f32 %v14680_v3, %v22111_v40  ;;  %v22113_v33 = vld [vmem:[#allocation107_spill] sm:$0xff] }
 0x640   : > { %8336 = vadd.xlane.f32.xlu0 %v8335_v14  ;;  %22108 = vst [vmem:[#allocation152_spill] sm:$0xff] %v19251_v31  ;;  %v19256_v55 = vpop.eup %14683  ;;  %14699 = vpow2.f32 %v8051_v34  ;;  %v8977_v14 = vpack.c.bf16 %v8729_v17, %v8727_v8  ;;  %v8383_v10 = vadd.f32 %v22114_v53, %v22113_v33  ;;  %v22115_v36 = vsub.f32 %v21970_v2, %v18991_v58 }
 0x641   : > { %22112 = vst [vmem:[#allocation156_spill] sm:$0xff] %v19256_v55  ;;  %14701 = vrcp.f32 %v8229_v54  ;;  %9155 = vmatprep.mubr.bf16.mxu0 %v8978_v56  ;;  %v8994_v50 = vpack.c.bf16 %v8762_v4, %v8760_v37  ;;  %v8993_v45 = vpack.c.bf16 %v8761_v13, %v8759_v46  ;;  %v19263_v26 = vpop.eup %14685  ;;  %v22117_v12 = vsub.f32 %v21982_v15, %v19022_v6  ;;  %v8280_v17 = vpop.xlane.xlu1 %8279  ;;  %v22119_v46 = vld [vmem:[#allocation104_spill] sm:$0xff]  ;;  %v22120_v4 = vld [vmem:[#allocation106_spill] sm:$0xff] }
 0x642   : > { %v8053_v11 = vmul.f32 1.442695, %v22115_v36  ;;  %22116 = vst [vmem:[#allocation147_spill] sm:$0xff] %v19263_v26  ;;  %14703 = vrcp.f32 %v8232_v61  ;;  %9156 = vmatmul.mubr.bf16.gmra.mrb[204].mxu0 %v8977_v14  ;;  %v19268_v3 = vpop.xlane.xlu0 %7340  ;;  %v22118_v58 = vsub.f32 %v21983_v30, %v19022_v6  ;;  %v22121_v15 = vsub.f32 %v22008_v18, %v19066_v62  ;;  %v22122_v37 = vld [vmem:[#allocation108_spill] sm:$0xff]  ;;  %v22123_v61 = vld [vmem:[#allocation110_spill] sm:$0xff]  ;;  %v22128_v36 = vld [vmem:[#allocation113_spill] sm:$0xff] }
 0x643   : > { %8339 = vadd.xlane.f32.xlu1 %v8338_v49  ;;  %v8055_v40 = vmul.f32 1.442695, %v22117_v12  ;;  %14705 = vrcp.f32 %v8277_v0  ;;  %9252 = vmatprep.mubr.bf16.mxu1 %v8994_v50  ;;  %v8386_v49 = vadd.f32 %v22120_v4, %v22119_v46  ;;  %v8341_v16 = vadd.f32 %v22123_v61, %v22122_v37  ;;  %v22130_v12 = vld [vmem:[#allocation115_spill] sm:$0xff]  ;;  %v22149_v61 = vld [vmem:[#allocation8_spill] sm:$0xff]  ;;  %v22152_v46 = vld [vmem:[#allocation122_spill] sm:$0xff] }
 0x644   : > { %8384 = vadd.xlane.f32.xlu0 %v8383_v10  ;;  %v19270_v34 = vpop.eup %14687  ;;  %v8057_v2 = vmul.f32 1.442695, %v22118_v58  ;;  %v7995_v13 = vmul.f32 1.442695, %v22121_v15  ;;  %14707 = vrcp.f32 %v8280_v17  ;;  %9253 = vmatmul.mubr.bf16.gmra.mrb[204].mxu1 %v8993_v45  ;;  %v22124_v6 = vsub.f32 %v22009_v20, %v19066_v62  ;;  %v22127_v10 = vld [vmem:[#allocation111_spill] sm:$0xff]  ;;  %v22228_v4 = vld [vmem:[#allocation216_spill] sm:$0xff] }
 0x645   : > { %v19277_v54 = vpop.eup %14689  ;;  %14709 = vpow2.f32 %v8053_v11  ;;  %v22125_v18 = vsub.f32 %v22023_v5, %v19091_v38  ;;  %v19294_v60 = vpop.xlane.xlu1 %7343  ;;  %v22126_v62 = vsub.f32 %v22024_v23, %v19091_v38  ;;  %v8344_v11 = vadd.f32 %v22128_v36, %v22127_v10 }
 0x646   : > { %v19284_v8 = vpop.eup %14691  ;;  %v7997_v30 = vmul.f32 1.442695, %v22124_v6  ;;  %14711 = vpow2.f32 %v8055_v40  ;;  %v19296_v7 = vpop.xlane.xlu0 %7388  ;;  %v22129_v5 = vsub.f32 %v22025_v59, %v19096_v35  ;;  %v22131_v40 = vld [vmem:[#allocation118_spill] sm:$0xff]  ;;  %v22132_v58 = vsub.f32 %v22028_v43, %v19096_v35 }
 0x647   : > { %8387 = vadd.xlane.f32.xlu1 %v8386_v49  ;;  %v19289_v0 = vpop.eup %14693  ;;  %v7999_v56 = vmul.f32 1.442695, %v22125_v18  ;;  %14713 = vpow2.f32 %v8057_v2  ;;  %v8001_v20 = vmul.f32 1.442695, %v22126_v62  ;;  %v8389_v17 = vadd.f32 %v22131_v40, %v22130_v12  ;;  %v22135_v6 = vld [vmem:[#allocation114_spill] sm:$0xff]  ;;  %v22138_v62 = vld [vmem:[#allocation117_spill] sm:$0xff] }
 0x648   : > { %8342 = vadd.xlane.f32.xlu0 %v8341_v16  ;;  %v19298_v14 = vpop.eup %14695  ;;  %14715 = vpow2.f32 %v7995_v13  ;;  %v8059_v45 = vmul.f32 1.442695, %v22129_v5  ;;  %v8061_v2 = vmul.f32 1.442695, %v22132_v58  ;;  %v22133_v23 = vsub.f32 %v22039_v41, %v19129_v27  ;;  %v22134_v16 = vld [vmem:[#allocation112_spill] sm:$0xff]  ;;  %v22139_v5 = vld [vmem:[#allocation7_spill] sm:$0xff] }
 0x649   : > { %v19305_v50 = vpop.eup %14697  ;;  %14717 = vpow2.f32 %v7997_v30  ;;  %v19320_v15 = vpop.xlane.xlu1 %7391  ;;  %v8392_v30 = vadd.f32 %v22135_v6, %v22134_v16  ;;  %v22136_v35 = vsub.f32 %v22040_v24, %v19129_v27  ;;  %v22140_v58 = vld [vmem:[#allocation202_spill] sm:$0xff]  ;;  %v22142_v12 = vld [vmem:[#allocation125_spill] sm:$0xff] }
 0x64a   : > { %v19315_v38 = vpop.eup %14699  ;;  %14719 = vpow2.f32 %v7999_v56  ;;  %v8063_v49 = vmul.f32 1.442695, %v22133_v23  ;;  %v8235_v59 = vpop.xlane.xlu0 %8234  ;;  %v22137_v56 = vld [vmem:[#allocation116_spill] sm:$0xff]  ;;  %v22143_v27 = vld [vmem:[#allocation5_spill] sm:$0xff] }
 0x64b   : > { %8345 = vadd.xlane.f32.xlu1 %v8344_v11  ;;  %v14702_v13 = vpop.eup %14701  ;;  %14721 = vpow2.f32 %v8001_v20  ;;  %v8065_v43 = vmul.f32 1.442695, %v22136_v35  ;;  %v8395_v11 = vadd.f32 %v22138_v62, %v22137_v56  ;;  %v22141_v20 = vld [vmem:[#allocation120_spill] sm:$0xff]  ;;  %v22145_v56 = vld [vmem:[#allocation203_spill] sm:$0xff] }
 0x64c   : > { %8390 = vadd.xlane.f32.xlu0 %v8389_v17  ;;  %v14704_v18 = vpop.eup %14703  ;;  %14723 = vpow2.f32 %v8059_v45  ;;  %v8732_v17 = vmul.f32 %v14702_v13, %v22139_v5  ;;  %v8398_v40 = vadd.f32 %v22142_v12, %v22141_v20  ;;  %v8731_v24 = vmul.f32 %v14702_v13, %v22143_v27  ;;  %v22144_v35 = vld [vmem:[#allocation200_spill] sm:$0xff] }
 0x64d   : > { %v14706_v41 = vpop.eup %14705  ;;  %14725 = vpow2.f32 %v8061_v2  ;;  %v8734_v23 = vmul.f32 %v14704_v18, %v22140_v58  ;;  %v8238_v45 = vpop.xlane.xlu1 %8237  ;;  %v8733_v37 = vmul.f32 %v14704_v18, %v22144_v35  ;;  %v22147_v5 = vld [vmem:[#allocation204_spill] sm:$0xff]  ;;  %v22148_v58 = vld [vmem:[#allocation29_spill] sm:$0xff]  ;;  %v22154_v18 = vsub.f32 %v22065_v51, %v19170_v44 }
 0x64e   : > { %v14708_v16 = vpop.eup %14707  ;;  %14727 = vpow2.f32 %v8063_v49  ;;  %v8283_v6 = vpop.xlane.xlu0 %8282  ;;  %v8764_v62 = vmul.f32 %v14706_v41, %v22145_v56  ;;  %v8763_v36 = vmul.f32 %v14706_v41, %v22148_v58  ;;  %v22158_v51 = vsub.f32 %v22083_v52, %v19197_v21 }
 0x64f   : > { %8393 = vadd.xlane.f32.xlu1 %v8392_v30  ;;  %v19336_v2 = vpop.eup %14709  ;;  %v8980_v30 = vpack.c.bf16 %v8734_v23, %v8732_v17  ;;  %v8766_v10 = vmul.f32 %v14708_v16, %v22147_v5  ;;  %v8765_v12 = vmul.f32 %v14708_v16, %v22149_v61  ;;  %14729 = vpow2.f32 %v8065_v43  ;;  %v22167_v5 = vld [vmem:[#allocation170_spill] sm:$0xff] }
 0x650   : > { %8396 = vadd.xlane.f32.xlu0 %v8395_v11  ;;  %22146 = vst [vmem:[#allocation149_spill] sm:$0xff] %v19336_v2  ;;  %v19341_v20 = vpop.eup %14711  ;;  %v8979_v49 = vpack.c.bf16 %v8733_v37, %v8731_v24  ;;  %v22151_v11 = vld [vmem:[#allocation131_spill] sm:$0xff]  ;;  %v8003_v56 = vmul.f32 1.442695, %v22154_v18  ;;  %14731 = vrcp.f32 %v8235_v59  ;;  %v22156_v61 = vsub.f32 %v22066_v48, %v19170_v44 }
 0x651   : > { %22150 = vst [vmem:[#allocation153_spill] sm:$0xff] %v19341_v20  ;;  %v8443_v13 = vadd.f32 %v22152_v46, %v22151_v11  ;;  %v19345_v27 = vpop.eup %14713  ;;  %9163 = vmatprep.mubr.bf16.mxu0 %v8980_v30  ;;  %v8996_v17 = vpack.c.bf16 %v8766_v10, %v8764_v62  ;;  %v8995_v41 = vpack.c.bf16 %v8765_v12, %v8763_v36  ;;  %14733 = vrcp.f32 %v8238_v45  ;;  %v8286_v16 = vpop.xlane.xlu1 %8285  ;;  %v22159_v10 = vld [vmem:[#allocation124_spill] sm:$0xff]  ;;  %v22160_v36 = vld [vmem:[#allocation119_spill] sm:$0xff]  ;;  %v22163_v62 = vld [vmem:[#allocation129_spill] sm:$0xff] }
 0x652   : > { %22153 = vst [vmem:[#allocation155_spill] sm:$0xff] %v19345_v27  ;;  %v19350_v23 = vpop.eup %14715  ;;  %v8005_v37 = vmul.f32 1.442695, %v22156_v61  ;;  %9164 = vmatmul.mubr.bf16.gmra.mrb[208].mxu0 %v8979_v49  ;;  %v19355_v43 = vpop.xlane.xlu0 %7346  ;;  %14735 = vrcp.f32 %v8283_v6  ;;  %v8446_v12 = vadd.f32 %v22160_v36, %v22159_v10  ;;  %v22162_v44 = vsub.f32 %v22084_v25, %v19197_v21  ;;  %v22164_v45 = vld [vmem:[#allocation121_spill] sm:$0xff]  ;;  %v22173_v61 = vld [vmem:[#allocation123_spill] sm:$0xff] }
 0x653   : > { %8399 = vadd.xlane.f32.xlu1 %v8398_v40  ;;  %22155 = vst [vmem:[#allocation168_spill] sm:$0xff] %v19350_v23  ;;  %v19357_v24 = vpop.eup %14717  ;;  %v8007_v40 = vmul.f32 1.442695, %v22158_v51  ;;  %9260 = vmatprep.mubr.bf16.mxu1 %v8996_v17  ;;  %14737 = vrcp.f32 %v8286_v16  ;;  %v8401_v35 = vadd.f32 %v22164_v45, %v22163_v62  ;;  %v22166_v52 = vsub.f32 %v22085_v28, %v19199_v1  ;;  %v22175_v51 = vld [vmem:[#allocation173_spill] sm:$0xff]  ;;  %v22186_v62 = vld [vmem:[#allocation28_spill] sm:$0xff] }
 0x654   : > { %8444 = vadd.xlane.f32.xlu0 %v8443_v13  ;;  %22157 = vst [vmem:[#allocation171_spill] sm:$0xff] %v19357_v24  ;;  %v19364_v59 = vpop.eup %14719  ;;  %v8009_v48 = vmul.f32 1.442695, %v22162_v44  ;;  %9261 = vmatmul.mubr.bf16.gmra.mrb[208].mxu1 %v8995_v41  ;;  %14739 = vpow2.f32 %v8003_v56  ;;  %v7627_v58 = vsub.f32 %v22167_v5, %v19268_v3  ;;  %v22169_v21 = vsub.f32 %v22088_v42, %v19199_v1  ;;  %v22172_v41 = vld [vmem:[#allocation132_spill] sm:$0xff]  ;;  %v22176_v44 = vld [vmem:[#allocation133_spill] sm:$0xff] }
 0x655   : > { %22161 = vst [vmem:[#allocation167_spill] sm:$0xff] %v19364_v59  ;;  %v19371_v30 = vpop.eup %14721  ;;  %v8067_v6 = vmul.f32 1.442695, %v22166_v52  ;;  %14741 = vpow2.f32 %v8005_v37  ;;  %v19383_v13 = vpop.xlane.xlu1 %7349  ;;  %v22171_v28 = vsub.f32 %v22094_v47, %v19231_v32  ;;  %v8404_v16 = vadd.f32 %v22173_v61, %v22172_v41  ;;  %v22191_v36 = vld [vmem:[#allocation21_spill] sm:$0xff] }
 0x656   : > { %22165 = vst [vmem:[#allocation169_spill] sm:$0xff] %v19371_v30  ;;  %v19378_v49 = vpop.eup %14723  ;;  %v8069_v25 = vmul.f32 1.442695, %v22169_v21  ;;  %v19385_v18 = vpop.xlane.xlu0 %7394  ;;  %14743 = vpow2.f32 %v8007_v40  ;;  %v22174_v1 = vsub.f32 %v22095_v29, %v19231_v32  ;;  %v8075_v52 = vmul.f32 1.442695, %v7627_v58 }
 0x657   : > { %8447 = vadd.xlane.f32.xlu1 %v8446_v12  ;;  %22168 = vst [vmem:[#allocation177_spill] sm:$0xff] %v19378_v49  ;;  %v19387_v56 = vpop.eup %14725  ;;  %v8071_v17 = vmul.f32 1.442695, %v22171_v28  ;;  %14745 = vpow2.f32 %v8009_v48  ;;  %v7628_v12 = vsub.f32 %v22175_v51, %v19268_v3  ;;  %v8452_v32 = vadd.f32 %v19054_v19, %v19050_v39  ;;  %v22178_v3 = vld [vmem:[#allocation139_spill] sm:$0xff]  ;;  %v22181_v51 = vld [vmem:[#allocation136_spill] sm:$0xff] }
 0x658   : > { %8402 = vadd.xlane.f32.xlu0 %v8401_v35  ;;  %22170 = vst [vmem:[#allocation182_spill] sm:$0xff] %v19387_v56  ;;  %v19394_v37 = vpop.eup %14727  ;;  %v8073_v42 = vmul.f32 1.442695, %v22174_v1  ;;  %v22177_v35 = vld [vmem:[#allocation126_spill] sm:$0xff]  ;;  %14747 = vpow2.f32 %v8067_v6  ;;  %v8407_v29 = vadd.f32 %v19068_v22, %v19061_v9  ;;  %v8410_v6 = vadd.f32 %v22178_v3, %v19076_v63  ;;  %v22183_v39 = vld [vmem:[#allocation31_spill] sm:$0xff] }
 0x659   : > { %v8449_v40 = vadd.f32 %v22177_v35, %v22176_v44  ;;  %v19403_v47 = vpop.eup %14729  ;;  %14749 = vpow2.f32 %v8069_v25  ;;  %v19405_v5 = vpop.xlane.xlu1 %7397  ;;  %v8077_v28 = vmul.f32 1.442695, %v7628_v12  ;;  %v22179_v25 = vld [vmem:[#allocation176_spill] sm:$0xff]  ;;  %v22180_v1 = vld [vmem:[#allocation142_spill] sm:$0xff] }
 0x65a   : > { %v8241_v48 = vpop.xlane.xlu0 %8240  ;;  %v14732_v21 = vpop.eup %14731  ;;  %14751 = vpow2.f32 %v8071_v17  ;;  %v22182_v17 = vld [vmem:[#allocation180_spill] sm:$0xff]  ;;  %v22184_v22 = vld [vmem:[#allocation206_spill] sm:$0xff] }
 0x65b   : > { %8405 = vadd.xlane.f32.xlu1 %v8404_v16  ;;  %v14734_v58 = vpop.eup %14733  ;;  %14753 = vpow2.f32 %v8073_v42  ;;  %v7629_v16 = vsub.f32 %v22179_v25, %v19294_v60  ;;  %v7630_v19 = vsub.f32 %v22182_v17, %v19294_v60  ;;  %v8736_v9 = vmul.f32 %v14732_v21, %v22183_v39  ;;  %v22185_v42 = vld [vmem:[#allocation172_spill] sm:$0xff]  ;;  %v22190_v17 = vld [vmem:[#allocation37_spill] sm:$0xff] }
 0x65c   : > { %8450 = vadd.xlane.f32.xlu0 %v8449_v40  ;;  %v8455_v40 = vadd.f32 %v22181_v51, %v22180_v1  ;;  %v14736_v35 = vpop.eup %14735  ;;  %14755 = vpow2.f32 %v8075_v52  ;;  %v8738_v44 = vmul.f32 %v14734_v58, %v22184_v22  ;;  %v7659_v12 = vsub.f32 %v22185_v42, %v19296_v7  ;;  %v22187_v51 = vld [vmem:[#allocation205_spill] sm:$0xff]  ;;  %v22188_v52 = vld [vmem:[#allocation32_spill] sm:$0xff]  ;;  %v22192_v42 = vld [vmem:[#allocation175_spill] sm:$0xff] }
 0x65d   : > { %v14738_v3 = vpop.eup %14737  ;;  %v8244_v63 = vpop.xlane.xlu1 %8243  ;;  %v8735_v61 = vmul.f32 %v14732_v21, %v22186_v62  ;;  %v8737_v1 = vmul.f32 %v14734_v58, %v22187_v51  ;;  %v8768_v45 = vmul.f32 %v14736_v35, %v22188_v52  ;;  %v8767_v22 = vmul.f32 %v14736_v35, %v22190_v17  ;;  %v22193_v51 = vld [vmem:[#allocation178_spill] sm:$0xff] }
 0x65e   : > { %v8289_v25 = vpop.xlane.xlu0 %8288  ;;  %v19426_v41 = vpop.eup %14739  ;;  %v8982_v60 = vpack.c.bf16 %v8738_v44, %v8736_v9  ;;  %v8769_v46 = vmul.f32 %v14738_v3, %v22191_v36  ;;  %14757 = vpow2.f32 %v8077_v28  ;;  %v7660_v62 = vsub.f32 %v22192_v42, %v19296_v7 }
 0x65f   : > { %8453 = vadd.xlane.f32.xlu1 %v8452_v32  ;;  %v22189_v32 = vld [vmem:[#allocation208_spill] sm:$0xff]  ;;  %v19431_v10 = vpop.eup %14741  ;;  %v8981_v21 = vpack.c.bf16 %v8737_v1, %v8735_v61  ;;  %v7661_v52 = vsub.f32 %v22193_v51, %v19320_v15  ;;  %14759 = vrcp.f32 %v8241_v48  ;;  %v8081_v36 = vmul.f32 1.442695, %v7630_v19  ;;  %v22196_v48 = vld [vmem:[#allocation185_spill] sm:$0xff] }
 0x660   : > { %8408 = vadd.xlane.f32.xlu0 %v8407_v29  ;;  %v8770_v39 = vmul.f32 %v14738_v3, %v22189_v32  ;;  %v8079_v29 = vmul.f32 1.442695, %v7629_v16  ;;  %v19435_v58 = vpop.eup %14743  ;;  %9171 = vmatprep.mubr.bf16.mxu0 %v8982_v60  ;;  %v8997_v44 = vpack.c.bf16 %v8769_v46, %v8767_v22  ;;  %v22194_v3 = vld [vmem:[#allocation179_spill] sm:$0xff]  ;;  %14761 = vrcp.f32 %v8244_v63  ;;  %v22197_v46 = vld [vmem:[#allocation137_spill] sm:$0xff]  ;;  %v22200_v63 = vld [vmem:[#allocation190_spill] sm:$0xff] }
 0x661   : > { %v19439_v35 = vpop.eup %14745  ;;  %v7662_v28 = vsub.f32 %v22194_v3, %v19320_v15  ;;  %9172 = vmatmul.mubr.bf16.gmra.mrb[212].mxu0 %v8981_v21  ;;  %v8292_v7 = vpop.xlane.xlu1 %8291  ;;  %v8139_v1 = vmul.f32 1.442695, %v7659_v12  ;;  %14763 = vrcp.f32 %v8289_v25  ;;  %v8141_v15 = vmul.f32 1.442695, %v7660_v62  ;;  %v22203_v25 = vld [vmem:[#allocation192_spill] sm:$0xff] }
 0x662   : > { %v8998_v9 = vpack.c.bf16 %v8770_v39, %v8768_v45  ;;  %v19443_v61 = vpop.xlane.xlu0 %7352  ;;  %v19445_v16 = vpop.eup %14747  ;;  %v22198_v45 = vld [vmem:[#allocation140_spill] sm:$0xff]  ;;  %v7632_v32 = vsub.f32 %v22200_v63, %v19355_v43  ;;  %14765 = vrcp.f32 %v8292_v7  ;;  %v8143_v17 = vmul.f32 1.442695, %v7661_v52  ;;  %v22208_v7 = vld [vmem:[#allocation197_spill] sm:$0xff] }
 0x663   : > { %8411 = vadd.xlane.f32.xlu1 %v8410_v6  ;;  %22195 = vst [vmem:[#allocation174_spill] sm:$0xff] %v19445_v16  ;;  %v7631_v6 = vsub.f32 %v22196_v48, %v19355_v43  ;;  %v8458_v19 = vadd.f32 %v22198_v45, %v22197_v46  ;;  %v19451_v60 = vpop.eup %14749  ;;  %14767 = vpow2.f32 %v8079_v29  ;;  %v7633_v22 = vsub.f32 %v22203_v25, %v19383_v13  ;;  %v22207_v29 = vld [vmem:[#allocation143_spill] sm:$0xff]  ;;  %v22222_v45 = vld [vmem:[#allocation209_spill] sm:$0xff] }
 0x664   : > { %8456 = vadd.xlane.f32.xlu0 %v8455_v40  ;;  %9268 = vmatprep.mubr.bf16.mxu1 %v8998_v9  ;;  %22199 = vst [vmem:[#allocation181_spill] sm:$0xff] %v19451_v60  ;;  %v22201_v40 = vld [vmem:[#allocation141_spill] sm:$0xff]  ;;  %v19457_v12 = vpop.eup %14751  ;;  %14769 = vpow2.f32 %v8081_v36  ;;  %v8145_v62 = vmul.f32 1.442695, %v7662_v28  ;;  %v8085_v3 = vmul.f32 1.442695, %v7632_v32  ;;  %v7634_v48 = vsub.f32 %v22208_v7, %v19383_v13 }
 0x665   : > { %9269 = vmatmul.mubr.bf16.gmra.mrb[212].mxu1 %v8997_v44  ;;  %v8413_v39 = vadd.f32 %v19153_v57, %v22201_v40  ;;  %22202 = vst [vmem:[#allocation159_spill] sm:$0xff] %v19457_v12  ;;  %v19461_v42 = vpop.eup %14753  ;;  %v19463_v21 = vpop.xlane.xlu1 %7355  ;;  %14771 = vpow2.f32 %v8139_v1  ;;  %v8083_v9 = vmul.f32 1.442695, %v7631_v6  ;;  %v22206_v44 = vld [vmem:[#allocation148_spill] sm:$0xff]  ;;  %v22210_v36 = vld [vmem:[#allocation154_spill] sm:$0xff]  ;;  %v22215_v13 = vld [vmem:[#allocation145_spill] sm:$0xff] }
 0x666   : > { %22204 = vst [vmem:[#allocation162_spill] sm:$0xff] %v19461_v42  ;;  %v19465_v43 = vpop.xlane.xlu0 %7400  ;;  %v19467_v51 = vpop.eup %14755  ;;  %v8416_v52 = vadd.f32 %v22207_v29, %v22206_v44  ;;  %14773 = vpow2.f32 %v8141_v15  ;;  %v8087_v63 = vmul.f32 1.442695, %v7633_v22  ;;  %v22212_v15 = vld [vmem:[#allocation151_spill] sm:$0xff]  ;;  %v22213_v32 = vld [vmem:[#allocation158_spill] sm:$0xff]  ;;  %v22214_v29 = vld [vmem:[#allocation157_spill] sm:$0xff] }
 0x667   : > { %8459 = vadd.xlane.f32.xlu1 %v8458_v19  ;;  %22205 = vst [vmem:[#allocation127_spill] sm:$0xff] %v19467_v51  ;;  %v22209_v19 = vld [vmem:[#allocation146_spill] sm:$0xff]  ;;  %14775 = vpow2.f32 %v8143_v17  ;;  %v8464_v40 = vadd.f32 %v22213_v32, %v22212_v15  ;;  %v8419_v7 = vadd.f32 %v22215_v13, %v22214_v29  ;;  %v22219_v15 = vld [vmem:[#allocation211_spill] sm:$0xff]  ;;  %v22220_v13 = vld [vmem:[#allocation213_spill] sm:$0xff] }
 0x668   : > { %8414 = vadd.xlane.f32.xlu0 %v8413_v39  ;;  %v8461_v28 = vadd.f32 %v22210_v36, %v22209_v19  ;;  %v19475_v39 = vpop.eup %14757  ;;  %14777 = vpow2.f32 %v8145_v62  ;;  %v22216_v57 = vld [vmem:[#allocation150_spill] sm:$0xff]  ;;  %v22217_v62 = vld [vmem:[#allocation187_spill] sm:$0xff] }
 0x669   : > { %22211 = vst [vmem:[#allocation128_spill] sm:$0xff] %v19475_v39  ;;  %v19477_v25 = vpop.xlane.xlu1 %7403  ;;  %v14760_v6 = vpop.eup %14759  ;;  %14779 = vpow2.f32 %v8083_v9  ;;  %v8422_v17 = vadd.f32 %v19251_v31, %v22216_v57  ;;  %v7663_v36 = vsub.f32 %v22217_v62, %v19385_v18  ;;  %v22218_v9 = vld [vmem:[#allocation189_spill] sm:$0xff] }
 0x66a   : > { %v8247_v1 = vpop.xlane.xlu0 %8246  ;;  %v14762_v22 = vpop.eup %14761  ;;  %14781 = vpow2.f32 %v8085_v3  ;;  %v7664_v32 = vsub.f32 %v22218_v9, %v19385_v18  ;;  %v8740_v29 = vmul.f32 %v14760_v6, %v22219_v15  ;;  %v22221_v3 = vld [vmem:[#allocation193_spill] sm:$0xff]  ;;  %v8739_v46 = vmul.f32 %v14760_v6, %v22222_v45  ;;  %v22227_v9 = vld [vmem:[#allocation23_spill] sm:$0xff] }
 0x66b   : > { %8417 = vadd.xlane.f32.xlu1 %v8416_v52  ;;  %v8089_v52 = vmul.f32 1.442695, %v7634_v48  ;;  %v14764_v19 = vpop.eup %14763  ;;  %14783 = vpow2.f32 %v8087_v63  ;;  %v8742_v44 = vmul.f32 %v14762_v22, %v22220_v13  ;;  %v7665_v48 = vsub.f32 %v22221_v3, %v19405_v5  ;;  %v22224_v63 = vld [vmem:[#allocation214_spill] sm:$0xff]  ;;  %v22230_v3 = vld [vmem:[#allocation195_spill] sm:$0xff] }
 0x66c   : > { %8462 = vadd.xlane.f32.xlu0 %v8461_v28  ;;  %v8467_v28 = vadd.f32 %v19263_v26, %v19256_v55  ;;  %v14766_v31 = vpop.eup %14765  ;;  %v22223_v26 = vld [vmem:[#allocation212_spill] sm:$0xff]  ;;  %v8772_v11 = vmul.f32 %v14764_v19, %v22224_v63  ;;  %v8771_v13 = vmul.f32 %v14764_v19, %v22227_v9  ;;  %v7666_v45 = vsub.f32 %v22230_v3, %v19405_v5 }
 0x66d   : > { %v8250_v57 = vpop.xlane.xlu1 %8249  ;;  %v8741_v55 = vmul.f32 %v14762_v22, %v22223_v26  ;;  %v19498_v33 = vpop.eup %14767  ;;  %v8984_v18 = vpack.c.bf16 %v8742_v44, %v8740_v29  ;;  %v8773_v53 = vmul.f32 %v14766_v31, %v22228_v4  ;;  %14785 = vpow2.f32 %v8089_v52  ;;  %v22232_v22 = vld [vmem:[#allocation4_spill] sm:$0xff]  ;;  %v22234_v4 = vld [vmem:[#allocation199_spill] sm:$0xff] }
 0x66e   : > { %v8295_v62 = vpop.xlane.xlu0 %8294  ;;  %22225 = vst [vmem:[#allocation130_spill] sm:$0xff] %v19498_v33  ;;  %v19503_v39 = vpop.eup %14769  ;;  %v7635_v63 = vsub.f32 %v22232_v22, %v19443_v61  ;;  %14787 = vrcp.f32 %v8247_v1  ;;  %v8151_v52 = vmul.f32 1.442695, %v7665_v48  ;;  %v22235_v1 = vld [vmem:[#allocation11_spill] sm:$0xff]  ;;  %v22238_v22 = vld [vmem:[#allocation9_spill] sm:$0xff] }
 0x66f   : > { %8465 = vadd.xlane.f32.xlu1 %v8464_v40  ;;  %v22226_v40 = vld [vmem:[#allocation218_spill] sm:$0xff]  ;;  %22229 = vst [vmem:[#allocation163_spill] sm:$0xff] %v19503_v39  ;;  %v8983_v6 = vpack.c.bf16 %v8741_v55, %v8739_v46  ;;  %v19507_v26 = vpop.eup %14771  ;;  %9179 = vmatprep.mubr.bf16.mxu0 %v8984_v18  ;;  %v8999_v29 = vpack.c.bf16 %v8773_v53, %v8771_v13  ;;  %14789 = vrcp.f32 %v8250_v57  ;;  %v22236_v57 = vld [vmem:[#allocation27_spill] sm:$0xff] }
 0x670   : > { %8420 = vadd.xlane.f32.xlu0 %v8419_v7  ;;  %v8774_v15 = vmul.f32 %v14766_v31, %v22226_v40  ;;  %v8147_v7 = vmul.f32 1.442695, %v7663_v36  ;;  %22231 = vst [vmem:[#allocation166_spill] sm:$0xff] %v19507_v26  ;;  %v19511_v19 = vpop.eup %14773  ;;  %v8149_v31 = vmul.f32 1.442695, %v7664_v32  ;;  %v7636_v36 = vsub.f32 %v22234_v4, %v19443_v61 }
 0x671   : > { %22233 = vst [vmem:[#allocation160_spill] sm:$0xff] %v19511_v19  ;;  %9180 = vmatmul.mubr.bf16.gmra.mrb[216].mxu0 %v8983_v6  ;;  %v8298_v5 = vpop.xlane.xlu1 %8297  ;;  %v19517_v46 = vpop.eup %14775  ;;  %14791 = vrcp.f32 %v8295_v62  ;;  %v8470_v53 = vadd.f32 %v19277_v54, %v19270_v34  ;;  %v8153_v61 = vmul.f32 1.442695, %v7666_v45  ;;  %v7638_v32 = vsub.f32 %v22236_v57, %v19463_v21  ;;  %v22237_v62 = vld [vmem:[#allocation6_spill] sm:$0xff] }
 0x672   : > { %v9000_v44 = vpack.c.bf16 %v8774_v15, %v8772_v11  ;;  %v19515_v55 = vpop.xlane.xlu0 %7358  ;;  %v19523_v11 = vpop.eup %14777  ;;  %14793 = vrcp.f32 %v8298_v5  ;;  %v8091_v18 = vmul.f32 1.442695, %v7635_v63  ;;  %v7667_v40 = vsub.f32 %v22237_v62, %v19465_v43 }
 0x673   : > { %8423 = vadd.xlane.f32.xlu1 %v8422_v17  ;;  %v7637_v17 = vsub.f32 %v22235_v1, %v19463_v21  ;;  %v19529_v48 = vpop.eup %14779  ;;  %14795 = vpow2.f32 %v8147_v7  ;;  %v8093_v9 = vmul.f32 1.442695, %v7636_v36  ;;  %v8428_v7 = vadd.f32 %v19305_v50, %v19298_v14 }
 0x674   : > { %8468 = vadd.xlane.f32.xlu0 %v8467_v28  ;;  %9276 = vmatprep.mubr.bf16.mxu1 %v9000_v44  ;;  %v8425_v28 = vadd.f32 %v19289_v0, %v19284_v8  ;;  %v19533_v15 = vpop.eup %14781  ;;  %14797 = vpow2.f32 %v8149_v31  ;;  %v8097_v6 = vmul.f32 1.442695, %v7638_v32  ;;  %v7668_v63 = vsub.f32 %v22238_v22, %v19465_v43 }
 0x675   : > { %9277 = vmatmul.mubr.bf16.gmra.mrb[216].mxu1 %v8999_v29  ;;  %v19535_v13 = vpop.xlane.xlu1 %7361  ;;  %v19539_v3 = vpop.eup %14783  ;;  %14799 = vpow2.f32 %v8151_v52  ;;  %v8095_v45 = vmul.f32 1.442695, %v7637_v17  ;;  %v8473_v44 = vadd.f32 %v19336_v2, %v19315_v38  ;;  %v8155_v29 = vmul.f32 1.442695, %v7667_v40  ;;  %v22241_v40 = vld [vmem:[#allocation53_spill] sm:$0xff] }
 0x676   : > { %v19537_v21 = vpop.xlane.xlu0 %7406  ;;  %14801 = vpow2.f32 %v8153_v61  ;;  %v8476_v52 = vadd.f32 %v19345_v27, %v19341_v20  ;;  %v8431_v43 = vadd.f32 %v19357_v24, %v19350_v23  ;;  %v8434_v1 = vadd.f32 %v19371_v30, %v19364_v59  ;;  %v22239_v61 = vld [vmem:[#allocation201_spill] sm:$0xff]  ;;  %v22244_v23 = vld [vmem:[#allocation219_spill] sm:$0xff] }
 0x677   : > { %8471 = vadd.xlane.f32.xlu1 %v8470_v53  ;;  %14803 = vpow2.f32 %v8091_v18  ;;  %v19547_v31 = vpop.eup %14785  ;;  %v8157_v53 = vmul.f32 1.442695, %v7668_v63  ;;  %v7669_v57 = vsub.f32 %v22239_v61, %v19477_v25  ;;  %v8479_v32 = vadd.f32 %v19387_v56, %v19378_v49  ;;  %v22240_v18 = vld [vmem:[#allocation13_spill] sm:$0xff]  ;;  %v22245_v56 = vld [vmem:[#allocation50_spill] sm:$0xff] }
 0x678   : > { %8426 = vadd.xlane.f32.xlu0 %v8425_v28  ;;  %14805 = vpow2.f32 %v8093_v9  ;;  %v14788_v5 = vpop.eup %14787  ;;  %v7670_v62 = vsub.f32 %v22240_v18, %v19477_v25  ;;  %v22250_v27 = vld [vmem:[#allocation225_spill] sm:$0xff] }
 0x679   : > { %14807 = vpow2.f32 %v8095_v45  ;;  %v14790_v17 = vpop.eup %14789  ;;  %v8744_v9 = vmul.f32 %v14788_v5, %v22241_v40  ;;  %v22242_v45 = vld [vmem:[#allocation54_spill] sm:$0xff]  ;;  %v8743_v30 = vmul.f32 %v14788_v5, %v22244_v23  ;;  %v22249_v40 = vld [vmem:[#allocation57_spill] sm:$0xff] }
 0x67a   : > { %v19549_v4 = vpop.xlane.xlu1 %7409  ;;  %v8301_v36 = vpop.xlane.xlu0 %8300  ;;  %14809 = vpow2.f32 %v8097_v6  ;;  %v22243_v6 = vld [vmem:[#allocation10_spill] sm:$0xff]  ;;  %v8745_v49 = vmul.f32 %v14790_v17, %v22245_v56 }
 0x67b   : > { %8429 = vadd.xlane.f32.xlu1 %v8428_v7  ;;  %v14792_v28 = vpop.eup %14791  ;;  %14811 = vpow2.f32 %v8155_v29  ;;  %v8746_v7 = vmul.f32 %v14790_v17, %v22242_v45  ;;  %v7639_v63 = vsub.f32 %v22243_v6, %v19515_v55  ;;  %v22246_v29 = vld [vmem:[#allocation223_spill] sm:$0xff]  ;;  %v22252_v6 = vld [vmem:[#allocation14_spill] sm:$0xff]  ;;  %v22254_v17 = vld [vmem:[#allocation33_spill] sm:$0xff] }
 0x67c   : > { %8474 = vadd.xlane.f32.xlu0 %v8473_v44  ;;  %v14794_v22 = vpop.eup %14793  ;;  %v8776_v24 = vmul.f32 %v14792_v28, %v22246_v29  ;;  %v8775_v45 = vmul.f32 %v14792_v28, %v22249_v40  ;;  %14813 = vpow2.f32 %v8157_v53  ;;  %v7640_v23 = vsub.f32 %v22252_v6, %v19515_v55  ;;  %v22256_v53 = vld [vmem:[#allocation35_spill] sm:$0xff] }
 0x67d   : > { %v19570_v59 = vpop.eup %14795  ;;  %v8986_v25 = vpack.c.bf16 %v8746_v7, %v8744_v9  ;;  %v8777_v2 = vmul.f32 %v14794_v22, %v22250_v27  ;;  %v8985_v5 = vpack.c.bf16 %v8745_v49, %v8743_v30  ;;  %v7641_v29 = vsub.f32 %v22254_v17, %v19535_v13  ;;  %v22265_v17 = vld [vmem:[#allocation17_spill] sm:$0xff] }
 0x67e   : > { %v8304_v44 = vpop.xlane.xlu1 %8303  ;;  %v8349_v61 = vpop.xlane.xlu0 %8348  ;;  %22247 = vst [vmem:[#allocation161_spill] sm:$0xff] %v19570_v59  ;;  %14815 = vrcp.f32 %v8301_v36  ;;  %v8161_v27 = vmul.f32 1.442695, %v7670_v62  ;;  %v22258_v36 = vld [vmem:[#allocation12_spill] sm:$0xff]  ;;  %v22260_v62 = vld [vmem:[#allocation30_spill] sm:$0xff] }
 0x67f   : > { %8477 = vadd.xlane.f32.xlu1 %v8476_v52  ;;  %v22248_v52 = vld [vmem:[#allocation61_spill] sm:$0xff]  ;;  %v19575_v20 = vpop.eup %14797  ;;  %9187 = vmatprep.mubr.bf16.mxu0 %v8986_v25  ;;  %v9001_v28 = vpack.c.bf16 %v8777_v2, %v8775_v45  ;;  %14817 = vrcp.f32 %v8304_v44  ;;  %v8482_v2 = vadd.f32 %v19403_v47, %v19394_v37  ;;  %v7672_v44 = vsub.f32 %v22260_v62, %v19537_v21  ;;  %v22268_v62 = vld [vmem:[#allocation19_spill] sm:$0xff] }
 0x680   : > { %8432 = vadd.xlane.f32.xlu0 %v8431_v43  ;;  %v8778_v18 = vmul.f32 %v14794_v22, %v22248_v52  ;;  %22251 = vst [vmem:[#allocation164_spill] sm:$0xff] %v19575_v20  ;;  %v8159_v43 = vmul.f32 1.442695, %v7669_v57  ;;  %v19579_v56 = vpop.eup %14799  ;;  %v7642_v57 = vsub.f32 %v22256_v53, %v19535_v13  ;;  %9188 = vmatmul.mubr.bf16.gmra.mrb[220].mxu0 %v8985_v5  ;;  %v8099_v22 = vmul.f32 1.442695, %v7639_v63 }
 0x681   : > { %22253 = vst [vmem:[#allocation165_spill] sm:$0xff] %v19579_v56  ;;  %v19583_v7 = vpop.eup %14801  ;;  %14819 = vrcp.f32 %v8349_v61  ;;  %v8101_v13 = vmul.f32 1.442695, %v7640_v23  ;;  %v8103_v25 = vmul.f32 1.442695, %v7641_v29  ;;  %v22262_v61 = vld [vmem:[#allocation15_spill] sm:$0xff]  ;;  %v7674_v29 = vsub.f32 %v22265_v17, %v19549_v4 }
 0x682   : > { %v9002_v9 = vpack.c.bf16 %v8778_v18, %v8776_v24  ;;  %22255 = vst [vmem:[#allocation184_spill] sm:$0xff] %v19583_v7  ;;  %v8352_v55 = vpop.xlane.xlu1 %8351  ;;  %v19587_v30 = vpop.xlane.xlu0 %7364  ;;  %v7673_v52 = vsub.f32 %v22262_v61, %v19549_v4  ;;  %v8105_v40 = vmul.f32 1.442695, %v7642_v57  ;;  %v8165_v5 = vmul.f32 1.442695, %v7672_v44  ;;  %v22267_v4 = vld [vmem:[#allocation128_spill] sm:$0xff] }
 0x683   : > { %8435 = vadd.xlane.f32.xlu1 %v8434_v1  ;;  %v19589_v49 = vpop.eup %14803  ;;  %v7671_v1 = vsub.f32 %v22258_v36, %v19537_v21  ;;  %14821 = vrcp.f32 %v8352_v55  ;;  %v8491_v36 = vadd.f32 %v22267_v4, %v19467_v51  ;;  %v7643_v44 = vsub.f32 %v22268_v62, %v19587_v30  ;;  %v22269_v61 = vld [vmem:[#allocation58_spill] sm:$0xff]  ;;  %v22272_v51 = vld [vmem:[#allocation231_spill] sm:$0xff] }
 0x684   : > { %8480 = vadd.xlane.f32.xlu0 %v8479_v32  ;;  %22257 = vst [vmem:[#allocation188_spill] sm:$0xff] %v19589_v49  ;;  %9284 = vmatprep.mubr.bf16.mxu1 %v9002_v9  ;;  %v19595_v24 = vpop.eup %14805  ;;  %v8437_v32 = vadd.f32 %v19431_v10, %v19426_v41  ;;  %14823 = vpow2.f32 %v8159_v43  ;;  %v8440_v43 = vadd.f32 %v19439_v35, %v19435_v58  ;;  %v22274_v4 = vld [vmem:[#allocation62_spill] sm:$0xff] }
 0x685   : > { %22259 = vst [vmem:[#allocation183_spill] sm:$0xff] %v19595_v24  ;;  %9285 = vmatmul.mubr.bf16.gmra.mrb[220].mxu1 %v9001_v28  ;;  %v19601_v63 = vpop.eup %14807  ;;  %14825 = vpow2.f32 %v8161_v27  ;;  %v8163_v23 = vmul.f32 1.442695, %v7671_v1  ;;  %v8485_v9 = vadd.f32 %v19451_v60, %v19445_v16  ;;  %v8167_v28 = vmul.f32 1.442695, %v7673_v52  ;;  %v22279_v16 = vld [vmem:[#allocation43_spill] sm:$0xff] }
 0x686   : > { %22261 = vst [vmem:[#allocation186_spill] sm:$0xff] %v19601_v63  ;;  %v19605_v18 = vpop.eup %14809  ;;  %14827 = vpow2.f32 %v8099_v22  ;;  %v8488_v22 = vadd.f32 %v19461_v42, %v19457_v12  ;;  %v8494_v1 = vadd.f32 %v19503_v39, %v19498_v33 }
 0x687   : > { %8483 = vadd.xlane.f32.xlu1 %v8482_v2  ;;  %22263 = vst [vmem:[#allocation194_spill] sm:$0xff] %v19605_v18  ;;  %v19607_v45 = vpop.xlane.xlu1 %7367  ;;  %v19611_v6 = vpop.eup %14811  ;;  %14829 = vpow2.f32 %v8101_v13  ;;  %v8169_v13 = vmul.f32 1.442695, %v7674_v29  ;;  %v22273_v29 = vld [vmem:[#allocation20_spill] sm:$0xff] }
 0x688   : > { %8438 = vadd.xlane.f32.xlu0 %v8437_v32  ;;  %v19609_v21 = vpop.xlane.xlu0 %7412  ;;  %22264 = vst [vmem:[#allocation198_spill] sm:$0xff] %v19611_v6  ;;  %14831 = vpow2.f32 %v8103_v25  ;;  %v19619_v27 = vpop.eup %14813  ;;  %v8539_v32 = vadd.f32 %v19511_v19, %v19507_v26  ;;  %v7645_v39 = vsub.f32 %v22273_v29, %v19607_v45  ;;  %v22275_v19 = vld [vmem:[#allocation229_spill] sm:$0xff]  ;;  %v8107_v29 = vmul.f32 1.442695, %v7643_v44 }
 0x689   : > { %22266 = vst [vmem:[#allocation191_spill] sm:$0xff] %v19619_v27  ;;  %14833 = vpow2.f32 %v8105_v40  ;;  %v14816_v55 = vpop.eup %14815  ;;  %v22270_v40 = vld [vmem:[#allocation65_spill] sm:$0xff] }
 0x68a   : > { %14835 = vpow2.f32 %v8163_v23  ;;  %v14818_v2 = vpop.eup %14817  ;;  %v8779_v52 = vmul.f32 %v14816_v55, %v22269_v61  ;;  %v8780_v33 = vmul.f32 %v14816_v55, %v22274_v4  ;;  %v7646_v55 = vsub.f32 %v22279_v16, %v19607_v45 }
 0x68b   : > { %8441 = vadd.xlane.f32.xlu1 %v8440_v43  ;;  %v19621_v53 = vpop.xlane.xlu1 %7415  ;;  %14837 = vpow2.f32 %v8165_v5  ;;  %v14820_v25 = vpop.eup %14819  ;;  %v8781_v23 = vmul.f32 %v14818_v2, %v22270_v40  ;;  %v22271_v43 = vld [vmem:[#allocation39_spill] sm:$0xff]  ;;  %v8782_v26 = vmul.f32 %v14818_v2, %v22275_v19 }
 0x68c   : > { %8486 = vadd.xlane.f32.xlu0 %v8485_v9  ;;  %v8307_v57 = vpop.xlane.xlu0 %8306  ;;  %14839 = vpow2.f32 %v8167_v28  ;;  %v7644_v17 = vsub.f32 %v22271_v43, %v19587_v30  ;;  %v8811_v5 = vmul.f32 %v14820_v25, %v22272_v51  ;;  %v22276_v40 = vld [vmem:[#allocation67_spill] sm:$0xff]  ;;  %v22277_v30 = vld [vmem:[#allocation34_spill] sm:$0xff] }
 0x68d   : > { %v14822_v9 = vpop.eup %14821  ;;  %v9003_v60 = vpack.c.bf16 %v8781_v23, %v8779_v52  ;;  %v22278_v43 = vld [vmem:[#allocation38_spill] sm:$0xff]  ;;  %14841 = vpow2.f32 %v8169_v13  ;;  %v9004_v4 = vpack.c.bf16 %v8782_v26, %v8780_v33  ;;  %v5522_v26 = vld [vmem:[#allocation3 + $0x280] sm:$0xff] }
 0x68e   : > { %v19642_v61 = vpop.eup %14823  ;;  %v8813_v42 = vmul.f32 %v14822_v9, %v22276_v40  ;;  %v8814_v12 = vmul.f32 %v14822_v9, %v22278_v43  ;;  %14843 = vrcp.f32 %v8307_v57  ;;  %v8109_v9 = vmul.f32 1.442695, %v7644_v17  ;;  %v22281_v13 = vld [vmem:[#allocation18_spill] sm:$0xff] }
 0x68f   : > { %8489 = vadd.xlane.f32.xlu1 %v8488_v22  ;;  %v8310_v62 = vpop.xlane.xlu1 %8309  ;;  %v8812_v22 = vmul.f32 %v14820_v25, %v22277_v30  ;;  %v19647_v51 = vpop.eup %14825  ;;  %v5506_v25 = vld [vmem:[#allocation3 + $0x200] sm:$0xff]  ;;  %v7676_v44 = vsub.f32 %v22281_v13, %v19609_v21  ;;  %9325 = vmatprep.mubr.bf16.mxu0 %v9004_v4  ;;  %v8111_v30 = vmul.f32 1.442695, %v7645_v39  ;;  %v22282_v57 = vld [vmem:[#allocation210_spill] sm:$0xff]  ;;  %v8113_v17 = vmul.f32 1.442695, %v7646_v55 }
 0x690   : > { %8492 = vadd.xlane.f32.xlu0 %v8491_v36  ;;  %v8355_v28 = vpop.xlane.xlu0 %8354  ;;  %v19651_v19 = vpop.eup %14827  ;;  %v22280_v36 = vld [vmem:[#allocation16_spill] sm:$0xff]  ;;  %v9019_v23 = vpack.c.bf16 %v8813_v42, %v8811_v5  ;;  %14845 = vrcp.f32 %v8310_v62  ;;  %9326 = vmatmul.mubr.bf16.vlgmr.msra.gmra.mrb[224].mxu0 %v9003_v60  ;;  %v8542_v42 = vadd.f32 %v19523_v11, %v19517_v46  ;;  %v8497_v39 = vadd.f32 %v19533_v15, %v19529_v48  ;;  %v5531_v62 = vld [vmem:[#allocation3 + $0x2c8] sm:$0xff] }
 0x691   : > { %v7675_v2 = vsub.f32 %v22280_v36, %v19609_v21  ;;  %v9020_v52 = vpack.c.bf16 %v8814_v12, %v8812_v22  ;;  %v19655_v40 = vpop.eup %14829  ;;  %v7677_v12 = vsub.f32 %v22282_v57, %v19621_v53  ;;  %14847 = vrcp.f32 %v8355_v28  ;;  %12812 = vmatpush3.bf16.msra.mxu0 %v5506_v25  ;;  %v22285_v22 = vld [vmem:[#allocation42_spill] sm:$0xff]  ;;  %v5507_v4 = vld [vmem:[#allocation3 + $0x208] sm:$0xff]  ;;  %v22287_v36 = vld [vmem:[#allocation47_spill] sm:$0xff] }
 0x692   : > { %v19659_v45 = vpop.eup %14831  ;;  %v5523_v13 = vld [vmem:[#allocation3 + $0x288] sm:$0xff]  ;;  %v8545_v57 = vadd.f32 %v19575_v20, %v19570_v59 }
 0x693   : > { %8495 = vadd.xlane.f32.xlu1 %v8494_v1  ;;  %v8358_v16 = vpop.xlane.xlu1 %8357  ;;  %9422 = vmatprep.mubr.bf16.mxu1 %v9020_v52  ;;  %v5515_v1 = vld [vmem:[#allocation3 + $0x248] sm:$0xff]  ;;  %v19665_v21 = vpop.eup %14833  ;;  %v8171_v60 = vmul.f32 1.442695, %v7675_v2  ;;  %v8175_v2 = vmul.f32 1.442695, %v7677_v12 }
 0x694   : > { %8540 = vadd.xlane.f32.xlu0 %v8539_v32  ;;  %v7371_v33 = vpop.xlane.xlu0 %7370  ;;  %v22283_v32 = vld [vmem:[#allocation22_spill] sm:$0xff]  ;;  %14849 = vrcp.f32 %v8358_v16  ;;  %9423 = vmatmul.mubr.bf16.vlgmr.msra.gmra.mrb[224].mxu1 %v9019_v23  ;;  %v19671_v28 = vpop.eup %14835  ;;  %v8500_v16 = vadd.f32 %v19547_v31, %v19539_v3 }
 0x695   : > { %v7678_v5 = vsub.f32 %v22283_v32, %v19621_v53  ;;  %22284 = vst [vmem:[#allocation196_spill] sm:$0xff] %v19671_v28  ;;  %14851 = vpow2.f32 %v8107_v29  ;;  %v7647_v43 = vsub.f32 %v22285_v22, %v7371_v33  ;;  %12876 = vmatpush3.bf16.msra.mxu1 %v5522_v26  ;;  %v19674_v55 = vpop.eup %14837  ;;  %v8173_v53 = vmul.f32 1.442695, %v7676_v44  ;;  %12813 = vmatprep.subr.bf16.mxu0 %v5515_v1  ;;  %v5516_v26 = vld [vmem:[#allocation3 + $0x250] sm:$0xff]  ;;  %v22289_v44 = vld [vmem:[#allocation24_spill] sm:$0xff] }
 0x696   : > { %22286 = vst [vmem:[#allocation7_spill] sm:$0xff] %v19674_v55  ;;  %14853 = vpow2.f32 %v8109_v9  ;;  %v7648_v52 = vsub.f32 %v22287_v36, %v7371_v33  ;;  %v19681_v29 = vpop.eup %14839  ;;  %12877 = vmatprep.subr.bf16.mxu1 %v5531_v62  ;;  %12814 = vmatpush3.bf16.msra.mxu0 %v5507_v4  ;;  %v5524_v62 = vld [vmem:[#allocation3 + $0x290] sm:$0xff]  ;;  %v8551_v4 = vadd.f32 %v19619_v27, %v19611_v6  ;;  %v22294_v27 = vld [vmem:[#allocation207_spill] sm:$0xff]  ;;  %v22295_v6 = vld [vmem:[#allocation68_spill] sm:$0xff] }
 0x697   : > { %8543 = vadd.xlane.f32.xlu1 %v8542_v42  ;;  %v19677_v23 = vpop.xlane.xlu1 %7373  ;;  %22288 = vst [vmem:[#allocation202_spill] sm:$0xff] %v19681_v29  ;;  %14855 = vpow2.f32 %v8111_v30  ;;  %v8177_v9 = vmul.f32 1.442695, %v7678_v5  ;;  %v5532_v42 = vld [vmem:[#allocation3 + $0x2d0] sm:$0xff]  ;;  %v8115_v1 = vmul.f32 1.442695, %v7647_v43  ;;  %v19689_v12 = vpop.eup %14841  ;;  %v8548_v5 = vadd.f32 %v19583_v7, %v19579_v56  ;;  %12815 = vmatprep.subr.bf16.mxu0 %v5516_v26 }
 0x698   : > { %8498 = vadd.xlane.f32.xlu0 %v8497_v39  ;;  %v19679_v25 = vpop.xlane.xlu0 %7418  ;;  %14857 = vpow2.f32 %v8113_v17  ;;  %v7649_v33 = vsub.f32 %v22289_v44, %v19677_v23  ;;  %v5508_v30 = vld [vmem:[#allocation3 + $0x210] sm:$0xff]  ;;  %22290 = vst [vmem:[#allocation5_spill] sm:$0xff] %v19689_v12  ;;  %v8117_v32 = vmul.f32 1.442695, %v7648_v52  ;;  %v14844_v22 = vpop.eup %14843  ;;  %v8506_v43 = vadd.f32 %v19605_v18, %v19601_v63  ;;  %v22291_v52 = vld [vmem:[#allocation51_spill] sm:$0xff]  ;;  %v22292_v26 = vld [vmem:[#allocation25_spill] sm:$0xff] }
 0x699   : > { %14859 = vpow2.f32 %v8171_v60  ;;  %12878 = vmatpush3.bf16.msra.mxu1 %v5523_v13  ;;  %v8503_v60 = vadd.f32 %v19595_v24, %v19589_v49  ;;  %v7650_v13 = vsub.f32 %v22291_v52, %v19677_v23  ;;  %v5533_v44 = vld [vmem:[#allocation3 + $0x2d8] sm:$0xff]  ;;  %v22298_v7 = vld [vmem:[#allocation45_spill] sm:$0xff] }
 0x69a   : > { %14861 = vpow2.f32 %v8173_v53  ;;  %12879 = vmatprep.subr.bf16.mxu1 %v5532_v42  ;;  %v5517_v53 = vld [vmem:[#allocation3 + $0x258] sm:$0xff]  ;;  %v14846_v36 = vpop.eup %14845  ;;  %12816 = vmatpush3.bf16.msra.mxu0 %v5508_v30  ;;  %v8784_v42 = vmul.f32 %v14844_v22, %v22294_v27  ;;  %v22297_v30 = vld [vmem:[#allocation41_spill] sm:$0xff]  ;;  %v22300_v27 = vld [vmem:[#allocation44_spill] sm:$0xff] }
 0x69b   : > { %8501 = vadd.xlane.f32.xlu1 %v8500_v16  ;;  %v19691_v39 = vpop.xlane.xlu1 %7421  ;;  %14863 = vpow2.f32 %v8175_v2  ;;  %v8119_v16 = vmul.f32 1.442695, %v7649_v33  ;;  %v7679_v2 = vsub.f32 %v22292_v26, %v19679_v25  ;;  %v22293_v49 = vld [vmem:[#allocation215_spill] sm:$0xff]  ;;  %v8786_v24 = vmul.f32 %v14846_v36, %v22295_v6  ;;  %v22296_v33 = vld [vmem:[#allocation66_spill] sm:$0xff]  ;;  %12817 = vmatprep.subr.bf16.mxu0 %v5517_v53 }
 0x69c   : > { %8546 = vadd.xlane.f32.xlu0 %v8545_v57  ;;  %v8313_v17 = vpop.xlane.xlu0 %8312  ;;  %14865 = vpow2.f32 %v8177_v9  ;;  %v14848_v57 = vpop.eup %14847  ;;  %v7680_v18 = vsub.f32 %v22293_v49, %v19679_v25  ;;  %v5509_v9 = vld [vmem:[#allocation3 + $0x218] sm:$0xff]  ;;  %v8783_v52 = vmul.f32 %v14844_v22, %v22296_v33  ;;  %v8785_v26 = vmul.f32 %v14846_v36, %v22297_v30  ;;  %v22301_v6 = vld [vmem:[#allocation70_spill] sm:$0xff] }
 0x69d   : > { %14867 = vpow2.f32 %v8115_v1  ;;  %12880 = vmatpush3.bf16.msra.mxu1 %v5524_v62  ;;  %v8816_v1 = vmul.f32 %v14848_v57, %v22298_v7  ;;  %v9006_v49 = vpack.c.bf16 %v8786_v24, %v8784_v42  ;;  %v8815_v62 = vmul.f32 %v14848_v57, %v22301_v6  ;;  %v22302_v56 = vld [vmem:[#allocation71_spill] sm:$0xff]  ;;  %v22306_v24 = vld [vmem:[#allocation26_spill] sm:$0xff]  ;;  %v5535_v6 = vld [vmem:[#allocation3 + $0x2e8] sm:$0xff] }
 0x69e   : > { %v14850_v63 = vpop.eup %14849  ;;  %14869 = vpow2.f32 %v8117_v32  ;;  %12881 = vmatprep.subr.bf16.mxu1 %v5533_v44  ;;  %v8121_v22 = vmul.f32 1.442695, %v7650_v13  ;;  %v9005_v7 = vpack.c.bf16 %v8785_v26, %v8783_v52  ;;  %12818 = vmatpush3.bf16.msra.mxu0 %v5509_v9  ;;  %v5525_v53 = vld [vmem:[#allocation3 + $0x298] sm:$0xff]  ;;  %v7682_v42 = vsub.f32 %v22306_v24, %v19691_v39  ;;  %v5518_v44 = vld [vmem:[#allocation3 + $0x260] sm:$0xff] }
 0x69f   : > { %8549 = vadd.xlane.f32.xlu1 %v8548_v5  ;;  %v8316_v23 = vpop.xlane.xlu1 %8315  ;;  %v19712_v20 = vpop.eup %14851  ;;  %v8818_v5 = vmul.f32 %v14850_v63, %v22300_v27  ;;  %v8817_v59 = vmul.f32 %v14850_v63, %v22302_v56  ;;  %14871 = vpow2.f32 %v8119_v16  ;;  %9333 = vmatprep.mubr.bf16.mxu0 %v9006_v49  ;;  %v8179_v13 = vmul.f32 1.442695, %v7679_v2  ;;  %v5510_v9 = vld [vmem:[#allocation3 + $0x220] sm:$0xff] }
 0x6a0   : > { %8504 = vadd.xlane.f32.xlu0 %v8503_v60  ;;  %22299 = vst [vmem:[#allocation200_spill] sm:$0xff] %v19712_v20  ;;  %v8361_v25 = vpop.xlane.xlu0 %8360  ;;  %v19717_v32 = vpop.eup %14853  ;;  %v22304_v60 = vld [vmem:[#allocation217_spill] sm:$0xff]  ;;  %14873 = vrcp.f32 %v8313_v17  ;;  %9334 = vmatmul.mubr.bf16.gmra.mrb[228].mxu0 %v9005_v7  ;;  %v8181_v30 = vmul.f32 1.442695, %v7680_v18  ;;  %v8554_v17 = vadd.f32 %v19647_v51, %v19642_v61  ;;  %v5526_v49 = vld [vmem:[#allocation3 + $0x2a0] sm:$0xff]  ;;  %v8512_v7 = vadd.f32 %v19665_v21, %v19659_v45 }
 0x6a1   : > { %22303 = vst [vmem:[#allocation203_spill] sm:$0xff] %v19717_v32  ;;  %v7681_v36 = vsub.f32 %v22304_v60, %v19691_v39  ;;  %v19721_v33 = vpop.eup %14855  ;;  %v9022_v56 = vpack.c.bf16 %v8818_v5, %v8816_v1  ;;  %v9021_v63 = vpack.c.bf16 %v8817_v59, %v8815_v62  ;;  %14875 = vrcp.f32 %v8316_v23  ;;  %12882 = vmatpush3.bf16.msra.mxu1 %v5525_v53  ;;  %v22309_v1 = vld [vmem:[#allocation55_spill] sm:$0xff]  ;;  %v5511_v53 = vld [vmem:[#allocation3 + $0x228] sm:$0xff] }
 0x6a2   : > { %22305 = vst [vmem:[#allocation204_spill] sm:$0xff] %v19721_v33  ;;  %v19725_v57 = vpop.eup %14857  ;;  %14877 = vrcp.f32 %v8361_v25  ;;  %v8509_v59 = vadd.f32 %v19655_v40, %v19651_v19  ;;  %12819 = vmatprep.subr.bf16.mxu0 %v5518_v44  ;;  %v5519_v25 = vld [vmem:[#allocation3 + $0x268] sm:$0xff]  ;;  %v8185_v5 = vmul.f32 1.442695, %v7682_v42 }
 0x6a3   : > { %8507 = vadd.xlane.f32.xlu1 %v8506_v43  ;;  %22307 = vst [vmem:[#allocation29_spill] sm:$0xff] %v19725_v57  ;;  %v8364_v16 = vpop.xlane.xlu1 %8363  ;;  %v19727_v52 = vpop.eup %14859  ;;  %9430 = vmatprep.mubr.bf16.mxu1 %v9022_v56  ;;  %v5534_v43 = vld [vmem:[#allocation3 + $0x2e0] sm:$0xff]  ;;  %v8183_v23 = vmul.f32 1.442695, %v7681_v36 }
 0x6a4   : > { %8552 = vadd.xlane.f32.xlu0 %v8551_v4  ;;  %v7377_v39 = vpop.xlane.xlu0 %7376  ;;  %v19733_v2 = vpop.eup %14861  ;;  %14879 = vrcp.f32 %v8364_v16  ;;  %9431 = vmatmul.mubr.bf16.gmra.mrb[228].mxu1 %v9021_v63  ;;  %v22308_v4 = vld [vmem:[#allocation48_spill] sm:$0xff]  ;;  %v22311_v63 = vld [vmem:[#allocation59_spill] sm:$0xff] }
 0x6a5   : > { %v7651_v26 = vsub.f32 %v22308_v4, %v7377_v39  ;;  %v7652_v18 = vsub.f32 %v22309_v1, %v7377_v39  ;;  %v19737_v27 = vpop.eup %14863  ;;  %14881 = vpow2.f32 %v8121_v22  ;;  %12820 = vmatpush3.bf16.msra.mxu0 %v5510_v9  ;;  %12883 = vmatprep.subr.bf16.mxu1 %v5534_v43  ;;  %v22310_v22 = vld [vmem:[#allocation221_spill] sm:$0xff]  ;;  %v22312_v39 = vld [vmem:[#allocation52_spill] sm:$0xff]  ;;  %v8557_v4 = vadd.f32 %v19674_v55, %v19671_v28 }
 0x6a6   : > { %v19739_v62 = vpop.eup %14865  ;;  %14883 = vpow2.f32 %v8179_v13  ;;  %12884 = vmatpush3.bf16.msra.mxu1 %v5526_v49  ;;  %12821 = vmatprep.subr.bf16.mxu0 %v5519_v25  ;;  %v5520_v13 = vld [vmem:[#allocation3 + $0x270] sm:$0xff] }
 0x6a7   : > { %8555 = vadd.xlane.f32.xlu1 %v8554_v17  ;;  %v8123_v60 = vmul.f32 1.442695, %v7651_v26  ;;  %v7380_v36 = vpop.xlane.xlu1 %7379  ;;  %v19743_v24 = vpop.eup %14867  ;;  %14885 = vpow2.f32 %v8181_v30  ;;  %v8125_v56 = vmul.f32 1.442695, %v7652_v18  ;;  %12885 = vmatprep.subr.bf16.mxu1 %v5535_v6  ;;  %v5527_v30 = vld [vmem:[#allocation3 + $0x2a8] sm:$0xff]  ;;  %v5536_v18 = vld [vmem:[#allocation3 + $0x2f0] sm:$0xff]  ;;  %v8560_v6 = vadd.f32 %v19689_v12, %v19681_v29 }
 0x6a8   : > { %8510 = vadd.xlane.f32.xlu0 %v8509_v59  ;;  %v7653_v42 = vsub.f32 %v22310_v22, %v7380_v36  ;;  %v7654_v44 = vsub.f32 %v22311_v63, %v7380_v36  ;;  %v7425_v16 = vpop.xlane.xlu0 %7424  ;;  %v19747_v9 = vpop.eup %14869  ;;  %14887 = vpow2.f32 %v8183_v23  ;;  %v22313_v59 = vld [vmem:[#allocation220_spill] sm:$0xff]  ;;  %v5512_v36 = vld [vmem:[#allocation3 + $0x230] sm:$0xff] }
 0x6a9   : > { %v7683_v17 = vsub.f32 %v22312_v39, %v7425_v16  ;;  %v7684_v43 = vsub.f32 %v22313_v59, %v7425_v16  ;;  %14889 = vpow2.f32 %v8185_v5  ;;  %12822 = vmatpush3.bf16.msra.mxu0 %v5511_v53  ;;  %v19753_v49 = vpop.eup %14871  ;;  %v8515_v5 = vadd.f32 %v19717_v32, %v19712_v20  ;;  %v22315_v39 = vld [vmem:[#allocation224_spill] sm:$0xff]  ;;  %v22316_v59 = vld [vmem:[#allocation75_spill] sm:$0xff] }
 0x6aa   : > { %v8127_v26 = vmul.f32 1.442695, %v7653_v42  ;;  %v8129_v1 = vmul.f32 1.442695, %v7654_v44  ;;  %14891 = vpow2.f32 %v8123_v60  ;;  %12823 = vmatprep.subr.bf16.mxu0 %v5520_v13  ;;  %v14874_v22 = vpop.eup %14873  ;;  %12886 = vmatpush3.bf16.msra.mxu1 %v5527_v30  ;;  %v22314_v60 = vld [vmem:[#allocation222_spill] sm:$0xff]  ;;  %v8518_v16 = vadd.f32 %v19725_v57, %v19721_v33  ;;  %v22317_v20 = vld [vmem:[#allocation72_spill] sm:$0xff] }
 0x6ab   : > { %8513 = vadd.xlane.f32.xlu1 %v8512_v7  ;;  %v8187_v25 = vmul.f32 1.442695, %v7683_v17  ;;  %v7428_v23 = vpop.xlane.xlu1 %7427  ;;  %14893 = vpow2.f32 %v8125_v56  ;;  %v5521_v7 = vld [vmem:[#allocation3 + $0x278] sm:$0xff]  ;;  %v14876_v53 = vpop.eup %14875  ;;  %v8189_v42 = vmul.f32 1.442695, %v7684_v43  ;;  %12887 = vmatprep.subr.bf16.mxu1 %v5536_v18  ;;  %v5528_v13 = vld [vmem:[#allocation3 + $0x2b0] sm:$0xff] }
 0x6ac   : > { %8558 = vadd.xlane.f32.xlu0 %v8557_v4  ;;  %v8319_v63 = vpop.xlane.xlu0 %8318  ;;  %14895 = vpow2.f32 %v8127_v26  ;;  %v7685_v44 = vsub.f32 %v22314_v60, %v7428_v23  ;;  %v14878_v56 = vpop.eup %14877  ;;  %v7686_v17 = vsub.f32 %v22315_v39, %v7428_v23  ;;  %v8788_v4 = vmul.f32 %v14874_v22, %v22316_v59  ;;  %v5537_v32 = vld [vmem:[#allocation3 + $0x2f8] sm:$0xff]  ;;  %v22318_v60 = vld [vmem:[#allocation40_spill] sm:$0xff]  ;;  %v22319_v57 = vld [vmem:[#allocation46_spill] sm:$0xff] }
 0x6ad   : > { %14897 = vpow2.f32 %v8129_v1  ;;  %v8790_v30 = vmul.f32 %v14876_v53, %v22317_v20  ;;  %12824 = vmatpush3.bf16.msra.mxu0 %v5512_v36  ;;  %v8787_v12 = vmul.f32 %v14874_v22, %v22318_v60  ;;  %v8789_v18 = vmul.f32 %v14876_v53, %v22319_v57  ;;  %v22320_v33 = vld [vmem:[#allocation49_spill] sm:$0xff]  ;;  %v22321_v39 = vld [vmem:[#allocation78_spill] sm:$0xff]  ;;  %v22323_v29 = vld [vmem:[#allocation76_spill] sm:$0xff] }
 0x6ae   : > { %v14880_v26 = vpop.eup %14879  ;;  %14899 = vpow2.f32 %v8187_v25  ;;  %v8820_v55 = vmul.f32 %v14878_v56, %v22320_v33  ;;  %12825 = vmatprep.subr.bf16.mxu0 %v5521_v7  ;;  %v22322_v20 = vld [vmem:[#allocation74_spill] sm:$0xff]  ;;  %12888 = vmatpush3.bf16.msra.mxu1 %v5528_v13  ;;  %v8563_v57 = vadd.f32 %v19733_v2, %v19727_v52  ;;  %v5513_v33 = vld [vmem:[#allocation3 + $0x238] sm:$0xff]  ;;  %v8191_v7 = vmul.f32 1.442695, %v7685_v44  ;;  %v22327_v44 = vld [vmem:[#allocation56_spill] sm:$0xff] }
 0x6af   : > { %8561 = vadd.xlane.f32.xlu1 %v8560_v6  ;;  %v8322_v43 = vpop.xlane.xlu1 %8321  ;;  %v19768_v1 = vpop.eup %14881  ;;  %v9008_v23 = vpack.c.bf16 %v8790_v30, %v8788_v4  ;;  %v8822_v59 = vmul.f32 %v14880_v26, %v22321_v39  ;;  %v8819_v36 = vmul.f32 %v14878_v56, %v22322_v20  ;;  %v8821_v28 = vmul.f32 %v14880_v26, %v22323_v29  ;;  %v5546_v4 = vld [vmem:[#allocation3 + $0x340] sm:$0xff]  ;;  %v22332_v20 = vld [vmem:[#allocation227_spill] sm:$0xff] }
 0x6b0   : > { %8516 = vadd.xlane.f32.xlu0 %v8515_v5  ;;  %v8367_v6 = vpop.xlane.xlu0 %8366  ;;  %v19773_v25 = vpop.eup %14883  ;;  %14901 = vpow2.f32 %v8189_v42  ;;  %v9007_v22 = vpack.c.bf16 %v8789_v18, %v8787_v12  ;;  %12889 = vmatprep.subr.bf16.mxu1 %v5537_v32  ;;  %v8193_v13 = vmul.f32 1.442695, %v7686_v17  ;;  %v5529_v42 = vld [vmem:[#allocation3 + $0x2b8] sm:$0xff] }
 0x6b1   : > { %v19777_v5 = vpop.eup %14885  ;;  %14903 = vrcp.f32 %v8319_v63  ;;  %9341 = vmatprep.mubr.bf16.mxu0 %v9008_v23  ;;  %v9024_v53 = vpack.c.bf16 %v8822_v59, %v8820_v55  ;;  %v9023_v56 = vpack.c.bf16 %v8821_v28, %v8819_v36  ;;  %v8566_v63 = vadd.f32 %v19739_v62, %v19737_v27  ;;  %12826 = vmatpush3.bf16.msra.mxu0 %v5513_v33  ;;  %v5562_v55 = vld [vmem:[#allocation3 + $0x3c0] sm:$0xff]  ;;  %v22328_v17 = vld [vmem:[#allocation63_spill] sm:$0xff] }
 0x6b2   : > { %22324 = vst [vmem:[#allocation8_spill] sm:$0xff] %v19777_v5  ;;  %v19779_v29 = vpop.eup %14887  ;;  %14905 = vrcp.f32 %v8322_v43  ;;  %9342 = vmatmul.mubr.bf16.gmra.mrb[232].mxu0 %v9007_v22  ;;  %v8521_v43 = vadd.f32 %v19747_v9, %v19743_v24  ;;  %12939 = vmatprep.subr.bf16.mxu0 %v5546_v4  ;;  %v22333_v22 = vld [vmem:[#allocation36_spill] sm:$0xff] }
 0x6b3   : > { %8519 = vadd.xlane.f32.xlu1 %v8518_v16  ;;  %v8370_v12 = vpop.xlane.xlu1 %8369  ;;  %v19781_v30 = vpop.eup %14889  ;;  %14907 = vrcp.f32 %v8367_v6  ;;  %9438 = vmatprep.mubr.bf16.mxu1 %v9024_v53 }
 0x6b4   : > { %8564 = vadd.xlane.f32.xlu0 %v8563_v57  ;;  %22325 = vst [vmem:[#allocation170_spill] sm:$0xff] %v19781_v30  ;;  %v19785_v28 = vpop.eup %14891  ;;  %14909 = vrcp.f32 %v8370_v12  ;;  %9439 = vmatmul.mubr.bf16.gmra.mrb[232].mxu1 %v9023_v56  ;;  %v22334_v56 = vld [vmem:[#allocation60_spill] sm:$0xff] }
 0x6b5   : > { %v7383_v32 = vpop.xlane.xlu0 %7382  ;;  %22326 = vst [vmem:[#allocation173_spill] sm:$0xff] %v19785_v28  ;;  %v19791_v60 = vpop.eup %14893  ;;  %14911 = vpow2.f32 %v8191_v7  ;;  %12890 = vmatpush3.bf16.msra.mxu1 %v5529_v42  ;;  %v8524_v7 = vadd.f32 %v19768_v1, %v19753_v49  ;;  %v8569_v42 = vadd.f32 %v19777_v5, %v19773_v25  ;;  %v22344_v5 = vld [vmem:[#allocation80_spill] sm:$0xff] }
 0x6b6   : > { %v7655_v16 = vsub.f32 %v22327_v44, %v7383_v32  ;;  %v7656_v26 = vsub.f32 %v22328_v17, %v7383_v32  ;;  %22329 = vst [vmem:[#allocation176_spill] sm:$0xff] %v19791_v60  ;;  %v19793_v18 = vpop.eup %14895  ;;  %14913 = vpow2.f32 %v8193_v13  ;;  %13003 = vmatprep.subr.bf16.mxu1 %v5562_v55  ;;  %v22335_v13 = vld [vmem:[#allocation226_spill] sm:$0xff] }
 0x6b7   : > { %8567 = vadd.xlane.f32.xlu1 %v8566_v63  ;;  %22330 = vst [vmem:[#allocation180_spill] sm:$0xff] %v19793_v18  ;;  %v19795_v59 = vpop.eup %14897 }
 0x6b8   : > { %v8131_v23 = vmul.f32 1.442695, %v7655_v16  ;;  %v8133_v6 = vmul.f32 1.442695, %v7656_v26  ;;  %8522 = vadd.xlane.f32.xlu0 %v8521_v43  ;;  %v7386_v39 = vpop.xlane.xlu1 %7385  ;;  %22331 = vst [vmem:[#allocation31_spill] sm:$0xff] %v19795_v59  ;;  %v19801_v53 = vpop.eup %14899  ;;  %v8572_v26 = vadd.f32 %v19781_v30, %v19779_v29  ;;  %v22343_v30 = vld [vmem:[#allocation82_spill] sm:$0xff] }
 0x6b9   : > { %v7657_v36 = vsub.f32 %v22332_v20, %v7386_v39  ;;  %v7658_v57 = vsub.f32 %v22333_v22, %v7386_v39  ;;  %v7431_v33 = vpop.xlane.xlu0 %7430  ;;  %v22338_v20 = vld [vmem:[#allocation230_spill] sm:$0xff] }
 0x6ba   : > { %14915 = vpow2.f32 %v8131_v23  ;;  %v7687_v4 = vsub.f32 %v22334_v56, %v7431_v33  ;;  %v7688_v12 = vsub.f32 %v22335_v13, %v7431_v33  ;;  %v19807_v55 = vpop.eup %14901  ;;  %v22337_v23 = vld [vmem:[#allocation228_spill] sm:$0xff]  ;;  %v22340_v56 = vld [vmem:[#allocation79_spill] sm:$0xff]  ;;  %v8530_v13 = vadd.f32 %v19795_v59, %v19793_v18 }
 0x6bb   : > { %14917 = vpow2.f32 %v8133_v6  ;;  %v8135_v32 = vmul.f32 1.442695, %v7657_v36  ;;  %v8137_v63 = vmul.f32 1.442695, %v7658_v57  ;;  %8525 = vadd.xlane.f32.xlu1 %v8524_v7  ;;  %22336 = vst [vmem:[#allocation206_spill] sm:$0xff] %v19807_v55  ;;  %v14904_v43 = vpop.eup %14903  ;;  %v8527_v6 = vadd.f32 %v19791_v60, %v19785_v28  ;;  %v22339_v57 = vld [vmem:[#allocation81_spill] sm:$0xff] }
 0x6bc   : > { %v8195_v44 = vmul.f32 1.442695, %v7687_v4  ;;  %v8197_v16 = vmul.f32 1.442695, %v7688_v12  ;;  %8570 = vadd.xlane.f32.xlu0 %v8569_v42  ;;  %v7434_v17 = vpop.xlane.xlu1 %7433  ;;  %v14906_v36 = vpop.eup %14905  ;;  %v8792_v7 = vmul.f32 %v14904_v43, %v22339_v57  ;;  %v8791_v4 = vmul.f32 %v14904_v43, %v22340_v56  ;;  %v22342_v60 = vld [vmem:[#allocation83_spill] sm:$0xff] }
 0x6bd   : > { %14919 = vpow2.f32 %v8135_v32  ;;  %v7689_v39 = vsub.f32 %v22337_v23, %v7434_v17  ;;  %v7690_v22 = vsub.f32 %v22338_v20, %v7434_v17  ;;  %v8325_v33 = vpop.xlane.xlu0 %8324  ;;  %v14908_v12 = vpop.eup %14907  ;;  %v22341_v23 = vld [vmem:[#allocation85_spill] sm:$0xff] }
 0x6be   : > { %14921 = vpow2.f32 %v8137_v63  ;;  %v8794_v17 = vmul.f32 %v14906_v36, %v22341_v23  ;;  %v14910_v20 = vpop.eup %14909  ;;  %v8793_v63 = vmul.f32 %v14906_v36, %v22342_v60  ;;  %v8824_v57 = vmul.f32 %v14908_v12, %v22343_v30 }
 0x6bf   : > { %14923 = vpow2.f32 %v8195_v44  ;;  %v8199_v42 = vmul.f32 1.442695, %v7689_v39  ;;  %v8201_v32 = vmul.f32 1.442695, %v7690_v22  ;;  %8573 = vadd.xlane.f32.xlu1 %v8572_v26  ;;  %v8823_v43 = vmul.f32 %v14908_v12, %v22344_v5  ;;  %v19823_v56 = vpop.eup %14911  ;;  %v22346_v39 = vld [vmem:[#allocation86_spill] sm:$0xff]  ;;  %v22347_v26 = vld [vmem:[#allocation84_spill] sm:$0xff] }
 0x6c0   : > { %14925 = vpow2.f32 %v8197_v16  ;;  %8528 = vadd.xlane.f32.xlu0 %v8527_v6  ;;  %v8328_v28 = vpop.xlane.xlu1 %8327  ;;  %22345 = vst [vmem:[#allocation172_spill] sm:$0xff] %v19823_v56  ;;  %v9010_v59 = vpack.c.bf16 %v8794_v17, %v8792_v7  ;;  %v8826_v22 = vmul.f32 %v14910_v20, %v22346_v39  ;;  %v8825_v18 = vmul.f32 %v14910_v20, %v22347_v26  ;;  %v19827_v23 = vpop.eup %14913 }
 0x6c1   : > { %14927 = vpow2.f32 %v8199_v42  ;;  %v8373_v44 = vpop.xlane.xlu0 %8372  ;;  %22348 = vst [vmem:[#allocation28_spill] sm:$0xff] %v19827_v23  ;;  %v9009_v16 = vpack.c.bf16 %v8793_v63, %v8791_v4  ;;  %v8575_v60 = vadd.f32 %v19807_v55, %v19801_v53  ;;  %v8578_v4 = vadd.f32 %v19827_v23, %v19823_v56 }
 0x6c2   : > { %14929 = vpow2.f32 %v8201_v32  ;;  %9349 = vmatprep.mubr.bf16.mxu0 %v9010_v59  ;;  %v9026_v5 = vpack.c.bf16 %v8826_v22, %v8824_v57  ;;  %v9025_v30 = vpack.c.bf16 %v8825_v18, %v8823_v43 }
 0x6c3   : > { %14931 = vrcp.f32 %v8325_v33  ;;  %8531 = vadd.xlane.f32.xlu1 %v8530_v13  ;;  %9350 = vmatmul.mubr.bf16.gmra.mrb[236].mxu0 %v9009_v16 }
 0x6c4   : > { %v19831_v6 = vpop.eup %14915  ;;  %14933 = vrcp.f32 %v8328_v28  ;;  %8576 = vadd.xlane.f32.xlu0 %v8575_v60  ;;  %v8376_v36 = vpop.xlane.xlu1 %8375  ;;  %9446 = vmatprep.mubr.bf16.mxu1 %v9026_v5  ;;  %v22357_v60 = vld [vmem:[#allocation89_spill] sm:$0xff] }
 0x6c5   : > { %22349 = vst [vmem:[#allocation205_spill] sm:$0xff] %v19831_v6  ;;  %v19833_v7 = vpop.eup %14917  ;;  %14935 = vrcp.f32 %v8373_v44  ;;  %v8331_v12 = vpop.xlane.xlu0 %8330  ;;  %9447 = vmatmul.mubr.bf16.gmra.mrb[236].mxu1 %v9025_v30  ;;  %v22358_v30 = vld [vmem:[#allocation93_spill] sm:$0xff] }
 0x6c6   : > { %22350 = vst [vmem:[#allocation32_spill] sm:$0xff] %v19833_v7  ;;  %14937 = vrcp.f32 %v8376_v36  ;;  %v8533_v59 = vadd.f32 %v19833_v7, %v19831_v6 }
 0x6c7   : > { %v19839_v18 = vpop.eup %14919  ;;  %14939 = vrcp.f32 %v8331_v12  ;;  %8579 = vadd.xlane.f32.xlu1 %v8578_v4  ;;  %v22359_v12 = vld [vmem:[#allocation87_spill] sm:$0xff] }
 0x6c8   : > { %22351 = vst [vmem:[#allocation208_spill] sm:$0xff] %v19839_v18  ;;  %v19841_v28 = vpop.eup %14921  ;;  %8534 = vadd.xlane.f32.xlu0 %v8533_v59  ;;  %v8334_v33 = vpop.xlane.xlu1 %8333  ;;  %v22360_v59 = vld [vmem:[#allocation91_spill] sm:$0xff] }
 0x6c9   : > { %22352 = vst [vmem:[#allocation37_spill] sm:$0xff] %v19841_v28  ;;  %v19843_v13 = vpop.eup %14923  ;;  %14941 = vrcp.f32 %v8334_v33  ;;  %v8379_v42 = vpop.xlane.xlu0 %8378  ;;  %v8536_v32 = vadd.f32 %v19841_v28, %v19839_v18  ;;  %v22364_v28 = vld [vmem:[#allocation94_spill] sm:$0xff] }
 0x6ca   : > { %22353 = vst [vmem:[#allocation21_spill] sm:$0xff] %v19843_v13  ;;  %v19847_v17 = vpop.eup %14925  ;;  %14943 = vrcp.f32 %v8379_v42 }
 0x6cb   : > { %22354 = vst [vmem:[#allocation175_spill] sm:$0xff] %v19847_v17  ;;  %v19849_v20 = vpop.eup %14927  ;;  %8537 = vadd.xlane.f32.xlu1 %v8536_v32  ;;  %v8581_v63 = vadd.f32 %v19847_v17, %v19843_v13 }
 0x6cc   : > { %22355 = vst [vmem:[#allocation178_spill] sm:$0xff] %v19849_v20  ;;  %v19853_v57 = vpop.eup %14929  ;;  %v8382_v43 = vpop.xlane.xlu1 %8381 }
 0x6cd   : > { %22356 = vst [vmem:[#allocation179_spill] sm:$0xff] %v19853_v57  ;;  %v14932_v44 = vpop.eup %14931  ;;  %8582 = vadd.xlane.f32.xlu0 %v8581_v63  ;;  %14945 = vrcp.f32 %v8382_v43  ;;  %v8337_v39 = vpop.xlane.xlu0 %8336  ;;  %v8584_v22 = vadd.f32 %v19853_v57, %v19849_v20  ;;  %v22361_v63 = vld [vmem:[#allocation92_spill] sm:$0xff] }
 0x6ce   : > { %v14934_v26 = vpop.eup %14933  ;;  %14947 = vrcp.f32 %v8337_v39  ;;  %v8796_v5 = vmul.f32 %v14932_v44, %v22357_v60  ;;  %v8795_v4 = vmul.f32 %v14932_v44, %v22359_v12  ;;  %v22362_v39 = vld [vmem:[#allocation69_spill] sm:$0xff] }
 0x6cf   : > { %v14936_v16 = vpop.eup %14935  ;;  %8585 = vadd.xlane.f32.xlu1 %v8584_v22  ;;  %v8798_v36 = vmul.f32 %v14934_v26, %v22358_v30  ;;  %v8797_v33 = vmul.f32 %v14934_v26, %v22360_v59  ;;  %v22363_v22 = vld [vmem:[#allocation88_spill] sm:$0xff] }
 0x6d0   : > { %v14938_v42 = vpop.eup %14937  ;;  %v8340_v32 = vpop.xlane.xlu1 %8339  ;;  %v8828_v43 = vmul.f32 %v14936_v16, %v22361_v63  ;;  %v8827_v60 = vmul.f32 %v14936_v16, %v22363_v22  ;;  %v22365_v63 = vld [vmem:[#allocation97_spill] sm:$0xff] }
 0x6d1   : > { %v14940_v17 = vpop.eup %14939  ;;  %v9012_v13 = vpack.c.bf16 %v8798_v36, %v8796_v5  ;;  %14949 = vrcp.f32 %v8340_v32  ;;  %v8385_v57 = vpop.xlane.xlu0 %8384  ;;  %v9011_v20 = vpack.c.bf16 %v8797_v33, %v8795_v4  ;;  %v8830_v6 = vmul.f32 %v14938_v42, %v22362_v39  ;;  %v22366_v5 = vld [vmem:[#allocation99_spill] sm:$0xff]  ;;  %v22367_v32 = vld [vmem:[#allocation64_spill] sm:$0xff]  ;;  %v22370_v22 = vld [vmem:[#allocation73_spill] sm:$0xff] }
 0x6d2   : > { %14951 = vrcp.f32 %v8385_v57  ;;  %v8829_v30 = vmul.f32 %v14938_v42, %v22364_v28  ;;  %v8800_v18 = vmul.f32 %v14940_v17, %v22365_v63  ;;  %v22368_v33 = vld [vmem:[#allocation95_spill] sm:$0xff] }
 0x6d3   : > { %v14942_v7 = vpop.eup %14941  ;;  %9357 = vmatprep.mubr.bf16.mxu0 %v9012_v13  ;;  %v9028_v44 = vpack.c.bf16 %v8830_v6, %v8828_v43  ;;  %v8799_v28 = vmul.f32 %v14940_v17, %v22368_v33  ;;  %v22369_v6 = vld [vmem:[#allocation96_spill] sm:$0xff]  ;;  %v22375_v33 = vld [vmem:[#allocation77_spill] sm:$0xff] }
 0x6d4   : > { %v14944_v26 = vpop.eup %14943  ;;  %9358 = vmatmul.mubr.bf16.gmra.mrb[240].mxu0 %v9011_v20  ;;  %v8388_v12 = vpop.xlane.xlu1 %8387  ;;  %v9027_v59 = vpack.c.bf16 %v8829_v30, %v8827_v60  ;;  %v8802_v36 = vmul.f32 %v14942_v7, %v22366_v5  ;;  %v8801_v4 = vmul.f32 %v14942_v7, %v22367_v32  ;;  %v22371_v30 = vld [vmem:[#allocation101_spill] sm:$0xff]  ;;  %v22372_v7 = vld [vmem:[#allocation98_spill] sm:$0xff] }
 0x6d5   : > { %9454 = vmatprep.mubr.bf16.mxu1 %v9028_v44  ;;  %14953 = vrcp.f32 %v8388_v12  ;;  %v8343_v57 = vpop.xlane.xlu0 %8342  ;;  %v8832_v13 = vmul.f32 %v14944_v26, %v22369_v6  ;;  %v8831_v63 = vmul.f32 %v14944_v26, %v22371_v30  ;;  %v22373_v32 = vld [vmem:[#allocation102_spill] sm:$0xff]  ;;  %v22376_v6 = vld [vmem:[#allocation100_spill] sm:$0xff] }
 0x6d6   : > { %9455 = vmatmul.mubr.bf16.gmra.mrb[240].mxu1 %v9027_v59  ;;  %v9014_v16 = vpack.c.bf16 %v8802_v36, %v8800_v18  ;;  %14955 = vrcp.f32 %v8343_v57  ;;  %v9013_v39 = vpack.c.bf16 %v8801_v4, %v8799_v28 }
 0x6d7   : > { %v14946_v42 = vpop.eup %14945 }
 0x6d8   : > { %v14948_v20 = vpop.eup %14947  ;;  %9365 = vmatprep.mubr.bf16.mxu0 %v9014_v16  ;;  %v8346_v43 = vpop.xlane.xlu1 %8345  ;;  %v8834_v60 = vmul.f32 %v14946_v42, %v22370_v22  ;;  %v8833_v44 = vmul.f32 %v14946_v42, %v22372_v7  ;;  %v22374_v16 = vld [vmem:[#allocation103_spill] sm:$0xff]  ;;  %v22377_v22 = vld [vmem:[#allocation109_spill] sm:$0xff] }
 0x6d9   : > { %14957 = vrcp.f32 %v8346_v43  ;;  %v8391_v12 = vpop.xlane.xlu0 %8390  ;;  %v8804_v57 = vmul.f32 %v14948_v20, %v22373_v32  ;;  %v8803_v43 = vmul.f32 %v14948_v20, %v22376_v6  ;;  %v22383_v6 = vld [vmem:[#allocation111_spill] sm:$0xff] }
 0x6da   : > { %14959 = vrcp.f32 %v8391_v12  ;;  %v9030_v18 = vpack.c.bf16 %v8834_v60, %v8832_v13  ;;  %v9029_v59 = vpack.c.bf16 %v8833_v44, %v8831_v63  ;;  %v22378_v63 = vld [vmem:[#allocation106_spill] sm:$0xff]  ;;  %v22379_v44 = vld [vmem:[#allocation107_spill] sm:$0xff] }
 0x6db   : > { %v14950_v17 = vpop.eup %14949 }
 0x6dc   : > { %v14952_v5 = vpop.eup %14951  ;;  %9366 = vmatmul.mubr.bf16.gmra.mrb[244].mxu0 %v9013_v39  ;;  %9462 = vmatprep.mubr.bf16.mxu1 %v9030_v18  ;;  %v8394_v36 = vpop.xlane.xlu1 %8393  ;;  %v8806_v4 = vmul.f32 %v14950_v17, %v22374_v16  ;;  %v8805_v28 = vmul.f32 %v14950_v17, %v22375_v33  ;;  %v22380_v18 = vld [vmem:[#allocation104_spill] sm:$0xff]  ;;  %v22381_v33 = vld [vmem:[#allocation110_spill] sm:$0xff] }
 0x6dd   : > { %14961 = vrcp.f32 %v8394_v36  ;;  %v8397_v26 = vpop.xlane.xlu0 %8396  ;;  %v8836_v60 = vmul.f32 %v14952_v5, %v22377_v22  ;;  %v8835_v12 = vmul.f32 %v14952_v5, %v22379_v44  ;;  %v22385_v44 = vld [vmem:[#allocation118_spill] sm:$0xff] }
 0x6de   : > { %14963 = vrcp.f32 %v8397_v26  ;;  %9463 = vmatmul.mubr.bf16.gmra.mrb[244].mxu1 %v9029_v59  ;;  %v9016_v42 = vpack.c.bf16 %v8806_v4, %v8804_v57  ;;  %v9015_v30 = vpack.c.bf16 %v8805_v28, %v8803_v43  ;;  %v22382_v28 = vld [vmem:[#allocation113_spill] sm:$0xff] }
 0x6df   : > { %v14954_v13 = vpop.eup %14953 }
 0x6e0   : > { %9373 = vmatprep.mubr.bf16.mxu0 %v9016_v42  ;;  %v8400_v39 = vpop.xlane.xlu1 %8399  ;;  %v8838_v7 = vmul.f32 %v14954_v13, %v22378_v63  ;;  %v8837_v32 = vmul.f32 %v14954_v13, %v22380_v18  ;;  %v14956_v17 = vpop.eup %14955 }
 0x6e1   : > { %14965 = vrcp.f32 %v8400_v39  ;;  %v8445_v36 = vpop.xlane.xlu0 %8444  ;;  %v8808_v26 = vmul.f32 %v14956_v17, %v22381_v33  ;;  %v22384_v39 = vld [vmem:[#allocation108_spill] sm:$0xff]  ;;  %v22388_v33 = vld [vmem:[#allocation114_spill] sm:$0xff] }
 0x6e2   : > { %14967 = vrcp.f32 %v8445_v36  ;;  %v9032_v59 = vpack.c.bf16 %v8838_v7, %v8836_v60  ;;  %v9031_v57 = vpack.c.bf16 %v8837_v32, %v8835_v12  ;;  %v8807_v63 = vmul.f32 %v14956_v17, %v22384_v39  ;;  %v22386_v12 = vld [vmem:[#allocation115_spill] sm:$0xff] }
 0x6e3   : > { %v14958_v16 = vpop.eup %14957  ;;  %v12571_v13 = vpop.f32.mrb[192].mxu0 }
 0x6e4   : > { %v14960_v20 = vpop.eup %14959  ;;  %9374 = vmatmul.mubr.bf16.gmra.mrb[248].mxu0 %v9015_v30  ;;  %9470 = vmatprep.mubr.bf16.mxu1 %v9032_v59  ;;  %v8448_v4 = vpop.xlane.xlu1 %8447  ;;  %v8810_v42 = vmul.f32 %v14958_v16, %v22382_v28  ;;  %v8809_v43 = vmul.f32 %v14958_v16, %v22383_v6 }
 0x6e5   : > { %14969 = vrcp.f32 %v8448_v4  ;;  %v8403_v5 = vpop.xlane.xlu0 %8402  ;;  %v12572_v7 = vpop.f32.mrb[193].mxu0  ;;  %v8840_v30 = vmul.f32 %v14960_v20, %v22385_v44  ;;  %v8839_v18 = vmul.f32 %v14960_v20, %v22386_v12 }
 0x6e6   : > { %9471 = vmatmul.mubr.bf16.gmra.mrb[248].mxu1 %v9031_v57  ;;  %v9018_v22 = vpack.c.bf16 %v8810_v42, %v8808_v26  ;;  %14971 = vrcp.f32 %v8403_v5  ;;  %v19887_v36 = vadd.f32 %v12572_v7, %v12571_v13  ;;  %v12574_v59 = vpop.f32.mrb[194].mxu0  ;;  %v9017_v4 = vpack.c.bf16 %v8809_v43, %v8807_v63  ;;  %v22389_v57 = vld [vmem:[#allocation112_spill] sm:$0xff]  ;;  %v22392_v7 = vld [vmem:[#allocation117_spill] sm:$0xff] }
 0x6e7   : > { %v14962_v60 = vpop.eup %14961  ;;  %v12575_v42 = vpop.f32.mrb[195].mxu0 }
 0x6e8   : > { %v14964_v32 = vpop.eup %14963  ;;  %22387 = vst [vmem:[#allocation185_spill] sm:$0xff] %v19887_v36  ;;  %9381 = vmatprep.mubr.bf16.mxu0 %v9018_v22  ;;  %v8406_v16 = vpop.xlane.xlu1 %8405  ;;  %v8842_v28 = vmul.f32 %v14962_v60, %v22388_v33  ;;  %v8841_v26 = vmul.f32 %v14962_v60, %v22389_v57  ;;  %v19891_v6 = vadd.f32 %v12575_v42, %v12574_v59  ;;  %v22393_v33 = vld [vmem:[#allocation120_spill] sm:$0xff]  ;;  %v22394_v57 = vld [vmem:[#allocation125_spill] sm:$0xff] }
 0x6e9   : > { %v12635_v17 = vpop.f32.mrb[192].mxu1  ;;  %14973 = vrcp.f32 %v8406_v16  ;;  %v8451_v39 = vpop.xlane.xlu0 %8450  ;;  %v8844_v43 = vmul.f32 %v14964_v32, %v22392_v7  ;;  %v5547_v36 = vld [vmem:[#allocation3 + $0x348] sm:$0xff] }
 0x6ea   : > { %22390 = vst [vmem:[#allocation190_spill] sm:$0xff] %v19891_v6  ;;  %v12636_v5 = vpop.f32.mrb[193].mxu1  ;;  %v9034_v44 = vpack.c.bf16 %v8842_v28, %v8840_v30  ;;  %v9033_v20 = vpack.c.bf16 %v8841_v26, %v8839_v18  ;;  %14975 = vrcp.f32 %v8451_v39  ;;  %v22396_v28 = vld [vmem:[#allocation116_spill] sm:$0xff]  ;;  %v22397_v39 = vld [vmem:[#allocation131_spill] sm:$0xff]  ;;  %v5564_v6 = vld [vmem:[#allocation3 + $0x3d0] sm:$0xff] }
 0x6eb   : > { %v14966_v12 = vpop.eup %14965  ;;  %v19893_v13 = vadd.f32 %v12636_v5, %v12635_v17  ;;  %v12638_v22 = vpop.f32.mrb[194].mxu1  ;;  %v8843_v26 = vmul.f32 %v14964_v32, %v22396_v28 }
 0x6ec   : > { %v14968_v63 = vpop.eup %14967  ;;  %v8845_v23 = vmul.f32 %v14966_v12, %v22393_v33  ;;  %9382 = vmatmul.mubr.bf16.gmra.mrb[252].mxu0 %v9017_v4  ;;  %v12639_v59 = vpop.f32.mrb[195].mxu1  ;;  %9478 = vmatprep.mubr.bf16.mxu1 %v9034_v44  ;;  %v8846_v30 = vmul.f32 %v14966_v12, %v22394_v57  ;;  %v22398_v44 = vld [vmem:[#allocation124_spill] sm:$0xff] }
 0x6ed   : > { %22391 = vst [vmem:[#allocation192_spill] sm:$0xff] %v19893_v13  ;;  %v8454_v16 = vpop.xlane.xlu1 %8453  ;;  %v19900_v18 = vadd.f32 %v12639_v59, %v12638_v22  ;;  %v8409_v42 = vpop.xlane.xlu0 %8408  ;;  %v8875_v7 = vmul.f32 %v14968_v63, %v22397_v39  ;;  %v22399_v22 = vld [vmem:[#allocation122_spill] sm:$0xff]  ;;  %v22401_v33 = vld [vmem:[#allocation132_spill] sm:$0xff] }
 0x6ee   : > { %14977 = vrcp.f32 %v8454_v16  ;;  %9479 = vmatmul.mubr.bf16.gmra.mrb[252].mxu1 %v9033_v20  ;;  %v9036_v17 = vpack.c.bf16 %v8846_v30, %v8844_v43  ;;  %v9035_v4 = vpack.c.bf16 %v8845_v23, %v8843_v26  ;;  %v8876_v59 = vmul.f32 %v14968_v63, %v22399_v22  ;;  %v22400_v16 = vld [vmem:[#allocation119_spill] sm:$0xff]  ;;  %v5538_v30 = vld [vmem:[#allocation3 + $0x300] sm:$0xff] }
 0x6ef   : > { %22395 = vst [vmem:[#allocation197_spill] sm:$0xff] %v19900_v18  ;;  %v14970_v5 = vpop.eup %14969  ;;  %14979 = vrcp.f32 %v8409_v42  ;;  %v5554_v26 = vld [vmem:[#allocation3 + $0x380] sm:$0xff]  ;;  %v22403_v63 = vld [vmem:[#allocation123_spill] sm:$0xff] }
 0x6f0   : > { %v8877_v60 = vmul.f32 %v14970_v5, %v22398_v44  ;;  %9519 = vmatprep.mubr.bf16.mxu0 %v9036_v17  ;;  %v8878_v57 = vmul.f32 %v14970_v5, %v22400_v16  ;;  %v14972_v32 = vpop.eup %14971  ;;  %v22402_v17 = vld [vmem:[#allocation121_spill] sm:$0xff] }
 0x6f1   : > { %v8412_v12 = vpop.xlane.xlu1 %8411  ;;  %v8457_v43 = vpop.xlane.xlu0 %8456  ;;  %v8848_v44 = vmul.f32 %v14972_v32, %v22402_v17  ;;  %v22404_v16 = vld [vmem:[#allocation129_spill] sm:$0xff]  ;;  %v5548_v17 = vld [vmem:[#allocation3 + $0x350] sm:$0xff] }
 0x6f2   : > { %14981 = vrcp.f32 %v8412_v12  ;;  %v9051_v20 = vpack.c.bf16 %v8877_v60, %v8875_v7  ;;  %v9052_v28 = vpack.c.bf16 %v8878_v57, %v8876_v59  ;;  %v8847_v12 = vmul.f32 %v14972_v32, %v22404_v16  ;;  %v5563_v60 = vld [vmem:[#allocation3 + $0x3c8] sm:$0xff]  ;;  %v22408_v16 = vld [vmem:[#allocation135_spill] sm:$0xff] }
 0x6f3   : > { %v14974_v39 = vpop.eup %14973  ;;  %14983 = vrcp.f32 %v8457_v43  ;;  %v5539_v57 = vld [vmem:[#allocation3 + $0x308] sm:$0xff] }
 0x6f4   : > { %v8849_v42 = vmul.f32 %v14974_v39, %v22401_v33  ;;  %9520 = vmatmul.mubr.bf16.vlgmr.msra.gmra.mrb[0].mxu0 %v9035_v4  ;;  %9616 = vmatprep.mubr.bf16.mxu1 %v9052_v28  ;;  %v8850_v22 = vmul.f32 %v14974_v39, %v22403_v63  ;;  %v14976_v5 = vpop.eup %14975  ;;  %v22405_v43 = vld [vmem:[#allocation133_spill] sm:$0xff]  ;;  %v22406_v39 = vld [vmem:[#allocation134_spill] sm:$0xff] }
 0x6f5   : > { %v8460_v23 = vpop.xlane.xlu1 %8459  ;;  %12940 = vmatpush3.bf16.msra.mxu0 %v5538_v30  ;;  %v8415_v7 = vpop.xlane.xlu0 %8414  ;;  %v8879_v28 = vmul.f32 %v14976_v5, %v22405_v43  ;;  %v22407_v30 = vld [vmem:[#allocation126_spill] sm:$0xff] }
 0x6f6   : > { %14985 = vrcp.f32 %v8460_v23  ;;  %9617 = vmatmul.mubr.bf16.vlgmr.msra.gmra.mrb[0].mxu1 %v9051_v20  ;;  %v9038_v59 = vpack.c.bf16 %v8850_v22, %v8848_v44  ;;  %12941 = vmatprep.subr.bf16.mxu0 %v5547_v36  ;;  %v9037_v4 = vpack.c.bf16 %v8849_v42, %v8847_v12  ;;  %v12577_v13 = vpop.f32.mrb[196].mxu0  ;;  %v8880_v23 = vmul.f32 %v14976_v5, %v22407_v30  ;;  %v5555_v36 = vld [vmem:[#allocation3 + $0x388] sm:$0xff] }
 0x6f7   : > { %14987 = vrcp.f32 %v8415_v7  ;;  %13004 = vmatpush3.bf16.msra.mxu1 %v5554_v26  ;;  %v12578_v18 = vpop.f32.mrb[197].mxu0 }
 0x6f8   : > { %v14978_v33 = vpop.eup %14977  ;;  %9527 = vmatprep.mubr.bf16.mxu0 %v9038_v59  ;;  %13005 = vmatprep.subr.bf16.mxu1 %v5563_v60  ;;  %v19917_v22 = vadd.f32 %v12578_v18, %v12577_v13  ;;  %v12580_v42 = vpop.f32.mrb[198].mxu0  ;;  %v5540_v59 = vld [vmem:[#allocation3 + $0x310] sm:$0xff]  ;;  %v22411_v13 = vld [vmem:[#allocation105_spill] sm:$0xff] }
 0x6f9   : > { %v8881_v63 = vmul.f32 %v14978_v33, %v22406_v39  ;;  %v8418_v32 = vpop.xlane.xlu1 %8417  ;;  %v8882_v20 = vmul.f32 %v14978_v33, %v22408_v16  ;;  %v14980_v44 = vpop.eup %14979  ;;  %12942 = vmatpush3.bf16.msra.mxu0 %v5539_v57  ;;  %v5556_v16 = vld [vmem:[#allocation3 + $0x390] sm:$0xff] }
 0x6fa   : > { %22409 = vst [vmem:[#allocation187_spill] sm:$0xff] %v19917_v22  ;;  %v12641_v12 = vpop.f32.mrb[196].mxu1  ;;  %14989 = vrcp.f32 %v8418_v32  ;;  %v12581_v7 = vpop.f32.mrb[199].mxu0  ;;  %12943 = vmatprep.subr.bf16.mxu0 %v5548_v17  ;;  %v22413_v17 = vld [vmem:[#allocation139_spill] sm:$0xff] }
 0x6fb   : > { %v9053_v26 = vpack.c.bf16 %v8881_v63, %v8879_v28  ;;  %v12642_v43 = vpop.f32.mrb[197].mxu1  ;;  %v9054_v39 = vpack.c.bf16 %v8882_v20, %v8880_v23  ;;  %v19919_v5 = vadd.f32 %v12581_v7, %v12580_v42  ;;  %v8463_v60 = vpop.xlane.xlu0 %8462  ;;  %13006 = vmatpush3.bf16.msra.mxu1 %v5555_v36  ;;  %v22412_v63 = vld [vmem:[#allocation90_spill] sm:$0xff]  ;;  %v5549_v20 = vld [vmem:[#allocation3 + $0x358] sm:$0xff] }
 0x6fc   : > { %v14982_v55 = vpop.eup %14981  ;;  %v19921_v33 = vadd.f32 %v12642_v43, %v12641_v12  ;;  %v12644_v30 = vpop.f32.mrb[198].mxu1  ;;  %14991 = vrcp.f32 %v8463_v60  ;;  %9528 = vmatmul.mubr.bf16.gmra.mrb[4].mxu0 %v9037_v4  ;;  %v8852_v32 = vmul.f32 %v14980_v44, %v22412_v63  ;;  %v22414_v7 = vld [vmem:[#allocation138_spill] sm:$0xff]  ;;  %13007 = vmatprep.subr.bf16.mxu1 %v5564_v6  ;;  %v5565_v4 = vld [vmem:[#allocation3 + $0x3d8] sm:$0xff] }
 0x6fd   : > { %v8853_v18 = vmul.f32 %v14982_v55, %v22411_v13  ;;  %v12645_v57 = vpop.f32.mrb[199].mxu1  ;;  %9624 = vmatprep.mubr.bf16.mxu1 %v9054_v39  ;;  %v8466_v28 = vpop.xlane.xlu1 %8465  ;;  %v8854_v23 = vmul.f32 %v14982_v55, %v22413_v17  ;;  %v8851_v12 = vmul.f32 %v14980_v44, %v22414_v7  ;;  %12944 = vmatpush3.bf16.msra.mxu0 %v5540_v59  ;;  %v5541_v60 = vld [vmem:[#allocation3 + $0x318] sm:$0xff]  ;;  %v22416_v55 = vld [vmem:[#allocation142_spill] sm:$0xff]  ;;  %v5550_v7 = vld [vmem:[#allocation3 + $0x360] sm:$0xff] }
 0x6fe   : > { %22410 = vst [vmem:[#allocation189_spill] sm:$0xff] %v19921_v33  ;;  %v14984_v42 = vpop.eup %14983  ;;  %v19929_v36 = vadd.f32 %v12645_v57, %v12644_v30  ;;  %14993 = vrcp.f32 %v8466_v28  ;;  %9625 = vmatmul.mubr.bf16.gmra.mrb[4].mxu1 %v9053_v26  ;;  %12945 = vmatprep.subr.bf16.mxu0 %v5549_v20  ;;  %v22417_v30 = vld [vmem:[#allocation137_spill] sm:$0xff]  ;;  %v22418_v59 = vld [vmem:[#allocation136_spill] sm:$0xff] }
 0x6ff   : > { %v9040_v39 = vpack.c.bf16 %v8854_v23, %v8852_v32  ;;  %v9039_v63 = vpack.c.bf16 %v8853_v18, %v8851_v12  ;;  %v8883_v17 = vmul.f32 %v14984_v42, %v22416_v55  ;;  %v8421_v44 = vpop.xlane.xlu0 %8420  ;;  %13008 = vmatpush3.bf16.msra.mxu1 %v5556_v16  ;;  %v8884_v26 = vmul.f32 %v14984_v42, %v22418_v59  ;;  %v22419_v28 = vld [vmem:[#allocation140_spill] sm:$0xff]  ;;  %v5557_v18 = vld [vmem:[#allocation3 + $0x398] sm:$0xff] }
 0x700   : > { %22415 = vst [vmem:[#allocation211_spill] sm:$0xff] %v19929_v36  ;;  %v14986_v13 = vpop.eup %14985  ;;  %14995 = vrcp.f32 %v8421_v44  ;;  %13009 = vmatprep.subr.bf16.mxu1 %v5565_v4  ;;  %v5542_v16 = vld [vmem:[#allocation3 + $0x320] sm:$0xff]  ;;  %v5551_v44 = vld [vmem:[#allocation3 + $0x368] sm:$0xff]  ;;  %v22422_v59 = vld [vmem:[#allocation143_spill] sm:$0xff] }
 0x701   : > { %v8885_v57 = vmul.f32 %v14986_v13, %v22417_v30  ;;  %9535 = vmatprep.mubr.bf16.mxu0 %v9040_v39  ;;  %v8424_v6 = vpop.xlane.xlu1 %8423  ;;  %v8886_v32 = vmul.f32 %v14986_v13, %v22419_v28  ;;  %v14988_v23 = vpop.eup %14987  ;;  %12946 = vmatpush3.bf16.msra.mxu0 %v5541_v60  ;;  %v5566_v20 = vld [vmem:[#allocation3 + $0x3e0] sm:$0xff]  ;;  %v5568_v36 = vld [vmem:[#allocation3 + $0x3f0] sm:$0xff] }
 0x702   : > { %14997 = vrcp.f32 %v8424_v6  ;;  %12947 = vmatprep.subr.bf16.mxu0 %v5550_v7  ;;  %v22420_v39 = vld [vmem:[#allocation148_spill] sm:$0xff]  ;;  %v5567_v7 = vld [vmem:[#allocation3 + $0x3e8] sm:$0xff] }
 0x703   : > { %v9055_v12 = vpack.c.bf16 %v8885_v57, %v8883_v17  ;;  %v9056_v55 = vpack.c.bf16 %v8886_v32, %v8884_v26  ;;  %v8469_v43 = vpop.xlane.xlu0 %8468  ;;  %13010 = vmatpush3.bf16.msra.mxu1 %v5557_v18  ;;  %v22421_v4 = vld [vmem:[#allocation144_spill] sm:$0xff]  ;;  %v22423_v17 = vld [vmem:[#allocation141_spill] sm:$0xff]  ;;  %v22424_v18 = vld [vmem:[#allocation146_spill] sm:$0xff] }
 0x704   : > { %v14990_v56 = vpop.eup %14989  ;;  %14999 = vrcp.f32 %v8469_v43  ;;  %9536 = vmatmul.mubr.bf16.gmra.mrb[8].mxu0 %v9039_v63  ;;  %v8856_v13 = vmul.f32 %v14988_v23, %v22421_v4  ;;  %v5558_v60 = vld [vmem:[#allocation3 + $0x3a0] sm:$0xff]  ;;  %v8855_v57 = vmul.f32 %v14988_v23, %v22423_v17  ;;  %13011 = vmatprep.subr.bf16.mxu1 %v5566_v20  ;;  %v5543_v32 = vld [vmem:[#allocation3 + $0x328] sm:$0xff]  ;;  %v22426_v20 = vld [vmem:[#allocation154_spill] sm:$0xff] }
 0x705   : > { %v8857_v30 = vmul.f32 %v14990_v56, %v22420_v39  ;;  %9632 = vmatprep.mubr.bf16.mxu1 %v9056_v55  ;;  %v8472_v42 = vpop.xlane.xlu1 %8471  ;;  %v8858_v6 = vmul.f32 %v14990_v56, %v22422_v59  ;;  %12948 = vmatpush3.bf16.msra.mxu0 %v5542_v16  ;;  %v5552_v56 = vld [vmem:[#allocation3 + $0x370] sm:$0xff]  ;;  %v22425_v59 = vld [vmem:[#allocation151_spill] sm:$0xff] }
 0x706   : > { %15001 = vrcp.f32 %v8472_v42  ;;  %v14992_v26 = vpop.eup %14991  ;;  %9633 = vmatmul.mubr.bf16.gmra.mrb[8].mxu1 %v9055_v12  ;;  %12949 = vmatprep.subr.bf16.mxu0 %v5551_v44  ;;  %v12583_v39 = vpop.f32.mrb[200].mxu0  ;;  %v22427_v12 = vld [vmem:[#allocation158_spill] sm:$0xff]  ;;  %v5559_v44 = vld [vmem:[#allocation3 + $0x3a8] sm:$0xff] }
 0x707   : > { %v9042_v28 = vpack.c.bf16 %v8858_v6, %v8856_v13  ;;  %v9041_v63 = vpack.c.bf16 %v8857_v30, %v8855_v57  ;;  %v8887_v55 = vmul.f32 %v14992_v26, %v22424_v18  ;;  %v8427_v4 = vpop.xlane.xlu0 %8426  ;;  %13012 = vmatpush3.bf16.msra.mxu1 %v5558_v60  ;;  %v12584_v23 = vpop.f32.mrb[201].mxu0  ;;  %v8888_v42 = vmul.f32 %v14992_v26, %v22426_v20  ;;  %v22428_v20 = vld [vmem:[#allocation150_spill] sm:$0xff] }
 0x708   : > { %v14994_v43 = vpop.eup %14993  ;;  %15003 = vrcp.f32 %v8427_v4  ;;  %13013 = vmatprep.subr.bf16.mxu1 %v5567_v7  ;;  %v19945_v6 = vadd.f32 %v12584_v23, %v12583_v39  ;;  %v12586_v30 = vpop.f32.mrb[202].mxu0  ;;  %v5553_v23 = vld [vmem:[#allocation3 + $0x378] sm:$0xff] }
 0x709   : > { %v8889_v33 = vmul.f32 %v14994_v43, %v22425_v59  ;;  %9543 = vmatprep.mubr.bf16.mxu0 %v9042_v28  ;;  %v8430_v16 = vpop.xlane.xlu1 %8429  ;;  %v8890_v13 = vmul.f32 %v14994_v43, %v22427_v12  ;;  %v12647_v17 = vpop.f32.mrb[200].mxu1  ;;  %12950 = vmatpush3.bf16.msra.mxu0 %v5543_v32  ;;  %v5544_v28 = vld [vmem:[#allocation3 + $0x330] sm:$0xff] }
 0x70a   : > { %15005 = vrcp.f32 %v8430_v16  ;;  %v14996_v60 = vpop.eup %14995  ;;  %v12587_v18 = vpop.f32.mrb[203].mxu0  ;;  %12951 = vmatprep.subr.bf16.mxu0 %v5552_v56 }
 0x70b   : > { %v9057_v57 = vpack.c.bf16 %v8889_v33, %v8887_v55  ;;  %v12648_v59 = vpop.f32.mrb[201].mxu1  ;;  %v9058_v4 = vpack.c.bf16 %v8890_v13, %v8888_v42  ;;  %v19947_v26 = vadd.f32 %v12587_v18, %v12586_v30  ;;  %v8475_v7 = vpop.xlane.xlu0 %8474  ;;  %13014 = vmatpush3.bf16.msra.mxu1 %v5559_v44  ;;  %v22429_v55 = vld [vmem:[#allocation145_spill] sm:$0xff]  ;;  %v22430_v42 = vld [vmem:[#allocation152_spill] sm:$0xff]  ;;  %v5560_v13 = vld [vmem:[#allocation3 + $0x3b0] sm:$0xff] }
 0x70c   : > { %v14998_v22 = vpop.eup %14997  ;;  %v19949_v43 = vadd.f32 %v12648_v59, %v12647_v17  ;;  %v12650_v39 = vpop.f32.mrb[202].mxu1  ;;  %15007 = vrcp.f32 %v8475_v7  ;;  %9544 = vmatmul.mubr.bf16.gmra.mrb[12].mxu0 %v9041_v63  ;;  %v8860_v56 = vmul.f32 %v14996_v60, %v22429_v55  ;;  %v22431_v30 = vld [vmem:[#allocation157_spill] sm:$0xff]  ;;  %13015 = vmatprep.subr.bf16.mxu1 %v5568_v36  ;;  %v5569_v44 = vld [vmem:[#allocation3 + $0x3f8] sm:$0xff] }
 0x70d   : > { %v8861_v16 = vmul.f32 %v14998_v22, %v22428_v20  ;;  %v12651_v33 = vpop.f32.mrb[203].mxu1  ;;  %9640 = vmatprep.mubr.bf16.mxu1 %v9058_v4  ;;  %v8478_v32 = vpop.xlane.xlu1 %8477  ;;  %v8862_v12 = vmul.f32 %v14998_v22, %v22430_v42  ;;  %v8859_v18 = vmul.f32 %v14996_v60, %v22431_v30  ;;  %v9877_v17 = vpack.c.bf16 %v19947_v26, %v19945_v6  ;;  %v5545_v7 = vld [vmem:[#allocation3 + $0x338] sm:$0xff]  ;;  %v22432_v22 = vld [vmem:[#allocation156_spill] sm:$0xff] }
 0x70e   : > { %v19957_v59 = vadd.f32 %v12651_v33, %v12650_v39  ;;  %15009 = vrcp.f32 %v8478_v32  ;;  %12952 = vmatpush3.bf16.msra.mxu0 %v5544_v28  ;;  %v15000_v63 = vpop.eup %14999  ;;  %9641 = vmatmul.mubr.bf16.gmra.mrb[12].mxu1 %v9057_v57  ;;  %v19965_v28 = vld [vmem:[%s20640_s5] sm:$0xf]  ;;  %v22433_v39 = vld [vmem:[#allocation147_spill] sm:$0xff] }
 0x70f   : > { %v9044_v4 = vpack.c.bf16 %v8862_v12, %v8860_v56  ;;  %12953 = vmatprep.subr.bf16.mxu0 %v5553_v23  ;;  %v9043_v55 = vpack.c.bf16 %v8861_v16, %v8859_v18  ;;  %v8891_v42 = vmul.f32 %v15000_v63, %v22432_v22  ;;  %v8433_v30 = vpop.xlane.xlu0 %8432  ;;  %13016 = vmatpush3.bf16.msra.mxu1 %v5560_v13  ;;  %v5561_v33 = vld [vmem:[#allocation3 + $0x3b8] sm:$0xff] }
 0x710   : > { %v15002_v20 = vpop.eup %15001  ;;  %v9885_v60 = vpack.c.bf16 %v19957_v59, %v19949_v43  ;;  %15011 = vrcp.f32 %v8433_v30  ;;  %v8892_v23 = vmul.f32 %v15000_v63, %v22433_v39  ;;  %13017 = vmatprep.subr.bf16.mxu1 %v5569_v44 }
 0x711   : > { %v8893_v36 = vmul.f32 %v15002_v20, %v19270_v34  ;;  %9551 = vmatprep.mubr.bf16.mxu0 %v9044_v4  ;;  %v8436_v57 = vpop.xlane.xlu1 %8435  ;;  %v8894_v16 = vmul.f32 %v15002_v20, %v19277_v54  ;;  %v19975_v34 = vld [vmem:[%s20640_s5 + $0x4] sm:$0xf] }
 0x712   : > { %15013 = vrcp.f32 %v8436_v57  ;;  %12954 = vmatpush3.bf16.msra.mxu0 %v5545_v7  ;;  %v15004_v32 = vpop.eup %15003  ;;  %v22434_v57 = vld [vmem:[#allocation153_spill] sm:$0xff] }
 0x713   : > { %v9059_v56 = vpack.c.bf16 %v8893_v36, %v8891_v42  ;;  %v9060_v12 = vpack.c.bf16 %v8894_v16, %v8892_v23  ;;  %14179 = vmatprep.subr.msk.bf16.mxu0 %vm9971_vm4, %v19965_v28  ;;  %v8481_v18 = vpop.xlane.xlu0 %8480  ;;  %13018 = vmatpush3.bf16.msra.mxu1 %v5561_v33  ;;  %v8864_v63 = vmul.f32 %v15004_v32, %v19289_v0  ;;  %v22436_v16 = vld [vmem:[#allocation155_spill] sm:$0xff] }
 0x714   : > { %v15006_v13 = vpop.eup %15005  ;;  %15015 = vrcp.f32 %v8481_v18  ;;  %9552 = vmatmul.mubr.bf16.gmra.mrb[16].mxu0 %v9043_v55  ;;  %v8863_v7 = vmul.f32 %v15004_v32, %v19284_v8  ;;  %14180 = vmatprep.subr.msk.bf16.mxu1 %vm9971_vm4, %v19975_v34  ;;  %v22435_v8 = vld [vmem:[#allocation149_spill] sm:$0xff] }
 0x715   : > { %v8865_v54 = vmul.f32 %v15006_v13, %v19298_v14  ;;  %9648 = vmatprep.mubr.bf16.mxu1 %v9060_v12  ;;  %v8484_v44 = vpop.xlane.xlu1 %8483  ;;  %v8866_v4 = vmul.f32 %v15006_v13, %v19305_v50  ;;  %v12589_v55 = vpop.f32.mrb[204].mxu0 }
 0x716   : > { %15017 = vrcp.f32 %v8484_v44  ;;  %v15008_v20 = vpop.eup %15007  ;;  %9649 = vmatmul.mubr.bf16.gmra.mrb[16].mxu1 %v9059_v56  ;;  %v12590_v0 = vpop.f32.mrb[205].mxu0 }
 0x717   : > { %v9046_v22 = vpack.c.bf16 %v8866_v4, %v8864_v63  ;;  %v9045_v30 = vpack.c.bf16 %v8865_v54, %v8863_v7  ;;  %v8895_v14 = vmul.f32 %v15008_v20, %v19315_v38  ;;  %v8439_v36 = vpop.xlane.xlu0 %8438  ;;  %v8896_v23 = vmul.f32 %v15008_v20, %v22435_v8  ;;  %v12592_v56 = vpop.f32.mrb[206].mxu0  ;;  %v22437_v20 = vld [vmem:[#allocation167_spill] sm:$0xff]  ;;  %v22440_v8 = vld [vmem:[#allocation168_spill] sm:$0xff] }
 0x718   : > { %v15010_v42 = vpop.eup %15009  ;;  %15019 = vrcp.f32 %v8439_v36  ;;  %v19987_v32 = vadd.f32 %v12590_v0, %v12589_v55  ;;  %v12653_v12 = vpop.f32.mrb[204].mxu1  ;;  %v22438_v0 = vld [vmem:[#allocation171_spill] sm:$0xff] }
 0x719   : > { %v8897_v39 = vmul.f32 %v15010_v42, %v22434_v57  ;;  %9559 = vmatprep.mubr.bf16.mxu0 %v9046_v22  ;;  %v8442_v50 = vpop.xlane.xlu1 %8441  ;;  %v8898_v33 = vmul.f32 %v15010_v42, %v22436_v16  ;;  %v12593_v38 = vpop.f32.mrb[207].mxu0 }
 0x71a   : > { %15021 = vrcp.f32 %v8442_v50  ;;  %v15012_v13 = vpop.eup %15011  ;;  %v12654_v54 = vpop.f32.mrb[205].mxu1  ;;  %v19989_v4 = vadd.f32 %v12593_v38, %v12592_v56 }
 0x71b   : > { %v9061_v18 = vpack.c.bf16 %v8897_v39, %v8895_v14  ;;  %v9062_v44 = vpack.c.bf16 %v8898_v33, %v8896_v23  ;;  %v19991_v7 = vadd.f32 %v12654_v54, %v12653_v12  ;;  %v8487_v22 = vpop.xlane.xlu0 %8486  ;;  %v12656_v36 = vpop.f32.mrb[206].mxu1  ;;  %v8868_v50 = vmul.f32 %v15012_v13, %v22438_v0  ;;  %v22439_v14 = vld [vmem:[#allocation169_spill] sm:$0xff]  ;;  %v22442_v0 = vld [vmem:[#allocation182_spill] sm:$0xff] }
 0x71c   : > { %v15014_v63 = vpop.eup %15013  ;;  %15023 = vrcp.f32 %v8487_v22  ;;  %9560 = vmatmul.mubr.bf16.gmra.mrb[20].mxu0 %v9045_v30  ;;  %v12657_v42 = vpop.f32.mrb[207].mxu1  ;;  %v8867_v23 = vmul.f32 %v15012_v13, %v22440_v8  ;;  %v9878_v16 = vpack.c.bf16 %v19989_v4, %v19987_v32  ;;  %v22441_v54 = vld [vmem:[#allocation177_spill] sm:$0xff] }
 0x71d   : > { %v8869_v57 = vmul.f32 %v15014_v63, %v22437_v20  ;;  %9656 = vmatprep.mubr.bf16.mxu1 %v9062_v44  ;;  %v8490_v55 = vpop.xlane.xlu1 %8489  ;;  %v8870_v39 = vmul.f32 %v15014_v63, %v22439_v14  ;;  %v19999_v33 = vadd.f32 %v12657_v42, %v12656_v36 }
 0x71e   : > { %15025 = vrcp.f32 %v8490_v55  ;;  %v15016_v56 = vpop.eup %15015  ;;  %9657 = vmatmul.mubr.bf16.gmra.mrb[20].mxu1 %v9061_v18 }
 0x71f   : > { %v9048_v12 = vpack.c.bf16 %v8870_v39, %v8868_v50  ;;  %v9047_v30 = vpack.c.bf16 %v8869_v57, %v8867_v23  ;;  %v8899_v44 = vmul.f32 %v15016_v56, %v22441_v54  ;;  %v9886_v22 = vpack.c.bf16 %v19999_v33, %v19991_v7  ;;  %v8493_v20 = vpop.xlane.xlu0 %8492 }
 0x720   : > { %v15018_v38 = vpop.eup %15017  ;;  %15027 = vrcp.f32 %v8493_v20  ;;  %v8900_v36 = vmul.f32 %v15016_v56, %v22442_v0 }
 0x721   : > { %v8901_v63 = vmul.f32 %v15018_v38, %v19394_v37  ;;  %9567 = vmatprep.mubr.bf16.mxu0 %v9048_v12  ;;  %v8496_v13 = vpop.xlane.xlu1 %8495  ;;  %v8902_v42 = vmul.f32 %v15018_v38, %v19403_v47 }
 0x722   : > { %15029 = vrcp.f32 %v8496_v13  ;;  %v15020_v18 = vpop.eup %15019  ;;  %v22444_v13 = vld [vmem:[#allocation159_spill] sm:$0xff] }
 0x723   : > { %v9063_v55 = vpack.c.bf16 %v8901_v63, %v8899_v44  ;;  %v9064_v50 = vpack.c.bf16 %v8902_v42, %v8900_v36  ;;  %v8541_v14 = vpop.xlane.xlu0 %8540  ;;  %v8872_v37 = vmul.f32 %v15020_v18, %v19431_v10  ;;  %v8871_v56 = vmul.f32 %v15020_v18, %v19426_v41  ;;  %v22443_v44 = vld [vmem:[#allocation174_spill] sm:$0xff]  ;;  %v22445_v36 = vld [vmem:[#allocation181_spill] sm:$0xff] }
 0x724   : > { %v15022_v57 = vpop.eup %15021  ;;  %15031 = vrcp.f32 %v8541_v14  ;;  %9568 = vmatmul.mubr.bf16.gmra.mrb[24].mxu0 %v9047_v30  ;;  %v22446_v42 = vld [vmem:[#allocation162_spill] sm:$0xff] }
 0x725   : > { %v8873_v39 = vmul.f32 %v15022_v57, %v19435_v58  ;;  %9664 = vmatprep.mubr.bf16.mxu1 %v9064_v50  ;;  %v8544_v8 = vpop.xlane.xlu1 %8543  ;;  %v8874_v23 = vmul.f32 %v15022_v57, %v19439_v35  ;;  %v12595_v63 = vpop.f32.mrb[208].mxu0 }
 0x726   : > { %15033 = vrcp.f32 %v8544_v8  ;;  %v15024_v47 = vpop.eup %15023  ;;  %9665 = vmatmul.mubr.bf16.gmra.mrb[24].mxu1 %v9063_v55  ;;  %v12596_v0 = vpop.f32.mrb[209].mxu0 }
 0x727   : > { %v9050_v12 = vpack.c.bf16 %v8874_v23, %v8872_v37  ;;  %v9049_v54 = vpack.c.bf16 %v8873_v39, %v8871_v56  ;;  %v8903_v20 = vmul.f32 %v15024_v47, %v22443_v44  ;;  %v8499_v58 = vpop.xlane.xlu0 %8498  ;;  %v8904_v35 = vmul.f32 %v15024_v47, %v22445_v36  ;;  %v12598_v55 = vpop.f32.mrb[210].mxu0  ;;  %v22447_v47 = vld [vmem:[#allocation130_spill] sm:$0xff]  ;;  %v22450_v36 = vld [vmem:[#allocation127_spill] sm:$0xff] }
 0x728   : > { %v15026_v38 = vpop.eup %15025  ;;  %15035 = vrcp.f32 %v8499_v58  ;;  %v20015_v18 = vadd.f32 %v12596_v0, %v12595_v63  ;;  %v12659_v50 = vpop.f32.mrb[208].mxu1  ;;  %v22448_v0 = vld [vmem:[#allocation128_spill] sm:$0xff] }
 0x729   : > { %v8905_v30 = vmul.f32 %v15026_v38, %v22444_v13  ;;  %9575 = vmatprep.mubr.bf16.mxu0 %v9050_v12  ;;  %v8502_v10 = vpop.xlane.xlu1 %8501  ;;  %v8906_v41 = vmul.f32 %v15026_v38, %v22446_v42  ;;  %v12599_v39 = vpop.f32.mrb[211].mxu0 }
 0x72a   : > { %15037 = vrcp.f32 %v8502_v10  ;;  %v15028_v57 = vpop.eup %15027  ;;  %v12660_v8 = vpop.f32.mrb[209].mxu1  ;;  %v20017_v56 = vadd.f32 %v12599_v39, %v12598_v55 }
 0x72b   : > { %v9065_v14 = vpack.c.bf16 %v8905_v30, %v8903_v20  ;;  %v9066_v37 = vpack.c.bf16 %v8906_v41, %v8904_v35  ;;  %v20019_v44 = vadd.f32 %v12660_v8, %v12659_v50  ;;  %v8547_v12 = vpop.xlane.xlu0 %8546  ;;  %v12662_v58 = vpop.f32.mrb[210].mxu1  ;;  %v8908_v10 = vmul.f32 %v15028_v57, %v22448_v0  ;;  %v22449_v20 = vld [vmem:[#allocation163_spill] sm:$0xff]  ;;  %v22451_v8 = vld [vmem:[#allocation166_spill] sm:$0xff]  ;;  %v22452_v0 = vld [vmem:[#allocation160_spill] sm:$0xff] }
 0x72c   : > { %v15030_v23 = vpop.eup %15029  ;;  %15039 = vrcp.f32 %v8547_v12  ;;  %9576 = vmatmul.mubr.bf16.gmra.mrb[28].mxu0 %v9049_v54  ;;  %v12663_v38 = vpop.f32.mrb[211].mxu1  ;;  %v8907_v35 = vmul.f32 %v15028_v57, %v22450_v36  ;;  %v9879_v42 = vpack.c.bf16 %v20017_v56, %v20015_v18  ;;  %v10097_v36 = vsel %vm9971_vm4, %v19975_v34, 0  ;;  %v20051_v34 = vld [vmem:[%s20640_s5 + $0xc] sm:$0xf] }
 0x72d   : > { %v8909_v13 = vmul.f32 %v15030_v23, %v22447_v47  ;;  %9672 = vmatprep.mubr.bf16.mxu1 %v9066_v37  ;;  %v8550_v63 = vpop.xlane.xlu1 %8549  ;;  %v8910_v30 = vmul.f32 %v15030_v23, %v22449_v20  ;;  %v20027_v41 = vadd.f32 %v12663_v38, %v12662_v58 }
 0x72e   : > { %15041 = vrcp.f32 %v8550_v63  ;;  %v15032_v55 = vpop.eup %15031  ;;  %9673 = vmatmul.mubr.bf16.gmra.mrb[28].mxu1 %v9065_v14 }
 0x72f   : > { %v9068_v50 = vpack.c.bf16 %v8910_v30, %v8908_v10  ;;  %v9067_v54 = vpack.c.bf16 %v8909_v13, %v8907_v35  ;;  %v8939_v37 = vmul.f32 %v15032_v55, %v22451_v8  ;;  %v9887_v12 = vpack.c.bf16 %v20027_v41, %v20019_v44  ;;  %v8505_v47 = vpop.xlane.xlu0 %8504 }
 0x730   : > { %v15034_v39 = vpop.eup %15033  ;;  %15043 = vrcp.f32 %v8505_v47  ;;  %v8940_v58 = vmul.f32 %v15032_v55, %v22452_v0  ;;  %v9973_v13 = vsel %vm9971_vm4, %v19965_v28, 0 }
 0x731   : > { %v8941_v23 = vmul.f32 %v15034_v39, %v19517_v46  ;;  %9713 = vmatprep.mubr.bf16.mxu0 %v9068_v50  ;;  %v8508_v57 = vpop.xlane.xlu1 %8507  ;;  %v8942_v38 = vmul.f32 %v15034_v39, %v19523_v11  ;;  %v20042_v46 = vld [vmem:[%s20640_s5 + $0x8] sm:$0xf] }
 0x732   : > { %15045 = vrcp.f32 %v8508_v57  ;;  %v15036_v14 = vpop.eup %15035 }
 0x733   : > { %v9083_v63 = vpack.c.bf16 %v8941_v23, %v8939_v37  ;;  %v9084_v10 = vpack.c.bf16 %v8942_v38, %v8940_v58  ;;  %v8553_v30 = vpop.xlane.xlu0 %8552  ;;  %v8912_v55 = vmul.f32 %v15036_v14, %v19533_v15  ;;  %v8911_v50 = vmul.f32 %v15036_v14, %v19529_v48  ;;  %v22453_v15 = vld [vmem:[#allocation161_spill] sm:$0xff]  ;;  %v22455_v58 = vld [vmem:[#allocation164_spill] sm:$0xff] }
 0x734   : > { %v15038_v20 = vpop.eup %15037  ;;  %15047 = vrcp.f32 %v8553_v30  ;;  %9714 = vmatmul.mubr.bf16.vlgmr.msra.gmra.mrb[32].mxu0 %v9067_v54  ;;  %v22454_v48 = vld [vmem:[#allocation165_spill] sm:$0xff]  ;;  %v22456_v14 = vld [vmem:[#allocation184_spill] sm:$0xff] }
 0x735   : > { %v8913_v35 = vmul.f32 %v15038_v20, %v19539_v3  ;;  %9810 = vmatprep.mubr.bf16.mxu1 %v9084_v10  ;;  %v8556_v11 = vpop.xlane.xlu1 %8555  ;;  %v8914_v28 = vmul.f32 %v15038_v20, %v19547_v31  ;;  %13972 = vmatpush3.bf16.msra.mxu0 %v9973_v13  ;;  %v12601_v31 = vpop.f32.mrb[212].mxu0 }
 0x736   : > { %15049 = vrcp.f32 %v8556_v11  ;;  %v15040_v39 = vpop.eup %15039  ;;  %9811 = vmatmul.mubr.bf16.vlgmr.msra.gmra.mrb[32].mxu1 %v9083_v63  ;;  %14181 = vmatprep.subr.msk.bf16.mxu0 %vm9971_vm4, %v20042_v46  ;;  %v12602_v57 = vpop.f32.mrb[213].mxu0 }
 0x737   : > { %v9070_v3 = vpack.c.bf16 %v8914_v28, %v8912_v55  ;;  %v9069_v8 = vpack.c.bf16 %v8913_v35, %v8911_v50  ;;  %v8943_v37 = vmul.f32 %v15040_v39, %v22453_v15  ;;  %v8511_v47 = vpop.xlane.xlu0 %8510  ;;  %13990 = vmatpush3.bf16.msra.mxu1 %v10097_v36  ;;  %v8944_v38 = vmul.f32 %v15040_v39, %v22455_v58  ;;  %v12604_v13 = vpop.f32.mrb[214].mxu0  ;;  %v22457_v15 = vld [vmem:[#allocation186_spill] sm:$0xff]  ;;  %v22460_v58 = vld [vmem:[#allocation188_spill] sm:$0xff] }
 0x738   : > { %v15042_v54 = vpop.eup %15041  ;;  %15051 = vrcp.f32 %v8511_v47  ;;  %14182 = vmatprep.subr.msk.bf16.mxu1 %vm9971_vm4, %v20051_v34  ;;  %v20061_v10 = vadd.f32 %v12602_v57, %v12601_v31  ;;  %v12665_v20 = vpop.f32.mrb[212].mxu1  ;;  %v22458_v57 = vld [vmem:[#allocation183_spill] sm:$0xff] }
 0x739   : > { %v8945_v23 = vmul.f32 %v15042_v54, %v22454_v48  ;;  %9721 = vmatprep.mubr.bf16.mxu0 %v9070_v3  ;;  %v8514_v0 = vpop.xlane.xlu1 %8513  ;;  %v8946_v63 = vmul.f32 %v15042_v54, %v22456_v14  ;;  %v12605_v35 = vpop.f32.mrb[215].mxu0 }
 0x73a   : > { %15053 = vrcp.f32 %v8514_v0  ;;  %v15044_v30 = vpop.eup %15043  ;;  %v12666_v11 = vpop.f32.mrb[213].mxu1  ;;  %v20063_v50 = vadd.f32 %v12605_v35, %v12604_v13 }
 0x73b   : > { %v9085_v36 = vpack.c.bf16 %v8945_v23, %v8943_v37  ;;  %v9086_v55 = vpack.c.bf16 %v8946_v63, %v8944_v38  ;;  %v20065_v3 = vadd.f32 %v12666_v11, %v12665_v20  ;;  %v8559_v39 = vpop.xlane.xlu0 %8558  ;;  %v12668_v54 = vpop.f32.mrb[214].mxu1  ;;  %v8916_v0 = vmul.f32 %v15044_v30, %v22458_v57  ;;  %v22459_v37 = vld [vmem:[#allocation194_spill] sm:$0xff]  ;;  %v22462_v57 = vld [vmem:[#allocation191_spill] sm:$0xff] }
 0x73c   : > { %v15046_v28 = vpop.eup %15045  ;;  %15055 = vrcp.f32 %v8559_v39  ;;  %9722 = vmatmul.mubr.bf16.gmra.mrb[36].mxu0 %v9069_v8  ;;  %v12669_v31 = vpop.f32.mrb[215].mxu1  ;;  %v8915_v38 = vmul.f32 %v15044_v30, %v22460_v58  ;;  %v9880_v14 = vpack.c.bf16 %v20063_v50, %v20061_v10  ;;  %v22461_v11 = vld [vmem:[#allocation198_spill] sm:$0xff] }
 0x73d   : > { %v8917_v47 = vmul.f32 %v15046_v28, %v22457_v15  ;;  %9818 = vmatprep.mubr.bf16.mxu1 %v9086_v55  ;;  %v8562_v48 = vpop.xlane.xlu1 %8561  ;;  %v8918_v23 = vmul.f32 %v15046_v28, %v22459_v37  ;;  %v20073_v63 = vadd.f32 %v12669_v31, %v12668_v54 }
 0x73e   : > { %15057 = vrcp.f32 %v8562_v48  ;;  %v15048_v13 = vpop.eup %15047  ;;  %9819 = vmatmul.mubr.bf16.gmra.mrb[36].mxu1 %v9085_v36 }
 0x73f   : > { %v9072_v20 = vpack.c.bf16 %v8918_v23, %v8916_v0  ;;  %v9071_v8 = vpack.c.bf16 %v8917_v47, %v8915_v38  ;;  %v8947_v55 = vmul.f32 %v15048_v13, %v22461_v11  ;;  %v9888_v39 = vpack.c.bf16 %v20073_v63, %v20065_v3  ;;  %v8517_v15 = vpop.xlane.xlu0 %8516 }
 0x740   : > { %v15050_v35 = vpop.eup %15049  ;;  %15059 = vrcp.f32 %v8517_v15  ;;  %v8948_v54 = vmul.f32 %v15048_v13, %v22462_v57 }
 0x741   : > { %v8949_v28 = vmul.f32 %v15050_v35, %v19642_v61  ;;  %9729 = vmatprep.mubr.bf16.mxu0 %v9072_v20  ;;  %v8520_v30 = vpop.xlane.xlu1 %8519  ;;  %v8950_v31 = vmul.f32 %v15050_v35, %v19647_v51 }
 0x742   : > { %15061 = vrcp.f32 %v8520_v30  ;;  %v15052_v36 = vpop.eup %15051  ;;  %v22464_v30 = vld [vmem:[#allocation202_spill] sm:$0xff] }
 0x743   : > { %v9087_v48 = vpack.c.bf16 %v8949_v28, %v8947_v55  ;;  %v9088_v0 = vpack.c.bf16 %v8950_v31, %v8948_v54  ;;  %v8565_v37 = vpop.xlane.xlu0 %8564  ;;  %v8920_v61 = vmul.f32 %v15052_v36, %v19655_v40  ;;  %v8919_v13 = vmul.f32 %v15052_v36, %v19651_v19  ;;  %v22463_v55 = vld [vmem:[#allocation196_spill] sm:$0xff]  ;;  %v22465_v54 = vld [vmem:[#allocation7_spill] sm:$0xff]  ;;  %v22466_v31 = vld [vmem:[#allocation5_spill] sm:$0xff] }
 0x744   : > { %v15054_v47 = vpop.eup %15053  ;;  %15063 = vrcp.f32 %v8565_v37  ;;  %9730 = vmatmul.mubr.bf16.gmra.mrb[40].mxu0 %v9071_v8  ;;  %v12607_v28 = vpop.f32.mrb[216].mxu0 }
 0x745   : > { %v8921_v23 = vmul.f32 %v15054_v47, %v19659_v45  ;;  %9826 = vmatprep.mubr.bf16.mxu1 %v9088_v0  ;;  %v8568_v58 = vpop.xlane.xlu1 %8567  ;;  %v8922_v38 = vmul.f32 %v15054_v47, %v19665_v21  ;;  %v12608_v57 = vpop.f32.mrb[217].mxu0 }
 0x746   : > { %15065 = vrcp.f32 %v8568_v58  ;;  %v15056_v51 = vpop.eup %15055  ;;  %9827 = vmatmul.mubr.bf16.gmra.mrb[40].mxu1 %v9087_v48  ;;  %v20089_v36 = vadd.f32 %v12608_v57, %v12607_v28  ;;  %v12610_v48 = vpop.f32.mrb[218].mxu0  ;;  %v22468_v57 = vld [vmem:[#allocation203_spill] sm:$0xff] }
 0x747   : > { %v9074_v20 = vpack.c.bf16 %v8922_v38, %v8920_v61  ;;  %v9073_v11 = vpack.c.bf16 %v8921_v23, %v8919_v13  ;;  %v8951_v15 = vmul.f32 %v15056_v51, %v22463_v55  ;;  %v8523_v45 = vpop.xlane.xlu0 %8522  ;;  %v8952_v21 = vmul.f32 %v15056_v51, %v22465_v54  ;;  %v12611_v23 = vpop.f32.mrb[219].mxu0  ;;  %v22467_v51 = vld [vmem:[#allocation204_spill] sm:$0xff] }
 0x748   : > { %v15058_v35 = vpop.eup %15057  ;;  %15067 = vrcp.f32 %v8523_v45  ;;  %v12671_v0 = vpop.f32.mrb[216].mxu1  ;;  %v20091_v13 = vadd.f32 %v12611_v23, %v12610_v48  ;;  %v22470_v54 = vld [vmem:[#allocation200_spill] sm:$0xff] }
 0x749   : > { %v8953_v8 = vmul.f32 %v15058_v35, %v22464_v30  ;;  %9737 = vmatprep.mubr.bf16.mxu0 %v9074_v20  ;;  %v8526_v40 = vpop.xlane.xlu1 %8525  ;;  %v8954_v19 = vmul.f32 %v15058_v35, %v22466_v31  ;;  %v12672_v58 = vpop.f32.mrb[217].mxu1 }
 0x74a   : > { %15069 = vrcp.f32 %v8526_v40  ;;  %v15060_v47 = vpop.eup %15059  ;;  %v20093_v55 = vadd.f32 %v12672_v58, %v12671_v0  ;;  %v12674_v45 = vpop.f32.mrb[218].mxu1  ;;  %v9881_v31 = vpack.c.bf16 %v20091_v13, %v20089_v36 }
 0x74b   : > { %v9089_v37 = vpack.c.bf16 %v8953_v8, %v8951_v15  ;;  %v9090_v61 = vpack.c.bf16 %v8954_v19, %v8952_v21  ;;  %v8571_v20 = vpop.xlane.xlu0 %8570  ;;  %v12675_v35 = vpop.f32.mrb[219].mxu1  ;;  %v8924_v40 = vmul.f32 %v15060_v47, %v22468_v57  ;;  %v22469_v15 = vld [vmem:[#allocation29_spill] sm:$0xff]  ;;  %v8923_v21 = vmul.f32 %v15060_v47, %v22470_v54 }
 0x74c   : > { %v15062_v38 = vpop.eup %15061  ;;  %15071 = vrcp.f32 %v8571_v20  ;;  %9738 = vmatmul.mubr.bf16.gmra.mrb[44].mxu0 %v9073_v11  ;;  %v20101_v19 = vadd.f32 %v12675_v35, %v12674_v45 }
 0x74d   : > { %v8925_v30 = vmul.f32 %v15062_v38, %v22467_v51  ;;  %9834 = vmatprep.mubr.bf16.mxu1 %v9090_v61  ;;  %v8574_v28 = vpop.xlane.xlu1 %8573  ;;  %v8926_v8 = vmul.f32 %v15062_v38, %v22469_v15 }
 0x74e   : > { %15073 = vrcp.f32 %v8574_v28  ;;  %v15064_v48 = vpop.eup %15063  ;;  %9835 = vmatmul.mubr.bf16.gmra.mrb[44].mxu1 %v9089_v37  ;;  %v9889_v61 = vpack.c.bf16 %v20101_v19, %v20093_v55 }
 0x74f   : > { %v9076_v0 = vpack.c.bf16 %v8926_v8, %v8924_v40  ;;  %v9075_v11 = vpack.c.bf16 %v8925_v30, %v8923_v21  ;;  %v8955_v58 = vmul.f32 %v15064_v48, %v19727_v52  ;;  %v8529_v20 = vpop.xlane.xlu0 %8528  ;;  %v8956_v45 = vmul.f32 %v15064_v48, %v19733_v2 }
 0x750   : > { %v15066_v23 = vpop.eup %15065  ;;  %15075 = vrcp.f32 %v8529_v20  ;;  %v22472_v20 = vld [vmem:[#allocation170_spill] sm:$0xff] }
 0x751   : > { %v8957_v38 = vmul.f32 %v15066_v23, %v19737_v27  ;;  %9745 = vmatprep.mubr.bf16.mxu0 %v9076_v0  ;;  %v8532_v47 = vpop.xlane.xlu1 %8531  ;;  %v8958_v51 = vmul.f32 %v15066_v23, %v19739_v62 }
 0x752   : > { %15077 = vrcp.f32 %v8532_v47  ;;  %v15068_v37 = vpop.eup %15067 }
 0x753   : > { %v9091_v35 = vpack.c.bf16 %v8957_v38, %v8955_v58  ;;  %v9092_v28 = vpack.c.bf16 %v8958_v51, %v8956_v45  ;;  %v8577_v57 = vpop.xlane.xlu0 %8576  ;;  %v8928_v27 = vmul.f32 %v15068_v37, %v19747_v9  ;;  %v8927_v2 = vmul.f32 %v15068_v37, %v19743_v24  ;;  %v12613_v0 = vpop.f32.mrb[220].mxu0  ;;  %v22471_v58 = vld [vmem:[#allocation8_spill] sm:$0xff] }
 0x754   : > { %v15070_v30 = vpop.eup %15069  ;;  %15079 = vrcp.f32 %v8577_v57  ;;  %9746 = vmatmul.mubr.bf16.gmra.mrb[48].mxu0 %v9075_v11  ;;  %v12614_v11 = vpop.f32.mrb[221].mxu0 }
 0x755   : > { %v8929_v52 = vmul.f32 %v15070_v30, %v19753_v49  ;;  %9842 = vmatprep.mubr.bf16.mxu1 %v9092_v28  ;;  %v8580_v40 = vpop.xlane.xlu1 %8579  ;;  %v8930_v15 = vmul.f32 %v15070_v30, %v19768_v1  ;;  %v20117_v38 = vadd.f32 %v12614_v11, %v12613_v0  ;;  %v12616_v47 = vpop.f32.mrb[222].mxu0 }
 0x756   : > { %15081 = vrcp.f32 %v8580_v40  ;;  %v15072_v62 = vpop.eup %15071  ;;  %9843 = vmatmul.mubr.bf16.gmra.mrb[48].mxu1 %v9091_v35 }
 0x757   : > { %v9078_v8 = vpack.c.bf16 %v8930_v15, %v8928_v27  ;;  %v9077_v21 = vpack.c.bf16 %v8929_v52, %v8927_v2  ;;  %v8959_v48 = vmul.f32 %v15072_v62, %v19773_v25  ;;  %v8535_v49 = vpop.xlane.xlu0 %8534  ;;  %v8960_v1 = vmul.f32 %v15072_v62, %v22471_v58  ;;  %v12617_v25 = vpop.f32.mrb[223].mxu0  ;;  %v22473_v27 = vld [vmem:[#allocation180_spill] sm:$0xff] }
 0x758   : > { %v15074_v54 = vpop.eup %15073  ;;  %15083 = vrcp.f32 %v8535_v49  ;;  %v12677_v45 = vpop.f32.mrb[220].mxu1  ;;  %v22476_v49 = vld [vmem:[#allocation173_spill] sm:$0xff] }
 0x759   : > { %v8961_v23 = vmul.f32 %v15074_v54, %v19779_v29  ;;  %9753 = vmatprep.mubr.bf16.mxu0 %v9078_v8  ;;  %v8538_v9 = vpop.xlane.xlu1 %8537  ;;  %v8962_v24 = vmul.f32 %v15074_v54, %v22472_v20  ;;  %v12678_v35 = vpop.f32.mrb[221].mxu1  ;;  %v20119_v29 = vadd.f32 %v12617_v25, %v12616_v47  ;;  %v22474_v8 = vld [vmem:[#allocation176_spill] sm:$0xff] }
 0x75a   : > { %15085 = vrcp.f32 %v8538_v9  ;;  %v15076_v51 = vpop.eup %15075  ;;  %v20121_v57 = vadd.f32 %v12678_v35, %v12677_v45  ;;  %v12680_v40 = vpop.f32.mrb[222].mxu1  ;;  %v22477_v45 = vld [vmem:[#allocation172_spill] sm:$0xff] }
 0x75b   : > { %v9093_v37 = vpack.c.bf16 %v8961_v23, %v8959_v48  ;;  %v9094_v28 = vpack.c.bf16 %v8962_v24, %v8960_v1  ;;  %v8583_v52 = vpop.xlane.xlu0 %8582  ;;  %v12681_v2 = vpop.f32.mrb[223].mxu1  ;;  %v8932_v54 = vmul.f32 %v15076_v51, %v22474_v8  ;;  %v22475_v48 = vld [vmem:[#allocation31_spill] sm:$0xff]  ;;  %v8931_v23 = vmul.f32 %v15076_v51, %v22476_v49  ;;  %v22478_v51 = vld [vmem:[#allocation206_spill] sm:$0xff] }
 0x75c   : > { %v15078_v30 = vpop.eup %15077  ;;  %15087 = vrcp.f32 %v8583_v52  ;;  %9754 = vmatmul.mubr.bf16.gmra.mrb[52].mxu0 %v9077_v21  ;;  %v9882_v11 = vpack.c.bf16 %v20119_v29, %v20117_v38  ;;  %v20129_v9 = vadd.f32 %v12681_v2, %v12680_v40 }
 0x75d   : > { %v8933_v15 = vmul.f32 %v15078_v30, %v22473_v27  ;;  %9850 = vmatprep.mubr.bf16.mxu1 %v9094_v28  ;;  %v8586_v62 = vpop.xlane.xlu1 %8585  ;;  %v8934_v0 = vmul.f32 %v15078_v30, %v22475_v48  ;;  %v22479_v28 = vld [vmem:[#allocation28_spill] sm:$0xff] }
 0x75e   : > { %15089 = vrcp.f32 %v8586_v62  ;;  %v15080_v58 = vpop.eup %15079  ;;  %9851 = vmatmul.mubr.bf16.gmra.mrb[52].mxu1 %v9093_v37  ;;  %v9890_v24 = vpack.c.bf16 %v20129_v9, %v20121_v57  ;;  %v22480_v37 = vld [vmem:[#allocation208_spill] sm:$0xff] }
 0x75f   : > { %v9080_v1 = vpack.c.bf16 %v8934_v0, %v8932_v54  ;;  %v9079_v21 = vpack.c.bf16 %v8933_v15, %v8931_v23  ;;  %v8963_v47 = vmul.f32 %v15080_v58, %v19801_v53  ;;  %v8964_v35 = vmul.f32 %v15080_v58, %v22478_v51  ;;  %v22481_v15 = vld [vmem:[#allocation32_spill] sm:$0xff]  ;;  %v22482_v54 = vld [vmem:[#allocation37_spill] sm:$0xff] }
 0x760   : > { %v15082_v20 = vpop.eup %15081  ;;  %v22483_v53 = vld [vmem:[#allocation205_spill] sm:$0xff] }
 0x761   : > { %v8965_v25 = vmul.f32 %v15082_v20, %v22477_v45  ;;  %9761 = vmatprep.mubr.bf16.mxu0 %v9080_v1  ;;  %v8966_v30 = vmul.f32 %v15082_v20, %v22479_v28  ;;  %v22484_v20 = vld [vmem:[#allocation21_spill] sm:$0xff]  ;;  %v22487_v28 = vld [vmem:[#allocation179_spill] sm:$0xff] }
 0x762   : > { %v15084_v52 = vpop.eup %15083 }
 0x763   : > { %v9095_v40 = vpack.c.bf16 %v8965_v25, %v8963_v47  ;;  %v9096_v27 = vpack.c.bf16 %v8966_v30, %v8964_v35  ;;  %v8936_v8 = vmul.f32 %v15084_v52, %v22481_v15  ;;  %v8935_v0 = vmul.f32 %v15084_v52, %v22483_v53  ;;  %v22485_v47 = vld [vmem:[#allocation178_spill] sm:$0xff]  ;;  %v12699_v51 = vpop.f32.mrb[224].mxu0  ;;  %v22486_v35 = vld [vmem:[#allocation175_spill] sm:$0xff] }
 0x764   : > { %v15086_v2 = vpop.eup %15085  ;;  %9762 = vmatmul.mubr.bf16.gmra.mrb[56].mxu0 %v9079_v21 }
 0x765   : > { %v8937_v62 = vmul.f32 %v15086_v2, %v22480_v37  ;;  %9858 = vmatprep.mubr.bf16.mxu1 %v9096_v27  ;;  %v8938_v48 = vmul.f32 %v15086_v2, %v22482_v54  ;;  %v12700_v27 = vpop.f32.mrb[225].mxu0 }
 0x766   : > { %v15088_v49 = vpop.eup %15087  ;;  %9859 = vmatmul.mubr.bf16.gmra.mrb[56].mxu1 %v9095_v40  ;;  %v20145_v15 = vadd.f32 %v12700_v27, %v12699_v51  ;;  %v12702_v52 = vpop.f32.mrb[226].mxu0  ;;  %v22492_v51 = vld [vmem:[#allocation192_spill] sm:$0xff]  ;;  %v10345_v27 = vsel %vm9971_vm4, %v20051_v34, 0 }
 0x767   : > { %v9082_v23 = vpack.c.bf16 %v8938_v48, %v8936_v8  ;;  %v9081_v1 = vpack.c.bf16 %v8937_v62, %v8935_v0  ;;  %v8967_v45 = vmul.f32 %v15088_v49, %v22484_v20  ;;  %v8968_v21 = vmul.f32 %v15088_v49, %v22486_v35  ;;  %v12763_v37 = vpop.f32.mrb[224].mxu1  ;;  %v12703_v54 = vpop.f32.mrb[227].mxu0  ;;  %v22489_v49 = vld [vmem:[#allocation185_spill] sm:$0xff] }
 0x768   : > { %v15090_v58 = vpop.eup %15089  ;;  %v12764_v40 = vpop.f32.mrb[225].mxu1  ;;  %v12704_v53 = vadd.f32 %v12703_v54, %v12702_v52 }
 0x769   : > { %v8969_v25 = vmul.f32 %v15090_v58, %v22485_v47  ;;  %9769 = vmatprep.mubr.bf16.mxu0 %v9082_v23  ;;  %v8970_v30 = vmul.f32 %v15090_v58, %v22487_v28  ;;  %v20147_v62 = vadd.f32 %v12764_v40, %v12763_v37  ;;  %v12766_v48 = vpop.f32.mrb[226].mxu1  ;;  %v22488_v23 = vld [vmem:[#allocation190_spill] sm:$0xff]  ;;  %v22494_v28 = vld [vmem:[#allocation187_spill] sm:$0xff] }
 0x76a   : > { %v12767_v0 = vpop.f32.mrb[227].mxu1  ;;  %v22490_v20 = vpack.c.bf16 %v22488_v23, %v22489_v49  ;;  %v22496_v37 = vld [vmem:[#allocation211_spill] sm:$0xff] }
 0x76b   : > { %v9097_v2 = vpack.c.bf16 %v8969_v25, %v8967_v45  ;;  %v9098_v8 = vpack.c.bf16 %v8970_v30, %v8968_v21  ;;  %v12768_v58 = vadd.f32 %v12767_v0, %v12766_v48  ;;  %v9891_v45 = vpack.c.bf16 %v12704_v53, %v20145_v15  ;;  %v22491_v25 = vld [vmem:[#allocation197_spill] sm:$0xff]  ;;  %v9943_v21 = vld [vmem:[%s20640_s5 + $0x10] sm:$0xf] }
 0x76c   : > { %9770 = vmatmul.mubr.bf16.gmra.mrb[60].mxu0 %v9081_v1  ;;  %v22493_v35 = vpack.c.bf16 %v22491_v25, %v22492_v51  ;;  %v10221_v1 = vsel %vm9971_vm4, %v20042_v46, 0  ;;  %v22495_v30 = vpack.c.bf16 %v19919_v5, %v22494_v28  ;;  %v9944_v46 = vld [vmem:[%s20640_s5 + $0x14] sm:$0xf]  ;;  %v10469_v3 = vsel %vm9971_vm4, %v9943_v21, 0 }
 0x76d   : > { %9866 = vmatprep.mubr.bf16.mxu1 %v9098_v8  ;;  %13973 = vmatprep.mubr.msk.bf16.mxu0 %vm5570_vm3, %v22490_v20  ;;  %v9899_v47 = vpack.c.bf16 %v12768_v58, %v20147_v62  ;;  %v10593_v63 = vsel %vm9971_vm4, %v9944_v46, 0 }
 0x76e   : > { %9867 = vmatmul.mubr.bf16.gmra.mrb[60].mxu1 %v9097_v2  ;;  %v22497_v2 = vld [vmem:[#allocation189_spill] sm:$0xff] }
 0x76f   : > { %13991 = vmatprep.mubr.msk.bf16.mxu1 %vm5570_vm3, %v22493_v35  ;;  %v22498_v15 = vpack.c.bf16 %v22496_v37, %v22497_v2 }
 0x773   : > { %v12705_v5 = vpop.f32.mrb[228].mxu0 }
 0x774   : > { %13974 = vmatmul.mubr.msk.bf16.vlgmr.msra.gmra.mrb[64].mxu0 %vm5570_vm3, %v22495_v30  ;;  %v12706_v6 = vpop.f32.mrb[229].mxu0 }
 0x775   : > { %13977 = vmatprep.mubr.msk.bf16.mxu0 %vm5570_vm3, %v9877_v17  ;;  %14008 = vmatpush3.bf16.msra.mxu0 %v10221_v1  ;;  %v12707_v26 = vadd.f32 %v12706_v6, %v12705_v5  ;;  %v12708_v17 = vpop.f32.mrb[230].mxu0 }
 0x776   : > { %13992 = vmatmul.mubr.msk.bf16.vlgmr.msra.gmra.mrb[64].mxu1 %vm5570_vm3, %v22498_v15  ;;  %14183 = vmatprep.subr.msk.bf16.mxu0 %vm9971_vm4, %v9943_v21  ;;  %v12709_v52 = vpop.f32.mrb[231].mxu0 }
 0x777   : > { %13995 = vmatprep.mubr.msk.bf16.mxu1 %vm5570_vm3, %v9885_v60  ;;  %14026 = vmatpush3.bf16.msra.mxu1 %v10345_v27  ;;  %v12769_v34 = vpop.f32.mrb[228].mxu1  ;;  %v12710_v8 = vadd.f32 %v12709_v52, %v12708_v17 }
 0x778   : > { %14184 = vmatprep.subr.msk.bf16.mxu1 %vm9971_vm4, %v9944_v46  ;;  %v12770_v40 = vpop.f32.mrb[229].mxu1 }
 0x779   : > { %v12771_v54 = vadd.f32 %v12770_v40, %v12769_v34  ;;  %v12772_v62 = vpop.f32.mrb[230].mxu1  ;;  %v9892_v59 = vpack.c.bf16 %v12710_v8, %v12707_v26 }
 0x77a   : > { %v12773_v43 = vpop.f32.mrb[231].mxu1 }
 0x77b   : > { %v12774_v60 = vadd.f32 %v12773_v43, %v12772_v62 }
 0x77c   : > { %13978 = vmatmul.mubr.msk.bf16.gmra.mrb[68].mxu0 %vm5570_vm3, %v9878_v16 }
 0x77d   : > { %13981 = vmatprep.mubr.msk.bf16.mxu0 %vm5570_vm3, %v9879_v42  ;;  %v9900_v48 = vpack.c.bf16 %v12774_v60, %v12771_v54 }
 0x77e   : > { %13996 = vmatmul.mubr.msk.bf16.gmra.mrb[68].mxu1 %vm5570_vm3, %v9886_v22 }
 0x77f   : > { %13999 = vmatprep.mubr.msk.bf16.mxu1 %vm5570_vm3, %v9887_v12 }
 0x784   : > { %13982 = vmatmul.mubr.msk.bf16.gmra.mrb[72].mxu0 %vm5570_vm3, %v9880_v14  ;;  %v20233_v14 = vld [vmem:[%s20640_s5 + $0x18] sm:$0xf] }
 0x785   : > { %13985 = vmatprep.mubr.msk.bf16.mxu0 %vm5570_vm3, %v9881_v31  ;;  %v12711_v32 = vpop.f32.mrb[232].mxu0 }
 0x786   : > { %14000 = vmatmul.mubr.msk.bf16.gmra.mrb[72].mxu1 %vm5570_vm3, %v9888_v39  ;;  %v12712_v4 = vpop.f32.mrb[233].mxu0  ;;  %v20241_v39 = vld [vmem:[%s20640_s5 + $0x1c] sm:$0xf] }
 0x787   : > { %14003 = vmatprep.mubr.msk.bf16.mxu1 %vm5570_vm3, %v9889_v61  ;;  %v12713_v7 = vadd.f32 %v12712_v4, %v12711_v32  ;;  %v12714_v16 = vpop.f32.mrb[234].mxu0  ;;  %v12775_v33 = vpop.f32.mrb[232].mxu1 }
 0x788   : > { %v12715_v22 = vpop.f32.mrb[235].mxu0  ;;  %v12776_v18 = vpop.f32.mrb[233].mxu1 }
 0x789   : > { %v12716_v56 = vadd.f32 %v12715_v22, %v12714_v16  ;;  %v12777_v44 = vadd.f32 %v12776_v18, %v12775_v33  ;;  %v12778_v42 = vpop.f32.mrb[234].mxu1 }
 0x78a   : > { %v12779_v41 = vpop.f32.mrb[235].mxu1 }
 0x78b   : > { %v9893_v12 = vpack.c.bf16 %v12716_v56, %v12713_v7  ;;  %v12780_v10 = vadd.f32 %v12779_v41, %v12778_v42 }
 0x78c   : > { %13986 = vmatmul.mubr.msk.bf16.gmra.mrb[76].mxu0 %vm5570_vm3, %v9882_v11 }
 0x78d   : > { %14009 = vmatprep.mubr.msk.bf16.mxu0 %vm5570_vm3, %v9891_v45  ;;  %v9901_v50 = vpack.c.bf16 %v12780_v10, %v12777_v44 }
 0x78e   : > { %14004 = vmatmul.mubr.msk.bf16.gmra.mrb[76].mxu1 %vm5570_vm3, %v9890_v24 }
 0x78f   : > { %14027 = vmatprep.mubr.msk.bf16.mxu1 %vm5570_vm3, %v9899_v47 }
 0x794   : > { %14010 = vmatmul.mubr.msk.bf16.vlgmr.msra.gmra.mrb[80].mxu0 %vm5570_vm3, %v9892_v59 }
 0x795   : > { %14013 = vmatprep.mubr.msk.bf16.mxu0 %vm5570_vm3, %v9893_v12  ;;  %14044 = vmatpush3.bf16.msra.mxu0 %v10469_v3 }
 0x796   : > { %14028 = vmatmul.mubr.msk.bf16.vlgmr.msra.gmra.mrb[80].mxu1 %vm5570_vm3, %v9900_v48  ;;  %14185 = vmatprep.subr.msk.bf16.mxu0 %vm9971_vm4, %v20233_v14  ;;  %v12717_v36 = vpop.f32.mrb[236].mxu0 }
 0x797   : > { %14031 = vmatprep.mubr.msk.bf16.mxu1 %vm5570_vm3, %v9901_v50  ;;  %14062 = vmatpush3.bf16.msra.mxu1 %v10593_v63  ;;  %v12718_v13 = vpop.f32.mrb[237].mxu0 }
 0x798   : > { %14186 = vmatprep.subr.msk.bf16.mxu1 %vm9971_vm4, %v20241_v39  ;;  %v12719_v55 = vadd.f32 %v12718_v13, %v12717_v36  ;;  %v12720_v31 = vpop.f32.mrb[238].mxu0  ;;  %v12781_v19 = vpop.f32.mrb[236].mxu1 }
 0x799   : > { %v12721_v61 = vpop.f32.mrb[239].mxu0  ;;  %v12782_v38 = vpop.f32.mrb[237].mxu1 }
 0x79a   : > { %v12722_v29 = vadd.f32 %v12721_v61, %v12720_v31  ;;  %v12783_v57 = vadd.f32 %v12782_v38, %v12781_v19  ;;  %v12784_v11 = vpop.f32.mrb[238].mxu1 }
 0x79b   : > { %v12785_v9 = vpop.f32.mrb[239].mxu1 }
 0x79c   : > { %v9894_v24 = vpack.c.bf16 %v12722_v29, %v12719_v55  ;;  %v12786_v53 = vadd.f32 %v12785_v9, %v12784_v11 }
 0x79e   : > { %v9902_v0 = vpack.c.bf16 %v12786_v53, %v12783_v57  ;;  %14014 = vmatmul.mubr.msk.bf16.gmra.mrb[84].mxu0 %vm5570_vm3, %v9894_v24 }
 0x7a0   : > { %14032 = vmatmul.mubr.msk.bf16.gmra.mrb[84].mxu1 %vm5570_vm3, %v9902_v0 }
 0x7a7   : > { %v12723_v23 = vpop.f32.mrb[240].mxu0 }
 0x7a8   : > { %v12724_v49 = vpop.f32.mrb[241].mxu0 }
 0x7a9   : > { %v12725_v20 = vadd.f32 %v12724_v49, %v12723_v23  ;;  %v12726_v58 = vpop.f32.mrb[242].mxu0  ;;  %v12787_v45 = vpop.f32.mrb[240].mxu1 }
 0x7aa   : > { %v12727_v47 = vpop.f32.mrb[243].mxu0  ;;  %v12788_v25 = vpop.f32.mrb[241].mxu1 }
 0x7ab   : > { %v12728_v51 = vadd.f32 %v12727_v47, %v12726_v58  ;;  %v12789_v35 = vadd.f32 %v12788_v25, %v12787_v45  ;;  %v12790_v1 = vpop.f32.mrb[242].mxu1 }
 0x7ac   : > { %v12791_v21 = vpop.f32.mrb[243].mxu1 }
 0x7ad   : > { %v9895_v28 = vpack.c.bf16 %v12728_v51, %v12725_v20  ;;  %v12792_v30 = vadd.f32 %v12791_v21, %v12790_v1 }
 0x7af   : > { %v9903_v27 = vpack.c.bf16 %v12792_v30, %v12789_v35  ;;  %v12729_v46 = vpop.f32.mrb[244].mxu0  ;;  %14017 = vmatprep.mubr.msk.bf16.mxu0 %vm5570_vm3, %v9895_v28 }
 0x7b0   : > { %v12730_v37 = vpop.f32.mrb[245].mxu0 }
 0x7b1   : > { %v12731_v2 = vadd.f32 %v12730_v37, %v12729_v46  ;;  %v12732_v15 = vpop.f32.mrb[246].mxu0  ;;  %v12793_v5 = vpop.f32.mrb[244].mxu1  ;;  %14035 = vmatprep.mubr.msk.bf16.mxu1 %vm5570_vm3, %v9903_v27 }
 0x7b2   : > { %v12733_v6 = vpop.f32.mrb[247].mxu0  ;;  %v12794_v26 = vpop.f32.mrb[245].mxu1 }
 0x7b3   : > { %v12734_v17 = vadd.f32 %v12733_v6, %v12732_v15  ;;  %v12795_v34 = vadd.f32 %v12794_v26, %v12793_v5  ;;  %v12796_v52 = vpop.f32.mrb[246].mxu1 }
 0x7b4   : > { %v12797_v40 = vpop.f32.mrb[247].mxu1 }
 0x7b5   : > { %v9896_v8 = vpack.c.bf16 %v12734_v17, %v12731_v2  ;;  %v12798_v54 = vadd.f32 %v12797_v40, %v12796_v52  ;;  %v10717_v17 = vsel %vm9971_vm4, %v20233_v14, 0  ;;  %v10841_v40 = vsel %vm9971_vm4, %v20241_v39, 0 }
 0x7b7   : > { %v9904_v62 = vpack.c.bf16 %v12798_v54, %v12795_v34  ;;  %v12735_v43 = vpop.f32.mrb[248].mxu0  ;;  %14018 = vmatmul.mubr.msk.bf16.gmra.mrb[88].mxu0 %vm5570_vm3, %v9896_v8 }
 0x7b8   : > { %v12736_v59 = vpop.f32.mrb[249].mxu0 }
 0x7b9   : > { %v12737_v60 = vadd.f32 %v12736_v59, %v12735_v43  ;;  %v12738_v48 = vpop.f32.mrb[250].mxu0  ;;  %v12799_v32 = vpop.f32.mrb[248].mxu1  ;;  %14036 = vmatmul.mubr.msk.bf16.gmra.mrb[88].mxu1 %vm5570_vm3, %v9904_v62 }
 0x7ba   : > { %v12739_v4 = vpop.f32.mrb[251].mxu0  ;;  %v12800_v7 = vpop.f32.mrb[249].mxu1 }
 0x7bb   : > { %v12740_v16 = vadd.f32 %v12739_v4, %v12738_v48  ;;  %v12801_v33 = vadd.f32 %v12800_v7, %v12799_v32  ;;  %v12802_v22 = vpop.f32.mrb[250].mxu1 }
 0x7bc   : > { %v12803_v18 = vpop.f32.mrb[251].mxu1 }
 0x7bd   : > { %v9897_v56 = vpack.c.bf16 %v12740_v16, %v12737_v60  ;;  %v12804_v44 = vadd.f32 %v12803_v18, %v12802_v22 }
 0x7bf   : > { %v9905_v42 = vpack.c.bf16 %v12804_v44, %v12801_v33  ;;  %v12741_v41 = vpop.f32.mrb[252].mxu0  ;;  %14021 = vmatprep.mubr.msk.bf16.mxu0 %vm5570_vm3, %v9897_v56 }
 0x7c0   : > { %v12742_v12 = vpop.f32.mrb[253].mxu0 }
 0x7c1   : > { %v12743_v10 = vadd.f32 %v12742_v12, %v12741_v41  ;;  %v12744_v50 = vpop.f32.mrb[254].mxu0  ;;  %v12805_v3 = vpop.f32.mrb[252].mxu1  ;;  %14039 = vmatprep.mubr.msk.bf16.mxu1 %vm5570_vm3, %v9905_v42 }
 0x7c2   : > { %v12745_v63 = vpop.f32.mrb[255].mxu0  ;;  %v12806_v36 = vpop.f32.mrb[253].mxu1 }
 0x7c3   : > { %v12746_v13 = vadd.f32 %v12745_v63, %v12744_v50  ;;  %v12807_v55 = vadd.f32 %v12806_v36, %v12805_v3  ;;  %v12808_v31 = vpop.f32.mrb[254].mxu1 }
 0x7c4   : > { %v12809_v19 = vpop.f32.mrb[255].mxu1 }
 0x7c5   : > { %v9898_v61 = vpack.c.bf16 %v12746_v13, %v12743_v10  ;;  %v12810_v38 = vadd.f32 %v12809_v19, %v12808_v31 }
 0x7c7   : > { %v9906_v29 = vpack.c.bf16 %v12810_v38, %v12807_v55  ;;  %v12827_v57 = vpop.f32.mrb[0].mxu0  ;;  %14022 = vmatmul.mubr.msk.bf16.gmra.mrb[92].mxu0 %vm5570_vm3, %v9898_v61 }
 0x7c8   : > { %v12828_v11 = vpop.f32.mrb[1].mxu0 }
 0x7c9   : > { %v12829_v9 = vadd.f32 %v12828_v11, %v12827_v57  ;;  %v12830_v24 = vpop.f32.mrb[2].mxu0  ;;  %v12891_v53 = vpop.f32.mrb[0].mxu1  ;;  %14040 = vmatmul.mubr.msk.bf16.gmra.mrb[92].mxu1 %vm5570_vm3, %v9906_v29 }
 0x7ca   : > { %v12831_v0 = vpop.f32.mrb[3].mxu0  ;;  %v12892_v23 = vpop.f32.mrb[1].mxu1 }
 0x7cb   : > { %v12832_v49 = vadd.f32 %v12831_v0, %v12830_v24  ;;  %v12893_v20 = vadd.f32 %v12892_v23, %v12891_v53  ;;  %v12894_v58 = vpop.f32.mrb[2].mxu1 }
 0x7cc   : > { %v12895_v45 = vpop.f32.mrb[3].mxu1 }
 0x7cd   : > { %v9907_v47 = vpack.c.bf16 %v12832_v49, %v12829_v9  ;;  %v12896_v25 = vadd.f32 %v12895_v45, %v12894_v58 }
 0x7cf   : > { %v9915_v51 = vpack.c.bf16 %v12896_v25, %v12893_v20  ;;  %v12833_v35 = vpop.f32.mrb[4].mxu0  ;;  %14045 = vmatprep.mubr.msk.bf16.mxu0 %vm5570_vm3, %v9907_v47 }
 0x7d0   : > { %v12834_v1 = vpop.f32.mrb[5].mxu0 }
 0x7d1   : > { %v12835_v21 = vadd.f32 %v12834_v1, %v12833_v35  ;;  %v12836_v28 = vpop.f32.mrb[6].mxu0  ;;  %v12897_v30 = vpop.f32.mrb[4].mxu1  ;;  %14063 = vmatprep.mubr.msk.bf16.mxu1 %vm5570_vm3, %v9915_v51 }
 0x7d2   : > { %v12837_v27 = vpop.f32.mrb[7].mxu0  ;;  %v12898_v46 = vpop.f32.mrb[5].mxu1 }
 0x7d3   : > { %v12838_v37 = vadd.f32 %v12837_v27, %v12836_v28  ;;  %v12899_v2 = vadd.f32 %v12898_v46, %v12897_v30  ;;  %v12900_v15 = vpop.f32.mrb[6].mxu1 }
 0x7d4   : > { %v12901_v5 = vpop.f32.mrb[7].mxu1 }
 0x7d5   : > { %v9908_v6 = vpack.c.bf16 %v12838_v37, %v12835_v21  ;;  %v12902_v26 = vadd.f32 %v12901_v5, %v12900_v15 }
 0x7d7   : > { %v9916_v34 = vpack.c.bf16 %v12902_v26, %v12899_v2  ;;  %v12839_v52 = vpop.f32.mrb[8].mxu0  ;;  %14046 = vmatmul.mubr.msk.bf16.vlgmr.msra.gmra.mrb[96].mxu0 %vm5570_vm3, %v9908_v6 }
 0x7d8   : > { %v12840_v8 = vpop.f32.mrb[9].mxu0  ;;  %14080 = vmatpush3.bf16.msra.mxu0 %v10717_v17 }
 0x7d9   : > { %v12841_v54 = vadd.f32 %v12840_v8, %v12839_v52  ;;  %v12842_v62 = vpop.f32.mrb[10].mxu0  ;;  %v12903_v43 = vpop.f32.mrb[8].mxu1  ;;  %14064 = vmatmul.mubr.msk.bf16.vlgmr.msra.gmra.mrb[96].mxu1 %vm5570_vm3, %v9916_v34 }
 0x7da   : > { %v12843_v59 = vpop.f32.mrb[11].mxu0  ;;  %v12904_v60 = vpop.f32.mrb[9].mxu1  ;;  %14098 = vmatpush3.bf16.msra.mxu1 %v10841_v40 }
 0x7db   : > { %v12844_v48 = vadd.f32 %v12843_v59, %v12842_v62  ;;  %v12905_v32 = vadd.f32 %v12904_v60, %v12903_v43  ;;  %v12906_v14 = vpop.f32.mrb[10].mxu1 }
 0x7dc   : > { %v12907_v4 = vpop.f32.mrb[11].mxu1 }
 0x7dd   : > { %v9909_v7 = vpack.c.bf16 %v12844_v48, %v12841_v54  ;;  %v12908_v16 = vadd.f32 %v12907_v4, %v12906_v14 }
 0x7df   : > { %v9917_v33 = vpack.c.bf16 %v12908_v16, %v12905_v32  ;;  %v12845_v22 = vpop.f32.mrb[12].mxu0  ;;  %14049 = vmatprep.mubr.msk.bf16.mxu0 %vm5570_vm3, %v9909_v7 }
 0x7e0   : > { %v12846_v39 = vpop.f32.mrb[13].mxu0 }
 0x7e1   : > { %v12847_v18 = vadd.f32 %v12846_v39, %v12845_v22  ;;  %v12848_v56 = vpop.f32.mrb[14].mxu0  ;;  %v12909_v44 = vpop.f32.mrb[12].mxu1  ;;  %14067 = vmatprep.mubr.msk.bf16.mxu1 %vm5570_vm3, %v9917_v33 }
 0x7e2   : > { %v12849_v42 = vpop.f32.mrb[15].mxu0  ;;  %v12910_v41 = vpop.f32.mrb[13].mxu1 }
 0x7e3   : > { %v12850_v12 = vadd.f32 %v12849_v42, %v12848_v56  ;;  %v12911_v10 = vadd.f32 %v12910_v41, %v12909_v44  ;;  %v12912_v50 = vpop.f32.mrb[14].mxu1 }
 0x7e4   : > { %v12913_v3 = vpop.f32.mrb[15].mxu1 }
 0x7e5   : > { %v9910_v63 = vpack.c.bf16 %v12850_v12, %v12847_v18  ;;  %v12914_v36 = vadd.f32 %v12913_v3, %v12912_v50 }
 0x7e7   : > { %v9918_v13 = vpack.c.bf16 %v12914_v36, %v12911_v10  ;;  %v12851_v55 = vpop.f32.mrb[16].mxu0  ;;  %14050 = vmatmul.mubr.msk.bf16.gmra.mrb[100].mxu0 %vm5570_vm3, %v9910_v63 }
 0x7e8   : > { %v12852_v31 = vpop.f32.mrb[17].mxu0 }
 0x7e9   : > { %v12853_v19 = vadd.f32 %v12852_v31, %v12851_v55  ;;  %v12854_v61 = vpop.f32.mrb[18].mxu0  ;;  %v12915_v38 = vpop.f32.mrb[16].mxu1  ;;  %14068 = vmatmul.mubr.msk.bf16.gmra.mrb[100].mxu1 %vm5570_vm3, %v9918_v13 }
 0x7ea   : > { %v12855_v29 = vpop.f32.mrb[19].mxu0  ;;  %v12916_v57 = vpop.f32.mrb[17].mxu1 }
 0x7eb   : > { %v12856_v11 = vadd.f32 %v12855_v29, %v12854_v61  ;;  %v12917_v9 = vadd.f32 %v12916_v57, %v12915_v38  ;;  %v12918_v24 = vpop.f32.mrb[18].mxu1 }
 0x7ec   : > { %v12919_v53 = vpop.f32.mrb[19].mxu1 }
 0x7ed   : > { %v9911_v0 = vpack.c.bf16 %v12856_v11, %v12853_v19  ;;  %v12920_v23 = vadd.f32 %v12919_v53, %v12918_v24 }
 0x7ef   : > { %v9919_v49 = vpack.c.bf16 %v12920_v23, %v12917_v9  ;;  %v12857_v20 = vpop.f32.mrb[20].mxu0  ;;  %14053 = vmatprep.mubr.msk.bf16.mxu0 %vm5570_vm3, %v9911_v0 }
 0x7f0   : > { %v12858_v58 = vpop.f32.mrb[21].mxu0 }
 0x7f1   : > { %v12859_v45 = vadd.f32 %v12858_v58, %v12857_v20  ;;  %v12860_v47 = vpop.f32.mrb[22].mxu0  ;;  %v12921_v25 = vpop.f32.mrb[20].mxu1  ;;  %14071 = vmatprep.mubr.msk.bf16.mxu1 %vm5570_vm3, %v9919_v49 }
 0x7f2   : > { %v12861_v51 = vpop.f32.mrb[23].mxu0  ;;  %v12922_v35 = vpop.f32.mrb[21].mxu1 }
 0x7f3   : > { %v12862_v1 = vadd.f32 %v12861_v51, %v12860_v47  ;;  %v12923_v21 = vadd.f32 %v12922_v35, %v12921_v25  ;;  %v12924_v28 = vpop.f32.mrb[22].mxu1 }
 0x7f4   : > { %v12925_v30 = vpop.f32.mrb[23].mxu1 }
 0x7f5   : > { %v9912_v27 = vpack.c.bf16 %v12862_v1, %v12859_v45  ;;  %v12926_v46 = vadd.f32 %v12925_v30, %v12924_v28 }
 0x7f7   : > { %v9920_v37 = vpack.c.bf16 %v12926_v46, %v12923_v21  ;;  %v12863_v2 = vpop.f32.mrb[24].mxu0  ;;  %14054 = vmatmul.mubr.msk.bf16.gmra.mrb[104].mxu0 %vm5570_vm3, %v9912_v27 }
 0x7f8   : > { %v12864_v15 = vpop.f32.mrb[25].mxu0 }
 0x7f9   : > { %v12865_v5 = vadd.f32 %v12864_v15, %v12863_v2  ;;  %v12866_v6 = vpop.f32.mrb[26].mxu0  ;;  %v12927_v26 = vpop.f32.mrb[24].mxu1  ;;  %14072 = vmatmul.mubr.msk.bf16.gmra.mrb[104].mxu1 %vm5570_vm3, %v9920_v37 }
 0x7fa   : > { %v12867_v17 = vpop.f32.mrb[27].mxu0  ;;  %v12928_v34 = vpop.f32.mrb[25].mxu1 }
 0x7fb   : > { %v12868_v52 = vadd.f32 %v12867_v17, %v12866_v6  ;;  %v12929_v40 = vadd.f32 %v12928_v34, %v12927_v26  ;;  %v12930_v8 = vpop.f32.mrb[26].mxu1 }
 0x7fc   : > { %v12931_v54 = vpop.f32.mrb[27].mxu1 }
 0x7fd   : > { %v9913_v62 = vpack.c.bf16 %v12868_v52, %v12865_v5  ;;  %v12932_v43 = vadd.f32 %v12931_v54, %v12930_v8 }
 0x7ff   : > { %v9921_v59 = vpack.c.bf16 %v12932_v43, %v12929_v40  ;;  %v12869_v60 = vpop.f32.mrb[28].mxu0  ;;  %14057 = vmatprep.mubr.msk.bf16.mxu0 %vm5570_vm3, %v9913_v62 }
 0x800   : > { %v12870_v48 = vpop.f32.mrb[29].mxu0 }
 0x801   : > { %v12871_v32 = vadd.f32 %v12870_v48, %v12869_v60  ;;  %v12872_v14 = vpop.f32.mrb[30].mxu0  ;;  %v12933_v4 = vpop.f32.mrb[28].mxu1  ;;  %14075 = vmatprep.mubr.msk.bf16.mxu1 %vm5570_vm3, %v9921_v59 }
 0x802   : > { %v12873_v7 = vpop.f32.mrb[31].mxu0  ;;  %v12934_v16 = vpop.f32.mrb[29].mxu1 }
 0x803   : > { %v12874_v33 = vadd.f32 %v12873_v7, %v12872_v14  ;;  %v12935_v22 = vadd.f32 %v12934_v16, %v12933_v4  ;;  %v12936_v39 = vpop.f32.mrb[30].mxu1 }
 0x804   : > { %v12937_v18 = vpop.f32.mrb[31].mxu1 }
 0x805   : > { %v9914_v56 = vpack.c.bf16 %v12874_v33, %v12871_v32  ;;  %v12938_v44 = vadd.f32 %v12937_v18, %v12936_v39 }
 0x807   : > { %v9922_v42 = vpack.c.bf16 %v12938_v44, %v12935_v22  ;;  %v12955_v41 = vpop.f32.mrb[32].mxu0  ;;  %14058 = vmatmul.mubr.msk.bf16.gmra.mrb[108].mxu0 %vm5570_vm3, %v9914_v56 }
 0x808   : > { %v12956_v12 = vpop.f32.mrb[33].mxu0 }
 0x809   : > { %v12957_v10 = vadd.f32 %v12956_v12, %v12955_v41  ;;  %v12958_v50 = vpop.f32.mrb[34].mxu0  ;;  %v13019_v3 = vpop.f32.mrb[32].mxu1  ;;  %14076 = vmatmul.mubr.msk.bf16.gmra.mrb[108].mxu1 %vm5570_vm3, %v9922_v42 }
 0x80a   : > { %v12959_v63 = vpop.f32.mrb[35].mxu0  ;;  %v13020_v36 = vpop.f32.mrb[33].mxu1 }
 0x80b   : > { %v12960_v13 = vadd.f32 %v12959_v63, %v12958_v50  ;;  %v13021_v55 = vadd.f32 %v13020_v36, %v13019_v3  ;;  %v13022_v31 = vpop.f32.mrb[34].mxu1 }
 0x80c   : > { %v13023_v19 = vpop.f32.mrb[35].mxu1 }
 0x80d   : > { %v9923_v61 = vpack.c.bf16 %v12960_v13, %v12957_v10  ;;  %v13024_v38 = vadd.f32 %v13023_v19, %v13022_v31 }
 0x80f   : > { %v9931_v29 = vpack.c.bf16 %v13024_v38, %v13021_v55  ;;  %v12961_v57 = vpop.f32.mrb[36].mxu0  ;;  %14081 = vmatprep.mubr.msk.bf16.mxu0 %vm5570_vm3, %v9923_v61 }
 0x810   : > { %v12962_v11 = vpop.f32.mrb[37].mxu0 }
 0x811   : > { %v12963_v9 = vadd.f32 %v12962_v11, %v12961_v57  ;;  %v12964_v24 = vpop.f32.mrb[38].mxu0  ;;  %v13025_v53 = vpop.f32.mrb[36].mxu1  ;;  %14099 = vmatprep.mubr.msk.bf16.mxu1 %vm5570_vm3, %v9931_v29 }
 0x812   : > { %v12965_v0 = vpop.f32.mrb[39].mxu0  ;;  %v13026_v23 = vpop.f32.mrb[37].mxu1 }
 0x813   : > { %v12966_v49 = vadd.f32 %v12965_v0, %v12964_v24  ;;  %v13027_v20 = vadd.f32 %v13026_v23, %v13025_v53  ;;  %v13028_v58 = vpop.f32.mrb[38].mxu1 }
 0x814   : > { %v13029_v45 = vpop.f32.mrb[39].mxu1 }
 0x815   : > { %v9924_v47 = vpack.c.bf16 %v12966_v49, %v12963_v9  ;;  %v13030_v25 = vadd.f32 %v13029_v45, %v13028_v58 }
 0x817   : > { %v9932_v51 = vpack.c.bf16 %v13030_v25, %v13027_v20  ;;  %v12967_v35 = vpop.f32.mrb[40].mxu0  ;;  %14082 = vmatmul.mubr.msk.bf16.vlgmr.msra.gmra.mrb[112].mxu0 %vm5570_vm3, %v9924_v47 }
 0x818   : > { %v12968_v1 = vpop.f32.mrb[41].mxu0 }
 0x819   : > { %v12969_v21 = vadd.f32 %v12968_v1, %v12967_v35  ;;  %v12970_v28 = vpop.f32.mrb[42].mxu0  ;;  %v13031_v30 = vpop.f32.mrb[40].mxu1  ;;  %14100 = vmatmul.mubr.msk.bf16.vlgmr.msra.gmra.mrb[112].mxu1 %vm5570_vm3, %v9932_v51 }
 0x81a   : > { %v12971_v27 = vpop.f32.mrb[43].mxu0  ;;  %v13032_v46 = vpop.f32.mrb[41].mxu1 }
 0x81b   : > { %v12972_v37 = vadd.f32 %v12971_v27, %v12970_v28  ;;  %v13033_v2 = vadd.f32 %v13032_v46, %v13031_v30  ;;  %v13034_v15 = vpop.f32.mrb[42].mxu1 }
 0x81c   : > { %v13035_v5 = vpop.f32.mrb[43].mxu1 }
 0x81d   : > { %v9925_v6 = vpack.c.bf16 %v12972_v37, %v12969_v21  ;;  %v13036_v26 = vadd.f32 %v13035_v5, %v13034_v15 }
 0x81f   : > { %v9933_v17 = vpack.c.bf16 %v13036_v26, %v13033_v2  ;;  %v12973_v34 = vpop.f32.mrb[44].mxu0  ;;  %14085 = vmatprep.mubr.msk.bf16.mxu0 %vm5570_vm3, %v9925_v6 }
 0x820   : > { %v12974_v52 = vpop.f32.mrb[45].mxu0 }
 0x821   : > { %v12975_v40 = vadd.f32 %v12974_v52, %v12973_v34  ;;  %v12976_v8 = vpop.f32.mrb[46].mxu0  ;;  %v13037_v54 = vpop.f32.mrb[44].mxu1  ;;  %14103 = vmatprep.mubr.msk.bf16.mxu1 %vm5570_vm3, %v9933_v17 }
 0x822   : > { %v12977_v62 = vpop.f32.mrb[47].mxu0  ;;  %v13038_v43 = vpop.f32.mrb[45].mxu1 }
 0x823   : > { %v12978_v59 = vadd.f32 %v12977_v62, %v12976_v8  ;;  %v13039_v60 = vadd.f32 %v13038_v43, %v13037_v54  ;;  %v13040_v48 = vpop.f32.mrb[46].mxu1 }
 0x824   : > { %v13041_v32 = vpop.f32.mrb[47].mxu1 }
 0x825   : > { %v9926_v14 = vpack.c.bf16 %v12978_v59, %v12975_v40  ;;  %v13042_v4 = vadd.f32 %v13041_v32, %v13040_v48 }
 0x827   : > { %v9934_v7 = vpack.c.bf16 %v13042_v4, %v13039_v60  ;;  %v12979_v16 = vpop.f32.mrb[48].mxu0  ;;  %14086 = vmatmul.mubr.msk.bf16.gmra.mrb[116].mxu0 %vm5570_vm3, %v9926_v14 }
 0x828   : > { %v12980_v33 = vpop.f32.mrb[49].mxu0 }
 0x829   : > { %v12981_v22 = vadd.f32 %v12980_v33, %v12979_v16  ;;  %v12982_v39 = vpop.f32.mrb[50].mxu0  ;;  %v13043_v18 = vpop.f32.mrb[48].mxu1  ;;  %14104 = vmatmul.mubr.msk.bf16.gmra.mrb[116].mxu1 %vm5570_vm3, %v9934_v7 }
 0x82a   : > { %v12983_v56 = vpop.f32.mrb[51].mxu0  ;;  %v13044_v44 = vpop.f32.mrb[49].mxu1 }
 0x82b   : > { %v12984_v42 = vadd.f32 %v12983_v56, %v12982_v39  ;;  %v13045_v41 = vadd.f32 %v13044_v44, %v13043_v18  ;;  %v13046_v12 = vpop.f32.mrb[50].mxu1 }
 0x82c   : > { %v13047_v10 = vpop.f32.mrb[51].mxu1 }
 0x82d   : > { %v9927_v50 = vpack.c.bf16 %v12984_v42, %v12981_v22  ;;  %v13048_v3 = vadd.f32 %v13047_v10, %v13046_v12 }
 0x82f   : > { %v9935_v63 = vpack.c.bf16 %v13048_v3, %v13045_v41  ;;  %v12985_v36 = vpop.f32.mrb[52].mxu0  ;;  %14089 = vmatprep.mubr.msk.bf16.mxu0 %vm5570_vm3, %v9927_v50 }
 0x830   : > { %v12986_v13 = vpop.f32.mrb[53].mxu0 }
 0x831   : > { %v12987_v55 = vadd.f32 %v12986_v13, %v12985_v36  ;;  %v12988_v31 = vpop.f32.mrb[54].mxu0  ;;  %v13049_v19 = vpop.f32.mrb[52].mxu1  ;;  %14107 = vmatprep.mubr.msk.bf16.mxu1 %vm5570_vm3, %v9935_v63 }
 0x832   : > { %v12989_v61 = vpop.f32.mrb[55].mxu0  ;;  %v13050_v38 = vpop.f32.mrb[53].mxu1 }
 0x833   : > { %v12990_v29 = vadd.f32 %v12989_v61, %v12988_v31  ;;  %v13051_v57 = vadd.f32 %v13050_v38, %v13049_v19  ;;  %v13052_v11 = vpop.f32.mrb[54].mxu1 }
 0x834   : > { %v13053_v9 = vpop.f32.mrb[55].mxu1 }
 0x835   : > { %v9928_v24 = vpack.c.bf16 %v12990_v29, %v12987_v55  ;;  %v13054_v53 = vadd.f32 %v13053_v9, %v13052_v11 }
 0x837   : > { %v9936_v0 = vpack.c.bf16 %v13054_v53, %v13051_v57  ;;  %v12991_v23 = vpop.f32.mrb[56].mxu0  ;;  %14090 = vmatmul.mubr.msk.bf16.gmra.mrb[120].mxu0 %vm5570_vm3, %v9928_v24 }
 0x838   : > { %v12992_v49 = vpop.f32.mrb[57].mxu0 }
 0x839   : > { %v12993_v20 = vadd.f32 %v12992_v49, %v12991_v23  ;;  %v12994_v58 = vpop.f32.mrb[58].mxu0  ;;  %v13055_v45 = vpop.f32.mrb[56].mxu1  ;;  %14108 = vmatmul.mubr.msk.bf16.gmra.mrb[120].mxu1 %vm5570_vm3, %v9936_v0 }
 0x83a   : > { %v12995_v47 = vpop.f32.mrb[59].mxu0  ;;  %v13056_v25 = vpop.f32.mrb[57].mxu1 }
 0x83b   : > { %v12996_v51 = vadd.f32 %v12995_v47, %v12994_v58  ;;  %v13057_v35 = vadd.f32 %v13056_v25, %v13055_v45  ;;  %v13058_v1 = vpop.f32.mrb[58].mxu1 }
 0x83c   : > { %v13059_v21 = vpop.f32.mrb[59].mxu1 }
 0x83d   : > { %v9929_v28 = vpack.c.bf16 %v12996_v51, %v12993_v20  ;;  %v13060_v30 = vadd.f32 %v13059_v21, %v13058_v1 }
 0x83f   : > { %v9937_v27 = vpack.c.bf16 %v13060_v30, %v13057_v35  ;;  %v12997_v46 = vpop.f32.mrb[60].mxu0  ;;  %14093 = vmatprep.mubr.msk.bf16.mxu0 %vm5570_vm3, %v9929_v28 }
 0x840   : > { %v12998_v37 = vpop.f32.mrb[61].mxu0 }
 0x841   : > { %v12999_v2 = vadd.f32 %v12998_v37, %v12997_v46  ;;  %v13000_v15 = vpop.f32.mrb[62].mxu0  ;;  %v13061_v5 = vpop.f32.mrb[60].mxu1  ;;  %14111 = vmatprep.mubr.msk.bf16.mxu1 %vm5570_vm3, %v9937_v27 }
 0x842   : > { %v13001_v6 = vpop.f32.mrb[63].mxu0  ;;  %v13062_v26 = vpop.f32.mrb[61].mxu1 }
 0x843   : > { %v13002_v17 = vadd.f32 %v13001_v6, %v13000_v15  ;;  %v13063_v34 = vadd.f32 %v13062_v26, %v13061_v5  ;;  %v13064_v52 = vpop.f32.mrb[62].mxu1 }
 0x844   : > { %v13065_v40 = vpop.f32.mrb[63].mxu1 }
 0x845   : > { %v9930_v8 = vpack.c.bf16 %v13002_v17, %v12999_v2  ;;  %v13066_v54 = vadd.f32 %v13065_v40, %v13064_v52 }
 0x847   : > { %v9938_v62 = vpack.c.bf16 %v13066_v54, %v13063_v34  ;;  %v13975_v43 = vpop.f32.mrb[64].mxu0  ;;  %14094 = vmatmul.mubr.msk.bf16.gmra.mrb[124].mxu0 %vm5570_vm3, %v9930_v8 }
 0x848   : > { %v10009_v59 = vpop.f32.mrb[65].mxu0  ;;  %v10970_v32 = vsel %vm4153_vm2, %v13975_v43, 0.0 }
 0x849   : > { %v13976_v60 = vpop.f32.mrb[66].mxu0  ;;  %v13993_v48 = vpop.f32.mrb[64].mxu1  ;;  %14112 = vmatmul.mubr.msk.bf16.gmra.mrb[124].mxu1 %vm5570_vm3, %v9938_v62  ;;  %v10940_v16 = vsel %vm4153_vm2, %v10009_v59, 0.0 }
 0x84a   : > { %v10012_v14 = vpop.f32.mrb[67].mxu0  ;;  %v10971_v4 = vsel %vm4153_vm2, %v13993_v48, 0.0  ;;  %v10133_v7 = vpop.f32.mrb[65].mxu1  ;;  %v10985_v18 = vsel %vm4153_vm2, %v13976_v60, 0.0 }
 0x84b   : > { %v20298_v33 = vadd.f32 %v10971_v4, %v10970_v32  ;;  %v10941_v22 = vsel %vm4153_vm2, %v10133_v7, 0.0  ;;  %v13994_v39 = vpop.f32.mrb[66].mxu1  ;;  %v10955_v41 = vsel %vm4153_vm2, %v10012_v14, 0.0 }
 0x84c   : > { %v20302_v56 = vadd.f32 %v10941_v22, %v10940_v16  ;;  %v10986_v44 = vsel %vm4153_vm2, %v13994_v39, 0.0  ;;  %v10136_v42 = vpop.f32.mrb[67].mxu1 }
 0x84d   : > { %v20306_v12 = vadd.f32 %v10986_v44, %v10985_v18  ;;  %v10956_v10 = vsel %vm4153_vm2, %v10136_v42, 0.0 }
 0x84e   : > { %v20309_v50 = vadd.f32 %v10956_v10, %v10955_v41 }
 0x84f   : > { %v13979_v3 = vpop.f32.mrb[68].mxu0 }
 0x850   : > { %v10025_v63 = vpop.f32.mrb[69].mxu0  ;;  %v11030_v55 = vsel %vm4153_vm2, %v13979_v3, 0.0 }
 0x851   : > { %v13980_v36 = vpop.f32.mrb[70].mxu0  ;;  %v13997_v13 = vpop.f32.mrb[68].mxu1  ;;  %v11000_v38 = vsel %vm4153_vm2, %v10025_v63, 0.0 }
 0x852   : > { %v10028_v31 = vpop.f32.mrb[71].mxu0  ;;  %v11031_v19 = vsel %vm4153_vm2, %v13997_v13, 0.0  ;;  %v10149_v61 = vpop.f32.mrb[69].mxu1  ;;  %v11045_v9 = vsel %vm4153_vm2, %v13980_v36, 0.0 }
 0x853   : > { %v20314_v29 = vadd.f32 %v11031_v19, %v11030_v55  ;;  %v11001_v57 = vsel %vm4153_vm2, %v10149_v61, 0.0  ;;  %v13998_v11 = vpop.f32.mrb[70].mxu1  ;;  %v11015_v23 = vsel %vm4153_vm2, %v10028_v31, 0.0 }
 0x854   : > { %v20318_v24 = vadd.f32 %v11001_v57, %v11000_v38  ;;  %v11046_v53 = vsel %vm4153_vm2, %v13998_v11, 0.0  ;;  %v10152_v0 = vpop.f32.mrb[71].mxu1 }
 0x855   : > { %v20322_v49 = vadd.f32 %v11046_v53, %v11045_v9  ;;  %v11016_v20 = vsel %vm4153_vm2, %v10152_v0, 0.0 }
 0x856   : > { %v20325_v58 = vadd.f32 %v11016_v20, %v11015_v23 }
 0x857   : > { %v13983_v45 = vpop.f32.mrb[72].mxu0 }
 0x858   : > { %v10041_v47 = vpop.f32.mrb[73].mxu0  ;;  %v11090_v35 = vsel %vm4153_vm2, %v13983_v45, 0.0 }
 0x859   : > { %v13984_v25 = vpop.f32.mrb[74].mxu0  ;;  %v14001_v51 = vpop.f32.mrb[72].mxu1  ;;  %v11060_v30 = vsel %vm4153_vm2, %v10041_v47, 0.0 }
 0x85a   : > { %v10044_v1 = vpop.f32.mrb[75].mxu0  ;;  %v11091_v21 = vsel %vm4153_vm2, %v14001_v51, 0.0  ;;  %v10165_v28 = vpop.f32.mrb[73].mxu1  ;;  %v11105_v2 = vsel %vm4153_vm2, %v13984_v25, 0.0 }
 0x85b   : > { %v20330_v27 = vadd.f32 %v11091_v21, %v11090_v35  ;;  %v11061_v46 = vsel %vm4153_vm2, %v10165_v28, 0.0  ;;  %v14002_v37 = vpop.f32.mrb[74].mxu1  ;;  %v11075_v26 = vsel %vm4153_vm2, %v10044_v1, 0.0 }
 0x85c   : > { %v20334_v15 = vadd.f32 %v11061_v46, %v11060_v30  ;;  %v11106_v5 = vsel %vm4153_vm2, %v14002_v37, 0.0  ;;  %v10168_v6 = vpop.f32.mrb[75].mxu1 }
 0x85d   : > { %v20338_v17 = vadd.f32 %v11106_v5, %v11105_v2  ;;  %v11076_v34 = vsel %vm4153_vm2, %v10168_v6, 0.0 }
 0x85e   : > { %v20341_v52 = vadd.f32 %v11076_v34, %v11075_v26 }
 0x85f   : > { %v13987_v40 = vpop.f32.mrb[76].mxu0 }
 0x860   : > { %v10057_v8 = vpop.f32.mrb[77].mxu0  ;;  %v11150_v43 = vsel %vm4153_vm2, %v13987_v40, 0.0 }
 0x861   : > { %v13988_v54 = vpop.f32.mrb[78].mxu0  ;;  %v14005_v62 = vpop.f32.mrb[76].mxu1  ;;  %v11120_v32 = vsel %vm4153_vm2, %v10057_v8, 0.0 }
 0x862   : > { %v10060_v59 = vpop.f32.mrb[79].mxu0  ;;  %v11151_v60 = vsel %vm4153_vm2, %v14005_v62, 0.0  ;;  %v10181_v48 = vpop.f32.mrb[77].mxu1  ;;  %v11165_v16 = vsel %vm4153_vm2, %v13988_v54, 0.0 }
 0x863   : > { %v20346_v14 = vadd.f32 %v11151_v60, %v11150_v43  ;;  %v11121_v4 = vsel %vm4153_vm2, %v10181_v48, 0.0  ;;  %v14006_v7 = vpop.f32.mrb[78].mxu1  ;;  %v11135_v44 = vsel %vm4153_vm2, %v10060_v59, 0.0 }
 0x864   : > { %v20350_v22 = vadd.f32 %v11121_v4, %v11120_v32  ;;  %v11166_v39 = vsel %vm4153_vm2, %v14006_v7, 0.0  ;;  %v10184_v18 = vpop.f32.mrb[79].mxu1 }
 0x865   : > { %v20354_v42 = vadd.f32 %v11166_v39, %v11165_v16  ;;  %v11136_v41 = vsel %vm4153_vm2, %v10184_v18, 0.0 }
 0x866   : > { %v20357_v10 = vadd.f32 %v11136_v41, %v11135_v44 }
 0x867   : > { %v14011_v3 = vpop.f32.mrb[80].mxu0 }
 0x868   : > { %v10973_v63 = vsel %vm4153_vm2, %v14011_v3, 0.0  ;;  %v10257_v36 = vpop.f32.mrb[81].mxu0 }
 0x869   : > { %v10974_v13 = vadd.f32 %v10973_v63, %v20298_v33  ;;  %v10943_v55 = vsel %vm4153_vm2, %v10257_v36, 0.0  ;;  %v14012_v31 = vpop.f32.mrb[82].mxu0  ;;  %v14029_v19 = vpop.f32.mrb[80].mxu1 }
 0x86a   : > { %v10944_v61 = vadd.f32 %v10943_v55, %v20302_v56  ;;  %v10988_v38 = vsel %vm4153_vm2, %v14012_v31, 0.0  ;;  %v10260_v57 = vpop.f32.mrb[83].mxu0  ;;  %v10975_v11 = vsel %vm4153_vm2, %v14029_v19, 0.0  ;;  %v10381_v9 = vpop.f32.mrb[81].mxu1 }
 0x86b   : > { %v10989_v53 = vadd.f32 %v10988_v38, %v20306_v12  ;;  %v10958_v0 = vsel %vm4153_vm2, %v10260_v57, 0.0  ;;  %v20367_v23 = vadd.f32 %v10975_v11, %v10974_v13  ;;  %v10945_v33 = vsel %vm4153_vm2, %v10381_v9, 0.0  ;;  %v14030_v20 = vpop.f32.mrb[82].mxu1 }
 0x86c   : > { %v10959_v45 = vadd.f32 %v10958_v0, %v20309_v50  ;;  %v20371_v47 = vadd.f32 %v10945_v33, %v10944_v61  ;;  %v10990_v56 = vsel %vm4153_vm2, %v14030_v20, 0.0  ;;  %v10384_v25 = vpop.f32.mrb[83].mxu1 }
 0x86d   : > { %v20374_v51 = vadd.f32 %v10990_v56, %v10989_v53  ;;  %v10960_v35 = vsel %vm4153_vm2, %v10384_v25, 0.0 }
 0x86e   : > { %v20377_v1 = vadd.f32 %v10960_v35, %v10959_v45 }
 0x871   : > { %v14015_v12 = vpop.f32.mrb[84].mxu0 }
 0x872   : > { %v11033_v21 = vsel %vm4153_vm2, %v14015_v12, 0.0  ;;  %v10273_v28 = vpop.f32.mrb[85].mxu0 }
 0x873   : > { %v11034_v30 = vadd.f32 %v11033_v21, %v20314_v29  ;;  %v11003_v46 = vsel %vm4153_vm2, %v10273_v28, 0.0  ;;  %v14016_v50 = vpop.f32.mrb[86].mxu0  ;;  %v14033_v37 = vpop.f32.mrb[84].mxu1 }
 0x874   : > { %v11004_v2 = vadd.f32 %v11003_v46, %v20318_v24  ;;  %v11048_v5 = vsel %vm4153_vm2, %v14016_v50, 0.0  ;;  %v10276_v6 = vpop.f32.mrb[87].mxu0  ;;  %v11035_v26 = vsel %vm4153_vm2, %v14033_v37, 0.0  ;;  %v10397_v34 = vpop.f32.mrb[85].mxu1 }
 0x875   : > { %v11049_v40 = vadd.f32 %v11048_v5, %v20322_v49  ;;  %v11018_v8 = vsel %vm4153_vm2, %v10276_v6, 0.0  ;;  %v20387_v54 = vadd.f32 %v11035_v26, %v11034_v30  ;;  %v11005_v29 = vsel %vm4153_vm2, %v10397_v34, 0.0  ;;  %v14034_v62 = vpop.f32.mrb[86].mxu1 }
 0x876   : > { %v11019_v43 = vadd.f32 %v11018_v8, %v20325_v58  ;;  %v20391_v59 = vadd.f32 %v11005_v29, %v11004_v2  ;;  %v11050_v24 = vsel %vm4153_vm2, %v14034_v62, 0.0  ;;  %v10400_v60 = vpop.f32.mrb[87].mxu1 }
 0x877   : > { %v20394_v48 = vadd.f32 %v11050_v24, %v11049_v40  ;;  %v11020_v32 = vsel %vm4153_vm2, %v10400_v60, 0.0 }
 0x878   : > { %v20397_v4 = vadd.f32 %v11020_v32, %v11019_v43 }
 0x88a   : > { %v14019_v49 = vpop.f32.mrb[88].mxu0 }
 0x88b   : > { %v11093_v7 = vsel %vm4153_vm2, %v14019_v49, 0.0  ;;  %v10289_v16 = vpop.f32.mrb[89].mxu0 }
 0x88c   : > { %v11094_v39 = vadd.f32 %v11093_v7, %v20330_v27  ;;  %v11063_v18 = vsel %vm4153_vm2, %v10289_v16, 0.0  ;;  %v14020_v58 = vpop.f32.mrb[90].mxu0  ;;  %v14037_v44 = vpop.f32.mrb[88].mxu1 }
 0x88d   : > { %v11064_v41 = vadd.f32 %v11063_v18, %v20334_v15  ;;  %v11108_v3 = vsel %vm4153_vm2, %v14020_v58, 0.0  ;;  %v10292_v63 = vpop.f32.mrb[91].mxu0  ;;  %v11095_v36 = vsel %vm4153_vm2, %v14037_v44, 0.0  ;;  %v10413_v13 = vpop.f32.mrb[89].mxu1 }
 0x88e   : > { %v11109_v55 = vadd.f32 %v11108_v3, %v20338_v17  ;;  %v11078_v31 = vsel %vm4153_vm2, %v10292_v63, 0.0  ;;  %v20407_v19 = vadd.f32 %v11095_v36, %v11094_v39  ;;  %v11065_v27 = vsel %vm4153_vm2, %v10413_v13, 0.0  ;;  %v14038_v61 = vpop.f32.mrb[90].mxu1 }
 0x88f   : > { %v11079_v38 = vadd.f32 %v11078_v31, %v20341_v52  ;;  %v20411_v57 = vadd.f32 %v11065_v27, %v11064_v41  ;;  %v11110_v15 = vsel %vm4153_vm2, %v14038_v61, 0.0  ;;  %v10416_v11 = vpop.f32.mrb[91].mxu1 }
 0x890   : > { %v20414_v9 = vadd.f32 %v11110_v15, %v11109_v55  ;;  %v11080_v53 = vsel %vm4153_vm2, %v10416_v11, 0.0 }
 0x891   : > { %v20417_v0 = vadd.f32 %v11080_v53, %v11079_v38 }
 0x89a   : > { %v14023_v17 = vpop.f32.mrb[92].mxu0 }
 0x89b   : > { %v11153_v33 = vsel %vm4153_vm2, %v14023_v17, 0.0  ;;  %v10305_v20 = vpop.f32.mrb[93].mxu0 }
 0x89c   : > { %v11154_v45 = vadd.f32 %v11153_v33, %v20346_v14  ;;  %v11123_v56 = vsel %vm4153_vm2, %v10305_v20, 0.0  ;;  %v14024_v52 = vpop.f32.mrb[94].mxu0  ;;  %v14041_v25 = vpop.f32.mrb[92].mxu1 }
 0x89d   : > { %v11124_v35 = vadd.f32 %v11123_v56, %v20350_v22  ;;  %v11168_v12 = vsel %vm4153_vm2, %v14024_v52, 0.0  ;;  %v10308_v21 = vpop.f32.mrb[95].mxu0  ;;  %v11155_v28 = vsel %vm4153_vm2, %v14041_v25, 0.0  ;;  %v10429_v30 = vpop.f32.mrb[93].mxu1 }
 0x89e   : > { %v11169_v46 = vadd.f32 %v11168_v12, %v20354_v42  ;;  %v11138_v50 = vsel %vm4153_vm2, %v10308_v21, 0.0  ;;  %v20427_v37 = vadd.f32 %v11155_v28, %v11154_v45  ;;  %v11125_v14 = vsel %vm4153_vm2, %v10429_v30, 0.0  ;;  %v14042_v2 = vpop.f32.mrb[94].mxu1 }
 0x89f   : > { %v11139_v5 = vadd.f32 %v11138_v50, %v20357_v10  ;;  %v20431_v6 = vadd.f32 %v11125_v14, %v11124_v35  ;;  %v11170_v22 = vsel %vm4153_vm2, %v14042_v2, 0.0  ;;  %v10432_v26 = vpop.f32.mrb[95].mxu1 }
 0x8a0   : > { %v20434_v34 = vadd.f32 %v11170_v22, %v11169_v46  ;;  %v11140_v40 = vsel %vm4153_vm2, %v10432_v26, 0.0 }
 0x8a1   : > { %v20437_v8 = vadd.f32 %v11140_v40, %v11139_v5 }
 0x8aa   : > { %v14047_v42 = vpop.f32.mrb[96].mxu0 }
 0x8ab   : > { %v10977_v29 = vsel %vm4153_vm2, %v14047_v42, 0.0  ;;  %v10505_v62 = vpop.f32.mrb[97].mxu0 }
 0x8ac   : > { %v10978_v43 = vadd.f32 %v10977_v29, %v20367_v23  ;;  %v10947_v24 = vsel %vm4153_vm2, %v10505_v62, 0.0  ;;  %v14048_v10 = vpop.f32.mrb[98].mxu0  ;;  %v14065_v60 = vpop.f32.mrb[96].mxu1 }
 0x8ad   : > { %v10948_v32 = vadd.f32 %v10947_v24, %v20371_v47  ;;  %v10992_v49 = vsel %vm4153_vm2, %v14048_v10, 0.0  ;;  %v10508_v7 = vpop.f32.mrb[99].mxu0  ;;  %v10979_v16 = vsel %vm4153_vm2, %v14065_v60, 0.0  ;;  %v10629_v39 = vpop.f32.mrb[97].mxu1 }
 0x8ae   : > { %v10993_v18 = vadd.f32 %v10992_v49, %v20374_v51  ;;  %v10962_v58 = vsel %vm4153_vm2, %v10508_v7, 0.0  ;;  %v20447_v44 = vadd.f32 %v10979_v16, %v10978_v43  ;;  %v10949_v23 = vsel %vm4153_vm2, %v10629_v39, 0.0  ;;  %v14066_v41 = vpop.f32.mrb[98].mxu1 }
 0x8af   : > { %v10963_v3 = vadd.f32 %v10962_v58, %v20377_v1  ;;  %v20451_v63 = vadd.f32 %v10949_v23, %v10948_v32  ;;  %v10994_v47 = vsel %vm4153_vm2, %v14066_v41, 0.0  ;;  %v10632_v36 = vpop.f32.mrb[99].mxu1 }
 0x8b0   : > { %v20454_v13 = vadd.f32 %v10994_v47, %v10993_v18  ;;  %v10964_v55 = vsel %vm4153_vm2, %v10632_v36, 0.0 }
 0x8b1   : > { %v20457_v31 = vadd.f32 %v10964_v55, %v10963_v3 }
 0x8ba   : > { %v14051_v51 = vpop.f32.mrb[100].mxu0 }
 0x8bb   : > { %v11037_v27 = vsel %vm4153_vm2, %v14051_v51, 0.0  ;;  %v10521_v61 = vpop.f32.mrb[101].mxu0 }
 0x8bc   : > { %v11038_v38 = vadd.f32 %v11037_v27, %v20387_v54  ;;  %v11007_v15 = vsel %vm4153_vm2, %v10521_v61, 0.0  ;;  %v14052_v1 = vpop.f32.mrb[102].mxu0  ;;  %v14069_v11 = vpop.f32.mrb[100].mxu1 }
 0x8bd   : > { %v11008_v53 = vadd.f32 %v11007_v15, %v20391_v59  ;;  %v11052_v17 = vsel %vm4153_vm2, %v14052_v1, 0.0  ;;  %v10524_v33 = vpop.f32.mrb[103].mxu0  ;;  %v11039_v20 = vsel %vm4153_vm2, %v14069_v11, 0.0  ;;  %v10645_v45 = vpop.f32.mrb[101].mxu1 }
 0x8be   : > { %v11053_v56 = vadd.f32 %v11052_v17, %v20394_v48  ;;  %v11022_v52 = vsel %vm4153_vm2, %v10524_v33, 0.0  ;;  %v20467_v25 = vadd.f32 %v11039_v20, %v11038_v38  ;;  %v11009_v54 = vsel %vm4153_vm2, %v10645_v45, 0.0  ;;  %v14070_v35 = vpop.f32.mrb[102].mxu1 }
 0x8bf   : > { %v11023_v12 = vadd.f32 %v11022_v52, %v20397_v4  ;;  %v20471_v21 = vadd.f32 %v11009_v54, %v11008_v53  ;;  %v11054_v59 = vsel %vm4153_vm2, %v14070_v35, 0.0  ;;  %v10648_v28 = vpop.f32.mrb[103].mxu1 }
 0x8c0   : > { %v20474_v30 = vadd.f32 %v11054_v59, %v11053_v56  ;;  %v11024_v46 = vsel %vm4153_vm2, %v10648_v28, 0.0 }
 0x8c1   : > { %v20477_v50 = vadd.f32 %v11024_v46, %v11023_v12 }
 0x8ca   : > { %v14055_v48 = vpop.f32.mrb[104].mxu0 }
 0x8cb   : > { %v11097_v14 = vsel %vm4153_vm2, %v14055_v48, 0.0  ;;  %v10537_v2 = vpop.f32.mrb[105].mxu0 }
 0x8cc   : > { %v11098_v5 = vadd.f32 %v11097_v14, %v20407_v19  ;;  %v11067_v22 = vsel %vm4153_vm2, %v10537_v2, 0.0  ;;  %v14056_v4 = vpop.f32.mrb[106].mxu0  ;;  %v14073_v26 = vpop.f32.mrb[104].mxu1 }
 0x8cd   : > { %v11068_v40 = vadd.f32 %v11067_v22, %v20411_v57  ;;  %v11112_v42 = vsel %vm4153_vm2, %v14056_v4, 0.0  ;;  %v10540_v29 = vpop.f32.mrb[107].mxu0  ;;  %v11099_v62 = vsel %vm4153_vm2, %v14073_v26, 0.0  ;;  %v10661_v43 = vpop.f32.mrb[105].mxu1 }
 0x8ce   : > { %v11113_v24 = vadd.f32 %v11112_v42, %v20414_v9  ;;  %v11082_v10 = vsel %vm4153_vm2, %v10540_v29, 0.0  ;;  %v20487_v60 = vadd.f32 %v11099_v62, %v11098_v5  ;;  %v11069_v19 = vsel %vm4153_vm2, %v10661_v43, 0.0  ;;  %v14074_v32 = vpop.f32.mrb[106].mxu1  ;;  %v20528_v5 = vld [vmem:[%s20641_s6] ss:$0 sm:$0xff] }
 0x8cf   : > { %v11083_v49 = vadd.f32 %v11082_v10, %v20417_v0  ;;  %v20491_v7 = vadd.f32 %v11069_v19, %v11068_v40  ;;  %v11114_v57 = vsel %vm4153_vm2, %v14074_v32, 0.0  ;;  %v10664_v16 = vpop.f32.mrb[107].mxu1 }
 0x8d0   : > { %v20494_v39 = vadd.f32 %v11114_v57, %v11113_v24  ;;  %v11084_v18 = vsel %vm4153_vm2, %v10664_v16, 0.0 }
 0x8d1   : > { %v20497_v58 = vadd.f32 %v11084_v18, %v11083_v49 }
 0x8da   : > { %v14059_v9 = vpop.f32.mrb[108].mxu0 }
 0x8db   : > { %v11157_v23 = vsel %vm4153_vm2, %v14059_v9, 0.0  ;;  %v10553_v41 = vpop.f32.mrb[109].mxu0 }
 0x8dc   : > { %v11158_v3 = vadd.f32 %v11157_v23, %v20427_v37  ;;  %v11127_v47 = vsel %vm4153_vm2, %v10553_v41, 0.0  ;;  %v14060_v0 = vpop.f32.mrb[110].mxu0  ;;  %v14077_v36 = vpop.f32.mrb[108].mxu1 }
 0x8dd   : > { %v11128_v55 = vadd.f32 %v11127_v47, %v20431_v6  ;;  %v11172_v51 = vsel %vm4153_vm2, %v14060_v0, 0.0  ;;  %v10556_v27 = vpop.f32.mrb[111].mxu0  ;;  %v11159_v61 = vsel %vm4153_vm2, %v14077_v36, 0.0  ;;  %v10677_v38 = vpop.f32.mrb[109].mxu1 }
 0x8de   : > { %v11173_v15 = vadd.f32 %v11172_v51, %v20434_v34  ;;  %v11142_v1 = vsel %vm4153_vm2, %v10556_v27, 0.0  ;;  %v20507_v11 = vadd.f32 %v11159_v61, %v11158_v3  ;;  %v11129_v37 = vsel %vm4153_vm2, %v10677_v38, 0.0  ;;  %v14078_v53 = vpop.f32.mrb[110].mxu1 }
 0x8df   : > { %v11143_v17 = vadd.f32 %v11142_v1, %v20437_v8  ;;  %v20511_v33 = vadd.f32 %v11129_v37, %v11128_v55  ;;  %v11174_v6 = vsel %vm4153_vm2, %v14078_v53, 0.0  ;;  %v10680_v20 = vpop.f32.mrb[111].mxu1 }
 0x8e0   : > { %v20514_v45 = vadd.f32 %v11174_v6, %v11173_v15  ;;  %v11144_v56 = vsel %vm4153_vm2, %v10680_v20, 0.0 }
 0x8e1   : > { %v20517_v52 = vadd.f32 %v11144_v56, %v11143_v17 }
 0x8ea   : > { %v14083_v34 = vpop.f32.mrb[112].mxu0 }
 0x8eb   : > { %v10981_v54 = vsel %vm4153_vm2, %v14083_v34, 0.0  ;;  %v10753_v35 = vpop.f32.mrb[113].mxu0 }
 0x8ec   : > { %v10982_v12 = vadd.f32 %v10981_v54, %v20447_v44  ;;  %v10951_v59 = vsel %vm4153_vm2, %v10753_v35, 0.0  ;;  %v14084_v8 = vpop.f32.mrb[114].mxu0  ;;  %v14101_v28 = vpop.f32.mrb[112].mxu1 }
 0x8ed   : > { %v10952_v46 = vadd.f32 %v10951_v59, %v20451_v63  ;;  %v10996_v48 = vsel %vm4153_vm2, %v14084_v8, 0.0  ;;  %v10756_v14 = vpop.f32.mrb[115].mxu0  ;;  %v10983_v2 = vsel %vm4153_vm2, %v14101_v28, 0.0  ;;  %v10877_v22 = vpop.f32.mrb[113].mxu1 }
 0x8ee   : > { %v10997_v44 = vadd.f32 %v10996_v48, %v20454_v13  ;;  %v10966_v4 = vsel %vm4153_vm2, %v10756_v14, 0.0  ;;  %v10984_v26 = vadd.f32 %v10983_v2, %v10982_v12  ;;  %v10953_v63 = vsel %vm4153_vm2, %v10877_v22, 0.0  ;;  %v14102_v40 = vpop.f32.mrb[114].mxu1 }
 0x8ef   : > { %v10967_v42 = vadd.f32 %v10966_v4, %v20457_v31  ;;  %v10954_v29 = vadd.f32 %v10953_v63, %v10952_v46  ;;  %v10998_v62 = vsel %vm4153_vm2, %v14102_v40, 0.0  ;;  %v10880_v43 = vpop.f32.mrb[115].mxu1 }
 0x8f0   : > { %v11189_v24 = vadd.f32 %v20528_v5, %v10984_v26  ;;  %v10999_v10 = vadd.f32 %v10998_v62, %v10997_v44  ;;  %v10968_v13 = vsel %vm4153_vm2, %v10880_v43, 0.0 }
 0x8f1   : > { %v11187_v19 = vadd.f32 %v20528_v5, %v10954_v29  ;;  %v10969_v32 = vadd.f32 %v10968_v13, %v10967_v42 }
 0x8f2   : > { %11205 = vst.msk [vmem:[%s15214_s21 + $0x10] sm:$0xff] %vm4153_vm2, %v11189_v24  ;;  %v11190_v49 = vadd.f32 %v20528_v5, %v10999_v10 }
 0x8f3   : > { %11203 = vst.msk [vmem:[%s15214_s21] sm:$0xff] %vm4153_vm2, %v11187_v19  ;;  %v11188_v31 = vadd.f32 %v20528_v5, %v10969_v32 }
 0x8f4   : > { %11206 = vst.msk [vmem:[%s15214_s21 + $0x18] sm:$0xff] %vm4153_vm2, %v11190_v49 }
 0x8f5   : > { %11204 = vst.msk [vmem:[%s15214_s21 + $0x8] sm:$0xff] %vm4153_vm2, %v11188_v31 }
 0x8fa   : > { %v14087_v57 = vpop.f32.mrb[116].mxu0 }
 0x8fb   : > { %v11041_v16 = vsel %vm4153_vm2, %v14087_v57, 0.0  ;;  %v10769_v18 = vpop.f32.mrb[117].mxu0 }
 0x8fc   : > { %v11042_v9 = vadd.f32 %v11041_v16, %v20467_v25  ;;  %v11011_v23 = vsel %vm4153_vm2, %v10769_v18, 0.0  ;;  %v14088_v41 = vpop.f32.mrb[118].mxu0  ;;  %v14105_v3 = vpop.f32.mrb[116].mxu1 }
 0x8fd   : > { %v11012_v47 = vadd.f32 %v11011_v23, %v20471_v21  ;;  %v11056_v0 = vsel %vm4153_vm2, %v14088_v41, 0.0  ;;  %v10772_v36 = vpop.f32.mrb[119].mxu0  ;;  %v11043_v55 = vsel %vm4153_vm2, %v14105_v3, 0.0  ;;  %v10893_v51 = vpop.f32.mrb[117].mxu1 }
 0x8fe   : > { %v11057_v27 = vadd.f32 %v11056_v0, %v20474_v30  ;;  %v11026_v61 = vsel %vm4153_vm2, %v10772_v36, 0.0  ;;  %v11044_v38 = vadd.f32 %v11043_v55, %v11042_v9  ;;  %v11013_v25 = vsel %vm4153_vm2, %v10893_v51, 0.0  ;;  %v14106_v15 = vpop.f32.mrb[118].mxu1 }
 0x8ff   : > { %v11027_v21 = vadd.f32 %v11026_v61, %v20477_v50  ;;  %v11014_v1 = vadd.f32 %v11013_v25, %v11012_v47  ;;  %v11058_v37 = vsel %vm4153_vm2, %v14106_v15, 0.0  ;;  %v10896_v53 = vpop.f32.mrb[119].mxu1 }
 0x900   : > { %v11193_v17 = vadd.f32 %v20528_v5, %v11044_v38  ;;  %v11059_v6 = vadd.f32 %v11058_v37, %v11057_v27  ;;  %v11028_v30 = vsel %vm4153_vm2, %v10896_v53, 0.0 }
 0x901   : > { %v11191_v20 = vadd.f32 %v20528_v5, %v11014_v1  ;;  %v11029_v56 = vadd.f32 %v11028_v30, %v11027_v21 }
 0x902   : > { %11209 = vst.msk [vmem:[%s15214_s21 + $0x30] sm:$0xff] %vm4153_vm2, %v11193_v17  ;;  %v11194_v34 = vadd.f32 %v20528_v5, %v11059_v6 }
 0x903   : > { %11207 = vst.msk [vmem:[%s15214_s21 + $0x20] sm:$0xff] %vm4153_vm2, %v11191_v20  ;;  %v11192_v50 = vadd.f32 %v20528_v5, %v11029_v56 }
 0x904   : > { %11210 = vst.msk [vmem:[%s15214_s21 + $0x38] sm:$0xff] %vm4153_vm2, %v11194_v34 }
 0x905   : > { %11208 = vst.msk [vmem:[%s15214_s21 + $0x28] sm:$0xff] %vm4153_vm2, %v11192_v50 }
 0x90a   : > { %v14091_v54 = vpop.f32.mrb[120].mxu0 }
 0x90b   : > { %v11101_v35 = vsel %vm4153_vm2, %v14091_v54, 0.0  ;;  %v10785_v12 = vpop.f32.mrb[121].mxu0 }
 0x90c   : > { %v11102_v59 = vadd.f32 %v11101_v35, %v20487_v60  ;;  %v11071_v8 = vsel %vm4153_vm2, %v10785_v12, 0.0  ;;  %v14092_v28 = vpop.f32.mrb[122].mxu0  ;;  %v14109_v46 = vpop.f32.mrb[120].mxu1 }
 0x90d   : > { %v11072_v48 = vadd.f32 %v11071_v8, %v20491_v7  ;;  %v11116_v14 = vsel %vm4153_vm2, %v14092_v28, 0.0  ;;  %v10788_v2 = vpop.f32.mrb[123].mxu0  ;;  %v11103_v22 = vsel %vm4153_vm2, %v14109_v46, 0.0  ;;  %v10909_v44 = vpop.f32.mrb[121].mxu1 }
 0x90e   : > { %v11117_v4 = vadd.f32 %v11116_v14, %v20494_v39  ;;  %v11086_v26 = vsel %vm4153_vm2, %v10788_v2, 0.0  ;;  %v11104_v63 = vadd.f32 %v11103_v22, %v11102_v59  ;;  %v11073_v60 = vsel %vm4153_vm2, %v10909_v44, 0.0  ;;  %v14110_v40 = vpop.f32.mrb[122].mxu1 }
 0x90f   : > { %v11087_v7 = vadd.f32 %v11086_v26, %v20497_v58  ;;  %v11074_v42 = vadd.f32 %v11073_v60, %v11072_v48  ;;  %v11118_v29 = vsel %vm4153_vm2, %v14110_v40, 0.0  ;;  %v10912_v62 = vpop.f32.mrb[123].mxu1 }
 0x910   : > { %v11197_v43 = vadd.f32 %v20528_v5, %v11104_v63  ;;  %v11119_v24 = vadd.f32 %v11118_v29, %v11117_v4  ;;  %v11088_v39 = vsel %vm4153_vm2, %v10912_v62, 0.0 }
 0x911   : > { %v11195_v10 = vadd.f32 %v20528_v5, %v11074_v42  ;;  %v11089_v13 = vadd.f32 %v11088_v39, %v11087_v7 }
 0x912   : > { %11213 = vst.msk [vmem:[%s15214_s21 + $0x50] sm:$0xff] %vm4153_vm2, %v11197_v43  ;;  %v11198_v19 = vadd.f32 %v20528_v5, %v11119_v24 }
 0x913   : > { %11211 = vst.msk [vmem:[%s15214_s21 + $0x40] sm:$0xff] %vm4153_vm2, %v11195_v10  ;;  %v11196_v58 = vadd.f32 %v20528_v5, %v11089_v13 }
 0x914   : > { %11214 = vst.msk [vmem:[%s15214_s21 + $0x58] sm:$0xff] %vm4153_vm2, %v11198_v19 }
 0x915   : > { %11212 = vst.msk [vmem:[%s15214_s21 + $0x48] sm:$0xff] %vm4153_vm2, %v11196_v58 }
 0x91a   : > { %v14095_v32 = vpop.f32.mrb[124].mxu0 }
 0x91b   : > { %v11161_v49 = vsel %vm4153_vm2, %v14095_v32, 0.0  ;;  %v10801_v31 = vpop.f32.mrb[125].mxu0 }
 0x91c   : > { %v11162_v57 = vadd.f32 %v11161_v49, %v20507_v11  ;;  %v11131_v16 = vsel %vm4153_vm2, %v10801_v31, 0.0  ;;  %v14096_v18 = vpop.f32.mrb[126].mxu0  ;;  %v14113_v9 = vpop.f32.mrb[124].mxu1 }
 0x91d   : > { %v11132_v23 = vadd.f32 %v11131_v16, %v20511_v33  ;;  %v11176_v41 = vsel %vm4153_vm2, %v14096_v18, 0.0  ;;  %v10804_v3 = vpop.f32.mrb[127].mxu0  ;;  %v11163_v47 = vsel %vm4153_vm2, %v14113_v9, 0.0  ;;  %v10925_v0 = vpop.f32.mrb[125].mxu1 }
 0x91e   : > { %v11177_v36 = vadd.f32 %v11176_v41, %v20514_v45  ;;  %v11146_v55 = vsel %vm4153_vm2, %v10804_v3, 0.0  ;;  %v11164_v51 = vadd.f32 %v11163_v47, %v11162_v57  ;;  %v11133_v11 = vsel %vm4153_vm2, %v10925_v0, 0.0  ;;  %v14114_v27 = vpop.f32.mrb[126].mxu1 }
 0x91f   : > { %v11147_v33 = vadd.f32 %v11146_v55, %v20517_v52  ;;  %v11134_v61 = vadd.f32 %v11133_v11, %v11132_v23  ;;  %v11178_v38 = vsel %vm4153_vm2, %v14114_v27, 0.0  ;;  %v10928_v25 = vpop.f32.mrb[127].mxu1 }
 0x920   : > { %v11201_v15 = vadd.f32 %v20528_v5, %v11164_v51  ;;  %v11179_v21 = vadd.f32 %v11178_v38, %v11177_v36  ;;  %v11148_v45 = vsel %vm4153_vm2, %v10928_v25, 0.0 }
 0x921   : > { %v11199_v1 = vadd.f32 %v20528_v5, %v11134_v61  ;;  %v11149_v37 = vadd.f32 %v11148_v45, %v11147_v33 }
 0x922   : > { %11217 = vst.msk [vmem:[%s15214_s21 + $0x70] sm:$0xff] %vm4153_vm2, %v11201_v15  ;;  %v11202_v53 = vadd.f32 %v20528_v5, %v11179_v21 }
 0x923   : > { %11215 = vst.msk [vmem:[%s15214_s21 + $0x60] sm:$0xff] %vm4153_vm2, %v11199_v1  ;;  %v11200_v52 = vadd.f32 %v20528_v5, %v11149_v37 }
 0x924   : > { %11218 = vst.msk [vmem:[%s15214_s21 + $0x78] sm:$0xff] %vm4153_vm2, %v11202_v53 }
 0x925   : > { %11216 = vst.msk [vmem:[%s15214_s21 + $0x68] sm:$0xff] %vm4153_vm2, %v11200_v52 }
 0x926 PF: > { %s17_s28 = sadd.s32 1, %s15129_s28   ;;  %s22499_s24 = smov %s15121_s26 }
 0x927   : > { %p14_p8 = scmp.ge.s32.totalorder %s17_s28, 6   ;;  %s22500_s25 = smov %s15125_s27 }
 0x928   : > { %s22501_s26 = smov %s22504_s29  ;;  %s22502_s27 = smov %s22508_s30 }
 0x929   :  { %16 = sbr.rel (!%p14_p8) target bundleno = 3 (0x3), region = 85 }

</bundles_post_ra>
